<compile_context>
chip_gen: v7x
topology: tpu7x:2x2x1
jax: 0.10.0
libtpu: 0.0.40
codegen_flags: <defaults>
</compile_context>

<pallas_src>
import functools

import jax
import jax.numpy as jnp
from jax import lax
from jax.experimental import pallas as pl
from jax.experimental.pallas import tpu as pltpu

HEAD_CH = 512  # hardwired in the PyTorch module's head convs


def _round_up(x, m):
    return ((x + m - 1) // m) * m


def _head_row_chunk(H, W, target_rows):
    """Largest divisor of H whose row strip (d*W flattened rows) fits the
    target -> caps the streamed head's [rows, 1024] hidden buffer."""
    best = 1
    for d in range(1, H + 1):
        if H % d == 0 and d * W <= max(W, target_rows):
            best = d
    return best


def _default_taps_per_dot():
    # v5e's MXU is 128 wide -> K=C already fills it; the wide-K (3C) grouping
    # only costs VMEM copy traffic there.  v6e/v7x (256-wide MXU) prefer K=3C.
    try:
        kind = jax.devices()[0].device_kind.lower()
    except Exception:  # pragma: no cover - defensive
        return 3
    return 1 if ("v5" in kind and ("lite" in kind or "5e" in kind)) else 3


# ----------------------------------------------------------------------------
# Fused Pallas kernel (one batch image per grid step)
# ----------------------------------------------------------------------------

def _initial_stage_kernel(x_ref, tw1_ref, tb1_ref, tw2_ref, tb2_ref,
                          tw3_ref, tb3_ref, hw1_ref, hb1_ref, hw2_ref,
                          hb2_ref, o_ref, pad_ref, trunk_ref, *,
                          H, W, C, HR, taps_per_dot, compute_dtype):
    """x_ref: [1,H,W,C] (compute dtype); tw*: [9C,C]; tb*: [1,C] f32;
    hw1: [C,1024]; hb1: [1,1024] f32; hw2: [1024,n_out_p]; hb2: [1,n_out_p] f32;
    o_ref: [1,H*W,n_out_p] f32; pad_ref: VMEM [(H+2), W2p, C] scratch;
    trunk_ref: VMEM [H*W, C] scratch."""
    HW = H * W
    W2p = pad_ref.shape[1]
    cdt = compute_dtype

    # ---- 'same' zero padding: zero only the 4 border strips.  The interior
    # is fully rewritten per layer; done every grid step so it is correct when
    # the batch axis is sharded across TensorCores (each core owns a scratch).
    zrow = jnp.zeros((1, W2p, C), cdt)
    pad_ref[0:1, :, :] = zrow
    pad_ref[H + 1:H + 2, :, :] = zrow
    zcol = jnp.zeros((H + 2, 1, C), cdt)
    pad_ref[:, 0:1, :] = zcol
    pad_ref[:, W + 1:W + 2, :] = zcol

    def set_interior(y_hwc):
        pad_ref[1:H + 1, 1:W + 1, :] = y_hwc

    def conv3x3_relu(w_ref, b_ref):
        # Tap-accumulated 3x3 conv: no [HW, 9C] im2col buffer.
        acc = None
        if taps_per_dot == 3:
            # dy-grouped: 3 matmuls of K=3C (v6e/v7x keep the 256-wide MXU fed)
            for dy in range(3):
                blk = jnp.concatenate(
                    [pad_ref[dy:dy + H, dx:dx + W, :].reshape(HW, C)
                     for dx in range(3)], axis=-1)                 # [HW, 3C]
                p = jnp.dot(blk, w_ref[dy * 3 * C:(dy + 1) * 3 * C, :],
                            preferred_element_type=jnp.float32)
                acc = p if acc is None else acc + p
        else:
            # per-tap: 9 matmuls of K=C (v5e: K=128 already fills the MXU)
            for t in range(9):
                dy, dx = divmod(t, 3)
                tap = pad_ref[dy:dy + H, dx:dx + W, :].reshape(HW, C)
                p = jnp.dot(tap, w_ref[t * C:(t + 1) * C, :],
                            preferred_element_type=jnp.float32)
                acc = p if acc is None else acc + p
        return jnp.maximum(acc + b_ref[...], 0.0)                  # f32 [HW,C]

    # Trunk: three 3x3+ReLU convs, activations stay in VMEM.
    set_interior(x_ref[0])
    y = conv3x3_relu(tw1_ref, tb1_ref)
    set_interior(y.astype(cdt).reshape(H, W, C))
    y = conv3x3_relu(tw2_ref, tb2_ref)
    set_interior(y.astype(cdt).reshape(H, W, C))
    trunk_ref[...] = conv3x3_relu(tw3_ref, tb3_ref).astype(cdt)    # [HW, C]

    # Fused heads, STREAMED over row chunks: relu(chunk@hw1+b1)@hw2+b2 where
    # hw1 packs heat|paf C->512 projections ([C,1024]) and hw2 packs the two
    # 512->out projections block-diagonally ([1024, n_out_p], zero-padded to a
    # lane-dense multiple of 128 columns -> unmasked full-lane stores).
    R = HR * W

    def head_chunk(r0):
        t_chunk = trunk_ref[pl.ds(r0, R), :]                       # [R, C]
        hid = jnp.dot(t_chunk, hw1_ref[...],
                      preferred_element_type=jnp.float32)
        hid = jnp.maximum(hid + hb1_ref[...], 0.0).astype(cdt)     # [R, 1024]
        out = jnp.dot(hid, hw2_ref[...],
                      preferred_element_type=jnp.float32) + hb2_ref[...]
        o_ref[0, pl.ds(r0, R), :] = out.astype(o_ref.dtype)

    n_chunks = H // HR
    if n_chunks == 1:
        head_chunk(0)
    else:
        def body(ci, carry):
            r0 = ci * R
            if R % 8 == 0:
                r0 = pl.multiple_of(r0, 8)
            head_chunk(r0)
            return carry
        lax.fori_loop(0, n_chunks, body, 0)


def initial_stage_apply(params, x_nhwc, *, compute_dtype=jnp.float32,
                        taps_per_dot=None, head_rows=2048):
    N, H, W, C = x_nhwc.shape
    if taps_per_dot is None:
        taps_per_dot = _default_taps_per_dot()

    tw1, tw2, tw3 = params["trunk_w"]
    tb1, tb2, tb3 = params["trunk_b"]
    hw1, hb1 = params["head_w1"], params["head_b1"]
    hw2, hb2 = params["head_w2"], params["head_b2"]
    n_out_p = hw2.shape[-1]

    cdt = compute_dtype
    x = x_nhwc.astype(cdt)
    tw1 = tw1.astype(cdt); tw2 = tw2.astype(cdt); tw3 = tw3.astype(cdt)
    hw1 = hw1.astype(cdt); hw2 = hw2.astype(cdt)
    # biases stay f32 (added after the f32 MXU accumulation)

    HR = _head_row_chunk(H, W, head_rows)
    HW = H * W
    W2p = _round_up(W + 2, 8)   # sublane-friendly pad-scratch width

    # Scoped-VMEM budget from the actual buffers (+ margin), capped at v7x's
    # 64 MiB physical VMEM; default scoped limits (16/32 MiB) are too small at
    # production resolutions.
    cb = jnp.dtype(cdt).itemsize
    f32 = 4
    est = ((H + 2) * W2p * C * cb                       # pad scratch
           + HW * C * cb                                # trunk scratch
           + 2 * HW * C * cb                            # input block (x2 buf)
           + 2 * HW * n_out_p * f32                     # output block (x2 buf)
           + 2 * cb * (3 * 9 * C * C + C * 2 * HEAD_CH + 2 * HEAD_CH * n_out_p)
           + 2 * f32 * (3 * C + 2 * HEAD_CH + n_out_p)  # biases
           + HW * 3 * C * (cb + f32)                    # conv transient + acc
           + HR * W * 2 * HEAD_CH * (f32 + cb)          # streamed hidden chunk
           + HR * W * n_out_p * f32)                    # streamed out chunk
    vmem_limit = int(min(64 * 2 ** 20, max(32 * 2 ** 20, 1.25 * est + 4 * 2 ** 20)))

    def full_spec(arr):
        zeros = (0,) * arr.ndim
        return pl.BlockSpec(arr.shape, lambda n, _z=zeros: _z)

    kern = functools.partial(_initial_stage_kernel, H=H, W=W, C=C, HR=HR,
                             taps_per_dot=taps_per_dot, compute_dtype=cdt)

    # TODO(synk): for batch N == 1 on v7x (2 TensorCores) add a second
    # "parallel" grid axis over row halves (3-row trunk halo) so both cores
    # are used; with N >= 2 the batch axis already shards across cores.
    out = pl.pallas_call(
        kern,
        out_shape=jax.ShapeDtypeStruct((N, HW, n_out_p), jnp.float32),
        grid=(N,),
        in_specs=[
            pl.BlockSpec((1, H, W, C), lambda n: (n, 0, 0, 0)),
            full_spec(tw1), full_spec(tb1),
            full_spec(tw2), full_spec(tb2),
            full_spec(tw3), full_spec(tb3),
            full_spec(hw1), full_spec(hb1),
            full_spec(hw2), full_spec(hb2),
        ],
        out_specs=pl.BlockSpec((1, HW, n_out_p), lambda n: (n, 0, 0)),
        scratch_shapes=[pltpu.VMEM((H + 2, W2p, C), cdt),
                        pltpu.VMEM((HW, C), cdt)],
        compiler_params=pltpu.CompilerParams(
            dimension_semantics=("parallel",),
            vmem_limit_bytes=vmem_limit),
    )(x, tw1, tb1, tw2, tb2, tw3, tb3, hw1, hb1, hw2, hb2)
    return out.reshape(N, H, W, n_out_p)


def initial_stage_forward(params, x_nchw, *, num_heatmaps, num_pafs,
                          compute_dtype=jnp.float32, taps_per_dot=None,
                          head_rows=2048):
    """Matches InitialStage.forward: x [N,C,H,W] -> [heatmaps, pafs] (NCHW, f32)."""
    x = jnp.transpose(x_nchw, (0, 2, 3, 1))                       # NCHW -> NHWC
    out = initial_stage_apply(params, x, compute_dtype=compute_dtype,
                              taps_per_dot=taps_per_dot, head_rows=head_rows)
    heatmaps = jnp.transpose(out[..., :num_heatmaps], (0, 3, 1, 2))
    pafs = jnp.transpose(out[..., num_heatmaps:num_heatmaps + num_pafs],
                         (0, 3, 1, 2))
    return [heatmaps, pafs]


# ----------------------------------------------------------------------------
# Deterministic synthetic parameters (no checkpoint loading)
# ----------------------------------------------------------------------------

def _conv_init(key, kh, kw, cin, cout):
    kw_key, kb_key = jax.random.split(key)
    scale = 1.0 / float(kh * kw * cin) ** 0.5
    w = scale * jax.random.normal(kw_key, (kh, kw, cin, cout), jnp.float32)  # HWIO
    b = 0.1 * jax.random.normal(kb_key, (cout,), jnp.float32)
    return w, b


def init_initial_stage(key, num_channels, num_heatmaps, num_pafs):
    """Returns (params, raw): kernel-ready layouts + raw HWIO weights for the
    pure-JAX reference check."""
    C = num_channels
    ks = jax.random.split(key, 7)
    trunk = [_conv_init(ks[i], 3, 3, C, C) for i in range(3)]
    wh1, bh1 = _conv_init(ks[3], 1, 1, C, HEAD_CH)
    wh2, bh2 = _conv_init(ks[4], 1, 1, HEAD_CH, num_heatmaps)
    wp1, bp1 = _conv_init(ks[5], 1, 1, C, HEAD_CH)
    wp2, bp2 = _conv_init(ks[6], 1, 1, HEAD_CH, num_pafs)

    n_out = num_heatmaps + num_pafs
    n_out_p = _round_up(n_out, 128)   # lane-dense output columns (exact zeros)
    # Block-diagonal packing of the two 512->out projections (off-blocks and
    # pad columns are exact zeros -> identical results, one matmul, unmasked
    # full-lane stores).
    hw2 = jnp.zeros((2 * HEAD_CH, n_out_p), jnp.float32)
    hw2 = hw2.at[:HEAD_CH, :num_heatmaps].set(wh2[0, 0])
    hw2 = hw2.at[HEAD_CH:, num_heatmaps:n_out].set(wp2[0, 0])
    hb2 = jnp.zeros((1, n_out_p), jnp.float32)
    hb2 = hb2.at[0, :n_out].set(jnp.concatenate([bh2, bp2]))

    params = {
        "trunk_w": tuple(w.reshape(9 * C, C) for w, _ in trunk),    # tap layout
        "trunk_b": tuple(b.reshape(1, C) for _, b in trunk),
        "head_w1": jnp.concatenate([wh1[0, 0], wp1[0, 0]], axis=1),  # [C, 1024]
        "head_b1": jnp.concatenate([bh1, bp1]).reshape(1, 2 * HEAD_CH),
        "head_w2": hw2,                                              # [1024, n_out_p]
        "head_b2": hb2,                                              # [1, n_out_p]
    }
    raw = {"trunk": trunk,
           "heat": [(wh1, bh1), (wh2, bh2)],
           "paf": [(wp1, bp1), (wp2, bp2)]}
    return params, raw


# ----------------------------------------------------------------------------
# Pure-JAX reference (for correctness check only)
# ----------------------------------------------------------------------------

def _ref_conv(x_nhwc, w_hwio, b, relu):
    pad = "SAME" if w_hwio.shape[0] == 3 else "VALID"
    y = jax.lax.conv_general_dilated(
        x_nhwc, w_hwio, window_strides=(1, 1), padding=pad,
        dimension_numbers=("NHWC", "HWIO", "NHWC"),
        precision=jax.lax.Precision.HIGHEST)
    y = y + b
    return jnp.maximum(y, 0.0) if relu else y


def initial_stage_reference(raw, x_nchw):
    t = jnp.transpose(x_nchw, (0, 2, 3, 1))
    for w, b in raw["trunk"]:
        t = _ref_conv(t, w, b, relu=True)
    h = _ref_conv(t, *raw["heat"][0], relu=True)
    heat = _ref_conv(h, *raw["heat"][1], relu=False)
    p = _ref_conv(t, *raw["paf"][0], relu=True)
    paf = _ref_conv(p, *raw["paf"][1], relu=False)
    return [jnp.transpose(heat, (0, 3, 1, 2)), jnp.transpose(paf, (0, 3, 1, 2))]


if __name__ == "__main__":
    key = jax.random.PRNGKey(0)
    k_x, k_p = jax.random.split(key)

    # Small shapes consistent with the module (heads' 512 hidden is fixed by it).
    N, C, H, W = 2, 32, 16, 16
    num_heatmaps, num_pafs = 8, 16

    x = jax.random.normal(k_x, (N, C, H, W), jnp.float32)
    params, raw = init_initial_stage(k_p, C, num_heatmaps, num_pafs)
    ref_h, ref_p = initial_stage_reference(raw, x)

    # f32 compute path: small head_rows forces the streamed (chunked) head and
    # taps_per_dot=3 exercises the dy-grouped conv path.
    fwd = jax.jit(functools.partial(initial_stage_forward,
                                    num_heatmaps=num_heatmaps,
                                    num_pafs=num_pafs,
                                    taps_per_dot=3, head_rows=64))
    heatmaps, pafs = fwd(params, x)
    jax.block_until_ready((heatmaps, pafs))

    assert heatmaps.shape == (N, num_heatmaps, H, W), heatmaps.shape
    assert pafs.shape == (N, num_pafs, H, W), pafs.shape
    assert heatmaps.dtype == jnp.float32 and pafs.dtype == jnp.float32
    assert jnp.allclose(heatmaps, ref_h, atol=5e-3, rtol=5e-3), \
        float(jnp.max(jnp.abs(heatmaps - ref_h)))
    assert jnp.allclose(pafs, ref_p, atol=5e-3, rtol=5e-3), \
        float(jnp.max(jnp.abs(pafs - ref_p)))

    # bf16 compute path (v6e/v7x MXU-rate optimization; per-tap conv path).
    # Outputs remain f32; loose sanity tolerance for bf16 rounding.
    fwd_bf16 = jax.jit(functools.partial(initial_stage_forward,
                                         num_heatmaps=num_heatmaps,
                                         num_pafs=num_pafs,
                                         compute_dtype=jnp.bfloat16,
                                         taps_per_dot=1))
    h16, p16 = fwd_bf16(params, x)
    jax.block_until_ready((h16, p16))
    assert h16.dtype == jnp.float32 and p16.dtype == jnp.float32
    assert jnp.allclose(h16, ref_h, atol=1e-1, rtol=1e-1), \
        float(jnp.max(jnp.abs(h16 - ref_h)))
    assert jnp.allclose(p16, ref_p, atol=1e-1, rtol=1e-1), \
        float(jnp.max(jnp.abs(p16 - ref_p)))

    print("KERNEL_OK")
</pallas_src>

<mosaic_0001>
module attributes {stable_mosaic.version = 11 : i64} {
  func.func @_initial_stage_kernel(%arg0: i32, %arg1: memref<1x16x16x32xf32, #tpu.memory_space<vmem>>, %arg2: memref<288x32xf32, #tpu.memory_space<vmem>>, %arg3: memref<1x32xf32, #tpu.memory_space<vmem>>, %arg4: memref<288x32xf32, #tpu.memory_space<vmem>>, %arg5: memref<1x32xf32, #tpu.memory_space<vmem>>, %arg6: memref<288x32xf32, #tpu.memory_space<vmem>>, %arg7: memref<1x32xf32, #tpu.memory_space<vmem>>, %arg8: memref<32x1024xf32, #tpu.memory_space<vmem>>, %arg9: memref<1x1024xf32, #tpu.memory_space<vmem>>, %arg10: memref<1024x128xf32, #tpu.memory_space<vmem>>, %arg11: memref<1x128xf32, #tpu.memory_space<vmem>>, %arg12: memref<1x256x128xf32, #tpu.memory_space<vmem>>, %arg13: memref<18x24x32xf32, #tpu.memory_space<vmem>>, %arg14: memref<256x32xf32, #tpu.memory_space<vmem>>) attributes {dimension_semantics = [#tpu.dimension_semantics<parallel>], iteration_bounds = array<i64: 2>, scalar_prefetch = 0 : i64, scratch_operands = 2 : i64, tpu.core_type = #tpu.core_type<tc>, window_params = [{transform_indices = @transform_0, window_bounds = array<i64: 1, 16, 16, 32>}, {pipeline_mode = #tpu.pipeline_mode<synchronous>, transform_indices = @transform_1, window_bounds = array<i64: 288, 32>}, {pipeline_mode = #tpu.pipeline_mode<synchronous>, transform_indices = @transform_2, window_bounds = array<i64: 1, 32>}, {pipeline_mode = #tpu.pipeline_mode<synchronous>, transform_indices = @transform_3, window_bounds = array<i64: 288, 32>}, {pipeline_mode = #tpu.pipeline_mode<synchronous>, transform_indices = @transform_4, window_bounds = array<i64: 1, 32>}, {pipeline_mode = #tpu.pipeline_mode<synchronous>, transform_indices = @transform_5, window_bounds = array<i64: 288, 32>}, {pipeline_mode = #tpu.pipeline_mode<synchronous>, transform_indices = @transform_6, window_bounds = array<i64: 1, 32>}, {pipeline_mode = #tpu.pipeline_mode<synchronous>, transform_indices = @transform_7, window_bounds = array<i64: 32, 1024>}, {pipeline_mode = #tpu.pipeline_mode<synchronous>, transform_indices = @transform_8, window_bounds = array<i64: 1, 1024>}, {pipeline_mode = #tpu.pipeline_mode<synchronous>, transform_indices = @transform_9, window_bounds = array<i64: 1024, 128>}, {pipeline_mode = #tpu.pipeline_mode<synchronous>, transform_indices = @transform_10, window_bounds = array<i64: 1, 128>}, {transform_indices = @transform_11, window_bounds = array<i64: 1, 256, 128>}]} {
    %cst = arith.constant 0.000000e+00 : f32
    %0 = vector.broadcast %cst : f32 to vector<1x24x32xf32>
    %c0 = arith.constant 0 : index
    %c0_0 = arith.constant 0 : index
    %c0_1 = arith.constant 0 : index
    %1 = vector.load %arg13[%c0, %c0_0, %c0_1] : memref<18x24x32xf32, #tpu.memory_space<vmem>>, vector<1x24x32xf32>
    tpu.vector_store %arg13[%c0, %c0_0, %c0_1], %0 {strides = array<i32>} : memref<18x24x32xf32, #tpu.memory_space<vmem>>, vector<1x24x32xf32>,
    %c17 = arith.constant 17 : index
    %c0_2 = arith.constant 0 : index
    %c0_3 = arith.constant 0 : index
    %2 = vector.load %arg13[%c17, %c0_2, %c0_3] : memref<18x24x32xf32, #tpu.memory_space<vmem>>, vector<1x24x32xf32>
    tpu.vector_store %arg13[%c17, %c0_2, %c0_3], %0 {strides = array<i32>} : memref<18x24x32xf32, #tpu.memory_space<vmem>>, vector<1x24x32xf32>,
    %cst_4 = arith.constant 0.000000e+00 : f32
    %3 = vector.broadcast %cst_4 : f32 to vector<18x1x32xf32>
    %c0_5 = arith.constant 0 : index
    %c0_6 = arith.constant 0 : index
    %c0_7 = arith.constant 0 : index
    %4 = vector.load %arg13[%c0_5, %c0_6, %c0_7] : memref<18x24x32xf32, #tpu.memory_space<vmem>>, vector<18x1x32xf32>
    tpu.vector_store %arg13[%c0_5, %c0_6, %c0_7], %3 {strides = array<i32>} : memref<18x24x32xf32, #tpu.memory_space<vmem>>, vector<18x1x32xf32>,
    %c0_8 = arith.constant 0 : index
    %c17_9 = arith.constant 17 : index
    %c0_10 = arith.constant 0 : index
    %5 = vector.load %arg13[%c0_8, %c17_9, %c0_10] : memref<18x24x32xf32, #tpu.memory_space<vmem>>, vector<18x1x32xf32>
    tpu.vector_store %arg13[%c0_8, %c17_9, %c0_10], %3 {strides = array<i32>} : memref<18x24x32xf32, #tpu.memory_space<vmem>>, vector<18x1x32xf32>,
    %c0_11 = arith.constant 0 : index
    %c0_12 = arith.constant 0 : index
    %c0_13 = arith.constant 0 : index
    %c0_14 = arith.constant 0 : index
    %6 = vector.load %arg1[%c0_11, %c0_12, %c0_13, %c0_14] : memref<1x16x16x32xf32, #tpu.memory_space<vmem>>, vector<1x16x16x32xf32>
    %7 = vector.shape_cast %6 : vector<1x16x16x32xf32> to vector<16x16x32xf32>
    %c1 = arith.constant 1 : index
    %c1_15 = arith.constant 1 : index
    %c0_16 = arith.constant 0 : index
    %8 = vector.load %arg13[%c1, %c1_15, %c0_16] : memref<18x24x32xf32, #tpu.memory_space<vmem>>, vector<16x16x32xf32>
    tpu.vector_store %arg13[%c1, %c1_15, %c0_16], %7 {strides = array<i32>} : memref<18x24x32xf32, #tpu.memory_space<vmem>>, vector<16x16x32xf32>,
    %c0_17 = arith.constant 0 : index
    %c0_18 = arith.constant 0 : index
    %c0_19 = arith.constant 0 : index
    %9 = vector.load %arg13[%c0_17, %c0_18, %c0_19] : memref<18x24x32xf32, #tpu.memory_space<vmem>>, vector<16x16x32xf32>
    %10 = vector.shape_cast %9 : vector<16x16x32xf32> to vector<256x32xf32>
    %c0_20 = arith.constant 0 : index
    %c1_21 = arith.constant 1 : index
    %c0_22 = arith.constant 0 : index
    %11 = vector.load %arg13[%c0_20, %c1_21, %c0_22] : memref<18x24x32xf32, #tpu.memory_space<vmem>>, vector<16x16x32xf32>
    %12 = vector.shape_cast %11 : vector<16x16x32xf32> to vector<256x32xf32>
    %c0_23 = arith.constant 0 : index
    %c2 = arith.constant 2 : index
    %c0_24 = arith.constant 0 : index
    %13 = vector.load %arg13[%c0_23, %c2, %c0_24] : memref<18x24x32xf32, #tpu.memory_space<vmem>>, vector<16x16x32xf32>
    %14 = vector.shape_cast %13 : vector<16x16x32xf32> to vector<256x32xf32>
    %15 = tpu.concatenate %10, %12, %14 in 1 : vector<256x32xf32>, vector<256x32xf32>, vector<256x32xf32> -> vector<256x96xf32>
    %c0_25 = arith.constant 0 : index
    %c0_26 = arith.constant 0 : index
    %16 = vector.load %arg2[%c0_25, %c0_26] : memref<288x32xf32, #tpu.memory_space<vmem>>, vector<96x32xf32>
    %cst_27 = arith.constant dense<0.000000e+00> : vector<256x32xf32>
    %17 = tpu.matmul %15, %16, %cst_27 {dimension_numbers = #tpu.dot_dimension_numbers<[1], [0], [0], [1], [0, 0, 1, 1], [], []>} : vector<256x96xf32>, vector<96x32xf32>, vector<256x32xf32> -> vector<256x32xf32>
    %c1_28 = arith.constant 1 : index
    %c0_29 = arith.constant 0 : index
    %c0_30 = arith.constant 0 : index
    %18 = vector.load %arg13[%c1_28, %c0_29, %c0_30] : memref<18x24x32xf32, #tpu.memory_space<vmem>>, vector<16x16x32xf32>
    %19 = vector.shape_cast %18 : vector<16x16x32xf32> to vector<256x32xf32>
    %c1_31 = arith.constant 1 : index
    %c1_32 = arith.constant 1 : index
    %c0_33 = arith.constant 0 : index
    %20 = vector.load %arg13[%c1_31, %c1_32, %c0_33] : memref<18x24x32xf32, #tpu.memory_space<vmem>>, vector<16x16x32xf32>
    %21 = vector.shape_cast %20 : vector<16x16x32xf32> to vector<256x32xf32>
    %c1_34 = arith.constant 1 : index
    %c2_35 = arith.constant 2 : index
    %c0_36 = arith.constant 0 : index
    %22 = vector.load %arg13[%c1_34, %c2_35, %c0_36] : memref<18x24x32xf32, #tpu.memory_space<vmem>>, vector<16x16x32xf32>
    %23 = vector.shape_cast %22 : vector<16x16x32xf32> to vector<256x32xf32>
    %24 = tpu.concatenate %19, %21, %23 in 1 : vector<256x32xf32>, vector<256x32xf32>, vector<256x32xf32> -> vector<256x96xf32>
    %c96 = arith.constant 96 : index
    %c0_37 = arith.constant 0 : index
    %25 = vector.load %arg2[%c96, %c0_37] : memref<288x32xf32, #tpu.memory_space<vmem>>, vector<96x32xf32>
    %cst_38 = arith.constant dense<0.000000e+00> : vector<256x32xf32>
    %26 = tpu.matmul %24, %25, %cst_38 {dimension_numbers = #tpu.dot_dimension_numbers<[1], [0], [0], [1], [0, 0, 1, 1], [], []>} : vector<256x96xf32>, vector<96x32xf32>, vector<256x32xf32> -> vector<256x32xf32>
    %27 = arith.addf %17, %26 : vector<256x32xf32>
    %c2_39 = arith.constant 2 : index
    %c0_40 = arith.constant 0 : index
    %c0_41 = arith.constant 0 : index
    %28 = vector.load %arg13[%c2_39, %c0_40, %c0_41] : memref<18x24x32xf32, #tpu.memory_space<vmem>>, vector<16x16x32xf32>
    %29 = vector.shape_cast %28 : vector<16x16x32xf32> to vector<256x32xf32>
    %c2_42 = arith.constant 2 : index
    %c1_43 = arith.constant 1 : index
    %c0_44 = arith.constant 0 : index
    %30 = vector.load %arg13[%c2_42, %c1_43, %c0_44] : memref<18x24x32xf32, #tpu.memory_space<vmem>>, vector<16x16x32xf32>
    %31 = vector.shape_cast %30 : vector<16x16x32xf32> to vector<256x32xf32>
    %c2_45 = arith.constant 2 : index
    %c2_46 = arith.constant 2 : index
    %c0_47 = arith.constant 0 : index
    %32 = vector.load %arg13[%c2_45, %c2_46, %c0_47] : memref<18x24x32xf32, #tpu.memory_space<vmem>>, vector<16x16x32xf32>
    %33 = vector.shape_cast %32 : vector<16x16x32xf32> to vector<256x32xf32>
    %34 = tpu.concatenate %29, %31, %33 in 1 : vector<256x32xf32>, vector<256x32xf32>, vector<256x32xf32> -> vector<256x96xf32>
    %c192 = arith.constant 192 : index
    %c0_48 = arith.constant 0 : index
    %35 = vector.load %arg2[%c192, %c0_48] : memref<288x32xf32, #tpu.memory_space<vmem>>, vector<96x32xf32>
    %cst_49 = arith.constant dense<0.000000e+00> : vector<256x32xf32>
    %36 = tpu.matmul %34, %35, %cst_49 {dimension_numbers = #tpu.dot_dimension_numbers<[1], [0], [0], [1], [0, 0, 1, 1], [], []>} : vector<256x96xf32>, vector<96x32xf32>, vector<256x32xf32> -> vector<256x32xf32>
    %37 = arith.addf %27, %36 : vector<256x32xf32>
    %c0_50 = arith.constant 0 : index
    %c0_51 = arith.constant 0 : index
    %38 = vector.load %arg3[%c0_50, %c0_51] : memref<1x32xf32, #tpu.memory_space<vmem>>, vector<1x32xf32>
    %39 = vector.broadcast %38 : vector<1x32xf32> to vector<256x32xf32>
    %40 = arith.addf %37, %39 : vector<256x32xf32>
    %cst_52 = arith.constant 0.000000e+00 : f32
    %41 = vector.broadcast %cst_52 : f32 to vector<256x32xf32>
    %42 = arith.maximumf %40, %41 : vector<256x32xf32>
    %43 = vector.shape_cast %42 : vector<256x32xf32> to vector<16x16x32xf32>
    %c1_53 = arith.constant 1 : index
    %c1_54 = arith.constant 1 : index
    %c0_55 = arith.constant 0 : index
    %44 = vector.load %arg13[%c1_53, %c1_54, %c0_55] : memref<18x24x32xf32, #tpu.memory_space<vmem>>, vector<16x16x32xf32>
    tpu.vector_store %arg13[%c1_53, %c1_54, %c0_55], %43 {strides = array<i32>} : memref<18x24x32xf32, #tpu.memory_space<vmem>>, vector<16x16x32xf32>,
    %c0_56 = arith.constant 0 : index
    %c0_57 = arith.constant 0 : index
    %c0_58 = arith.constant 0 : index
    %45 = vector.load %arg13[%c0_56, %c0_57, %c0_58] : memref<18x24x32xf32, #tpu.memory_space<vmem>>, vector<16x16x32xf32>
    %46 = vector.shape_cast %45 : vector<16x16x32xf32> to vector<256x32xf32>
    %c0_59 = arith.constant 0 : index
    %c1_60 = arith.constant 1 : index
    %c0_61 = arith.constant 0 : index
    %47 = vector.load %arg13[%c0_59, %c1_60, %c0_61] : memref<18x24x32xf32, #tpu.memory_space<vmem>>, vector<16x16x32xf32>
    %48 = vector.shape_cast %47 : vector<16x16x32xf32> to vector<256x32xf32>
    %c0_62 = arith.constant 0 : index
    %c2_63 = arith.constant 2 : index
    %c0_64 = arith.constant 0 : index
    %49 = vector.load %arg13[%c0_62, %c2_63, %c0_64] : memref<18x24x32xf32, #tpu.memory_space<vmem>>, vector<16x16x32xf32>
    %50 = vector.shape_cast %49 : vector<16x16x32xf32> to vector<256x32xf32>
    %51 = tpu.concatenate %46, %48, %50 in 1 : vector<256x32xf32>, vector<256x32xf32>, vector<256x32xf32> -> vector<256x96xf32>
    %c0_65 = arith.constant 0 : index
    %c0_66 = arith.constant 0 : index
    %52 = vector.load %arg4[%c0_65, %c0_66] : memref<288x32xf32, #tpu.memory_space<vmem>>, vector<96x32xf32>
    %cst_67 = arith.constant dense<0.000000e+00> : vector<256x32xf32>
    %53 = tpu.matmul %51, %52, %cst_67 {dimension_numbers = #tpu.dot_dimension_numbers<[1], [0], [0], [1], [0, 0, 1, 1], [], []>} : vector<256x96xf32>, vector<96x32xf32>, vector<256x32xf32> -> vector<256x32xf32>
    %c1_68 = arith.constant 1 : index
    %c0_69 = arith.constant 0 : index
    %c0_70 = arith.constant 0 : index
    %54 = vector.load %arg13[%c1_68, %c0_69, %c0_70] : memref<18x24x32xf32, #tpu.memory_space<vmem>>, vector<16x16x32xf32>
    %55 = vector.shape_cast %54 : vector<16x16x32xf32> to vector<256x32xf32>
    %c1_71 = arith.constant 1 : index
    %c1_72 = arith.constant 1 : index
    %c0_73 = arith.constant 0 : index
    %56 = vector.load %arg13[%c1_71, %c1_72, %c0_73] : memref<18x24x32xf32, #tpu.memory_space<vmem>>, vector<16x16x32xf32>
    %57 = vector.shape_cast %56 : vector<16x16x32xf32> to vector<256x32xf32>
    %c1_74 = arith.constant 1 : index
    %c2_75 = arith.constant 2 : index
    %c0_76 = arith.constant 0 : index
    %58 = vector.load %arg13[%c1_74, %c2_75, %c0_76] : memref<18x24x32xf32, #tpu.memory_space<vmem>>, vector<16x16x32xf32>
    %59 = vector.shape_cast %58 : vector<16x16x32xf32> to vector<256x32xf32>
    %60 = tpu.concatenate %55, %57, %59 in 1 : vector<256x32xf32>, vector<256x32xf32>, vector<256x32xf32> -> vector<256x96xf32>
    %c96_77 = arith.constant 96 : index
    %c0_78 = arith.constant 0 : index
    %61 = vector.load %arg4[%c96_77, %c0_78] : memref<288x32xf32, #tpu.memory_space<vmem>>, vector<96x32xf32>
    %cst_79 = arith.constant dense<0.000000e+00> : vector<256x32xf32>
    %62 = tpu.matmul %60, %61, %cst_79 {dimension_numbers = #tpu.dot_dimension_numbers<[1], [0], [0], [1], [0, 0, 1, 1], [], []>} : vector<256x96xf32>, vector<96x32xf32>, vector<256x32xf32> -> vector<256x32xf32>
    %63 = arith.addf %53, %62 : vector<256x32xf32>
    %c2_80 = arith.constant 2 : index
    %c0_81 = arith.constant 0 : index
    %c0_82 = arith.constant 0 : index
    %64 = vector.load %arg13[%c2_80, %c0_81, %c0_82] : memref<18x24x32xf32, #tpu.memory_space<vmem>>, vector<16x16x32xf32>
    %65 = vector.shape_cast %64 : vector<16x16x32xf32> to vector<256x32xf32>
    %c2_83 = arith.constant 2 : index
    %c1_84 = arith.constant 1 : index
    %c0_85 = arith.constant 0 : index
    %66 = vector.load %arg13[%c2_83, %c1_84, %c0_85] : memref<18x24x32xf32, #tpu.memory_space<vmem>>, vector<16x16x32xf32>
    %67 = vector.shape_cast %66 : vector<16x16x32xf32> to vector<256x32xf32>
    %c2_86 = arith.constant 2 : index
    %c2_87 = arith.constant 2 : index
    %c0_88 = arith.constant 0 : index
    %68 = vector.load %arg13[%c2_86, %c2_87, %c0_88] : memref<18x24x32xf32, #tpu.memory_space<vmem>>, vector<16x16x32xf32>
    %69 = vector.shape_cast %68 : vector<16x16x32xf32> to vector<256x32xf32>
    %70 = tpu.concatenate %65, %67, %69 in 1 : vector<256x32xf32>, vector<256x32xf32>, vector<256x32xf32> -> vector<256x96xf32>
    %c192_89 = arith.constant 192 : index
    %c0_90 = arith.constant 0 : index
    %71 = vector.load %arg4[%c192_89, %c0_90] : memref<288x32xf32, #tpu.memory_space<vmem>>, vector<96x32xf32>
    %cst_91 = arith.constant dense<0.000000e+00> : vector<256x32xf32>
    %72 = tpu.matmul %70, %71, %cst_91 {dimension_numbers = #tpu.dot_dimension_numbers<[1], [0], [0], [1], [0, 0, 1, 1], [], []>} : vector<256x96xf32>, vector<96x32xf32>, vector<256x32xf32> -> vector<256x32xf32>
    %73 = arith.addf %63, %72 : vector<256x32xf32>
    %c0_92 = arith.constant 0 : index
    %c0_93 = arith.constant 0 : index
    %74 = vector.load %arg5[%c0_92, %c0_93] : memref<1x32xf32, #tpu.memory_space<vmem>>, vector<1x32xf32>
    %75 = vector.broadcast %74 : vector<1x32xf32> to vector<256x32xf32>
    %76 = arith.addf %73, %75 : vector<256x32xf32>
    %cst_94 = arith.constant 0.000000e+00 : f32
    %77 = vector.broadcast %cst_94 : f32 to vector<256x32xf32>
    %78 = arith.maximumf %76, %77 : vector<256x32xf32>
    %79 = vector.shape_cast %78 : vector<256x32xf32> to vector<16x16x32xf32>
    %c1_95 = arith.constant 1 : index
    %c1_96 = arith.constant 1 : index
    %c0_97 = arith.constant 0 : index
    %80 = vector.load %arg13[%c1_95, %c1_96, %c0_97] : memref<18x24x32xf32, #tpu.memory_space<vmem>>, vector<16x16x32xf32>
    tpu.vector_store %arg13[%c1_95, %c1_96, %c0_97], %79 {strides = array<i32>} : memref<18x24x32xf32, #tpu.memory_space<vmem>>, vector<16x16x32xf32>,
    %c0_98 = arith.constant 0 : index
    %c0_99 = arith.constant 0 : index
    %c0_100 = arith.constant 0 : index
    %81 = vector.load %arg13[%c0_98, %c0_99, %c0_100] : memref<18x24x32xf32, #tpu.memory_space<vmem>>, vector<16x16x32xf32>
    %82 = vector.shape_cast %81 : vector<16x16x32xf32> to vector<256x32xf32>
    %c0_101 = arith.constant 0 : index
    %c1_102 = arith.constant 1 : index
    %c0_103 = arith.constant 0 : index
    %83 = vector.load %arg13[%c0_101, %c1_102, %c0_103] : memref<18x24x32xf32, #tpu.memory_space<vmem>>, vector<16x16x32xf32>
    %84 = vector.shape_cast %83 : vector<16x16x32xf32> to vector<256x32xf32>
    %c0_104 = arith.constant 0 : index
    %c2_105 = arith.constant 2 : index
    %c0_106 = arith.constant 0 : index
    %85 = vector.load %arg13[%c0_104, %c2_105, %c0_106] : memref<18x24x32xf32, #tpu.memory_space<vmem>>, vector<16x16x32xf32>
    %86 = vector.shape_cast %85 : vector<16x16x32xf32> to vector<256x32xf32>
    %87 = tpu.concatenate %82, %84, %86 in 1 : vector<256x32xf32>, vector<256x32xf32>, vector<256x32xf32> -> vector<256x96xf32>
    %c0_107 = arith.constant 0 : index
    %c0_108 = arith.constant 0 : index
    %88 = vector.load %arg6[%c0_107, %c0_108] : memref<288x32xf32, #tpu.memory_space<vmem>>, vector<96x32xf32>
    %cst_109 = arith.constant dense<0.000000e+00> : vector<256x32xf32>
    %89 = tpu.matmul %87, %88, %cst_109 {dimension_numbers = #tpu.dot_dimension_numbers<[1], [0], [0], [1], [0, 0, 1, 1], [], []>} : vector<256x96xf32>, vector<96x32xf32>, vector<256x32xf32> -> vector<256x32xf32>
    %c1_110 = arith.constant 1 : index
    %c0_111 = arith.constant 0 : index
    %c0_112 = arith.constant 0 : index
    %90 = vector.load %arg13[%c1_110, %c0_111, %c0_112] : memref<18x24x32xf32, #tpu.memory_space<vmem>>, vector<16x16x32xf32>
    %91 = vector.shape_cast %90 : vector<16x16x32xf32> to vector<256x32xf32>
    %c1_113 = arith.constant 1 : index
    %c1_114 = arith.constant 1 : index
    %c0_115 = arith.constant 0 : index
    %92 = vector.load %arg13[%c1_113, %c1_114, %c0_115] : memref<18x24x32xf32, #tpu.memory_space<vmem>>, vector<16x16x32xf32>
    %93 = vector.shape_cast %92 : vector<16x16x32xf32> to vector<256x32xf32>
    %c1_116 = arith.constant 1 : index
    %c2_117 = arith.constant 2 : index
    %c0_118 = arith.constant 0 : index
    %94 = vector.load %arg13[%c1_116, %c2_117, %c0_118] : memref<18x24x32xf32, #tpu.memory_space<vmem>>, vector<16x16x32xf32>
    %95 = vector.shape_cast %94 : vector<16x16x32xf32> to vector<256x32xf32>
    %96 = tpu.concatenate %91, %93, %95 in 1 : vector<256x32xf32>, vector<256x32xf32>, vector<256x32xf32> -> vector<256x96xf32>
    %c96_119 = arith.constant 96 : index
    %c0_120 = arith.constant 0 : index
    %97 = vector.load %arg6[%c96_119, %c0_120] : memref<288x32xf32, #tpu.memory_space<vmem>>, vector<96x32xf32>
    %cst_121 = arith.constant dense<0.000000e+00> : vector<256x32xf32>
    %98 = tpu.matmul %96, %97, %cst_121 {dimension_numbers = #tpu.dot_dimension_numbers<[1], [0], [0], [1], [0, 0, 1, 1], [], []>} : vector<256x96xf32>, vector<96x32xf32>, vector<256x32xf32> -> vector<256x32xf32>
    %99 = arith.addf %89, %98 : vector<256x32xf32>
    %c2_122 = arith.constant 2 : index
    %c0_123 = arith.constant 0 : index
    %c0_124 = arith.constant 0 : index
    %100 = vector.load %arg13[%c2_122, %c0_123, %c0_124] : memref<18x24x32xf32, #tpu.memory_space<vmem>>, vector<16x16x32xf32>
    %101 = vector.shape_cast %100 : vector<16x16x32xf32> to vector<256x32xf32>
    %c2_125 = arith.constant 2 : index
    %c1_126 = arith.constant 1 : index
    %c0_127 = arith.constant 0 : index
    %102 = vector.load %arg13[%c2_125, %c1_126, %c0_127] : memref<18x24x32xf32, #tpu.memory_space<vmem>>, vector<16x16x32xf32>
    %103 = vector.shape_cast %102 : vector<16x16x32xf32> to vector<256x32xf32>
    %c2_128 = arith.constant 2 : index
    %c2_129 = arith.constant 2 : index
    %c0_130 = arith.constant 0 : index
    %104 = vector.load %arg13[%c2_128, %c2_129, %c0_130] : memref<18x24x32xf32, #tpu.memory_space<vmem>>, vector<16x16x32xf32>
    %105 = vector.shape_cast %104 : vector<16x16x32xf32> to vector<256x32xf32>
    %106 = tpu.concatenate %101, %103, %105 in 1 : vector<256x32xf32>, vector<256x32xf32>, vector<256x32xf32> -> vector<256x96xf32>
    %c192_131 = arith.constant 192 : index
    %c0_132 = arith.constant 0 : index
    %107 = vector.load %arg6[%c192_131, %c0_132] : memref<288x32xf32, #tpu.memory_space<vmem>>, vector<96x32xf32>
    %cst_133 = arith.constant dense<0.000000e+00> : vector<256x32xf32>
    %108 = tpu.matmul %106, %107, %cst_133 {dimension_numbers = #tpu.dot_dimension_numbers<[1], [0], [0], [1], [0, 0, 1, 1], [], []>} : vector<256x96xf32>, vector<96x32xf32>, vector<256x32xf32> -> vector<256x32xf32>
    %109 = arith.addf %99, %108 : vector<256x32xf32>
    %c0_134 = arith.constant 0 : index
    %c0_135 = arith.constant 0 : index
    %110 = vector.load %arg7[%c0_134, %c0_135] : memref<1x32xf32, #tpu.memory_space<vmem>>, vector<1x32xf32>
    %111 = vector.broadcast %110 : vector<1x32xf32> to vector<256x32xf32>
    %112 = arith.addf %109, %111 : vector<256x32xf32>
    %cst_136 = arith.constant 0.000000e+00 : f32
    %113 = vector.broadcast %cst_136 : f32 to vector<256x32xf32>
    %114 = arith.maximumf %112, %113 : vector<256x32xf32>
    %c0_137 = arith.constant 0 : index
    %c0_138 = arith.constant 0 : index
    %115 = vector.load %arg14[%c0_137, %c0_138] : memref<256x32xf32, #tpu.memory_space<vmem>>, vector<256x32xf32>
    tpu.vector_store %arg14[%c0_137, %c0_138], %114 {strides = array<i32>} : memref<256x32xf32, #tpu.memory_space<vmem>>, vector<256x32xf32>,
    %c0_i32 = arith.constant 0 : i32
    %c4_i32 = arith.constant 4 : i32
    %116 = arith.addi %c0_i32, %c4_i32 : i32
    %c1_i32 = arith.constant 1 : i32
    scf.for %arg15 = %c0_i32 to %116 step %c1_i32  : i32 {
      %c64_i32 = arith.constant 64 : i32
      %117 = arith.muli %arg15, %c64_i32 : i32
      %118 = tpu.assume_multiple %117, 8 : i32
      %119 = arith.index_cast %118 : i32 to index
      %c0_140 = arith.constant 0 : index
      %120 = vector.load %arg14[%119, %c0_140] : memref<256x32xf32, #tpu.memory_space<vmem>>, vector<64x32xf32>
      %c0_141 = arith.constant 0 : index
      %c0_142 = arith.constant 0 : index
      %121 = vector.load %arg8[%c0_141, %c0_142] : memref<32x1024xf32, #tpu.memory_space<vmem>>, vector<32x1024xf32>
      %cst_143 = arith.constant dense<0.000000e+00> : vector<64x1024xf32>
      %122 = tpu.matmul %120, %121, %cst_143 {dimension_numbers = #tpu.dot_dimension_numbers<[1], [0], [0], [1], [0, 0, 1, 1], [], []>} : vector<64x32xf32>, vector<32x1024xf32>, vector<64x1024xf32> -> vector<64x1024xf32>
      %c0_144 = arith.constant 0 : index
      %c0_145 = arith.constant 0 : index
      %123 = vector.load %arg9[%c0_144, %c0_145] : memref<1x1024xf32, #tpu.memory_space<vmem>>, vector<1x1024xf32>
      %124 = vector.broadcast %123 : vector<1x1024xf32> to vector<64x1024xf32>
      %125 = arith.addf %122, %124 : vector<64x1024xf32>
      %cst_146 = arith.constant 0.000000e+00 : f32
      %126 = vector.broadcast %cst_146 : f32 to vector<64x1024xf32>
      %127 = arith.maximumf %125, %126 : vector<64x1024xf32>
      %c0_147 = arith.constant 0 : index
      %c0_148 = arith.constant 0 : index
      %128 = vector.load %arg10[%c0_147, %c0_148] : memref<1024x128xf32, #tpu.memory_space<vmem>>, vector<1024x128xf32>
      %cst_149 = arith.constant dense<0.000000e+00> : vector<64x128xf32>
      %129 = tpu.matmul %127, %128, %cst_149 {dimension_numbers = #tpu.dot_dimension_numbers<[1], [0], [0], [1], [0, 0, 1, 1], [], []>} : vector<64x1024xf32>, vector<1024x128xf32>, vector<64x128xf32> -> vector<64x128xf32>
      %c0_150 = arith.constant 0 : index
      %c0_151 = arith.constant 0 : index
      %130 = vector.load %arg11[%c0_150, %c0_151] : memref<1x128xf32, #tpu.memory_space<vmem>>, vector<1x128xf32>
      %131 = vector.broadcast %130 : vector<1x128xf32> to vector<64x128xf32>
      %132 = arith.addf %129, %131 : vector<64x128xf32>
      %c0_152 = arith.constant 0 : index
      %133 = arith.index_cast %118 : i32 to index
      %c0_153 = arith.constant 0 : index
      %134 = vector.load %arg12[%c0_152, %133, %c0_153] : memref<1x256x128xf32, #tpu.memory_space<vmem>>, vector<1x64x128xf32>
      %135 = vector.shape_cast %134 : vector<1x64x128xf32> to vector<64x128xf32>
      %136 = vector.shape_cast %132 : vector<64x128xf32> to vector<1x64x128xf32>
      tpu.vector_store %arg12[%c0_152, %133, %c0_153], %136 {strides = array<i32>} : memref<1x256x128xf32, #tpu.memory_space<vmem>>, vector<1x64x128xf32>,
    }
    %c4_i32_139 = arith.constant 4 : i32
    return
  }
  func.func @transform_0(%arg0: i32) -> (i32, i32, i32, i32) {
    %c0_i32 = arith.constant 0 : i32
    %c0_i32_0 = arith.constant 0 : i32
    %c0_i32_1 = arith.constant 0 : i32
    %c0_i32_2 = arith.constant 0 : i32
    return %arg0, %c0_i32, %c0_i32_0, %c0_i32_1 : i32, i32, i32, i32
  }
  func.func @transform_1(%arg0: i32) -> (i32, i32) {
    %c0_i32 = arith.constant 0 : i32
    %c0_i32_0 = arith.constant 0 : i32
    %c0_i32_1 = arith.constant 0 : i32
    return %c0_i32, %c0_i32_0 : i32, i32
  }
  func.func @transform_2(%arg0: i32) -> (i32, i32) {
    %c0_i32 = arith.constant 0 : i32
    %c0_i32_0 = arith.constant 0 : i32
    %c0_i32_1 = arith.constant 0 : i32
    return %c0_i32, %c0_i32_0 : i32, i32
  }
  func.func @transform_3(%arg0: i32) -> (i32, i32) {
    %c0_i32 = arith.constant 0 : i32
    %c0_i32_0 = arith.constant 0 : i32
    %c0_i32_1 = arith.constant 0 : i32
    return %c0_i32, %c0_i32_0 : i32, i32
  }
  func.func @transform_4(%arg0: i32) -> (i32, i32) {
    %c0_i32 = arith.constant 0 : i32
    %c0_i32_0 = arith.constant 0 : i32
    %c0_i32_1 = arith.constant 0 : i32
    return %c0_i32, %c0_i32_0 : i32, i32
  }
  func.func @transform_5(%arg0: i32) -> (i32, i32) {
    %c0_i32 = arith.constant 0 : i32
    %c0_i32_0 = arith.constant 0 : i32
    %c0_i32_1 = arith.constant 0 : i32
    return %c0_i32, %c0_i32_0 : i32, i32
  }
  func.func @transform_6(%arg0: i32) -> (i32, i32) {
    %c0_i32 = arith.constant 0 : i32
    %c0_i32_0 = arith.constant 0 : i32
    %c0_i32_1 = arith.constant 0 : i32
    return %c0_i32, %c0_i32_0 : i32, i32
  }
  func.func @transform_7(%arg0: i32) -> (i32, i32) {
    %c0_i32 = arith.constant 0 : i32
    %c0_i32_0 = arith.constant 0 : i32
    %c0_i32_1 = arith.constant 0 : i32
    return %c0_i32, %c0_i32_0 : i32, i32
  }
  func.func @transform_8(%arg0: i32) -> (i32, i32) {
    %c0_i32 = arith.constant 0 : i32
    %c0_i32_0 = arith.constant 0 : i32
    %c0_i32_1 = arith.constant 0 : i32
    return %c0_i32, %c0_i32_0 : i32, i32
  }
  func.func @transform_9(%arg0: i32) -> (i32, i32) {
    %c0_i32 = arith.constant 0 : i32
    %c0_i32_0 = arith.constant 0 : i32
    %c0_i32_1 = arith.constant 0 : i32
    return %c0_i32, %c0_i32_0 : i32, i32
  }
  func.func @transform_10(%arg0: i32) -> (i32, i32) {
    %c0_i32 = arith.constant 0 : i32
    %c0_i32_0 = arith.constant 0 : i32
    %c0_i32_1 = arith.constant 0 : i32
    return %c0_i32, %c0_i32_0 : i32, i32
  }
  func.func @transform_11(%arg0: i32) -> (i32, i32, i32) {
    %c0_i32 = arith.constant 0 : i32
    %c0_i32_0 = arith.constant 0 : i32
    %c0_i32_1 = arith.constant 0 : i32
    return %arg0, %c0_i32, %c0_i32_0 : i32, i32, i32
  }
}

</mosaic_0001>

<bundles_post_ra>
// kernel: initial_stage_forward.1
= control target key start
LH: loop header
LB: loop body
LE: loop exit
PB: predicated region body
PF: predicated region fallthrough
CT: control target
= control target key end

     0   :  { %s15614_s0 = inlined_call_operand.hbm [shape: f32[2,16,16,32], index: 0, kind: input, shape index: {}]   ;;  %s15615_s1 = inlined_call_operand.vmem [shape: f32[288,32], index: 1, kind: input, shape index: {}]   ;;  %s15616_s2 = inlined_call_operand.vmem [shape: f32[1,32], index: 2, kind: input, shape index: {}]   ;;  %s15617_s3 = inlined_call_operand.vmem [shape: f32[288,32], index: 3, kind: input, shape index: {}]   ;;  %s15618_s4 = inlined_call_operand.vmem [shape: f32[1,32], index: 4, kind: input, shape index: {}]   ;;  %s15619_s5 = inlined_call_operand.vmem [shape: f32[288,32], index: 5, kind: input, shape index: {}]   ;;  %s15620_s6 = inlined_call_operand.vmem [shape: f32[1,32], index: 6, kind: input, shape index: {}]   ;;  %s15621_s7 = inlined_call_operand.hbm [shape: f32[32,1024], index: 7, kind: input, shape index: {}]   ;;  %s15622_s8 = inlined_call_operand.vmem [shape: f32[1,1024], index: 8, kind: input, shape index: {}]   ;;  %s15623_s9 = inlined_call_operand.vmem [shape: f32[1024,128], index: 9, kind: input, shape index: {}]   ;;  %s15624_s10 = inlined_call_operand.vmem [shape: f32[1,128], index: 10, kind: input, shape index: {}]   ;;  %s15625_s11 = inlined_call_operand.vmem [shape: f32[2,256,128], index: 11, kind: output, shape index: {}]  }
   0x1   :  { %15658 = sst [smem:[#allocation35_spill]] %s15622_s8 }
   0x2   :  { %15659 = sst [smem:[#allocation36_spill]] %s15624_s10 }
   0x3   :  { %16 = vsyncpa [#allocation5], 0 }
   0x4   :  { %18 = vsyncpa [#allocation5 + $0x1], 0 }
   0x5   :  { %19 = vsyncpa [#allocation7], 0  ;;  %s11392_s17 = smov 0   ;;  %s11394_s18 = smov 0  }
   0x6   :  { %s11396_s19 = smov 0   ;;  %s11398_s20 = smov 0  }
   0x7 LB: > { %s11411_s21 = sadd.s32 4294967295, %s11316_s20   ;;  %p45_p0 = scmp.ne.s32.totalorder %s11308_s18, %s11304_s17  ;;  %s11316_s20 = sphi %s11398_s20, %s15741_s20   ;;  %s11312_s19 = sphi %s11396_s19, %s15744_s19   ;;  %s11308_s18 = sphi %s11394_s18, %s15743_s18   ;;  %s11304_s17 = sphi %s11392_s17, %s15742_s17  }
   0x8   : > { %p15626_p1 = scmp.eq.s32.totalorder %s11411_s21, 0  ;;  %p8962_p2 = scmp.ge.s32.totalorder %s11316_s20, 1 }
   0x9   : > { %p292_p3 = scmp.lt.s32.totalorder %s11316_s20, 3  ;;  %s11322_s24 = smov [#allocation6]  }
   0xa   : > { %p11419_p4 = por %p15626_p1, %p45_p0  ;;  %s322_s25 = sshll.u32 %s11322_s24, 4  ;;  %s323_s25 = int_to_ptr.vmem [resolvable:$true] %s322_s25 }
   0xb   : > { %p11423_p5 = pnand %p8962_p2, %p292_p3  ;;  %s11436_s27 = sadd.s32 1, %s11316_s20  }
   0xc   : > { %s15660_s22 = scalar_select %p11419_p4, 1, 0 }
   0xd   : > { %s15661_s23 = scalar_select %p11423_p5, 1, 0 }
   0xe   : > { %p11156_p6 = pneg %p11423_p5  ;;  %15663 = sst [smem:[#allocation10_spill]] %s11436_s27 }
   0xf   : > { %s32_s28 = sadd.s32 1, %s11312_s19  ;;  %s29_s29 = ssub.s32 %s11316_s20, %s11436_s27 }
  0x10   : > { %p11431_p7 = pnand %p11156_p6, %p15626_p1  ;;  %s11216_s13 = scalar_lea.hbm %s15621_s7, 4096 }
  0x11   : > { %p11217_p8 = scmp.ne.s32.totalorder %s15621_s7, %s11216_s13  ;;  %p11223_p12 = scmp.lt.u32.totalorder %s11216_s13, %s15621_s7 }
  0x12   : > { %p11218_p9 = pneg %p11431_p7 }
  0x14   : > { %p11219_p10 = pnand %p11218_p9, %p11217_p8 }
  0x16   : > { %p11220_p11 = pneg %p11219_p10 }
  0x18   : > { %p11225_p13 = pnand %p11223_p12, %p11220_p11 }
  0x1a   : > { %11228 = shalt.err (!%p11225_p13)
}
  0x1b   : > { %s11229_s24 = scalar_lea.vmem %s323_s25, 4096  ;;  %p11237_p6 = scmp.lt.s32.totalorder %s323_s25, %s323_s25 }
  0x1c   : > { %p11230_p0 = scmp.ne.s32.totalorder %s323_s25, %s11229_s24  ;;  %p11238_p1 = scmp.lt.s32.totalorder %s11229_s24, %s11229_s24 }
  0x1e   : > { %p11232_p2 = pnand %p11230_p0, %p11218_p9  ;;  %p11239_p4 = por %p11238_p1, %p11237_p6 }
  0x20   : > { %p11233_p3 = pneg %p11232_p2 }
  0x22   : > { %p11240_p5 = pnand %p11239_p4, %p11233_p3 }
  0x24   : > { %11243 = shalt.err (!%p11240_p5)
}
  0x25   : > { %s11323_s30 = smov 1024   ;;  %s11324_s12 = smov 64  }
  0x26   : > { %11159 = dma.hbm_to_vmem [thread:$0]  (!%p11431_p7), %s15621_s7, 4096, %s323_s25, [#allocation7], %s11323_s30, %s11323_s30, %s11324_s12  }
  0x27   : > { %p30_p8 = scmp.eq.s32.totalorder %s29_s29, 0  ;;  %p39_p9 = scmp.ne.s32.totalorder %s11312_s19, %s11308_s18 }
  0x28   : > { %p40_p1 = scmp.eq.s32.totalorder %s11316_s20, 0  ;;  %p11165_p4 = scmp.lt.s32.totalorder %s11316_s20, 2 }
  0x29   : > { %s11462_s15 = scalar_select %p30_p8, %s11312_s19, %s32_s28  }
  0x2a   : > { %p41_p5 = por %p40_p1, %p39_p9  ;;  %s345_s16 = sand.u32 1, %s11312_s19  }
  0x2b   : > { %s8965_s17 = sshll.u32 %s345_s16, 8  ;;  %s9300_s24 = sshll.u32 %s11316_s20, 12 }
  0x2c   : > { %s11469_s8 = scalar_lea.hbm %s15614_s0, %s9300_s24  ;;  %s349_s25 = scalar_lea.vmem [#allocation4], %s8965_s17 }
  0x2d   : > { %s356_s26 = sshll.u32 %s349_s25, 4  ;;  %p11473_p7 = pnand %p11165_p4, %p41_p5  ;;  %s11471_s26 = int_to_ptr.vmem [resolvable:$true] %s356_s26 }
  0x2e   : > { %s11477_s20 = scalar_lea.sflag [#allocation5], %s345_s16  ;;  %s11244_s29 = scalar_lea.hbm %s11469_s8, 4096 }
  0x2f   : > { %p11245_p10 = scmp.ne.s32.totalorder %s11469_s8, %s11244_s29  ;;  %p11246_p11 = pneg %p11473_p7 }
  0x30   : > { %s11249_s30 = scalar_lea.hbm %s15614_s0, 8192  ;;  %p11250_p0 = scmp.lt.u32.totalorder %s11469_s8, %s15614_s0 }
  0x31   : > { %p11247_p12 = pnand %p11246_p11, %p11245_p10  ;;  %p11251_p2 = scmp.lt.u32.totalorder %s11249_s30, %s11244_s29 }
  0x32   : > { %p11253_p6 = scmp.lt.u32.totalorder %s11244_s29, %s11469_s8 }
  0x33   : > { %p11248_p13 = pneg %p11247_p12  ;;  %p11252_p3 = por %p11251_p2, %p11250_p0 }
  0x35   : > { %p11254_p8 = por %p11253_p6, %p11252_p3 }
  0x37   : > { %p11255_p9 = pnand %p11254_p8, %p11248_p13 }
  0x39   : > { %11258 = shalt.err (!%p11255_p9)
}
  0x3a   : > { %s11259_s14 = scalar_lea.vmem %s11471_s26, 4096  ;;  %s11325_s16 = smov [#allocation4]  }
  0x3b   : > { %p11260_p1 = scmp.ne.s32.totalorder %s11471_s26, %s11259_s14  ;;  %s11264_s17 = sshll.u32 %s11325_s16, 4  ;;  %s11265_s17 = int_to_ptr.vmem [resolvable:$false] %s11264_s17 }
  0x3c   : > { %s11266_s24 = scalar_lea.vmem %s11265_s17, 8192  ;;  %p11267_p10 = scmp.lt.s32.totalorder %s11471_s26, %s11265_s17 }
  0x3d   : > { %p11262_p4 = pnand %p11260_p1, %p11246_p11  ;;  %p11268_p12 = scmp.lt.s32.totalorder %s11266_s24, %s11259_s14 }
  0x3f   : > { %p11263_p5 = pneg %p11262_p4  ;;  %p11269_p0 = por %p11268_p12, %p11267_p10 }
  0x41   : > { %p11270_p2 = pnand %p11269_p0, %p11263_p5 }
  0x43   : > { %11273 = shalt.err (!%p11270_p2)
}
  0x44   : > { %s11326_s25 = smov 128   ;;  %s11327_s29 = smov 8  }
  0x45   : > { %11163 = dma.hbm_to_vmem [thread:$0]  (!%p11473_p7), %s11469_s8, 4096, %s11471_s26, %s11477_s20, %s11326_s25, %s11326_s25, %s11327_s29  }
  0x46   : > { %p15665_p11 = scmp.ne.s32.totalorder %s15661_s23, 0 }
  0x48   : > { %368 = sbr.rel (%p15665_p11) target bundleno = 2531 (0x9e3), region = 64 }
  0x4f   : > { %s370_s10 = sand.u32 1, %s11308_s18   ;;  %p15666_p13 = scmp.ne.s32.totalorder %s15660_s22, 0 }
  0x50   : > { %s8969_s27 = sshll.u32 %s370_s10, 8  ;;  %s371_s30 = scalar_lea.sflag [#allocation5], %s370_s10 }
  0x51   : > { %s11508_s12 = scalar_lea.vmem [#allocation4], %s8969_s27 }
  0x52   : > { %11295 = dma.done.wait (%p15666_p13), %s371_s30, 4096  }
  0x53   : > { %11297 = vsyncadd (%p15666_p13), %s371_s30, 4294963200  ;;  %p15667_p3 = scmp.eq.s32.totalorder %s11411_s21, 0 }
  0x55   : > { %11299 = dma.done.wait (%p15667_p3), [#allocation7], 4096   ;;  %p15668_p7 = pmov %p15667_p3 }
  0x56   : > { %vm422_vm0 = vcmask 261120   ;;  %v11328_v0 = vmov 0.0   ;;  %vm430_vm1 = vcmask 253952   ;;  %p417_p6 = scmp.lt.s32.totalorder %s11411_s21, 1  ;;  %v467_v1 = vld [vmem:[%s11508_s12] sm:$0xff]  ;;  %v468_v2 = vld [vmem:[%s11508_s12 + $0x8] sm:$0xff] }
  0x57   : > { %11301 = vsyncadd (%p15668_p7), [#allocation7], 4294963200  ;;  %424 = vst.msk [vmem:[#allocation2 + $0x8] sm:$0xff] %vm422_vm0, %v11328_v0  ;;  %v469_v3 = vld [vmem:[%s11508_s12 + $0x10] sm:$0xff]  ;;  %v470_v8 = vld [vmem:[%s11508_s12 + $0x18] sm:$0xff]  ;;  %s11330_s13 = smov 64  }
  0x58   : > { %425 = vst.msk [vmem:[#allocation2 + $0x10] sm:$0xff] %vm422_vm0, %v11328_v0  ;;  %423 = vst.msk [vmem:[#allocation2] sm:$0xff] %vm422_vm0, %v11328_v0  ;;  %s15746_s21 = smov (!%p417_p6, %s11411_s21), 1  ;;  %v471_v9 = vld [vmem:[%s11508_s12 + $0x20] sm:$0xff]  ;;  %v472_v10 = vld [vmem:[%s11508_s12 + $0x28] sm:$0xff]  ;;  %vm916_vm2 = vcmask 523264  }
  0x59   : > { %427 = vst.msk [vmem:[#allocation2 + $0x198] sm:$0xff] %vm422_vm0, %v11328_v0  ;;  %428 = vst.msk [vmem:[#allocation2 + $0x1a0] sm:$0xff] %vm422_vm0, %v11328_v0  ;;  %s9301_s8 = sshll.u32 %s15746_s21, 8  ;;  %s11329_s21 = smov 32   ;;  %v473_v11 = vld [vmem:[%s11508_s12 + $0x30] sm:$0xff]  ;;  %v474_v12 = vld [vmem:[%s11508_s12 + $0x38] sm:$0xff] }
  0x5a   : > { %429 = vst.msk [vmem:[#allocation2 + $0x1a8] sm:$0xff] %vm422_vm0, %v11328_v0  ;;  %s11567_s26 = scalar_lea.vmem %s15625_s11, %s9301_s8  ;;  %500 = vst.msk [vmem:[#allocation2 + $0x19] sm:$0xff] %vm422_vm0, %v467_v1  ;;  %v475_v13 = vld [vmem:[%s11508_s12 + $0x40] sm:$0xff]  ;;  %v476_v14 = vld [vmem:[%s11508_s12 + $0x48] sm:$0xff]  ;;  %vm1389_vm3 = vcmask 785408   ;;  %s14875_s22 = smov 0  }
  0x5b   : > { %449 = vst.msk [vmem:[#allocation2 + $0x11] sm:$0x1] %vm430_vm1, %v11328_v0  ;;  %431 = vst.msk [vmem:[#allocation2] sm:$0x1] %vm430_vm1, %v11328_v0  ;;  %v477_v15 = vld [vmem:[%s11508_s12 + $0x50] sm:$0xff]  ;;  %v478_v16 = vld [vmem:[%s11508_s12 + $0x58] sm:$0xff] }
  0x5c   : > { %432 = vst.msk [vmem:[#allocation2 + $0x18] sm:$0x1] %vm430_vm1, %v11328_v0  ;;  %433 = vst.msk [vmem:[#allocation2 + $0x30] sm:$0x1] %vm430_vm1, %v11328_v0  ;;  %v479_v17 = vld [vmem:[%s11508_s12 + $0x60] sm:$0xff]  ;;  %v949_v18 = vld [vmem:[%s15615_s1] sm:$0xff] }
  0x5d   : > { %434 = vst.msk [vmem:[#allocation2 + $0x48] sm:$0x1] %vm430_vm1, %v11328_v0  ;;  %435 = vst.msk [vmem:[#allocation2 + $0x60] sm:$0x1] %vm430_vm1, %v11328_v0  ;;  %v950_v19 = vld [vmem:[%s15615_s1 + $0x8] sm:$0xff]  ;;  %v951_v20 = vld [vmem:[%s15615_s1 + $0x10] sm:$0xff] }
  0x5e   : > { %436 = vst.msk [vmem:[#allocation2 + $0x78] sm:$0x1] %vm430_vm1, %v11328_v0  ;;  %437 = vst.msk [vmem:[#allocation2 + $0x90] sm:$0x1] %vm430_vm1, %v11328_v0  ;;  %v11608_v21 = vpack.c.bf16 %v950_v19, %v949_v18  ;;  %v952_v22 = vld [vmem:[%s15615_s1 + $0x18] sm:$0xff]  ;;  %v1377_v24 = vld [vmem:[%s15615_s1 + $0x60] sm:$0xff] }
  0x5f   : > { %438 = vst.msk [vmem:[#allocation2 + $0xa8] sm:$0x1] %vm430_vm1, %v11328_v0  ;;  %439 = vst.msk [vmem:[#allocation2 + $0xc0] sm:$0x1] %vm430_vm1, %v11328_v0  ;;  %v565_v4 = vld [vmem:[#allocation2 + $0x9] sm:$0xff]  ;;  %v564_v5 = vld [vmem:[#allocation2 + $0x1] sm:$0xff]  ;;  %v11617_v27 = vpack.c.bf16 %v952_v22, %v951_v20 }
  0x60   : > { %440 = vst.msk [vmem:[#allocation2 + $0xd8] sm:$0x1] %vm430_vm1, %v11328_v0  ;;  %441 = vst.msk [vmem:[#allocation2 + $0xf0] sm:$0x1] %vm430_vm1, %v11328_v0  ;;  %v596_v6 = vld [vmem:[#allocation2 + $0x2] sm:$0xff]  ;;  %662 = vrot.lane.b32.xlu1 %v565_v4, %s11329_s21  ;;  %660 = vrot.lane.b32.xlu0 %v564_v5, %s11329_s21  ;;  %v480_v23 = vld [vmem:[%s11508_s12 + $0x68] sm:$0xff] }
  0x61   : > { %442 = vst.msk [vmem:[#allocation2 + $0x108] sm:$0x1] %vm430_vm1, %v11328_v0  ;;  %443 = vst.msk [vmem:[#allocation2 + $0x120] sm:$0x1] %vm430_vm1, %v11328_v0  ;;  %v993_v26 = vld [vmem:[#allocation2 + $0x19] sm:$0xff]  ;;  %10595 = vmatprep.subr.bf16.mxu0 %v11608_v21  ;;  %v1378_v28 = vld [vmem:[%s15615_s1 + $0x68] sm:$0xff] }
  0x62   : > { %444 = vst.msk [vmem:[#allocation2 + $0x138] sm:$0x1] %vm430_vm1, %v11328_v0  ;;  %445 = vst.msk [vmem:[#allocation2 + $0x150] sm:$0x1] %vm430_vm1, %v11328_v0  ;;  %v597_v7 = vld [vmem:[#allocation2 + $0xa] sm:$0xff]  ;;  %v10570_v29 = vpack.c.bf16 %v1378_v28, %v1377_v24  ;;  %10597 = vmatpush3.bf16.msra.mxu0 %v11608_v21  ;;  %v953_v33 = vld [vmem:[%s15615_s1 + $0x20] sm:$0xff] }
  0x63   : > { %446 = vst.msk [vmem:[#allocation2 + $0x168] sm:$0x1] %vm430_vm1, %v11328_v0  ;;  %447 = vst.msk [vmem:[#allocation2 + $0x180] sm:$0x1] %vm430_vm1, %v11328_v0  ;;  %10599 = vmatprep.subr.bf16.mxu0 %v11617_v27  ;;  %v954_v34 = vld [vmem:[%s15615_s1 + $0x28] sm:$0xff]  ;;  %v1379_v36 = vld [vmem:[%s15615_s1 + $0x70] sm:$0xff] }
  0x64   : > { %448 = vst.msk [vmem:[#allocation2 + $0x198] sm:$0x1] %vm430_vm1, %v11328_v0  ;;  %450 = vst.msk [vmem:[#allocation2 + $0x29] sm:$0x1] %vm430_vm1, %v11328_v0  ;;  %788 = vrot.lane.b32.xlu1 %v596_v6, %s11330_s13  ;;  %790 = vrot.lane.b32.xlu0 %v597_v7, %s11330_s13  ;;  %v11645_v35 = vpack.c.bf16 %v954_v34, %v953_v33  ;;  %v1380_v37 = vld [vmem:[%s15615_s1 + $0x78] sm:$0xff]  ;;  %v955_v39 = vld [vmem:[%s15615_s1 + $0x30] sm:$0xff] }
  0x65   : > { %451 = vst.msk [vmem:[#allocation2 + $0x41] sm:$0x1] %vm430_vm1, %v11328_v0  ;;  %452 = vst.msk [vmem:[#allocation2 + $0x59] sm:$0x1] %vm430_vm1, %v11328_v0  ;;  %10571 = vmatprep.subr.bf16.mxu1 %v10570_v29  ;;  %v10574_v38 = vpack.c.bf16 %v1380_v37, %v1379_v36  ;;  %v956_v40 = vld [vmem:[%s15615_s1 + $0x38] sm:$0xff]  ;;  %v481_v41 = vld [vmem:[%s11508_s12 + $0x70] sm:$0xff] }
  0x66   : > { %453 = vst.msk [vmem:[#allocation2 + $0x71] sm:$0x1] %vm430_vm1, %v11328_v0  ;;  %454 = vst.msk [vmem:[#allocation2 + $0x89] sm:$0x1] %vm430_vm1, %v11328_v0  ;;  %10573 = vmatpush3.bf16.msra.mxu1 %v10570_v29  ;;  %10601 = vmatpush3.bf16.msra.mxu0 %v11617_v27  ;;  %v11661_v42 = vpack.c.bf16 %v956_v40, %v955_v39  ;;  %v1381_v43 = vld [vmem:[%s15615_s1 + $0x80] sm:$0xff]  ;;  %v1382_v44 = vld [vmem:[%s15615_s1 + $0x88] sm:$0xff] }
  0x67   : > { %455 = vst.msk [vmem:[#allocation2 + $0xa1] sm:$0x1] %vm430_vm1, %v11328_v0  ;;  %456 = vst.msk [vmem:[#allocation2 + $0xb9] sm:$0x1] %vm430_vm1, %v11328_v0  ;;  %10603 = vmatprep.subr.bf16.mxu0 %v11645_v35  ;;  %v957_v45 = vld [vmem:[%s15615_s1 + $0x40] sm:$0xff]  ;;  %10575 = vmatprep.subr.bf16.mxu1 %v10574_v38  ;;  %v10578_v46 = vpack.c.bf16 %v1382_v44, %v1381_v43  ;;  %v958_v47 = vld [vmem:[%s15615_s1 + $0x48] sm:$0xff] }
  0x68   : > { %457 = vst.msk [vmem:[#allocation2 + $0xd1] sm:$0x1] %vm430_vm1, %v11328_v0  ;;  %458 = vst.msk [vmem:[#allocation2 + $0xe9] sm:$0x1] %vm430_vm1, %v11328_v0  ;;  %1089 = vrot.lane.b32.xlu0 %v993_v26, %s11329_s21  ;;  %v1383_v48 = vld [vmem:[%s15615_s1 + $0x90] sm:$0xff]  ;;  %v1384_v49 = vld [vmem:[%s15615_s1 + $0x98] sm:$0xff]  ;;  %v11690_v52 = vpack.c.bf16 %v958_v47, %v957_v45 }
  0x69   : > { %459 = vst.msk [vmem:[#allocation2 + $0x101] sm:$0x1] %vm430_vm1, %v11328_v0  ;;  %460 = vst.msk [vmem:[#allocation2 + $0x119] sm:$0x1] %vm430_vm1, %v11328_v0  ;;  %v482_v53 = vld [vmem:[%s11508_s12 + $0x78] sm:$0xff]  ;;  %v10582_v54 = vpack.c.bf16 %v1384_v49, %v1383_v48  ;;  %v959_v55 = vld [vmem:[%s15615_s1 + $0x50] sm:$0xff] }
  0x6a   : > { %461 = vst.msk [vmem:[#allocation2 + $0x131] sm:$0x1] %vm430_vm1, %v11328_v0  ;;  %462 = vst.msk [vmem:[#allocation2 + $0x149] sm:$0x1] %vm430_vm1, %v11328_v0  ;;  %10605 = vmatpush3.bf16.msra.mxu0 %v11645_v35  ;;  %10577 = vmatpush3.bf16.msra.mxu1 %v10574_v38  ;;  %v960_v56 = vld [vmem:[%s15615_s1 + $0x58] sm:$0xff]  ;;  %v1385_v57 = vld [vmem:[%s15615_s1 + $0xa0] sm:$0xff] }
  0x6b   : > { %463 = vst.msk [vmem:[#allocation2 + $0x161] sm:$0x1] %vm430_vm1, %v11328_v0  ;;  %464 = vst.msk [vmem:[#allocation2 + $0x179] sm:$0x1] %vm430_vm1, %v11328_v0  ;;  %10607 = vmatprep.subr.bf16.mxu0 %v11661_v42  ;;  %10579 = vmatprep.subr.bf16.mxu1 %v10578_v46  ;;  %v1386_v58 = vld [vmem:[%s15615_s1 + $0xa8] sm:$0xff]  ;;  %v483_v59 = vld [vmem:[%s11508_s12 + $0x80] sm:$0xff]  ;;  %v11718_v63 = vpack.c.bf16 %v960_v56, %v959_v55 }
  0x6c   : > { %465 = vst.msk [vmem:[#allocation2 + $0x191] sm:$0x1] %vm430_vm1, %v11328_v0  ;;  %466 = vst.msk [vmem:[#allocation2 + $0x1a9] sm:$0x1] %vm430_vm1, %v11328_v0  ;;  %v484_v60 = vld [vmem:[%s11508_s12 + $0x88] sm:$0xff]  ;;  %v485_v61 = vld [vmem:[%s11508_s12 + $0x90] sm:$0xff]  ;;  %v10586_v1 = vpack.c.bf16 %v1386_v58, %v1385_v57 }
  0x6d   : > { %501 = vst.msk [vmem:[#allocation2 + $0x21] sm:$0xff] %vm422_vm0, %v468_v2  ;;  %502 = vst.msk [vmem:[#allocation2 + $0x31] sm:$0xff] %vm422_vm0, %v469_v3  ;;  %v486_v0 = vld [vmem:[%s11508_s12 + $0x98] sm:$0xff]  ;;  %v487_v2 = vld [vmem:[%s11508_s12 + $0xa0] sm:$0xff] }
  0x6e   : > { %503 = vst.msk [vmem:[#allocation2 + $0x39] sm:$0xff] %vm422_vm0, %v470_v8  ;;  %504 = vst.msk [vmem:[#allocation2 + $0x49] sm:$0xff] %vm422_vm0, %v471_v9  ;;  %10609 = vmatpush3.bf16.msra.mxu0 %v11661_v42  ;;  %10581 = vmatpush3.bf16.msra.mxu1 %v10578_v46  ;;  %v1387_v3 = vld [vmem:[%s15615_s1 + $0xb0] sm:$0xff]  ;;  %v1388_v4 = vld [vmem:[%s15615_s1 + $0xb8] sm:$0xff] }
  0x6f   : > { %505 = vst.msk [vmem:[#allocation2 + $0x51] sm:$0xff] %vm422_vm0, %v472_v10  ;;  %506 = vst.msk [vmem:[#allocation2 + $0x61] sm:$0xff] %vm422_vm0, %v473_v11  ;;  %10611 = vmatprep.subr.bf16.mxu0 %v11690_v52  ;;  %10583 = vmatprep.subr.bf16.mxu1 %v10582_v54  ;;  %v488_v5 = vld [vmem:[%s11508_s12 + $0xa8] sm:$0xff]  ;;  %v10590_v7 = vpack.c.bf16 %v1388_v4, %v1387_v3  ;;  %v489_v10 = vld [vmem:[%s11508_s12 + $0xb0] sm:$0xff] }
  0x70   : > { %507 = vst.msk [vmem:[#allocation2 + $0x69] sm:$0xff] %vm422_vm0, %v474_v12  ;;  %508 = vst.msk [vmem:[#allocation2 + $0x79] sm:$0xff] %vm422_vm0, %v475_v13  ;;  %v490_v12 = vld [vmem:[%s11508_s12 + $0xb8] sm:$0xff]  ;;  %v492_v18 = vld [vmem:[%s11508_s12 + $0xc8] sm:$0xff] }
  0x71   : > { %509 = vst.msk [vmem:[#allocation2 + $0x81] sm:$0xff] %vm422_vm0, %v476_v14  ;;  %510 = vst.msk [vmem:[#allocation2 + $0x91] sm:$0xff] %vm422_vm0, %v477_v15  ;;  %v496_v33 = vld [vmem:[%s11508_s12 + $0xe8] sm:$0xff]  ;;  %v2449_v38 = vld [vmem:[%s15615_s1 + $0xc0] sm:$0xff] }
  0x72   : > { %511 = vst.msk [vmem:[#allocation2 + $0x99] sm:$0xff] %vm422_vm0, %v478_v16  ;;  %512 = vst.msk [vmem:[#allocation2 + $0xa9] sm:$0xff] %vm422_vm0, %v479_v17  ;;  %10613 = vmatpush3.bf16.msra.mxu0 %v11690_v52  ;;  %10585 = vmatpush3.bf16.msra.mxu1 %v10582_v54  ;;  %v491_v16 = vld [vmem:[%s11508_s12 + $0xc0] sm:$0xff]  ;;  %v2450_v39 = vld [vmem:[%s15615_s1 + $0xc8] sm:$0xff] }
  0x73   : > { %513 = vst.msk [vmem:[#allocation2 + $0xb1] sm:$0xff] %vm422_vm0, %v480_v23  ;;  %514 = vst.msk [vmem:[#allocation2 + $0xc1] sm:$0xff] %vm422_vm0, %v481_v41  ;;  %10615 = vmatprep.subr.bf16.mxu0 %v11718_v63  ;;  %10587 = vmatprep.subr.bf16.mxu1 %v10586_v1  ;;  %v493_v23 = vld [vmem:[%s11508_s12 + $0xd0] sm:$0xff]  ;;  %v10618_v40 = vpack.c.bf16 %v2450_v39, %v2449_v38  ;;  %v498_v44 = vld [vmem:[%s11508_s12 + $0xf8] sm:$0xff] }
  0x74   : > { %v1025_v25 = vld [vmem:[#allocation2 + $0x1a] sm:$0xff]  ;;  %v11626_v30 = vld [vmem:[#allocation2 + $0x22] sm:$0xff]  ;;  %v11633_v32 = vld [vmem:[#allocation2 + $0x31] sm:$0xff]  ;;  %515 = vst.msk [vmem:[#allocation2 + $0xc9] sm:$0xff] %vm422_vm0, %v482_v53 }
  0x75   : > { %1217 = vrot.lane.b32.xlu1 %v1025_v25, %s11330_s13  ;;  %v994_v31 = vld [vmem:[#allocation2 + $0x21] sm:$0xff]  ;;  %v11685_v50 = vld [vmem:[#allocation2 + $0x32] sm:$0xff]  ;;  %516 = vst.msk [vmem:[#allocation2 + $0xd9] sm:$0xff] %vm422_vm0, %v483_v59  ;;  %517 = vst.msk [vmem:[#allocation2 + $0xe1] sm:$0xff] %vm422_vm0, %v484_v60 }
  0x76   : > { %1091 = vrot.lane.b32.xlu0 %v994_v31, %s11329_s21  ;;  %v11687_v51 = vld [vmem:[#allocation2 + $0x39] sm:$0xff]  ;;  %518 = vst.msk [vmem:[#allocation2 + $0xf1] sm:$0xff] %vm422_vm0, %v485_v61  ;;  %519 = vst.msk [vmem:[#allocation2 + $0xf9] sm:$0xff] %vm422_vm0, %v486_v0  ;;  %v11738_v6 = vld [vmem:[#allocation2 + $0x49] sm:$0xff]  ;;  %10617 = vmatpush3.bf16.msra.mxu0 %v11718_v63 }
  0x77   : > { %v11715_v62 = vld [vmem:[#allocation2 + $0x3a] sm:$0xff]  ;;  %520 = vst.msk [vmem:[#allocation2 + $0x109] sm:$0xff] %vm422_vm0, %v487_v2  ;;  %521 = vst.msk [vmem:[#allocation2 + $0x111] sm:$0xff] %vm422_vm0, %v488_v5  ;;  %10589 = vmatpush3.bf16.msra.mxu1 %v10586_v1  ;;  %v11751_v8 = vld [vmem:[#allocation2 + $0x4a] sm:$0xff]  ;;  %10619 = vmatprep.subr.bf16.mxu0 %v10618_v40 }
  0x78   : > { %10591 = vmatprep.subr.bf16.mxu1 %v10590_v7  ;;  %v11753_v9 = vld [vmem:[#allocation2 + $0x51] sm:$0xff]  ;;  %522 = vst.msk [vmem:[#allocation2 + $0x121] sm:$0xff] %vm422_vm0, %v489_v10  ;;  %v11769_v13 = vld [vmem:[#allocation2 + $0x61] sm:$0xff]  ;;  %523 = vst.msk [vmem:[#allocation2 + $0x129] sm:$0xff] %vm422_vm0, %v490_v12 }
  0x79   : > { %1219 = vrot.lane.b32.xlu1 %v11626_v30, %s11330_s13  ;;  %v11761_v11 = vld [vmem:[#allocation2 + $0x52] sm:$0xff]  ;;  %v11780_v14 = vld [vmem:[#allocation2 + $0x62] sm:$0xff]  ;;  %v11789_v17 = vld [vmem:[#allocation2 + $0x6a] sm:$0xff]  ;;  %524 = vst.msk [vmem:[#allocation2 + $0x139] sm:$0xff] %vm422_vm0, %v491_v16 }
  0x7a   : > { %664 = vrot.lane.b32.xlu0 %v993_v26, %s11329_s21  ;;  %v11782_v15 = vld [vmem:[#allocation2 + $0x69] sm:$0xff]  ;;  %v11797_v19 = vld [vmem:[#allocation2 + $0x79] sm:$0xff]  ;;  %525 = vst.msk [vmem:[#allocation2 + $0x141] sm:$0xff] %vm422_vm0, %v492_v18  ;;  %v11810_v22 = vld [vmem:[#allocation2 + $0x81] sm:$0xff] }
  0x7b   : > { %10593 = vmatpush3.bf16.msra.mxu1 %v10590_v7  ;;  %v11808_v20 = vld [vmem:[#allocation2 + $0x7a] sm:$0xff]  ;;  %v11817_v24 = vld [vmem:[#allocation2 + $0x82] sm:$0xff]  ;;  %526 = vst.msk [vmem:[#allocation2 + $0x151] sm:$0xff] %vm422_vm0, %v493_v23  ;;  %v11825_v26 = vld [vmem:[#allocation2 + $0x91] sm:$0xff] }
  0x7c   : > { %10946 = vmatprep.subr.bf16.mxu1 %v11608_v21  ;;  %v11836_v28 = vld [vmem:[#allocation2 + $0x92] sm:$0xff]  ;;  %v11853_v34 = vld [vmem:[#allocation2 + $0xa9] sm:$0xff]  ;;  %529 = vst.msk [vmem:[#allocation2 + $0x171] sm:$0xff] %vm422_vm0, %v496_v33  ;;  %v497_v41 = vld [vmem:[%s11508_s12 + $0xf0] sm:$0xff] }
  0x7d   : > { %1093 = vrot.lane.b32.xlu1 %v11633_v32, %s11329_s21  ;;  %v11838_v29 = vld [vmem:[#allocation2 + $0x99] sm:$0xff]  ;;  %v11864_v36 = vld [vmem:[#allocation2 + $0xaa] sm:$0xff]  ;;  %530 = vst.msk [vmem:[#allocation2 + $0x181] sm:$0xff] %vm422_vm0, %v497_v41  ;;  %v11887_v45 = vld [vmem:[#allocation2 + $0xc1] sm:$0xff] }
  0x7e   : > { %666 = vrot.lane.b32.xlu0 %v994_v31, %s11329_s21  ;;  %v11845_v31 = vld [vmem:[#allocation2 + $0x9a] sm:$0xff]  ;;  %v11866_v37 = vld [vmem:[#allocation2 + $0xb1] sm:$0xff]  ;;  %531 = vst.msk [vmem:[#allocation2 + $0x189] sm:$0xff] %vm422_vm0, %v498_v44  ;;  %v533_v48 = vld [vmem:[#allocation2 + $0x8] sm:$0xff] }
  0x7f   : > { %v11879_v43 = vld [vmem:[#allocation2 + $0xb2] sm:$0xff]  ;;  %v532_v49 = vld [vmem:[#allocation2] sm:$0xff]  ;;  %v11900_v54 = vld [vmem:[#allocation2 + $0xc9] sm:$0xff] }
  0x80   : > { %v11898_v53 = vld [vmem:[#allocation2 + $0xc2] sm:$0xff]  ;;  %v2451_v59 = vld [vmem:[%s15615_s1 + $0xd0] sm:$0xff]  ;;  %v2452_v60 = vld [vmem:[%s15615_s1 + $0xd8] sm:$0xff] }
  0x81   : > { %792 = vrot.lane.b32.xlu1 %v1025_v25, %s11330_s13  ;;  %v494_v25 = vld [vmem:[%s11508_s12 + $0xd8] sm:$0xff]  ;;  %v961_v1 = vld [vmem:[#allocation2 + $0x18] sm:$0xff]  ;;  %v10622_v3 = vpack.c.bf16 %v2452_v60, %v2451_v59  ;;  %v2453_v7 = vld [vmem:[%s15615_s1 + $0xe0] sm:$0xff] }
  0x82   : > { %1095 = vrot.lane.b32.xlu0 %v11687_v51, %s11329_s21  ;;  %527 = vst.msk [vmem:[#allocation2 + $0x159] sm:$0xff] %vm422_vm0, %v494_v25  ;;  %v11917_v2 = vld [vmem:[#allocation2 + $0xca] sm:$0xff]  ;;  %v962_v18 = vld [vmem:[#allocation2 + $0x20] sm:$0xff]  ;;  %v2456_v39 = vld [vmem:[%s15615_s1 + $0xf8] sm:$0xff] }
  0x83   : > { %v2454_v10 = vld [vmem:[%s15615_s1 + $0xe8] sm:$0xff]  ;;  %v11933_v23 = vld [vmem:[#allocation2 + $0xd9] sm:$0xff]  ;;  %v2455_v38 = vld [vmem:[%s15615_s1 + $0xf0] sm:$0xff] }
  0x84   : > { %v10626_v25 = vpack.c.bf16 %v2454_v10, %v2453_v7  ;;  %v11948_v44 = vld [vmem:[#allocation2 + $0xda] sm:$0xff]  ;;  %v2459_v60 = vld [vmem:[%s15615_s1 + $0x110] sm:$0xff] }
  0x85   : > { %1221 = vrot.lane.b32.xlu1 %v11685_v50, %s11330_s13  ;;  %v11987_v10 = vld [vmem:[#allocation2 + $0x38] sm:$0xff] }
  0x86   : > { %794 = vrot.lane.b32.xlu0 %v11626_v30, %s11330_s13  ;;  %v495_v30 = vld [vmem:[%s11508_s12 + $0xe0] sm:$0xff] }
  0x87   : > { %528 = vst.msk [vmem:[#allocation2 + $0x169] sm:$0xff] %vm422_vm0, %v495_v30 }
  0x89   : > { %1223 = vrot.lane.b32.xlu1 %v11715_v62, %s11330_s13 }
  0x8a   : > { %668 = vrot.lane.b32.xlu0 %v11633_v32, %s11329_s21 }
  0x8d   : > { %1097 = vrot.lane.b32.xlu1 %v11738_v6, %s11329_s21 }
  0x8e   : > { %670 = vrot.lane.b32.xlu0 %v11687_v51, %s11329_s21 }
  0x91   : > { %796 = vrot.lane.b32.xlu1 %v11685_v50, %s11330_s13 }
  0x92   : > { %1099 = vrot.lane.b32.xlu0 %v11753_v9, %s11329_s21 }
  0x95   : > { %1225 = vrot.lane.b32.xlu1 %v11751_v8, %s11330_s13 }
  0x96   : > { %798 = vrot.lane.b32.xlu0 %v11715_v62, %s11330_s13 }
  0x99   : > { %1227 = vrot.lane.b32.xlu1 %v11761_v11, %s11330_s13 }
  0x9a   : > { %672 = vrot.lane.b32.xlu0 %v11738_v6, %s11329_s21 }
  0x9d   : > { %1101 = vrot.lane.b32.xlu1 %v11769_v13, %s11329_s21 }
  0x9e   : > { %674 = vrot.lane.b32.xlu0 %v11753_v9, %s11329_s21 }
  0xa1   : > { %800 = vrot.lane.b32.xlu1 %v11751_v8, %s11330_s13 }
  0xa2   : > { %1103 = vrot.lane.b32.xlu0 %v11782_v15, %s11329_s21 }
  0xa5   : > { %1229 = vrot.lane.b32.xlu1 %v11780_v14, %s11330_s13 }
  0xa6   : > { %802 = vrot.lane.b32.xlu0 %v11761_v11, %s11330_s13 }
  0xa9   : > { %1231 = vrot.lane.b32.xlu1 %v11789_v17, %s11330_s13 }
  0xaa   : > { %676 = vrot.lane.b32.xlu0 %v11769_v13, %s11329_s21 }
  0xad   : > { %1105 = vrot.lane.b32.xlu1 %v11797_v19, %s11329_s21 }
  0xae   : > { %678 = vrot.lane.b32.xlu0 %v11782_v15, %s11329_s21 }
  0xb1   : > { %804 = vrot.lane.b32.xlu1 %v11780_v14, %s11330_s13 }
  0xb2   : > { %1107 = vrot.lane.b32.xlu0 %v11810_v22, %s11329_s21 }
  0xb5   : > { %1233 = vrot.lane.b32.xlu1 %v11808_v20, %s11330_s13 }
  0xb6   : > { %806 = vrot.lane.b32.xlu0 %v11789_v17, %s11330_s13 }
  0xb9   : > { %1235 = vrot.lane.b32.xlu1 %v11817_v24, %s11330_s13 }
  0xba   : > { %680 = vrot.lane.b32.xlu0 %v11797_v19, %s11329_s21 }
  0xbd   : > { %1109 = vrot.lane.b32.xlu1 %v11825_v26, %s11329_s21 }
  0xbe   : > { %682 = vrot.lane.b32.xlu0 %v11810_v22, %s11329_s21 }
  0xc1   : > { %808 = vrot.lane.b32.xlu1 %v11808_v20, %s11330_s13 }
  0xc2   : > { %1111 = vrot.lane.b32.xlu0 %v11838_v29, %s11329_s21 }
  0xc5   : > { %1237 = vrot.lane.b32.xlu1 %v11836_v28, %s11330_s13 }
  0xc6   : > { %810 = vrot.lane.b32.xlu0 %v11817_v24, %s11330_s13 }
  0xc9   : > { %1239 = vrot.lane.b32.xlu1 %v11845_v31, %s11330_s13 }
  0xca   : > { %684 = vrot.lane.b32.xlu0 %v11825_v26, %s11329_s21 }
  0xcd   : > { %1113 = vrot.lane.b32.xlu1 %v11853_v34, %s11329_s21 }
  0xce   : > { %686 = vrot.lane.b32.xlu0 %v11838_v29, %s11329_s21 }
  0xd1   : > { %812 = vrot.lane.b32.xlu1 %v11836_v28, %s11330_s13 }
  0xd2   : > { %1115 = vrot.lane.b32.xlu0 %v11866_v37, %s11329_s21  ;;  %v663_v46 = vpop.permute.xlu1 %662  ;;  %v661_v47 = vpop.permute.xlu0 %660 }
  0xd3   : > { %v885_v55 = vsel %vm422_vm0, %v533_v48, %v663_v46  ;;  %v884_v56 = vsel %vm422_vm0, %v532_v49, %v661_v47  ;;  %v11950_v46 = vld [vmem:[#allocation2 + $0xe1] sm:$0xff]  ;;  %v10630_v47 = vpack.c.bf16 %v2456_v39, %v2455_v38 }
  0xd5   : > { %1241 = vrot.lane.b32.xlu1 %v11864_v36, %s11330_s13 }
  0xd6   : > { %814 = vrot.lane.b32.xlu0 %v11845_v31, %s11330_s13  ;;  %v789_v57 = vpop.permute.xlu1 %788  ;;  %v791_v58 = vpop.permute.xlu0 %790 }
  0xd7   : > { %v918_v61 = vsel %vm916_vm2, %v885_v55, %v791_v58  ;;  %v917_v0 = vsel %vm916_vm2, %v884_v56, %v789_v57  ;;  %v2457_v55 = vld [vmem:[%s15615_s1 + $0x100] sm:$0xff] }
  0xd8   : > { %10018 = vmatprep.mubr.msk.f32.mxu0 %vm1389_vm3, %v917_v0 }
  0xd9   : > { %1243 = vrot.lane.b32.xlu1 %v11879_v43, %s11330_s13  ;;  %10019 = vmatmul.mubr.msk.f32.vlgmr.msra.gmra.mrb[0].mxu0 %vm1389_vm3, %v918_v61  ;;  %v11972_v61 = vld [vmem:[#allocation2 + $0x30] sm:$0xff] }
  0xda   : > { %688 = vrot.lane.b32.xlu0 %v11853_v34, %s11329_s21  ;;  %v1090_v5 = vpop.permute.xlu0 %1089  ;;  %10621 = vmatpush3.bf16.msra.mxu0 %v10618_v40 }
  0xdb   : > { %v1313_v12 = vsel %vm422_vm0, %v961_v1, %v1090_v5  ;;  %10623 = vmatprep.subr.bf16.mxu0 %v10622_v3 }
  0xdd   : > { %1117 = vrot.lane.b32.xlu1 %v11887_v45, %s11329_s21 }
  0xde   : > { %690 = vrot.lane.b32.xlu0 %v11866_v37, %s11329_s21  ;;  %10625 = vmatpush3.bf16.msra.mxu0 %v10622_v3 }
  0xdf   : > { %10627 = vmatprep.subr.bf16.mxu0 %v10626_v25 }
  0xe1   : > { %816 = vrot.lane.b32.xlu1 %v11864_v36, %s11330_s13 }
  0xe2   : > { %1119 = vrot.lane.b32.xlu0 %v11900_v54, %s11329_s21  ;;  %10629 = vmatpush3.bf16.msra.mxu0 %v10626_v25 }
  0xe3   : > { %10631 = vmatprep.subr.bf16.mxu0 %v10630_v47 }
  0xe5   : > { %1245 = vrot.lane.b32.xlu1 %v11898_v53, %s11330_s13 }
  0xe6   : > { %818 = vrot.lane.b32.xlu0 %v11879_v43, %s11330_s13  ;;  %10633 = vmatpush3.bf16.msra.mxu0 %v10630_v47 }
  0xe7   : > { %v1218_v4 = vpop.permute.xlu1 %1217 }
  0xe8   : > { %v1345_v16 = vsel %vm916_vm2, %v1313_v12, %v1218_v4  ;;  %v1092_v33 = vpop.permute.xlu0 %1091 }
  0xe9   : > { %1247 = vrot.lane.b32.xlu1 %v11917_v2, %s11330_s13  ;;  %9946 = vmatprep.mubr.msk.f32.mxu1 %vm1389_vm3, %v1345_v16  ;;  %v1314_v40 = vsel %vm422_vm0, %v962_v18, %v1092_v33 }
  0xea   : > { %1121 = vrot.lane.b32.xlu0 %v11933_v23, %s11329_s21 }
  0xeb   : > { %v1220_v30 = vpop.permute.xlu1 %1219 }
  0xec   : > { %v1346_v41 = vsel %vm916_vm2, %v1314_v40, %v1220_v30  ;;  %v665_v49 = vpop.permute.xlu0 %664  ;;  %v12023_v40 = vld [vmem:[#allocation2 + $0x48] sm:$0xff] }
  0xed   : > { %2161 = vrot.lane.b32.xlu1 %v11633_v32, %s11329_s21  ;;  %9947 = vmatmul.mubr.msk.f32.vlgmr.msra.gmra.mrb[0].mxu1 %vm1389_vm3, %v1346_v41  ;;  %v2458_v32 = vld [vmem:[%s15615_s1 + $0x108] sm:$0xff]  ;;  %v886_v57 = vsel %vm422_vm0, %v961_v1, %v665_v49 }
  0xee   : > { %10952 = vmatpush3.bf16.msra.mxu1 %v11608_v21  ;;  %1123 = vrot.lane.b32.xlu0 %v11950_v46, %s11329_s21  ;;  %v10634_v56 = vpack.c.bf16 %v2458_v32, %v2457_v55  ;;  %v2460_v21 = vld [vmem:[%s15615_s1 + $0x118] sm:$0xff]  ;;  %v11981_v1 = vld [vmem:[#allocation2 + $0xe2] sm:$0xff]  ;;  %v12036_v55 = vld [vmem:[#allocation2 + $0x50] sm:$0xff] }
  0xef   : > { %v1094_v48 = vpop.permute.xlu1 %1093  ;;  %10947 = vmatprep.subr.bf16.mxu1 %v11617_v27  ;;  %v10638_v3 = vpack.c.bf16 %v2460_v21, %v2459_v60  ;;  %v12059_v60 = vld [vmem:[#allocation2 + $0x111] sm:$0xff] }
  0xf0   : > { %v667_v59 = vpop.permute.xlu0 %666  ;;  %10635 = vmatprep.subr.bf16.mxu0 %v10634_v56 }
  0xf1   : > { %1249 = vrot.lane.b32.xlu1 %v11948_v44, %s11330_s13  ;;  %10637 = vmatpush3.bf16.msra.mxu0 %v10634_v56 }
  0xf2   : > { %10953 = vmatpush3.bf16.msra.mxu1 %v11617_v27  ;;  %2163 = vrot.lane.b32.xlu0 %v11687_v51, %s11329_s21  ;;  %v1315_v27 = vsel %vm422_vm0, %v11972_v61, %v1094_v48 }
  0xf3   : > { %v793_v58 = vpop.permute.xlu1 %792  ;;  %10948 = vmatprep.subr.bf16.mxu1 %v11645_v35  ;;  %10639 = vmatprep.subr.bf16.mxu0 %v10638_v3 }
  0xf4   : > { %v919_v0 = vsel %vm916_vm2, %v886_v57, %v793_v58  ;;  %v1096_v5 = vpop.permute.xlu0 %1095 }
  0xf5   : > { %2289 = vrot.lane.b32.xlu1 %v11685_v50, %s11330_s13  ;;  %10021 = vmatprep.mubr.msk.f32.mxu0 %vm1389_vm3, %v919_v0  ;;  %v11995_v50 = vld [vmem:[#allocation2 + $0xf1] sm:$0xff]  ;;  %v1316_v51 = vsel %vm422_vm0, %v11987_v10, %v1096_v5 }
  0xf6   : > { %10954 = vmatpush3.bf16.msra.mxu1 %v11645_v35  ;;  %1251 = vrot.lane.b32.xlu0 %v11981_v1, %s11330_s13  ;;  %v887_v35 = vsel %vm422_vm0, %v962_v18, %v667_v59  ;;  %v12010_v18 = vld [vmem:[#allocation2 + $0xf2] sm:$0xff] }
  0xf7   : > { %v1222_v4 = vpop.permute.xlu1 %1221  ;;  %10949 = vmatprep.subr.bf16.mxu1 %v11661_v42  ;;  %10641 = vmatpush3.bf16.msra.mxu0 %v10638_v3 }
  0xf8   : > { %v1347_v7 = vsel %vm916_vm2, %v1315_v27, %v1222_v4  ;;  %v795_v16 = vpop.permute.xlu0 %794  ;;  %v12067_v4 = vld [vmem:[#allocation2 + $0x60] sm:$0xff] }
  0xf9   : > { %2291 = vrot.lane.b32.xlu1 %v11715_v62, %s11330_s13  ;;  %9949 = vmatprep.mubr.msk.f32.mxu1 %vm1389_vm3, %v1347_v7  ;;  %v920_v62 = vsel %vm916_vm2, %v887_v35, %v795_v16  ;;  %v12075_v7 = vld [vmem:[#allocation2 + $0x112] sm:$0xff] }
  0xfa   : > { %10955 = vmatpush3.bf16.msra.mxu1 %v11661_v42  ;;  %1125 = vrot.lane.b32.xlu0 %v11995_v50, %s11329_s21  ;;  %v12012_v42 = vld [vmem:[#allocation2 + $0xf9] sm:$0xff] }
  0xfb   : > { %v1224_v12 = vpop.permute.xlu1 %1223  ;;  %10950 = vmatprep.subr.bf16.mxu1 %v11690_v52  ;;  %10022 = vmatmul.mubr.msk.f32.gmra.mrb[2].mxu0 %vm1389_vm3, %v920_v62 }
  0xfc   : > { %v1348_v25 = vsel %vm916_vm2, %v1316_v51, %v1224_v12  ;;  %v669_v33 = vpop.permute.xlu0 %668 }
  0xfd   : > { %2165 = vrot.lane.b32.xlu1 %v11738_v6, %s11329_s21  ;;  %9950 = vmatmul.mubr.msk.f32.gmra.mrb[2].mxu1 %vm1389_vm3, %v1348_v25  ;;  %v888_v6 = vsel %vm422_vm0, %v11972_v61, %v669_v33  ;;  %v12080_v25 = vld [vmem:[#allocation2 + $0x68] sm:$0xff] }
  0xfe   : > { %10956 = vmatpush3.bf16.msra.mxu1 %v11690_v52  ;;  %1127 = vrot.lane.b32.xlu0 %v12012_v42, %s11329_s21  ;;  %v12031_v52 = vld [vmem:[#allocation2 + $0xfa] sm:$0xff] }
  0xff   : > { %v1098_v30 = vpop.permute.xlu1 %1097  ;;  %10951 = vmatprep.subr.bf16.mxu1 %v11718_v63 }
 0x100   : > { %v671_v39 = vpop.permute.xlu0 %670  ;;  %v1317_v47 = vsel %vm422_vm0, %v12023_v40, %v1098_v30 }
 0x101   : > { %1253 = vrot.lane.b32.xlu1 %v12010_v18, %s11330_s13 }
 0x102   : > { %10957 = vmatpush3.bf16.msra.mxu1 %v11718_v63  ;;  %2167 = vrot.lane.b32.xlu0 %v11753_v9, %s11329_s21  ;;  %v889_v9 = vsel %vm422_vm0, %v11987_v10, %v671_v39  ;;  %v12103_v39 = vld [vmem:[#allocation2 + $0x129] sm:$0xff] }
 0x103   : > { %v797_v38 = vpop.permute.xlu1 %796 }
 0x104   : > { %v921_v41 = vsel %vm916_vm2, %v888_v6, %v797_v38  ;;  %v1100_v49 = vpop.permute.xlu0 %1099 }
 0x105   : > { %2293 = vrot.lane.b32.xlu1 %v11751_v8, %s11330_s13  ;;  %10024 = vmatprep.mubr.msk.f32.mxu0 %vm1389_vm3, %v921_v41  ;;  %v12043_v8 = vld [vmem:[#allocation2 + $0x109] sm:$0xff]  ;;  %v1318_v32 = vsel %vm422_vm0, %v12036_v55, %v1100_v49 }
 0x106   : > { %1255 = vrot.lane.b32.xlu0 %v12031_v52, %s11330_s13 }
 0x107   : > { %v1226_v48 = vpop.permute.xlu1 %1225 }
 0x108   : > { %v1349_v63 = vsel %vm916_vm2, %v1317_v47, %v1226_v48  ;;  %v799_v57 = vpop.permute.xlu0 %798 }
 0x109   : > { %2295 = vrot.lane.b32.xlu1 %v11761_v11, %s11330_s13  ;;  %9952 = vmatprep.mubr.msk.f32.mxu1 %vm1389_vm3, %v1349_v63  ;;  %v922_v59 = vsel %vm916_vm2, %v889_v9, %v799_v57  ;;  %v12057_v11 = vld [vmem:[#allocation2 + $0x10a] sm:$0xff]  ;;  %v12111_v63 = vld [vmem:[#allocation2 + $0x78] sm:$0xff] }
 0x10a   : > { %1129 = vrot.lane.b32.xlu0 %v12043_v8, %s11329_s21  ;;  %10025 = vmatmul.mubr.msk.f32.gmra.mrb[4].mxu0 %vm1389_vm3, %v922_v59 }
 0x10b   : > { %v1228_v56 = vpop.permute.xlu1 %1227 }
 0x10c   : > { %v1350_v58 = vsel %vm916_vm2, %v1318_v32, %v1228_v56  ;;  %v673_v0 = vpop.permute.xlu0 %672  ;;  %v12119_v32 = vld [vmem:[#allocation2 + $0x12a] sm:$0xff] }
 0x10d   : > { %2169 = vrot.lane.b32.xlu1 %v11769_v13, %s11329_s21  ;;  %9953 = vmatmul.mubr.msk.f32.gmra.mrb[4].mxu1 %vm1389_vm3, %v1350_v58  ;;  %v890_v13 = vsel %vm422_vm0, %v12023_v40, %v673_v0 }
 0x10e   : > { %1131 = vrot.lane.b32.xlu0 %v12059_v60, %s11329_s21 }
 0x10f   : > { %v1102_v21 = vpop.permute.xlu1 %1101 }
 0x110   : > { %v675_v27 = vpop.permute.xlu0 %674  ;;  %v1319_v35 = vsel %vm422_vm0, %v12067_v4, %v1102_v21  ;;  %v12124_v21 = vld [vmem:[#allocation2 + $0x80] sm:$0xff] }
 0x111   : > { %1257 = vrot.lane.b32.xlu1 %v12057_v11, %s11330_s13 }
 0x112   : > { %2171 = vrot.lane.b32.xlu0 %v11782_v15, %s11329_s21  ;;  %v891_v15 = vsel %vm422_vm0, %v12036_v55, %v675_v27 }
 0x113   : > { %v801_v3 = vpop.permute.xlu1 %800 }
 0x114   : > { %v923_v5 = vsel %vm916_vm2, %v890_v13, %v801_v3  ;;  %v1104_v12 = vpop.permute.xlu0 %1103 }
 0x115   : > { %2297 = vrot.lane.b32.xlu1 %v11780_v14, %s11330_s13  ;;  %10027 = vmatprep.mubr.msk.f32.mxu0 %vm1389_vm3, %v923_v5  ;;  %v12087_v14 = vld [vmem:[#allocation2 + $0x121] sm:$0xff]  ;;  %v1320_v62 = vsel %vm422_vm0, %v12080_v25, %v1104_v12 }
 0x116   : > { %1259 = vrot.lane.b32.xlu0 %v12075_v7, %s11330_s13 }
 0x117   : > { %v1230_v51 = vpop.permute.xlu1 %1229 }
 0x118   : > { %v1351_v16 = vsel %vm916_vm2, %v1319_v35, %v1230_v51  ;;  %v803_v33 = vpop.permute.xlu0 %802  ;;  %v12147_v35 = vld [vmem:[#allocation2 + $0x141] sm:$0xff] }
 0x119   : > { %2299 = vrot.lane.b32.xlu1 %v11789_v17, %s11330_s13  ;;  %9955 = vmatprep.mubr.msk.f32.mxu1 %vm1389_vm3, %v1351_v16  ;;  %v924_v38 = vsel %vm916_vm2, %v891_v15, %v803_v33  ;;  %v12101_v17 = vld [vmem:[#allocation2 + $0x122] sm:$0xff] }
 0x11a   : > { %1133 = vrot.lane.b32.xlu0 %v12087_v14, %s11329_s21  ;;  %10028 = vmatmul.mubr.msk.f32.gmra.mrb[6].mxu0 %vm1389_vm3, %v924_v38  ;;  %v12163_v33 = vld [vmem:[#allocation2 + $0x142] sm:$0xff] }
 0x11b   : > { %v1232_v30 = vpop.permute.xlu1 %1231 }
 0x11c   : > { %v1352_v6 = vsel %vm916_vm2, %v1320_v62, %v1232_v30  ;;  %v677_v47 = vpop.permute.xlu0 %676  ;;  %v12155_v62 = vld [vmem:[#allocation2 + $0x90] sm:$0xff] }
 0x11d   : > { %2173 = vrot.lane.b32.xlu1 %v11797_v19, %s11329_s21  ;;  %9956 = vmatmul.mubr.msk.f32.gmra.mrb[6].mxu1 %vm1389_vm3, %v1352_v6  ;;  %v892_v19 = vsel %vm422_vm0, %v12067_v4, %v677_v47 }
 0x11e   : > { %1135 = vrot.lane.b32.xlu0 %v12103_v39, %s11329_s21 }
 0x11f   : > { %v1106_v41 = vpop.permute.xlu1 %1105 }
 0x120   : > { %v679_v49 = vpop.permute.xlu0 %678  ;;  %v1321_v56 = vsel %vm422_vm0, %v12111_v63, %v1106_v41 }
 0x121   : > { %1261 = vrot.lane.b32.xlu1 %v12101_v17, %s11330_s13 }
 0x122   : > { %2175 = vrot.lane.b32.xlu0 %v11810_v22, %s11329_s21  ;;  %v893_v22 = vsel %vm422_vm0, %v12080_v25, %v679_v49 }
 0x123   : > { %v805_v48 = vpop.permute.xlu1 %804 }
 0x124   : > { %v925_v9 = vsel %vm916_vm2, %v892_v19, %v805_v48  ;;  %v1108_v58 = vpop.permute.xlu0 %1107  ;;  %v12168_v19 = vld [vmem:[#allocation2 + $0x98] sm:$0xff] }
 0x125   : > { %2301 = vrot.lane.b32.xlu1 %v11808_v20, %s11330_s13  ;;  %10030 = vmatprep.mubr.msk.f32.mxu0 %vm1389_vm3, %v925_v9  ;;  %v12131_v20 = vld [vmem:[#allocation2 + $0x139] sm:$0xff]  ;;  %v1322_v0 = vsel %vm422_vm0, %v12124_v21, %v1108_v58 }
 0x126   : > { %1263 = vrot.lane.b32.xlu0 %v12119_v32, %s11330_s13  ;;  %v12191_v58 = vld [vmem:[#allocation2 + $0x159] sm:$0xff] }
 0x127   : > { %v1234_v57 = vpop.permute.xlu1 %1233 }
 0x128   : > { %v1353_v59 = vsel %vm916_vm2, %v1321_v56, %v1234_v57  ;;  %v807_v3 = vpop.permute.xlu0 %806 }
 0x129   : > { %2303 = vrot.lane.b32.xlu1 %v11817_v24, %s11330_s13  ;;  %9958 = vmatprep.mubr.msk.f32.mxu1 %vm1389_vm3, %v1353_v59  ;;  %v926_v5 = vsel %vm916_vm2, %v893_v22, %v807_v3  ;;  %v12145_v24 = vld [vmem:[#allocation2 + $0x13a] sm:$0xff]  ;;  %v12199_v3 = vld [vmem:[#allocation2 + $0xa8] sm:$0xff] }
 0x12a   : > { %1137 = vrot.lane.b32.xlu0 %v12131_v20, %s11329_s21  ;;  %10031 = vmatmul.mubr.msk.f32.gmra.mrb[8].mxu0 %vm1389_vm3, %v926_v5  ;;  %v12207_v5 = vld [vmem:[#allocation2 + $0x15a] sm:$0xff] }
 0x12b   : > { %v1236_v13 = vpop.permute.xlu1 %1235 }
 0x12c   : > { %v1354_v27 = vsel %vm916_vm2, %v1322_v0, %v1236_v13  ;;  %v681_v12 = vpop.permute.xlu0 %680 }
 0x12d   : > { %2177 = vrot.lane.b32.xlu1 %v11825_v26, %s11329_s21  ;;  %9959 = vmatmul.mubr.msk.f32.gmra.mrb[8].mxu1 %vm1389_vm3, %v1354_v27  ;;  %v894_v26 = vsel %vm422_vm0, %v12111_v63, %v681_v12 }
 0x12e   : > { %1139 = vrot.lane.b32.xlu0 %v12147_v35, %s11329_s21 }
 0x12f   : > { %v1110_v51 = vpop.permute.xlu1 %1109 }
 0x130   : > { %v683_v15 = vpop.permute.xlu0 %682  ;;  %v1323_v6 = vsel %vm422_vm0, %v12155_v62, %v1110_v51 }
 0x131   : > { %1265 = vrot.lane.b32.xlu1 %v12145_v24, %s11330_s13 }
 0x132   : > { %2179 = vrot.lane.b32.xlu0 %v11838_v29, %s11329_s21  ;;  %v895_v29 = vsel %vm422_vm0, %v12124_v21, %v683_v15  ;;  %v12212_v15 = vld [vmem:[#allocation2 + $0xb0] sm:$0xff] }
 0x133   : > { %v809_v16 = vpop.permute.xlu1 %808 }
 0x134   : > { %v927_v30 = vsel %vm916_vm2, %v894_v26, %v809_v16  ;;  %v1112_v41 = vpop.permute.xlu0 %1111 }
 0x135   : > { %2305 = vrot.lane.b32.xlu1 %v11836_v28, %s11330_s13  ;;  %10033 = vmatprep.mubr.msk.f32.mxu0 %vm1389_vm3, %v927_v30  ;;  %v12175_v28 = vld [vmem:[#allocation2 + $0x151] sm:$0xff]  ;;  %v1324_v48 = vsel %vm422_vm0, %v12168_v19, %v1112_v41 }
 0x136   : > { %1267 = vrot.lane.b32.xlu0 %v12163_v33, %s11330_s13 }
 0x137   : > { %v1238_v38 = vpop.permute.xlu1 %1237 }
 0x138   : > { %v1355_v47 = vsel %vm916_vm2, %v1323_v6, %v1238_v38  ;;  %v811_v9 = vpop.permute.xlu0 %810 }
 0x139   : > { %2307 = vrot.lane.b32.xlu1 %v11845_v31, %s11330_s13  ;;  %9961 = vmatprep.mubr.msk.f32.mxu1 %vm1389_vm3, %v1355_v47  ;;  %v928_v57 = vsel %vm916_vm2, %v895_v29, %v811_v9  ;;  %v12189_v31 = vld [vmem:[#allocation2 + $0x152] sm:$0xff] }
 0x13a   : > { %1141 = vrot.lane.b32.xlu0 %v12175_v28, %s11329_s21  ;;  %10034 = vmatmul.mubr.msk.f32.gmra.mrb[10].mxu0 %vm1389_vm3, %v928_v57  ;;  %v12235_v29 = vld [vmem:[#allocation2 + $0x171] sm:$0xff] }
 0x13b   : > { %v1240_v49 = vpop.permute.xlu1 %1239 }
 0x13c   : > { %v1356_v56 = vsel %vm916_vm2, %v1324_v48, %v1240_v49  ;;  %v685_v22 = vpop.permute.xlu0 %684 }
 0x13d   : > { %2181 = vrot.lane.b32.xlu1 %v11853_v34, %s11329_s21  ;;  %9962 = vmatmul.mubr.msk.f32.gmra.mrb[10].mxu1 %vm1389_vm3, %v1356_v56  ;;  %v896_v34 = vsel %vm422_vm0, %v12155_v62, %v685_v22 }
 0x13e   : > { %1143 = vrot.lane.b32.xlu0 %v12191_v58, %s11329_s21 }
 0x13f   : > { %v1114_v59 = vpop.permute.xlu1 %1113 }
 0x140   : > { %v687_v13 = vpop.permute.xlu0 %686  ;;  %v1325_v51 = vsel %vm422_vm0, %v12199_v3, %v1114_v59  ;;  %v12243_v59 = vld [vmem:[#allocation2 + $0xc0] sm:$0xff] }
 0x141   : > { %1269 = vrot.lane.b32.xlu1 %v12189_v31, %s11330_s13 }
 0x142   : > { %2183 = vrot.lane.b32.xlu0 %v11866_v37, %s11329_s21  ;;  %v897_v37 = vsel %vm422_vm0, %v12168_v19, %v687_v13 }
 0x143   : > { %v813_v0 = vpop.permute.xlu1 %812 }
 0x144   : > { %v929_v27 = vsel %vm916_vm2, %v896_v34, %v813_v0  ;;  %v1116_v26 = vpop.permute.xlu0 %1115  ;;  %v12251_v34 = vld [vmem:[#allocation2 + $0x172] sm:$0xff] }
 0x145   : > { %2309 = vrot.lane.b32.xlu1 %v11864_v36, %s11330_s13  ;;  %10036 = vmatprep.mubr.msk.f32.mxu0 %vm1389_vm3, %v929_v27  ;;  %v12219_v36 = vld [vmem:[#allocation2 + $0x169] sm:$0xff]  ;;  %v1326_v30 = vsel %vm422_vm0, %v12212_v15, %v1116_v26  ;;  %v12263_v26 = vld [vmem:[#allocation2 + $0x181] sm:$0xff] }
 0x146   : > { %1271 = vrot.lane.b32.xlu0 %v12207_v5, %s11330_s13 }
 0x147   : > { %v1242_v12 = vpop.permute.xlu1 %1241 }
 0x148   : > { %v1357_v16 = vsel %vm916_vm2, %v1325_v51, %v1242_v12  ;;  %v815_v38 = vpop.permute.xlu0 %814  ;;  %v12256_v12 = vld [vmem:[#allocation2 + $0xc8] sm:$0xff] }
 0x149   : > { %2311 = vrot.lane.b32.xlu1 %v11879_v43, %s11330_s13  ;;  %9964 = vmatprep.mubr.msk.f32.mxu1 %vm1389_vm3, %v1357_v16  ;;  %v930_v47 = vsel %vm916_vm2, %v897_v37, %v815_v38  ;;  %v12233_v43 = vld [vmem:[#allocation2 + $0x16a] sm:$0xff] }
 0x14a   : > { %1145 = vrot.lane.b32.xlu0 %v12219_v36, %s11329_s21  ;;  %10037 = vmatmul.mubr.msk.f32.gmra.mrb[12].mxu0 %vm1389_vm3, %v930_v47  ;;  %v12277_v47 = vld [vmem:[#allocation2 + $0x182] sm:$0xff] }
 0x14b   : > { %v1244_v6 = vpop.permute.xlu1 %1243 }
 0x14c   : > { %v1358_v41 = vsel %vm916_vm2, %v1326_v30, %v1244_v6  ;;  %v689_v49 = vpop.permute.xlu0 %688 }
 0x14d   : > { %2185 = vrot.lane.b32.xlu1 %v11887_v45, %s11329_s21  ;;  %9965 = vmatmul.mubr.msk.f32.gmra.mrb[12].mxu1 %vm1389_vm3, %v1358_v41  ;;  %v898_v9 = vsel %vm422_vm0, %v12199_v3, %v689_v49 }
 0x14e   : > { %1147 = vrot.lane.b32.xlu0 %v12235_v29, %s11329_s21 }
 0x14f   : > { %v1118_v48 = vpop.permute.xlu1 %1117 }
 0x150   : > { %v691_v57 = vpop.permute.xlu0 %690  ;;  %v1327_v0 = vsel %vm422_vm0, %v12243_v59, %v1118_v48  ;;  %v12279_v48 = vld [vmem:[#allocation2 + $0x189] sm:$0xff] }
 0x151   : > { %1273 = vrot.lane.b32.xlu1 %v12233_v43, %s11330_s13  ;;  %v899_v16 = vsel %vm422_vm0, %v12212_v15, %v691_v57 }
 0x152   : > { %2187 = vrot.lane.b32.xlu0 %v11900_v54, %s11329_s21 }
 0x153   : > { %v817_v56 = vpop.permute.xlu1 %816 }
 0x154   : > { %v931_v22 = vsel %vm916_vm2, %v898_v9, %v817_v56  ;;  %v1120_v27 = vpop.permute.xlu0 %1119  ;;  %v12281_v56 = vld [vmem:[#allocation2 + $0xd8] sm:$0xff] }
 0x155   : > { %2313 = vrot.lane.b32.xlu1 %v11898_v53, %s11330_s13  ;;  %10039 = vmatprep.mubr.msk.f32.mxu0 %vm1389_vm3, %v931_v22  ;;  %v1328_v37 = vsel %vm422_vm0, %v12256_v12, %v1120_v27  ;;  %v12295_v27 = vld [vmem:[#allocation2 + $0x18a] sm:$0xff] }
 0x156   : > { %1275 = vrot.lane.b32.xlu0 %v12251_v34, %s11330_s13 }
 0x157   : > { %v1246_v13 = vpop.permute.xlu1 %1245 }
 0x158   : > { %v1359_v51 = vsel %vm916_vm2, %v1327_v0, %v1246_v13  ;;  %v819_v6 = vpop.permute.xlu0 %818 }
 0x159   : > { %2315 = vrot.lane.b32.xlu1 %v11917_v2, %s11330_s13  ;;  %9967 = vmatprep.mubr.msk.f32.mxu1 %vm1389_vm3, %v1359_v51  ;;  %v932_v41 = vsel %vm916_vm2, %v899_v16, %v819_v6 }
 0x15a   : > { %1149 = vrot.lane.b32.xlu0 %v12263_v26, %s11329_s21  ;;  %10040 = vmatmul.mubr.msk.f32.gmra.mrb[14].mxu0 %vm1389_vm3, %v932_v41 }
 0x15b   : > { %v1248_v30 = vpop.permute.xlu1 %1247 }
 0x15c   : > { %v1360_v38 = vsel %vm916_vm2, %v1328_v37, %v1248_v30  ;;  %v1122_v9 = vpop.permute.xlu0 %1121  ;;  %v12299_v30 = vld [vmem:[#allocation2 + $0xe0] sm:$0xff] }
 0x15d   : > { %2189 = vrot.lane.b32.xlu1 %v11933_v23, %s11329_s21  ;;  %9968 = vmatmul.mubr.msk.f32.gmra.mrb[14].mxu1 %vm1389_vm3, %v1360_v38  ;;  %v1329_v57 = vsel %vm422_vm0, %v12281_v56, %v1122_v9 }
 0x15e   : > { %1151 = vrot.lane.b32.xlu0 %v12279_v48, %s11329_s21 }
 0x15f   : > { %v2162_v49 = vpop.permute.xlu1 %2161 }
 0x160   : > { %v1124_v0 = vpop.permute.xlu0 %1123  ;;  %v2385_v51 = vsel %vm422_vm0, %v11972_v61, %v2162_v49 }
 0x161   : > { %1277 = vrot.lane.b32.xlu1 %v12277_v47, %s11330_s13  ;;  %v1330_v38 = vsel %vm422_vm0, %v12299_v30, %v1124_v0 }
 0x162   : > { %2191 = vrot.lane.b32.xlu0 %v11950_v46, %s11329_s21 }
 0x163   : > { %v1250_v22 = vpop.permute.xlu1 %1249 }
 0x164   : > { %v1361_v13 = vsel %vm916_vm2, %v1329_v57, %v1250_v22  ;;  %v2164_v37 = vpop.permute.xlu0 %2163 }
 0x165   : > { %2317 = vrot.lane.b32.xlu1 %v11948_v44, %s11330_s13  ;;  %9970 = vmatprep.mubr.msk.f32.mxu1 %vm1389_vm3, %v1361_v13  ;;  %v2386_v61 = vsel %vm422_vm0, %v11987_v10, %v2164_v37  ;;  %v12319_v13 = vld [vmem:[#allocation2 + $0xf0] sm:$0xff] }
 0x166   : > { %1279 = vrot.lane.b32.xlu0 %v12295_v27, %s11330_s13 }
 0x167   : > { %v2290_v16 = vpop.permute.xlu1 %2289 }
 0x168   : > { %v2417_v6 = vsel %vm916_vm2, %v2385_v51, %v2290_v16  ;;  %v1252_v49 = vpop.permute.xlu0 %1251 }
 0x169   : > { %2319 = vrot.lane.b32.xlu1 %v11981_v1, %s11330_s13  ;;  %10090 = vmatprep.mubr.msk.f32.mxu0 %vm1389_vm3, %v2417_v6  ;;  %v1362_v57 = vsel %vm916_vm2, %v1330_v38, %v1252_v49  ;;  %v12335_v6 = vld [vmem:[#allocation2 + $0xf8] sm:$0xff] }
 0x16a   : > { %692 = vrot.lane.b32.xlu0 %v11887_v45, %s11329_s21  ;;  %9971 = vmatmul.mubr.msk.f32.gmra.mrb[16].mxu1 %vm1389_vm3, %v1362_v57 }
 0x16b   : > { %v2292_v41 = vpop.permute.xlu1 %2291 }
 0x16c   : > { %v2418_v9 = vsel %vm916_vm2, %v2386_v61, %v2292_v41  ;;  %v1126_v0 = vpop.permute.xlu0 %1125 }
 0x16d   : > { %2193 = vrot.lane.b32.xlu1 %v11995_v50, %s11329_s21  ;;  %10091 = vmatmul.mubr.msk.f32.vlgmr.msra.gmra.mrb[0].mxu0 %vm1389_vm3, %v2418_v9  ;;  %v1331_v10 = vsel %vm422_vm0, %v12319_v13, %v1126_v0  ;;  %v12355_v0 = vld [vmem:[#allocation2 + $0x108] sm:$0xff] }
 0x16e   : > { %694 = vrot.lane.b32.xlu0 %v11900_v54, %s11329_s21 }
 0x16f   : > { %v2166_v22 = vpop.permute.xlu1 %2165 }
 0x170   : > { %v1128_v16 = vpop.permute.xlu0 %1127 }
 0x171   : > { %820 = vrot.lane.b32.xlu1 %v11898_v53, %s11330_s13  ;;  %v2387_v53 = vsel %vm422_vm0, %v12023_v40, %v2166_v22  ;;  %v1332_v61 = vsel %vm422_vm0, %v12335_v6, %v1128_v16 }
 0x172   : > { %2195 = vrot.lane.b32.xlu0 %v12012_v42, %s11329_s21 }
 0x173   : > { %v1254_v51 = vpop.permute.xlu1 %1253 }
 0x174   : > { %v1363_v45 = vsel %vm916_vm2, %v1331_v10, %v1254_v51  ;;  %v2168_v54 = vpop.permute.xlu0 %2167 }
 0x175   : > { %2321 = vrot.lane.b32.xlu1 %v12010_v18, %s11330_s13  ;;  %9973 = vmatprep.mubr.msk.f32.mxu1 %vm1389_vm3, %v1363_v45  ;;  %v2388_v40 = vsel %vm422_vm0, %v12036_v55, %v2168_v54  ;;  %v12371_v45 = vld [vmem:[#allocation2 + $0x110] sm:$0xff] }
 0x176   : > { %822 = vrot.lane.b32.xlu0 %v11917_v2, %s11330_s13 }
 0x177   : > { %v2294_v37 = vpop.permute.xlu1 %2293 }
 0x178   : > { %v2419_v38 = vsel %vm916_vm2, %v2387_v53, %v2294_v37  ;;  %v1256_v49 = vpop.permute.xlu0 %1255 }
 0x179   : > { %2323 = vrot.lane.b32.xlu1 %v12031_v52, %s11330_s13  ;;  %10093 = vmatprep.mubr.msk.f32.mxu0 %vm1389_vm3, %v2419_v38  ;;  %v1364_v57 = vsel %vm916_vm2, %v1332_v61, %v1256_v49  ;;  %v12391_v49 = vld [vmem:[#allocation2 + $0x120] sm:$0xff] }
 0x17a   : > { %696 = vrot.lane.b32.xlu0 %v11933_v23, %s11329_s21  ;;  %9974 = vmatmul.mubr.msk.f32.gmra.mrb[18].mxu1 %vm1389_vm3, %v1364_v57 }
 0x17b   : > { %v2296_v41 = vpop.permute.xlu1 %2295 }
 0x17c   : > { %v2420_v9 = vsel %vm916_vm2, %v2388_v40, %v2296_v41  ;;  %v1130_v22 = vpop.permute.xlu0 %1129 }
 0x17d   : > { %2197 = vrot.lane.b32.xlu1 %v12043_v8, %s11329_s21  ;;  %10094 = vmatmul.mubr.msk.f32.gmra.mrb[2].mxu0 %vm1389_vm3, %v2420_v9  ;;  %v1333_v55 = vsel %vm422_vm0, %v12355_v0, %v1130_v22  ;;  %v12407_v22 = vld [vmem:[#allocation2 + $0x128] sm:$0xff] }
 0x17e   : > { %698 = vrot.lane.b32.xlu0 %v11950_v46, %s11329_s21 }
 0x17f   : > { %v2170_v2 = vpop.permute.xlu1 %2169 }
 0x180   : > { %v1132_v51 = vpop.permute.xlu0 %1131 }
 0x181   : > { %824 = vrot.lane.b32.xlu1 %v11948_v44, %s11330_s13  ;;  %v2389_v44 = vsel %vm422_vm0, %v12067_v4, %v2170_v2  ;;  %v1334_v37 = vsel %vm422_vm0, %v12371_v45, %v1132_v51 }
 0x182   : > { %2199 = vrot.lane.b32.xlu0 %v12059_v60, %s11329_s21 }
 0x183   : > { %v1258_v10 = vpop.permute.xlu1 %1257 }
 0x184   : > { %v1365_v23 = vsel %vm916_vm2, %v1333_v55, %v1258_v10  ;;  %v2172_v46 = vpop.permute.xlu0 %2171 }
 0x185   : > { %2325 = vrot.lane.b32.xlu1 %v12057_v11, %s11330_s13  ;;  %9976 = vmatprep.mubr.msk.f32.mxu1 %vm1389_vm3, %v1365_v23  ;;  %v2390_v4 = vsel %vm422_vm0, %v12080_v25, %v2172_v46 }
 0x186   : > { %826 = vrot.lane.b32.xlu0 %v11981_v1, %s11330_s13 }
 0x187   : > { %v2298_v16 = vpop.permute.xlu1 %2297 }
 0x188   : > { %v2421_v53 = vsel %vm916_vm2, %v2389_v44, %v2298_v16  ;;  %v1260_v38 = vpop.permute.xlu0 %1259 }
 0x189   : > { %2327 = vrot.lane.b32.xlu1 %v12075_v7, %s11330_s13  ;;  %10096 = vmatprep.mubr.msk.f32.mxu0 %vm1389_vm3, %v2421_v53  ;;  %v1366_v40 = vsel %vm916_vm2, %v1334_v37, %v1260_v38  ;;  %v12427_v53 = vld [vmem:[#allocation2 + $0x138] sm:$0xff]  ;;  %v12443_v38 = vld [vmem:[#allocation2 + $0x140] sm:$0xff] }
 0x18a   : > { %700 = vrot.lane.b32.xlu0 %v11995_v50, %s11329_s21  ;;  %9977 = vmatmul.mubr.msk.f32.gmra.mrb[20].mxu1 %vm1389_vm3, %v1366_v40 }
 0x18b   : > { %v2300_v54 = vpop.permute.xlu1 %2299 }
 0x18c   : > { %v2422_v61 = vsel %vm916_vm2, %v2390_v4, %v2300_v54  ;;  %v1134_v41 = vpop.permute.xlu0 %1133 }
 0x18d   : > { %2201 = vrot.lane.b32.xlu1 %v12087_v14, %s11329_s21  ;;  %10097 = vmatmul.mubr.msk.f32.gmra.mrb[4].mxu0 %vm1389_vm3, %v2422_v61  ;;  %v1335_v25 = vsel %vm422_vm0, %v12391_v49, %v1134_v41 }
 0x18e   : > { %702 = vrot.lane.b32.xlu0 %v12012_v42, %s11329_s21 }
 0x18f   : > { %v2174_v1 = vpop.permute.xlu1 %2173 }
 0x190   : > { %v1136_v57 = vpop.permute.xlu0 %1135 }
 0x191   : > { %828 = vrot.lane.b32.xlu1 %v12010_v18, %s11330_s13  ;;  %v2391_v18 = vsel %vm422_vm0, %v12111_v63, %v2174_v1  ;;  %v1336_v10 = vsel %vm422_vm0, %v12407_v22, %v1136_v57 }
 0x192   : > { %2203 = vrot.lane.b32.xlu0 %v12103_v39, %s11329_s21 }
 0x193   : > { %v1262_v9 = vpop.permute.xlu1 %1261 }
 0x194   : > { %v1367_v50 = vsel %vm916_vm2, %v1335_v25, %v1262_v9  ;;  %v2176_v42 = vpop.permute.xlu0 %2175 }
 0x195   : > { %2329 = vrot.lane.b32.xlu1 %v12101_v17, %s11330_s13  ;;  %9979 = vmatprep.mubr.msk.f32.mxu1 %vm1389_vm3, %v1367_v50  ;;  %v2392_v63 = vsel %vm422_vm0, %v12124_v21, %v2176_v42  ;;  %v12463_v50 = vld [vmem:[#allocation2 + $0x150] sm:$0xff] }
 0x196   : > { %830 = vrot.lane.b32.xlu0 %v12031_v52, %s11330_s13 }
 0x197   : > { %v2302_v2 = vpop.permute.xlu1 %2301 }
 0x198   : > { %v2423_v55 = vsel %vm916_vm2, %v2391_v18, %v2302_v2  ;;  %v1264_v23 = vpop.permute.xlu0 %1263 }
 0x199   : > { %2331 = vrot.lane.b32.xlu1 %v12119_v32, %s11330_s13  ;;  %10099 = vmatprep.mubr.msk.f32.mxu0 %vm1389_vm3, %v2423_v55  ;;  %v1368_v16 = vsel %vm916_vm2, %v1336_v10, %v1264_v23  ;;  %v12479_v55 = vld [vmem:[#allocation2 + $0x158] sm:$0xff] }
 0x19a   : > { %704 = vrot.lane.b32.xlu0 %v12043_v8, %s11329_s21  ;;  %9980 = vmatmul.mubr.msk.f32.gmra.mrb[22].mxu1 %vm1389_vm3, %v1368_v16 }
 0x19b   : > { %v2304_v51 = vpop.permute.xlu1 %2303 }
 0x19c   : > { %v2424_v44 = vsel %vm916_vm2, %v2392_v63, %v2304_v51  ;;  %v1138_v46 = vpop.permute.xlu0 %1137 }
 0x19d   : > { %2205 = vrot.lane.b32.xlu1 %v12131_v20, %s11329_s21  ;;  %10100 = vmatmul.mubr.msk.f32.gmra.mrb[6].mxu0 %vm1389_vm3, %v2424_v44  ;;  %v1337_v21 = vsel %vm422_vm0, %v12427_v53, %v1138_v46  ;;  %v12499_v46 = vld [vmem:[#allocation2 + $0x168] sm:$0xff] }
 0x19e   : > { %706 = vrot.lane.b32.xlu0 %v12059_v60, %s11329_s21 }
 0x19f   : > { %v2178_v52 = vpop.permute.xlu1 %2177 }
 0x1a0   : > { %v1140_v4 = vpop.permute.xlu0 %1139 }
 0x1a1   : > { %832 = vrot.lane.b32.xlu1 %v12057_v11, %s11330_s13  ;;  %v2393_v11 = vsel %vm422_vm0, %v12155_v62, %v2178_v52  ;;  %v1338_v40 = vsel %vm422_vm0, %v12443_v38, %v1140_v4 }
 0x1a2   : > { %2207 = vrot.lane.b32.xlu0 %v12147_v35, %s11329_s21 }
 0x1a3   : > { %v1266_v37 = vpop.permute.xlu1 %1265 }
 0x1a4   : > { %v1369_v8 = vsel %vm916_vm2, %v1337_v21, %v1266_v37  ;;  %v2180_v60 = vpop.permute.xlu0 %2179 }
 0x1a5   : > { %2333 = vrot.lane.b32.xlu1 %v12145_v24, %s11330_s13  ;;  %9982 = vmatprep.mubr.msk.f32.mxu1 %vm1389_vm3, %v1369_v8  ;;  %v2394_v62 = vsel %vm422_vm0, %v12168_v19, %v2180_v60 }
 0x1a6   : > { %834 = vrot.lane.b32.xlu0 %v12075_v7, %s11330_s13 }
 0x1a7   : > { %v2306_v54 = vpop.permute.xlu1 %2305 }
 0x1a8   : > { %v2425_v61 = vsel %vm916_vm2, %v2393_v11, %v2306_v54  ;;  %v1268_v41 = vpop.permute.xlu0 %1267  ;;  %v12519_v54 = vld [vmem:[#allocation2 + $0x170] sm:$0xff] }
 0x1a9   : > { %2335 = vrot.lane.b32.xlu1 %v12163_v33, %s11330_s13  ;;  %10102 = vmatprep.mubr.msk.f32.mxu0 %vm1389_vm3, %v2425_v61  ;;  %v1370_v9 = vsel %vm916_vm2, %v1338_v40, %v1268_v41 }
 0x1aa   : > { %708 = vrot.lane.b32.xlu0 %v12087_v14, %s11329_s21  ;;  %9983 = vmatmul.mubr.msk.f32.gmra.mrb[24].mxu1 %vm1389_vm3, %v1370_v9 }
 0x1ab   : > { %v2308_v1 = vpop.permute.xlu1 %2307 }
 0x1ac   : > { %v2426_v25 = vsel %vm916_vm2, %v2394_v62, %v2308_v1  ;;  %v1142_v57 = vpop.permute.xlu0 %1141 }
 0x1ad   : > { %2209 = vrot.lane.b32.xlu1 %v12175_v28, %s11329_s21  ;;  %10103 = vmatmul.mubr.msk.f32.gmra.mrb[8].mxu0 %vm1389_vm3, %v2426_v25  ;;  %v1339_v19 = vsel %vm422_vm0, %v12463_v50, %v1142_v57 }
 0x1ae   : > { %710 = vrot.lane.b32.xlu0 %v12103_v39, %s11329_s21 }
 0x1af   : > { %v2182_v7 = vpop.permute.xlu1 %2181 }
 0x1b0   : > { %v1144_v2 = vpop.permute.xlu0 %1143 }
 0x1b1   : > { %836 = vrot.lane.b32.xlu1 %v12101_v17, %s11330_s13  ;;  %v2395_v17 = vsel %vm422_vm0, %v12199_v3, %v2182_v7  ;;  %v1340_v63 = vsel %vm422_vm0, %v12479_v55, %v1144_v2  ;;  %v12539_v7 = vld [vmem:[#allocation2 + $0x180] sm:$0xff] }
 0x1b2   : > { %2211 = vrot.lane.b32.xlu0 %v12191_v58, %s11329_s21 }
 0x1b3   : > { %v1270_v18 = vpop.permute.xlu1 %1269 }
 0x1b4   : > { %v1371_v14 = vsel %vm916_vm2, %v1339_v19, %v1270_v18  ;;  %v2184_v39 = vpop.permute.xlu0 %2183 }
 0x1b5   : > { %2337 = vrot.lane.b32.xlu1 %v12189_v31, %s11330_s13  ;;  %9985 = vmatprep.mubr.msk.f32.mxu1 %vm1389_vm3, %v1371_v14  ;;  %v2396_v3 = vsel %vm422_vm0, %v12212_v15, %v2184_v39 }
 0x1b6   : > { %838 = vrot.lane.b32.xlu0 %v12119_v32, %s11330_s13 }
 0x1b7   : > { %v2310_v42 = vpop.permute.xlu1 %2309 }
 0x1b8   : > { %v2427_v10 = vsel %vm916_vm2, %v2395_v17, %v2310_v42  ;;  %v1272_v23 = vpop.permute.xlu0 %1271  ;;  %v12559_v17 = vld [vmem:[#allocation2 + $0x188] sm:$0xff] }
 0x1b9   : > { %2339 = vrot.lane.b32.xlu1 %v12207_v5, %s11330_s13  ;;  %10105 = vmatprep.mubr.msk.f32.mxu0 %vm1389_vm3, %v2427_v10  ;;  %v1372_v16 = vsel %vm916_vm2, %v1340_v63, %v1272_v23 }
 0x1ba   : > { %712 = vrot.lane.b32.xlu0 %v12131_v20, %s11329_s21  ;;  %9986 = vmatmul.mubr.msk.f32.gmra.mrb[26].mxu1 %vm1389_vm3, %v1372_v16  ;;  %v2127_v16 = vld [vmem:[#allocation2 + $0x19a] sm:$0xff] }
 0x1bb   : > { %v2312_v51 = vpop.permute.xlu1 %2311 }
 0x1bc   : > { %v2428_v44 = vsel %vm916_vm2, %v2396_v3, %v2312_v51  ;;  %v1146_v52 = vpop.permute.xlu0 %1145 }
 0x1bd   : > { %2213 = vrot.lane.b32.xlu1 %v12219_v36, %s11329_s21  ;;  %10106 = vmatmul.mubr.msk.f32.gmra.mrb[10].mxu0 %vm1389_vm3, %v2428_v44  ;;  %v1341_v20 = vsel %vm422_vm0, %v12499_v46, %v1146_v52 }
 0x1be   : > { %714 = vrot.lane.b32.xlu0 %v12147_v35, %s11329_s21 }
 0x1bf   : > { %v2186_v32 = vpop.permute.xlu1 %2185 }
 0x1c0   : > { %v12503_v15 = vpop.f32.mrb[0].mxu1  ;;  %v1148_v4 = vpop.permute.xlu0 %1147 }
 0x1c1   : > { %840 = vrot.lane.b32.xlu1 %v12145_v24, %s11330_s13  ;;  %v12507_v21 = vpop.f32.mrb[1].mxu1  ;;  %v2397_v24 = vsel %vm422_vm0, %v12243_v59, %v2186_v32  ;;  %v1342_v61 = vsel %vm422_vm0, %v12519_v54, %v1148_v4  ;;  %v2096_v32 = vld [vmem:[#allocation2 + $0x1a1] sm:$0xff] }
 0x1c2   : > { %2215 = vrot.lane.b32.xlu0 %v12235_v29, %s11329_s21 }
 0x1c3   : > { %v1274_v37 = vpop.permute.xlu1 %1273 }
 0x1c4   : > { %v1373_v8 = vsel %vm916_vm2, %v1341_v20, %v1274_v37  ;;  %v2188_v11 = vpop.permute.xlu0 %2187 }
 0x1c5   : > { %2341 = vrot.lane.b32.xlu1 %v12233_v43, %s11330_s13  ;;  %9988 = vmatprep.mubr.msk.f32.mxu1 %vm1389_vm3, %v1373_v8  ;;  %v2398_v40 = vsel %vm422_vm0, %v12256_v12, %v2188_v11 }
 0x1c6   : > { %842 = vrot.lane.b32.xlu0 %v12163_v33, %s11330_s13 }
 0x1c7   : > { %v2314_v35 = vpop.permute.xlu1 %2313 }
 0x1c8   : > { %v2429_v60 = vsel %vm916_vm2, %v2397_v24, %v2314_v35  ;;  %v1276_v1 = vpop.permute.xlu0 %1275 }
 0x1c9   : > { %2343 = vrot.lane.b32.xlu1 %v12251_v34, %s11330_s13  ;;  %10108 = vmatprep.mubr.msk.f32.mxu0 %vm1389_vm3, %v2429_v60  ;;  %v1374_v25 = vsel %vm916_vm2, %v1342_v61, %v1276_v1 }
 0x1ca   : > { %716 = vrot.lane.b32.xlu0 %v12175_v28, %s11329_s21  ;;  %9989 = vmatmul.mubr.msk.f32.gmra.mrb[28].mxu1 %vm1389_vm3, %v1374_v25 }
 0x1cb   : > { %v2316_v62 = vpop.permute.xlu1 %2315 }
 0x1cc   : > { %v2430_v41 = vsel %vm916_vm2, %v2398_v40, %v2316_v62  ;;  %v1150_v9 = vpop.permute.xlu0 %1149 }
 0x1cd   : > { %2217 = vrot.lane.b32.xlu1 %v12263_v26, %s11329_s21  ;;  %10109 = vmatmul.mubr.msk.f32.gmra.mrb[12].mxu0 %vm1389_vm3, %v2430_v41  ;;  %v1343_v28 = vsel %vm422_vm0, %v12539_v7, %v1150_v9 }
 0x1ce   : > { %718 = vrot.lane.b32.xlu0 %v12191_v58, %s11329_s21 }
 0x1cf   : > { %v2190_v33 = vpop.permute.xlu1 %2189 }
 0x1d0   : > { %v12541_v57 = vpop.f32.mrb[2].mxu1  ;;  %v1152_v18 = vpop.permute.xlu0 %1151 }
 0x1d1   : > { %844 = vrot.lane.b32.xlu1 %v12189_v31, %s11330_s13  ;;  %v12547_v26 = vpop.f32.mrb[3].mxu1  ;;  %v2399_v31 = vsel %vm422_vm0, %v12281_v56, %v2190_v33 }
 0x1d2   : > { %2219 = vrot.lane.b32.xlu0 %v12279_v48, %s11329_s21  ;;  %v1344_v48 = vsel %vm422_vm0, %v12559_v17, %v1152_v18 }
 0x1d3   : > { %v1278_v19 = vpop.permute.xlu1 %1277 }
 0x1d4   : > { %v1375_v2 = vsel %vm916_vm2, %v1343_v28, %v1278_v19  ;;  %v2192_v14 = vpop.permute.xlu0 %2191 }
 0x1d5   : > { %2345 = vrot.lane.b32.xlu1 %v12277_v47, %s11330_s13  ;;  %9991 = vmatprep.mubr.msk.f32.mxu1 %vm1389_vm3, %v1375_v2  ;;  %v2095_v47 = vld [vmem:[#allocation2 + $0x199] sm:$0xff]  ;;  %v2400_v39 = vsel %vm422_vm0, %v12299_v30, %v2192_v14 }
 0x1d6   : > { %846 = vrot.lane.b32.xlu0 %v12207_v5, %s11330_s13 }
 0x1d7   : > { %v2318_v58 = vpop.permute.xlu1 %2317 }
 0x1d8   : > { %v2431_v42 = vsel %vm916_vm2, %v2399_v31, %v2318_v58  ;;  %v1280_v63 = vpop.permute.xlu0 %1279 }
 0x1d9   : > { %2347 = vrot.lane.b32.xlu1 %v12295_v27, %s11330_s13  ;;  %10111 = vmatprep.mubr.msk.f32.mxu0 %vm1389_vm3, %v2431_v42  ;;  %v1376_v51 = vsel %vm916_vm2, %v1344_v48, %v1280_v63 }
 0x1da   : > { %720 = vrot.lane.b32.xlu0 %v12219_v36, %s11329_s21  ;;  %9992 = vmatmul.mubr.msk.f32.gmra.mrb[30].mxu1 %vm1389_vm3, %v1376_v51 }
 0x1db   : > { %v2320_v10 = vpop.permute.xlu1 %2319 }
 0x1dc   : > { %v2432_v3 = vsel %vm916_vm2, %v2400_v39, %v2320_v10  ;;  %v693_v27 = vpop.permute.xlu0 %692 }
 0x1dd   : > { %2221 = vrot.lane.b32.xlu1 %v2095_v47, %s11329_s21  ;;  %10112 = vmatmul.mubr.msk.f32.gmra.mrb[14].mxu0 %vm1389_vm3, %v2432_v3  ;;  %v900_v36 = vsel %vm422_vm0, %v12243_v59, %v693_v27 }
 0x1de   : > { %722 = vrot.lane.b32.xlu0 %v12235_v29, %s11329_s21 }
 0x1df   : > { %v2194_v5 = vpop.permute.xlu1 %2193 }
 0x1e0   : > { %v12578_v23 = vpop.f32.mrb[4].mxu1  ;;  %v695_v20 = vpop.permute.xlu0 %694  ;;  %v2401_v29 = vsel %vm422_vm0, %v12319_v13, %v2194_v5 }
 0x1e1   : > { %848 = vrot.lane.b32.xlu1 %v12233_v43, %s11330_s13  ;;  %v12584_v44 = vpop.f32.mrb[5].mxu1  ;;  %v2128_v43 = vld [vmem:[#allocation2 + $0x1a2] sm:$0xff]  ;;  %v901_v59 = vsel %vm422_vm0, %v12256_v12, %v695_v20 }
 0x1e2   : > { %2223 = vrot.lane.b32.xlu0 %v2096_v32, %s11329_s21 }
 0x1e3   : > { %v821_v52 = vpop.permute.xlu1 %820 }
 0x1e4   : > { %v933_v37 = vsel %vm916_vm2, %v900_v36, %v821_v52  ;;  %v2196_v8 = vpop.permute.xlu0 %2195 }
 0x1e5   : > { %2349 = vrot.lane.b32.xlu1 %v2127_v16, %s11330_s13  ;;  %10042 = vmatprep.mubr.msk.f32.mxu1 %vm1389_vm3, %v933_v37  ;;  %v2402_v35 = vsel %vm422_vm0, %v12335_v6, %v2196_v8 }
 0x1e6   : > { %850 = vrot.lane.b32.xlu0 %v12251_v34, %s11330_s13 }
 0x1e7   : > { %v2322_v4 = vpop.permute.xlu1 %2321 }
 0x1e8   : > { %v2433_v24 = vsel %vm916_vm2, %v2401_v29, %v2322_v4  ;;  %v823_v60 = vpop.permute.xlu0 %822 }
 0x1e9   : > { %2351 = vrot.lane.b32.xlu1 %v2128_v43, %s11330_s13  ;;  %10114 = vmatprep.mubr.msk.f32.mxu0 %vm1389_vm3, %v2433_v24  ;;  %v934_v40 = vsel %vm916_vm2, %v901_v59, %v823_v60 }
 0x1ea   : > { %10043 = vmatmul.mubr.msk.f32.vlgmr.msra.gmra.mrb[16].mxu1 %vm1389_vm3, %v934_v40 }
 0x1eb   : > { %v2324_v11 = vpop.permute.xlu1 %2323 }
 0x1ec   : > { %v2434_v61 = vsel %vm916_vm2, %v2402_v35, %v2324_v11  ;;  %v697_v34 = vpop.permute.xlu0 %696 }
 0x1ed   : > { %10115 = vmatmul.mubr.msk.f32.gmra.mrb[16].mxu0 %vm1389_vm3, %v2434_v61  ;;  %v902_v12 = vsel %vm422_vm0, %v12281_v56, %v697_v34 }
 0x1ef   : > { %v2198_v62 = vpop.permute.xlu1 %2197 }
 0x1f0   : > { %v12607_v1 = vpop.f32.mrb[6].mxu1  ;;  %v699_v33 = vpop.permute.xlu0 %698  ;;  %v2403_v28 = vsel %vm422_vm0, %v12355_v0, %v2198_v62 }
 0x1f1   : > { %v12609_v41 = vpop.f32.mrb[7].mxu1  ;;  %v903_v31 = vsel %vm422_vm0, %v12299_v30, %v699_v33 }
 0x1f3   : > { %v825_v25 = vpop.permute.xlu1 %824 }
 0x1f4   : > { %v935_v9 = vsel %vm916_vm2, %v902_v12, %v825_v25  ;;  %v2200_v18 = vpop.permute.xlu0 %2199 }
 0x1f5   : > { %10045 = vmatprep.mubr.msk.f32.mxu1 %vm1389_vm3, %v935_v9  ;;  %v2404_v56 = vsel %vm422_vm0, %v12371_v45, %v2200_v18 }
 0x1f7   : > { %v2326_v19 = vpop.permute.xlu1 %2325 }
 0x1f8   : > { %v2435_v2 = vsel %vm916_vm2, %v2403_v28, %v2326_v19  ;;  %v827_v14 = vpop.permute.xlu0 %826 }
 0x1f9   : > { %10117 = vmatprep.mubr.msk.f32.mxu0 %vm1389_vm3, %v2435_v2  ;;  %v936_v47 = vsel %vm916_vm2, %v903_v31, %v827_v14 }
 0x1fa   : > { %10046 = vmatmul.mubr.msk.f32.gmra.mrb[18].mxu1 %vm1389_vm3, %v936_v47 }
 0x1fb   : > { %v2328_v58 = vpop.permute.xlu1 %2327 }
 0x1fc   : > { %v2436_v42 = vsel %vm916_vm2, %v2404_v56, %v2328_v58  ;;  %v701_v39 = vpop.permute.xlu0 %700 }
 0x1fd   : > { %10118 = vmatmul.mubr.msk.f32.gmra.mrb[18].mxu0 %vm1389_vm3, %v2436_v42  ;;  %v904_v30 = vsel %vm422_vm0, %v12319_v13, %v701_v39 }
 0x1ff   : > { %v2202_v48 = vpop.permute.xlu1 %2201 }
 0x200   : > { %v12627_v10 = vpop.f32.mrb[8].mxu1  ;;  %v703_v51 = vpop.permute.xlu0 %702  ;;  %v2405_v27 = vsel %vm422_vm0, %v12391_v49, %v2202_v48 }
 0x201   : > { %v12629_v63 = vpop.f32.mrb[9].mxu1  ;;  %v905_v52 = vsel %vm422_vm0, %v12335_v6, %v703_v51 }
 0x203   : > { %v829_v3 = vpop.permute.xlu1 %828 }
 0x204   : > { %v937_v5 = vsel %vm916_vm2, %v904_v30, %v829_v3  ;;  %v2204_v32 = vpop.permute.xlu0 %2203 }
 0x205   : > { %10048 = vmatprep.mubr.msk.f32.mxu1 %vm1389_vm3, %v937_v5  ;;  %v2406_v13 = vsel %vm422_vm0, %v12407_v22, %v2204_v32 }
 0x207   : > { %v2330_v16 = vpop.permute.xlu1 %2329 }
 0x208   : > { %v2437_v36 = vsel %vm916_vm2, %v2405_v27, %v2330_v16  ;;  %v831_v37 = vpop.permute.xlu0 %830 }
 0x209   : > { %10120 = vmatprep.mubr.msk.f32.mxu0 %vm1389_vm3, %v2437_v36  ;;  %v938_v29 = vsel %vm916_vm2, %v905_v52, %v831_v37  ;;  %v3761_v36 = vld [vmem:[%s15617_s3 + $0x60] sm:$0xff] }
 0x20a   : > { %10049 = vmatmul.mubr.msk.f32.gmra.mrb[20].mxu1 %vm1389_vm3, %v938_v29 }
 0x20b   : > { %v2332_v20 = vpop.permute.xlu1 %2331 }
 0x20c   : > { %v2438_v43 = vsel %vm916_vm2, %v2406_v13, %v2332_v20  ;;  %v705_v8 = vpop.permute.xlu0 %704 }
 0x20d   : > { %10121 = vmatmul.mubr.msk.f32.gmra.mrb[20].mxu0 %vm1389_vm3, %v2438_v43  ;;  %v906_v6 = vsel %vm422_vm0, %v12355_v0, %v705_v8  ;;  %v3764_v8 = vld [vmem:[%s15617_s3 + $0x78] sm:$0xff] }
 0x20f   : > { %v2206_v4 = vpop.permute.xlu1 %2205 }
 0x210   : > { %v12647_v24 = vpop.f32.mrb[10].mxu1  ;;  %v707_v11 = vpop.permute.xlu0 %706  ;;  %v2407_v61 = vsel %vm422_vm0, %v12427_v53, %v2206_v4  ;;  %v3763_v4 = vld [vmem:[%s15617_s3 + $0x70] sm:$0xff] }
 0x211   : > { %v12649_v59 = vpop.f32.mrb[11].mxu1  ;;  %v907_v12 = vsel %vm422_vm0, %v12371_v45, %v707_v11 }
 0x213   : > { %v833_v35 = vpop.permute.xlu1 %832 }
 0x214   : > { %v939_v60 = vsel %vm916_vm2, %v906_v6, %v833_v35  ;;  %v2208_v62 = vpop.permute.xlu0 %2207  ;;  %v10646_v35 = vpack.c.bf16 %v3764_v8, %v3763_v4 }
 0x215   : > { %10051 = vmatprep.mubr.msk.f32.mxu1 %vm1389_vm3, %v939_v60  ;;  %v2408_v0 = vsel %vm422_vm0, %v12443_v38, %v2208_v62 }
 0x217   : > { %v2334_v40 = vpop.permute.xlu1 %2333 }
 0x218   : > { %v2439_v34 = vsel %vm916_vm2, %v2407_v61, %v2334_v40  ;;  %v835_v33 = vpop.permute.xlu0 %834  ;;  %v3765_v61 = vld [vmem:[%s15617_s3 + $0x80] sm:$0xff]  ;;  %v3766_v40 = vld [vmem:[%s15617_s3 + $0x88] sm:$0xff] }
 0x219   : > { %10123 = vmatprep.mubr.msk.f32.mxu0 %vm1389_vm3, %v2439_v34  ;;  %v940_v28 = vsel %vm916_vm2, %v907_v12, %v835_v33  ;;  %v10650_v34 = vpack.c.bf16 %v3766_v40, %v3765_v61  ;;  %v3767_v12 = vld [vmem:[%s15617_s3 + $0x90] sm:$0xff] }
 0x21a   : > { %10052 = vmatmul.mubr.msk.f32.gmra.mrb[22].mxu1 %vm1389_vm3, %v940_v28 }
 0x21b   : > { %v2336_v25 = vpop.permute.xlu1 %2335 }
 0x21c   : > { %v2440_v9 = vsel %vm916_vm2, %v2408_v0, %v2336_v25  ;;  %v709_v18 = vpop.permute.xlu0 %708  ;;  %v3768_v0 = vld [vmem:[%s15617_s3 + $0x98] sm:$0xff] }
 0x21d   : > { %10124 = vmatmul.mubr.msk.f32.gmra.mrb[22].mxu0 %vm1389_vm3, %v2440_v9  ;;  %v908_v45 = vsel %vm422_vm0, %v12391_v49, %v709_v18  ;;  %v10654_v25 = vpack.c.bf16 %v3768_v0, %v3767_v12 }
 0x21f   : > { %v2210_v19 = vpop.permute.xlu1 %2209 }
 0x220   : > { %v12667_v2 = vpop.f32.mrb[12].mxu1  ;;  %v711_v58 = vpop.permute.xlu0 %710  ;;  %v2409_v42 = vsel %vm422_vm0, %v12463_v50, %v2210_v19 }
 0x221   : > { %v12669_v31 = vpop.f32.mrb[13].mxu1  ;;  %v909_v30 = vsel %vm422_vm0, %v12407_v22, %v711_v58  ;;  %v3762_v22 = vld [vmem:[%s15617_s3 + $0x68] sm:$0xff] }
 0x222   : > { %v10642_v52 = vpack.c.bf16 %v3762_v22, %v3761_v36 }
 0x223   : > { %v837_v56 = vpop.permute.xlu1 %836 }
 0x224   : > { %v941_v14 = vsel %vm916_vm2, %v908_v45, %v837_v56  ;;  %v2212_v48 = vpop.permute.xlu0 %2211  ;;  %10643 = vmatprep.subr.bf16.mxu1 %v10642_v52 }
 0x225   : > { %10054 = vmatprep.mubr.msk.f32.mxu1 %vm1389_vm3, %v941_v14  ;;  %v2410_v49 = vsel %vm422_vm0, %v12479_v55, %v2212_v48  ;;  %10645 = vmatpush3.bf16.msra.mxu1 %v10642_v52  ;;  %v3770_v14 = vld [vmem:[%s15617_s3 + $0xa8] sm:$0xff]  ;;  %v12740_v48 = vld [vmem:[%s15616_s2] ss:$0 sm:$0xff] }
 0x226   : > { %10647 = vmatprep.subr.bf16.mxu1 %v10646_v35 }
 0x227   : > { %v2338_v47 = vpop.permute.xlu1 %2337 }
 0x228   : > { %v2441_v39 = vsel %vm916_vm2, %v2409_v42, %v2338_v47  ;;  %v839_v51 = vpop.permute.xlu0 %838 }
 0x229   : > { %10126 = vmatprep.mubr.msk.f32.mxu0 %vm1389_vm3, %v2441_v39  ;;  %v942_v27 = vsel %vm916_vm2, %v909_v30, %v839_v51  ;;  %10649 = vmatpush3.bf16.msra.mxu1 %v10646_v35 }
 0x22a   : > { %10055 = vmatmul.mubr.msk.f32.gmra.mrb[24].mxu1 %vm1389_vm3, %v942_v27  ;;  %10651 = vmatprep.subr.bf16.mxu1 %v10650_v34 }
 0x22b   : > { %v2340_v3 = vpop.permute.xlu1 %2339 }
 0x22c   : > { %v2442_v5 = vsel %vm916_vm2, %v2410_v49, %v2340_v3  ;;  %v713_v32 = vpop.permute.xlu0 %712 }
 0x22d   : > { %10127 = vmatmul.mubr.msk.f32.gmra.mrb[24].mxu0 %vm1389_vm3, %v2442_v5  ;;  %v910_v37 = vsel %vm422_vm0, %v12427_v53, %v713_v32  ;;  %10653 = vmatpush3.bf16.msra.mxu1 %v10650_v34  ;;  %v3771_v32 = vld [vmem:[%s15617_s3 + $0xb0] sm:$0xff] }
 0x22e   : > { %10655 = vmatprep.subr.bf16.mxu1 %v10654_v25 }
 0x22f   : > { %v2214_v16 = vpop.permute.xlu1 %2213 }
 0x230   : > { %v12693_v13 = vpop.f32.mrb[14].mxu1  ;;  %v715_v29 = vpop.permute.xlu0 %714  ;;  %v2411_v53 = vsel %vm422_vm0, %v12499_v46, %v2214_v16 }
 0x231   : > { %v12695_v20 = vpop.f32.mrb[15].mxu1  ;;  %v911_v33 = vsel %vm422_vm0, %v12443_v38, %v715_v29  ;;  %10657 = vmatpush3.bf16.msra.mxu1 %v10654_v25  ;;  %v3769_v38 = vld [vmem:[%s15617_s3 + $0xa0] sm:$0xff] }
 0x232   : > { %v10658_v42 = vpack.c.bf16 %v3770_v14, %v3769_v38  ;;  %v2064_v14 = vld [vmem:[#allocation2 + $0x1a0] sm:$0xff] }
 0x233   : > { %v841_v43 = vpop.permute.xlu1 %840 }
 0x234   : > { %v943_v6 = vsel %vm916_vm2, %v910_v37, %v841_v43  ;;  %v2216_v60 = vpop.permute.xlu0 %2215  ;;  %10659 = vmatprep.subr.bf16.mxu1 %v10658_v42 }
 0x235   : > { %10057 = vmatprep.mubr.msk.f32.mxu1 %vm1389_vm3, %v943_v6  ;;  %v2412_v9 = vsel %vm422_vm0, %v12519_v54, %v2216_v60  ;;  %10661 = vmatpush3.bf16.msra.mxu1 %v10658_v42 }
 0x237   : > { %v2342_v11 = vpop.permute.xlu1 %2341 }
 0x238   : > { %v2443_v62 = vsel %vm916_vm2, %v2411_v53, %v2342_v11  ;;  %v843_v19 = vpop.permute.xlu0 %842 }
 0x239   : > { %10129 = vmatprep.mubr.msk.f32.mxu0 %vm1389_vm3, %v2443_v62  ;;  %v944_v45 = vsel %vm916_vm2, %v911_v33, %v843_v19 }
 0x23a   : > { %10058 = vmatmul.mubr.msk.f32.gmra.mrb[26].mxu1 %vm1389_vm3, %v944_v45 }
 0x23b   : > { %v2344_v28 = vpop.permute.xlu1 %2343 }
 0x23c   : > { %v2444_v18 = vsel %vm916_vm2, %v2412_v9, %v2344_v28  ;;  %v717_v58 = vpop.permute.xlu0 %716  ;;  %v2063_v9 = vld [vmem:[#allocation2 + $0x198] sm:$0xff] }
 0x23d   : > { %10130 = vmatmul.mubr.msk.f32.gmra.mrb[26].mxu0 %vm1389_vm3, %v2444_v18  ;;  %v912_v49 = vsel %vm422_vm0, %v12463_v50, %v717_v58 }
 0x23f   : > { %v2218_v56 = vpop.permute.xlu1 %2217 }
 0x240   : > { %v10092_v47 = vpop.f32.mrb[0].mxu0  ;;  %v719_v5 = vpop.permute.xlu0 %718  ;;  %v2413_v22 = vsel %vm422_vm0, %v12539_v7, %v2218_v56 }
 0x241   : > { %v10958_v39 = vadd.f32 %v10092_v47, %v12503_v15  ;;  %v2623_v30 = vpop.f32.mrb[1].mxu0  ;;  %v3772_v15 = vld [vmem:[%s15617_s3 + $0xb8] sm:$0xff]  ;;  %v913_v4 = vsel %vm422_vm0, %v12479_v55, %v719_v5 }
 0x242   : > { %v10959_v3 = vadd.f32 %v2623_v30, %v12507_v21  ;;  %v10662_v50 = vpack.c.bf16 %v3772_v15, %v3771_v32 }
 0x243   : > { %v845_v51 = vpop.permute.xlu1 %844  ;;  %v2822_v27 = vadd.f32 %v10958_v39, %v12740_v48 }
 0x244   : > { %v945_v16 = vsel %vm916_vm2, %v912_v49, %v845_v51  ;;  %v2821_v36 = vadd.f32 %v10959_v3, %v12740_v48  ;;  %v2220_v43 = vpop.permute.xlu0 %2219  ;;  %10663 = vmatprep.subr.bf16.mxu1 %v10662_v50 }
 0x245   : > { %10060 = vmatprep.mubr.msk.f32.mxu1 %vm1389_vm3, %v945_v16  ;;  %v2854_v21 = vmax.f32 %v2822_v27, 0.0  ;;  %10665 = vmatpush3.bf16.msra.mxu1 %v10662_v50  ;;  %v2414_v8 = vsel %vm422_vm0, %v12559_v17, %v2220_v43 }
 0x246   : > { %v2853_v52 = vmax.f32 %v2821_v36, 0.0 }
 0x247   : > { %v2346_v37 = vpop.permute.xlu1 %2345  ;;  %2886 = vst.msk [vmem:[#allocation2 + $0x21] sm:$0xff] %vm422_vm0, %v2854_v21 }
 0x248   : > { %v2445_v29 = vsel %vm916_vm2, %v2413_v22, %v2346_v37  ;;  %2885 = vst.msk [vmem:[#allocation2 + $0x19] sm:$0xff] %vm422_vm0, %v2853_v52  ;;  %v847_v6 = vpop.permute.xlu0 %846 }
 0x249   : > { %10132 = vmatprep.mubr.msk.f32.mxu0 %vm1389_vm3, %v2445_v29  ;;  %v946_v53 = vsel %vm916_vm2, %v913_v4, %v847_v6 }
 0x24a   : > { %10061 = vmatmul.mubr.msk.f32.gmra.mrb[28].mxu1 %vm1389_vm3, %v946_v53 }
 0x24b   : > { %v2348_v7 = vpop.permute.xlu1 %2347 }
 0x24c   : > { %v2446_v35 = vsel %vm916_vm2, %v2414_v8, %v2348_v7  ;;  %v721_v60 = vpop.permute.xlu0 %720 }
 0x24d   : > { %10133 = vmatmul.mubr.msk.f32.gmra.mrb[28].mxu0 %vm1389_vm3, %v2446_v35  ;;  %v914_v34 = vsel %vm422_vm0, %v12499_v46, %v721_v60 }
 0x24e   : > { %v12770_v61 = vld [vmem:[#allocation2 + $0x21] sm:$0xff] }
 0x24f   : > { %v2222_v11 = vpop.permute.xlu1 %2221  ;;  %3475 = vrot.lane.b32.xlu1 %v12770_v61, %s11329_s21  ;;  %v12774_v55 = vld [vmem:[#allocation2 + $0x19] sm:$0xff]  ;;  %v12782_v33 = vld [vmem:[#allocation2 + $0x22] sm:$0xff] }
 0x250   : > { %3473 = vrot.lane.b32.xlu0 %v12774_v55, %s11329_s21  ;;  %v10095_v17 = vpop.f32.mrb[2].mxu0  ;;  %v723_v25 = vpop.permute.xlu0 %722  ;;  %v12788_v18 = vld [vmem:[#allocation2 + $0x1a] sm:$0xff] }
 0x251   : > { %v10960_v40 = vadd.f32 %v10095_v17, %v12541_v57  ;;  %v2633_v62 = vpop.f32.mrb[3].mxu0  ;;  %v915_v42 = vsel %vm422_vm0, %v12519_v54, %v723_v25 }
 0x252   : > { %v10961_v12 = vadd.f32 %v2633_v62, %v12547_v26  ;;  %v2415_v26 = vsel %vm422_vm0, %v2063_v9, %v2222_v11 }
 0x253   : > { %v849_v0 = vpop.permute.xlu1 %848  ;;  %v2824_v28 = vadd.f32 %v10960_v40, %v12740_v48  ;;  %3603 = vrot.lane.b32.xlu1 %v12782_v33, %s11330_s13 }
 0x254   : > { %v947_v19 = vsel %vm916_vm2, %v914_v34, %v849_v0  ;;  %v2823_v57 = vadd.f32 %v10961_v12, %v12740_v48  ;;  %3601 = vrot.lane.b32.xlu0 %v12788_v18, %s11330_s13  ;;  %v2224_v58 = vpop.permute.xlu0 %2223 }
 0x255   : > { %10063 = vmatprep.mubr.msk.f32.mxu1 %vm1389_vm3, %v947_v19  ;;  %v2856_v46 = vmax.f32 %v2824_v28, 0.0  ;;  %v2416_v47 = vsel %vm422_vm0, %v2064_v14, %v2224_v58 }
 0x256   : > { %v2855_v45 = vmax.f32 %v2823_v57, 0.0 }
 0x257   : > { %v2350_v56 = vpop.permute.xlu1 %2349  ;;  %2888 = vst.msk [vmem:[#allocation2 + $0x39] sm:$0xff] %vm422_vm0, %v2856_v46 }
 0x258   : > { %v2447_v38 = vsel %vm916_vm2, %v2415_v26, %v2350_v56  ;;  %2887 = vst.msk [vmem:[#allocation2 + $0x31] sm:$0xff] %vm422_vm0, %v2855_v45  ;;  %v851_v30 = vpop.permute.xlu0 %850 }
 0x259   : > { %10135 = vmatprep.mubr.msk.f32.mxu0 %vm1389_vm3, %v2447_v38  ;;  %v948_v3 = vsel %vm916_vm2, %v915_v42, %v851_v30 }
 0x25a   : > { %10064 = vmatmul.mubr.msk.f32.gmra.mrb[30].mxu1 %vm1389_vm3, %v948_v3 }
 0x25b   : > { %v2352_v39 = vpop.permute.xlu1 %2351 }
 0x25c   : > { %v2448_v49 = vsel %vm916_vm2, %v2416_v47, %v2352_v39 }
 0x25d   : > { %10136 = vmatmul.mubr.msk.f32.gmra.mrb[30].mxu0 %vm1389_vm3, %v2448_v49 }
 0x25e   : > { %v12806_v51 = vld [vmem:[#allocation2 + $0x39] sm:$0xff] }
 0x25f   : > { %3479 = vrot.lane.b32.xlu1 %v12806_v51, %s11329_s21  ;;  %v12810_v5 = vld [vmem:[#allocation2 + $0x31] sm:$0xff]  ;;  %v12816_v15 = vld [vmem:[#allocation2 + $0x3a] sm:$0xff] }
 0x260   : > { %3477 = vrot.lane.b32.xlu0 %v12810_v5, %s11329_s21  ;;  %v10098_v54 = vpop.f32.mrb[4].mxu0  ;;  %v12821_v50 = vld [vmem:[#allocation2 + $0x32] sm:$0xff] }
 0x261   : > { %v10962_v27 = vadd.f32 %v10098_v54, %v12578_v23  ;;  %v2643_v16 = vpop.f32.mrb[5].mxu0 }
 0x262   : > { %v10963_v32 = vadd.f32 %v2643_v16, %v12584_v44 }
 0x263   : > { %v2826_v36 = vadd.f32 %v10962_v27, %v12740_v48  ;;  %3607 = vrot.lane.b32.xlu1 %v12816_v15, %s11330_s13 }
 0x264   : > { %v2825_v21 = vadd.f32 %v10963_v32, %v12740_v48  ;;  %3605 = vrot.lane.b32.xlu0 %v12821_v50, %s11330_s13 }
 0x265   : > { %v2858_v22 = vmax.f32 %v2826_v36, 0.0 }
 0x266   : > { %v2857_v52 = vmax.f32 %v2825_v21, 0.0 }
 0x267   : > { %2890 = vst.msk [vmem:[#allocation2 + $0x51] sm:$0xff] %vm422_vm0, %v2858_v22 }
 0x268   : > { %2889 = vst.msk [vmem:[#allocation2 + $0x49] sm:$0xff] %vm422_vm0, %v2857_v52 }
 0x26e   : > { %v12828_v23 = vld [vmem:[#allocation2 + $0x51] sm:$0xff] }
 0x26f   : > { %3483 = vrot.lane.b32.xlu1 %v12828_v23, %s11329_s21  ;;  %v12832_v44 = vld [vmem:[#allocation2 + $0x49] sm:$0xff]  ;;  %v12838_v8 = vld [vmem:[#allocation2 + $0x52] sm:$0xff] }
 0x270   : > { %3481 = vrot.lane.b32.xlu0 %v12832_v44, %s11329_s21  ;;  %v10101_v37 = vpop.f32.mrb[6].mxu0  ;;  %v12843_v6 = vld [vmem:[#allocation2 + $0x4a] sm:$0xff] }
 0x271   : > { %v10964_v43 = vadd.f32 %v10101_v37, %v12607_v1  ;;  %v2653_v29 = vpop.f32.mrb[7].mxu0 }
 0x272   : > { %v10965_v4 = vadd.f32 %v2653_v29, %v12609_v41 }
 0x273   : > { %v2828_v7 = vadd.f32 %v10964_v43, %v12740_v48  ;;  %3611 = vrot.lane.b32.xlu1 %v12838_v8, %s11330_s13 }
 0x274   : > { %v2827_v35 = vadd.f32 %v10965_v4, %v12740_v48  ;;  %3609 = vrot.lane.b32.xlu0 %v12843_v6, %s11330_s13 }
 0x275   : > { %v2860_v53 = vmax.f32 %v2828_v7, 0.0 }
 0x276   : > { %v2859_v11 = vmax.f32 %v2827_v35, 0.0 }
 0x277   : > { %2892 = vst.msk [vmem:[#allocation2 + $0x69] sm:$0xff] %vm422_vm0, %v2860_v53 }
 0x278   : > { %2891 = vst.msk [vmem:[#allocation2 + $0x61] sm:$0xff] %vm422_vm0, %v2859_v11 }
 0x27e   : > { %v12850_v1 = vld [vmem:[#allocation2 + $0x69] sm:$0xff] }
 0x27f   : > { %3487 = vrot.lane.b32.xlu1 %v12850_v1, %s11329_s21  ;;  %v12854_v41 = vld [vmem:[#allocation2 + $0x61] sm:$0xff]  ;;  %v12860_v34 = vld [vmem:[#allocation2 + $0x6a] sm:$0xff] }
 0x280   : > { %3485 = vrot.lane.b32.xlu0 %v12854_v41, %s11329_s21  ;;  %v10104_v60 = vpop.f32.mrb[8].mxu0  ;;  %v12865_v0 = vld [vmem:[#allocation2 + $0x62] sm:$0xff] }
 0x281   : > { %v10966_v17 = vadd.f32 %v10104_v60, %v12627_v10  ;;  %v2663_v40 = vpop.f32.mrb[9].mxu0 }
 0x282   : > { %v10967_v62 = vadd.f32 %v2663_v40, %v12629_v63 }
 0x283   : > { %v2830_v12 = vadd.f32 %v10966_v17, %v12740_v48  ;;  %3615 = vrot.lane.b32.xlu1 %v12860_v34, %s11330_s13 }
 0x284   : > { %v2829_v25 = vadd.f32 %v10967_v62, %v12740_v48  ;;  %3613 = vrot.lane.b32.xlu0 %v12865_v0, %s11330_s13 }
 0x285   : > { %v2862_v9 = vmax.f32 %v2830_v12, 0.0 }
 0x286   : > { %v2861_v28 = vmax.f32 %v2829_v25, 0.0 }
 0x287   : > { %2894 = vst.msk [vmem:[#allocation2 + $0x81] sm:$0xff] %vm422_vm0, %v2862_v9 }
 0x288   : > { %2893 = vst.msk [vmem:[#allocation2 + $0x79] sm:$0xff] %vm422_vm0, %v2861_v28 }
 0x28e   : > { %v12872_v10 = vld [vmem:[#allocation2 + $0x81] sm:$0xff] }
 0x28f   : > { %3491 = vrot.lane.b32.xlu1 %v12872_v10, %s11329_s21  ;;  %v12876_v63 = vld [vmem:[#allocation2 + $0x79] sm:$0xff]  ;;  %v12882_v45 = vld [vmem:[#allocation2 + $0x82] sm:$0xff] }
 0x290   : > { %3489 = vrot.lane.b32.xlu0 %v12876_v63, %s11329_s21  ;;  %v10107_v19 = vpop.f32.mrb[10].mxu0  ;;  %v12887_v58 = vld [vmem:[#allocation2 + $0x7a] sm:$0xff] }
 0x291   : > { %v10968_v57 = vadd.f32 %v10107_v19, %v12647_v24  ;;  %v2673_v46 = vpop.f32.mrb[11].mxu0 }
 0x292   : > { %v10969_v26 = vadd.f32 %v2673_v46, %v12649_v59 }
 0x293   : > { %v2832_v56 = vadd.f32 %v10968_v57, %v12740_v48  ;;  %3619 = vrot.lane.b32.xlu1 %v12882_v45, %s11330_s13 }
 0x294   : > { %v2831_v38 = vadd.f32 %v10969_v26, %v12740_v48  ;;  %3617 = vrot.lane.b32.xlu0 %v12887_v58, %s11330_s13 }
 0x295   : > { %v2864_v14 = vmax.f32 %v2832_v56, 0.0 }
 0x296   : > { %v2863_v42 = vmax.f32 %v2831_v38, 0.0  ;;  %v3345_v38 = vld [vmem:[#allocation2 + $0x18] sm:$0xff] }
 0x297   : > { %2896 = vst.msk [vmem:[#allocation2 + $0x99] sm:$0xff] %vm422_vm0, %v2864_v14 }
 0x298   : > { %2895 = vst.msk [vmem:[#allocation2 + $0x91] sm:$0xff] %vm422_vm0, %v2863_v42  ;;  %v3346_v42 = vld [vmem:[#allocation2 + $0x20] sm:$0xff] }
 0x29e   : > { %v12894_v24 = vld [vmem:[#allocation2 + $0x99] sm:$0xff] }
 0x29f   : > { %3495 = vrot.lane.b32.xlu1 %v12894_v24, %s11329_s21  ;;  %v12898_v59 = vld [vmem:[#allocation2 + $0x91] sm:$0xff]  ;;  %v12904_v3 = vld [vmem:[#allocation2 + $0x9a] sm:$0xff] }
 0x2a0   : > { %3493 = vrot.lane.b32.xlu0 %v12898_v59, %s11329_s21  ;;  %v10110_v47 = vpop.f32.mrb[12].mxu0  ;;  %v12909_v27 = vld [vmem:[#allocation2 + $0x92] sm:$0xff] }
 0x2a1   : > { %v10970_v39 = vadd.f32 %v10110_v47, %v12667_v2  ;;  %v2683_v30 = vpop.f32.mrb[13].mxu0 }
 0x2a2   : > { %v10971_v49 = vadd.f32 %v2683_v30, %v12669_v31 }
 0x2a3   : > { %v2834_v54 = vadd.f32 %v10970_v39, %v12740_v48  ;;  %3623 = vrot.lane.b32.xlu1 %v12904_v3, %s11330_s13 }
 0x2a4   : > { %v2833_v16 = vadd.f32 %v10971_v49, %v12740_v48  ;;  %3621 = vrot.lane.b32.xlu0 %v12909_v27, %s11330_s13 }
 0x2a5   : > { %v2866_v32 = vmax.f32 %v2834_v54, 0.0 }
 0x2a6   : > { %v2865_v36 = vmax.f32 %v2833_v16, 0.0 }
 0x2a7   : > { %2898 = vst.msk [vmem:[#allocation2 + $0xb1] sm:$0xff] %vm422_vm0, %v2866_v32 }
 0x2a8   : > { %2897 = vst.msk [vmem:[#allocation2 + $0xa9] sm:$0xff] %vm422_vm0, %v2865_v36 }
 0x2ae   : > { %v12916_v2 = vld [vmem:[#allocation2 + $0xb1] sm:$0xff] }
 0x2af   : > { %3499 = vrot.lane.b32.xlu1 %v12916_v2, %s11329_s21  ;;  %v12920_v31 = vld [vmem:[#allocation2 + $0xa9] sm:$0xff]  ;;  %v12926_v43 = vld [vmem:[#allocation2 + $0xb2] sm:$0xff] }
 0x2b0   : > { %3497 = vrot.lane.b32.xlu0 %v12920_v31, %s11329_s21  ;;  %v10113_v21 = vpop.f32.mrb[14].mxu0  ;;  %v12931_v4 = vld [vmem:[#allocation2 + $0xaa] sm:$0xff] }
 0x2b1   : > { %v10972_v22 = vadd.f32 %v10113_v21, %v12693_v13  ;;  %v2693_v52 = vpop.f32.mrb[15].mxu0 }
 0x2b2   : > { %v10973_v37 = vadd.f32 %v2693_v52, %v12695_v20 }
 0x2b3   : > { %v2836_v29 = vadd.f32 %v10972_v22, %v12740_v48  ;;  %3627 = vrot.lane.b32.xlu1 %v12926_v43, %s11330_s13 }
 0x2b4   : > { %v2835_v7 = vadd.f32 %v10973_v37, %v12740_v48  ;;  %3625 = vrot.lane.b32.xlu0 %v12931_v4, %s11330_s13 }
 0x2b5   : > { %v2868_v35 = vmax.f32 %v2836_v29, 0.0 }
 0x2b6   : > { %v2867_v53 = vmax.f32 %v2835_v7, 0.0 }
 0x2b7   : > { %2900 = vst.msk [vmem:[#allocation2 + $0xc9] sm:$0xff] %vm422_vm0, %v2868_v35 }
 0x2b8   : > { %2899 = vst.msk [vmem:[#allocation2 + $0xc1] sm:$0xff] %vm422_vm0, %v2867_v53 }
 0x2bd   : > { %v10044_v20 = vpop.f32.mrb[16].mxu1 }
 0x2be   : > { %v12938_v13 = vld [vmem:[#allocation2 + $0xc9] sm:$0xff]  ;;  %v1953_v40 = vpop.f32.mrb[17].mxu1 }
 0x2bf   : > { %3503 = vrot.lane.b32.xlu1 %v12938_v13, %s11329_s21  ;;  %v12942_v11 = vld [vmem:[#allocation2 + $0xc1] sm:$0xff]  ;;  %v12947_v19 = vld [vmem:[#allocation2 + $0xca] sm:$0xff] }
 0x2c0   : > { %v10116_v60 = vpop.f32.mrb[16].mxu0  ;;  %3501 = vrot.lane.b32.xlu0 %v12942_v11, %s11329_s21  ;;  %v12952_v46 = vld [vmem:[#allocation2 + $0xc2] sm:$0xff] }
 0x2c1   : > { %v10974_v17 = vadd.f32 %v10116_v60, %v10044_v20  ;;  %v2703_v62 = vpop.f32.mrb[17].mxu0  ;;  %v3476_v12 = vpop.permute.xlu1 %3475 }
 0x2c2   : > { %v10975_v25 = vadd.f32 %v2703_v62, %v1953_v40  ;;  %v3474_v28 = vpop.permute.xlu0 %3473  ;;  %v3698_v30 = vsel %vm422_vm0, %v3346_v42, %v3476_v12  ;;  %v12982_v12 = vld [vmem:[#allocation2 + $0x30] sm:$0xff] }
 0x2c3   : > { %v2838_v9 = vadd.f32 %v10974_v17, %v12740_v48  ;;  %3631 = vrot.lane.b32.xlu1 %v12947_v19, %s11330_s13  ;;  %v3697_v47 = vsel %vm422_vm0, %v3345_v38, %v3474_v28  ;;  %15669 = vst [vmem:[#allocation11_spill] sm:$0xff] %v12982_v12 }
 0x2c4   : > { %v2837_v57 = vadd.f32 %v10975_v25, %v12740_v48  ;;  %3629 = vrot.lane.b32.xlu0 %v12952_v46, %s11330_s13 }
 0x2c5   : > { %v2870_v26 = vmax.f32 %v2838_v9, 0.0  ;;  %v3604_v14 = vpop.permute.xlu1 %3603  ;;  %v12985_v9 = vld [vmem:[#allocation2 + $0x38] sm:$0xff] }
 0x2c6   : > { %v2869_v56 = vmax.f32 %v2837_v57, 0.0  ;;  %v3602_v39 = vpop.permute.xlu0 %3601  ;;  %v3730_v54 = vsel %vm916_vm2, %v3698_v30, %v3604_v14  ;;  %15670 = vst [vmem:[#allocation12_spill] sm:$0xff] %v12985_v9 }
 0x2c7   : > { %2902 = vst.msk [vmem:[#allocation2 + $0xe1] sm:$0xff] %vm422_vm0, %v2870_v26  ;;  %v3729_v49 = vsel %vm916_vm2, %v3697_v47, %v3602_v39 }
 0x2c8   : > { %2901 = vst.msk [vmem:[#allocation2 + $0xd9] sm:$0xff] %vm422_vm0, %v2869_v56  ;;  %10162 = vmatprep.mubr.msk.f32.mxu1 %vm1389_vm3, %v3729_v49 }
 0x2c9   : > { %10163 = vmatmul.mubr.msk.f32.vlgmr.msra.gmra.mrb[32].mxu1 %vm1389_vm3, %v3730_v54 }
 0x2cd   : > { %v10047_v36 = vpop.f32.mrb[18].mxu1 }
 0x2ce   : > { %v12964_v16 = vld [vmem:[#allocation2 + $0xe1] sm:$0xff]  ;;  %v1963_v52 = vpop.f32.mrb[19].mxu1 }
 0x2cf   : > { %3507 = vrot.lane.b32.xlu1 %v12964_v16, %s11329_s21  ;;  %v12968_v32 = vld [vmem:[#allocation2 + $0xd9] sm:$0xff]  ;;  %v12972_v35 = vld [vmem:[#allocation2 + $0xe2] sm:$0xff] }
 0x2d0   : > { %3505 = vrot.lane.b32.xlu0 %v12968_v32, %s11329_s21  ;;  %v10119_v21 = vpop.f32.mrb[18].mxu0  ;;  %v12977_v60 = vld [vmem:[#allocation2 + $0xda] sm:$0xff] }
 0x2d1   : > { %v10976_v22 = vadd.f32 %v10119_v21, %v10047_v36  ;;  %v2713_v37 = vpop.f32.mrb[19].mxu0  ;;  %v3480_v29 = vpop.permute.xlu1 %3479 }
 0x2d2   : > { %v10977_v7 = vadd.f32 %v2713_v37, %v1963_v52  ;;  %v3478_v20 = vpop.permute.xlu0 %3477  ;;  %v3700_v26 = vsel %vm422_vm0, %v12985_v9, %v3480_v29 }
 0x2d3   : > { %v2840_v53 = vadd.f32 %v10976_v22, %v12740_v48  ;;  %3635 = vrot.lane.b32.xlu1 %v12972_v35, %s11330_s13  ;;  %v3699_v28 = vsel %vm422_vm0, %v12982_v12, %v3478_v20  ;;  %v13110_v12 = vld [vmem:[#allocation2 + $0x90] sm:$0xff] }
 0x2d4   : > { %v2839_v17 = vadd.f32 %v10977_v7, %v12740_v48  ;;  %3633 = vrot.lane.b32.xlu0 %v12977_v60, %s11330_s13  ;;  %15681 = vst [vmem:[#allocation23_spill] sm:$0xff] %v13110_v12 }
 0x2d5   : > { %v2872_v40 = vmax.f32 %v2840_v53, 0.0  ;;  %v3608_v25 = vpop.permute.xlu1 %3607 }
 0x2d6   : > { %v2871_v62 = vmax.f32 %v2839_v17, 0.0  ;;  %v3606_v57 = vpop.permute.xlu0 %3605  ;;  %v3732_v38 = vsel %vm916_vm2, %v3700_v26, %v3608_v25  ;;  %v13014_v17 = vld [vmem:[#allocation2 + $0x48] sm:$0xff] }
 0x2d7   : > { %2904 = vst.msk [vmem:[#allocation2 + $0xf9] sm:$0xff] %vm422_vm0, %v2872_v40  ;;  %v3731_v56 = vsel %vm916_vm2, %v3699_v28, %v3606_v57  ;;  %15671 = vst [vmem:[#allocation13_spill] sm:$0xff] %v13014_v17 }
 0x2d8   : > { %2903 = vst.msk [vmem:[#allocation2 + $0xf1] sm:$0xff] %vm422_vm0, %v2871_v62  ;;  %10165 = vmatprep.mubr.msk.f32.mxu1 %vm1389_vm3, %v3731_v56  ;;  %v13017_v62 = vld [vmem:[#allocation2 + $0x50] sm:$0xff] }
 0x2d9   : > { %10166 = vmatmul.mubr.msk.f32.gmra.mrb[34].mxu1 %vm1389_vm3, %v3732_v38  ;;  %15672 = vst [vmem:[#allocation14_spill] sm:$0xff] %v13017_v62 }
 0x2dd   : > { %v10050_v47 = vpop.f32.mrb[20].mxu1 }
 0x2de   : > { %v12996_v14 = vld [vmem:[#allocation2 + $0xf9] sm:$0xff]  ;;  %v1973_v49 = vpop.f32.mrb[21].mxu1 }
 0x2df   : > { %3511 = vrot.lane.b32.xlu1 %v12996_v14, %s11329_s21  ;;  %v13000_v42 = vld [vmem:[#allocation2 + $0xf1] sm:$0xff]  ;;  %v13004_v22 = vld [vmem:[#allocation2 + $0xfa] sm:$0xff] }
 0x2e0   : > { %3509 = vrot.lane.b32.xlu0 %v13000_v42, %s11329_s21  ;;  %v10122_v39 = vpop.f32.mrb[20].mxu0  ;;  %v13009_v29 = vld [vmem:[#allocation2 + $0xf2] sm:$0xff] }
 0x2e1   : > { %v10978_v30 = vadd.f32 %v10122_v39, %v10050_v47  ;;  %v2723_v54 = vpop.f32.mrb[21].mxu0  ;;  %v3484_v36 = vpop.permute.xlu1 %3483 }
 0x2e2   : > { %v10979_v21 = vadd.f32 %v2723_v54, %v1973_v49  ;;  %v3482_v37 = vpop.permute.xlu0 %3481  ;;  %v3702_v57 = vsel %vm422_vm0, %v13017_v62, %v3484_v36 }
 0x2e3   : > { %v2842_v52 = vadd.f32 %v10978_v30, %v12740_v48  ;;  %3639 = vrot.lane.b32.xlu1 %v13004_v22, %s11330_s13  ;;  %v3701_v25 = vsel %vm422_vm0, %v13014_v17, %v3482_v37 }
 0x2e4   : > { %v2841_v7 = vadd.f32 %v10979_v21, %v12740_v48  ;;  %3637 = vrot.lane.b32.xlu0 %v13009_v29, %s11330_s13 }
 0x2e5   : > { %v2874_v53 = vmax.f32 %v2842_v52, 0.0  ;;  %v3612_v40 = vpop.permute.xlu1 %3611 }
 0x2e6   : > { %v2873_v20 = vmax.f32 %v2841_v7, 0.0  ;;  %v3610_v28 = vpop.permute.xlu0 %3609  ;;  %v3734_v56 = vsel %vm916_vm2, %v3702_v57, %v3612_v40  ;;  %v13046_v57 = vld [vmem:[#allocation2 + $0x60] sm:$0xff] }
 0x2e7   : > { %2906 = vst.msk [vmem:[#allocation2 + $0x111] sm:$0xff] %vm422_vm0, %v2874_v53  ;;  %v3733_v26 = vsel %vm916_vm2, %v3701_v25, %v3610_v28  ;;  %15673 = vst [vmem:[#allocation15_spill] sm:$0xff] %v13046_v57 }
 0x2e8   : > { %2905 = vst.msk [vmem:[#allocation2 + $0x109] sm:$0xff] %vm422_vm0, %v2873_v20  ;;  %10168 = vmatprep.mubr.msk.f32.mxu1 %vm1389_vm3, %v3733_v26 }
 0x2e9   : > { %10169 = vmatmul.mubr.msk.f32.gmra.mrb[36].mxu1 %vm1389_vm3, %v3734_v56  ;;  %v13049_v56 = vld [vmem:[#allocation2 + $0x68] sm:$0xff] }
 0x2ea   : > { %15674 = vst [vmem:[#allocation16_spill] sm:$0xff] %v13049_v56 }
 0x2ed   : > { %v10053_v39 = vpop.f32.mrb[22].mxu1 }
 0x2ee   : > { %v13028_v38 = vld [vmem:[#allocation2 + $0x111] sm:$0xff]  ;;  %v1983_v54 = vpop.f32.mrb[23].mxu1 }
 0x2ef   : > { %3515 = vrot.lane.b32.xlu1 %v13028_v38, %s11329_s21  ;;  %v13032_v47 = vld [vmem:[#allocation2 + $0x109] sm:$0xff]  ;;  %v13036_v37 = vld [vmem:[#allocation2 + $0x112] sm:$0xff] }
 0x2f0   : > { %3513 = vrot.lane.b32.xlu0 %v13032_v47, %s11329_s21  ;;  %v10125_v30 = vpop.f32.mrb[22].mxu0  ;;  %v13041_v20 = vld [vmem:[#allocation2 + $0x10a] sm:$0xff] }
 0x2f1   : > { %v10980_v49 = vadd.f32 %v10125_v30, %v10053_v39  ;;  %v2733_v36 = vpop.f32.mrb[23].mxu0  ;;  %v3488_v21 = vpop.permute.xlu1 %3487 }
 0x2f2   : > { %v10981_v52 = vadd.f32 %v2733_v36, %v1983_v54  ;;  %v3486_v53 = vpop.permute.xlu0 %3485 }
 0x2f3   : > { %v2844_v7 = vadd.f32 %v10980_v49, %v12740_v48  ;;  %3643 = vrot.lane.b32.xlu1 %v13036_v37, %s11330_s13  ;;  %v3703_v39 = vsel %vm422_vm0, %v13046_v57, %v3486_v53  ;;  %v3704_v49 = vsel %vm422_vm0, %v13049_v56, %v3488_v21  ;;  %v13078_v57 = vld [vmem:[#allocation2 + $0x78] sm:$0xff] }
 0x2f4   : > { %v2843_v40 = vadd.f32 %v10981_v52, %v12740_v48  ;;  %3641 = vrot.lane.b32.xlu0 %v13041_v20, %s11330_s13  ;;  %15675 = vst [vmem:[#allocation17_spill] sm:$0xff] %v13078_v57 }
 0x2f5   : > { %v2876_v25 = vmax.f32 %v2844_v7, 0.0  ;;  %v3616_v26 = vpop.permute.xlu1 %3615 }
 0x2f6   : > { %v2875_v28 = vmax.f32 %v2843_v40, 0.0  ;;  %v3614_v30 = vpop.permute.xlu0 %3613  ;;  %v3736_v36 = vsel %vm916_vm2, %v3704_v49, %v3616_v26 }
 0x2f7   : > { %2908 = vst.msk [vmem:[#allocation2 + $0x129] sm:$0xff] %vm422_vm0, %v2876_v25  ;;  %v3735_v54 = vsel %vm916_vm2, %v3703_v39, %v3614_v30 }
 0x2f8   : > { %2907 = vst.msk [vmem:[#allocation2 + $0x121] sm:$0xff] %vm422_vm0, %v2875_v28  ;;  %10171 = vmatprep.mubr.msk.f32.mxu1 %vm1389_vm3, %v3735_v54 }
 0x2f9   : > { %10172 = vmatmul.mubr.msk.f32.gmra.mrb[38].mxu1 %vm1389_vm3, %v3736_v36 }
 0x2fd   : > { %v10056_v53 = vpop.f32.mrb[24].mxu1 }
 0x2fe   : > { %v13060_v52 = vld [vmem:[#allocation2 + $0x129] sm:$0xff]  ;;  %v1993_v25 = vpop.f32.mrb[25].mxu1 }
 0x2ff   : > { %3519 = vrot.lane.b32.xlu1 %v13060_v52, %s11329_s21  ;;  %v13064_v7 = vld [vmem:[#allocation2 + $0x121] sm:$0xff]  ;;  %v13068_v30 = vld [vmem:[#allocation2 + $0x12a] sm:$0xff] }
 0x300   : > { %3517 = vrot.lane.b32.xlu0 %v13064_v7, %s11329_s21  ;;  %v10128_v21 = vpop.f32.mrb[24].mxu0  ;;  %v13073_v36 = vld [vmem:[#allocation2 + $0x122] sm:$0xff] }
 0x301   : > { %v10982_v40 = vadd.f32 %v10128_v21, %v10056_v53  ;;  %v2743_v28 = vpop.f32.mrb[25].mxu0  ;;  %v3492_v26 = vpop.permute.xlu1 %3491 }
 0x302   : > { %v10983_v39 = vadd.f32 %v2743_v28, %v1993_v25  ;;  %v3490_v54 = vpop.permute.xlu0 %3489  ;;  %v13081_v28 = vld [vmem:[#allocation2 + $0x80] sm:$0xff] }
 0x303   : > { %v2846_v49 = vadd.f32 %v10982_v40, %v12740_v48  ;;  %3647 = vrot.lane.b32.xlu1 %v13068_v30, %s11330_s13  ;;  %15676 = vst [vmem:[#allocation18_spill] sm:$0xff] %v13081_v28  ;;  %v3705_v40 = vsel %vm422_vm0, %v13078_v57, %v3490_v54  ;;  %v3706_v17 = vsel %vm422_vm0, %v13081_v28, %v3492_v26 }
 0x304   : > { %v2845_v56 = vadd.f32 %v10983_v39, %v12740_v48  ;;  %3645 = vrot.lane.b32.xlu0 %v13073_v36, %s11330_s13 }
 0x305   : > { %v2878_v53 = vmax.f32 %v2846_v49, 0.0  ;;  %v3620_v25 = vpop.permute.xlu1 %3619 }
 0x306   : > { %v2877_v21 = vmax.f32 %v2845_v56, 0.0  ;;  %v3618_v62 = vpop.permute.xlu0 %3617  ;;  %v3738_v56 = vsel %vm916_vm2, %v3706_v17, %v3620_v25 }
 0x307   : > { %2910 = vst.msk [vmem:[#allocation2 + $0x141] sm:$0xff] %vm422_vm0, %v2878_v53  ;;  %v3737_v39 = vsel %vm916_vm2, %v3705_v40, %v3618_v62 }
 0x308   : > { %2909 = vst.msk [vmem:[#allocation2 + $0x139] sm:$0xff] %vm422_vm0, %v2877_v21  ;;  %10174 = vmatprep.mubr.msk.f32.mxu1 %vm1389_vm3, %v3737_v39 }
 0x309   : > { %10175 = vmatmul.mubr.msk.f32.gmra.mrb[40].mxu1 %vm1389_vm3, %v3738_v56 }
 0x30d   : > { %v10059_v53 = vpop.f32.mrb[26].mxu1 }
 0x30e   : > { %v13092_v49 = vld [vmem:[#allocation2 + $0x141] sm:$0xff]  ;;  %v2003_v62 = vpop.f32.mrb[27].mxu1 }
 0x30f   : > { %15677 = vst [vmem:[#allocation19_spill] sm:$0xff] %v13092_v49  ;;  %3523 = vrot.lane.b32.xlu1 %v13092_v49, %s11329_s21  ;;  %v13096_v54 = vld [vmem:[#allocation2 + $0x139] sm:$0xff]  ;;  %v13100_v39 = vld [vmem:[#allocation2 + $0x142] sm:$0xff] }
 0x310   : > { %15678 = vst [vmem:[#allocation20_spill] sm:$0xff] %v13096_v54  ;;  %3521 = vrot.lane.b32.xlu0 %v13096_v54, %s11329_s21  ;;  %v10131_v26 = vpop.f32.mrb[26].mxu0  ;;  %15679 = vst [vmem:[#allocation21_spill] sm:$0xff] %v13100_v39  ;;  %v13105_v57 = vld [vmem:[#allocation2 + $0x13a] sm:$0xff] }
 0x311   : > { %v10984_v21 = vadd.f32 %v10131_v26, %v10059_v53  ;;  %v2753_v40 = vpop.f32.mrb[27].mxu0  ;;  %v3496_v17 = vpop.permute.xlu1 %3495  ;;  %15680 = vst [vmem:[#allocation22_spill] sm:$0xff] %v13105_v57 }
 0x312   : > { %v10985_v25 = vadd.f32 %v2753_v40, %v2003_v62  ;;  %v3494_v28 = vpop.permute.xlu0 %3493  ;;  %v13113_v40 = vld [vmem:[#allocation2 + $0x98] sm:$0xff] }
 0x313   : > { %v2848_v56 = vadd.f32 %v10984_v21, %v12740_v48  ;;  %3651 = vrot.lane.b32.xlu1 %v13100_v39, %s11330_s13  ;;  %15682 = vst [vmem:[#allocation24_spill] sm:$0xff] %v13113_v40  ;;  %v3707_v21 = vsel %vm422_vm0, %v13110_v12, %v3494_v28  ;;  %v3708_v54 = vsel %vm422_vm0, %v13113_v40, %v3496_v17 }
 0x314   : > { %v2847_v9 = vadd.f32 %v10985_v25, %v12740_v48  ;;  %3649 = vrot.lane.b32.xlu0 %v13105_v57, %s11330_s13 }
 0x315   : > { %v2880_v53 = vmax.f32 %v2848_v56, 0.0  ;;  %v3624_v62 = vpop.permute.xlu1 %3623 }
 0x316   : > { %v2879_v26 = vmax.f32 %v2847_v9, 0.0  ;;  %v3622_v39 = vpop.permute.xlu0 %3621  ;;  %v3740_v9 = vsel %vm916_vm2, %v3708_v54, %v3624_v62 }
 0x317   : > { %2912 = vst.msk [vmem:[#allocation2 + $0x159] sm:$0xff] %vm422_vm0, %v2880_v53  ;;  %v3739_v25 = vsel %vm916_vm2, %v3707_v21, %v3622_v39 }
 0x318   : > { %2911 = vst.msk [vmem:[#allocation2 + $0x151] sm:$0xff] %vm422_vm0, %v2879_v26  ;;  %10177 = vmatprep.mubr.msk.f32.mxu1 %vm1389_vm3, %v3739_v25 }
 0x319   : > { %10178 = vmatmul.mubr.msk.f32.gmra.mrb[42].mxu1 %vm1389_vm3, %v3740_v9 }
 0x31d   : > { %v10062_v53 = vpop.f32.mrb[28].mxu1 }
 0x31e   : > { %v13124_v56 = vld [vmem:[#allocation2 + $0x159] sm:$0xff]  ;;  %v2013_v39 = vpop.f32.mrb[29].mxu1 }
 0x31f   : > { %15683 = vst [vmem:[#allocation25_spill] sm:$0xff] %v13124_v56  ;;  %3527 = vrot.lane.b32.xlu1 %v13124_v56, %s11329_s21  ;;  %v13128_v28 = vld [vmem:[#allocation2 + $0x151] sm:$0xff]  ;;  %v13132_v25 = vld [vmem:[#allocation2 + $0x15a] sm:$0xff] }
 0x320   : > { %15684 = vst [vmem:[#allocation26_spill] sm:$0xff] %v13128_v28  ;;  %3525 = vrot.lane.b32.xlu0 %v13128_v28, %s11329_s21  ;;  %v10134_v17 = vpop.f32.mrb[28].mxu0  ;;  %15685 = vst [vmem:[#allocation27_spill] sm:$0xff] %v13132_v25  ;;  %v13137_v12 = vld [vmem:[#allocation2 + $0x152] sm:$0xff]  ;;  %v13142_v28 = vld [vmem:[#allocation2 + $0xa8] sm:$0xff] }
 0x321   : > { %v10986_v26 = vadd.f32 %v10134_v17, %v10062_v53  ;;  %v2763_v21 = vpop.f32.mrb[29].mxu0  ;;  %v3500_v54 = vpop.permute.xlu1 %3499  ;;  %15686 = vst [vmem:[#allocation28_spill] sm:$0xff] %v13137_v12  ;;  %15687 = vst [vmem:[#allocation29_spill] sm:$0xff] %v13142_v28 }
 0x322   : > { %v10987_v62 = vadd.f32 %v2763_v21, %v2013_v39  ;;  %v3498_v40 = vpop.permute.xlu0 %3497  ;;  %v13145_v21 = vld [vmem:[#allocation2 + $0xb0] sm:$0xff] }
 0x323   : > { %v2850_v9 = vadd.f32 %v10986_v26, %v12740_v48  ;;  %3655 = vrot.lane.b32.xlu1 %v13132_v25, %s11330_s13  ;;  %15688 = vst [vmem:[#allocation30_spill] sm:$0xff] %v13145_v21  ;;  %v3709_v26 = vsel %vm422_vm0, %v13142_v28, %v3498_v40  ;;  %v3710_v57 = vsel %vm422_vm0, %v13145_v21, %v3500_v54  ;;  %v3335_v54 = vld [vmem:[%s15617_s3 + $0x10] sm:$0xff] }
 0x324   : > { %v2849_v56 = vadd.f32 %v10987_v62, %v12740_v48  ;;  %3653 = vrot.lane.b32.xlu0 %v13137_v12, %s11330_s13 }
 0x325   : > { %v2882_v53 = vmax.f32 %v2850_v9, 0.0  ;;  %v3628_v39 = vpop.permute.xlu1 %3627  ;;  %v3334_v9 = vld [vmem:[%s15617_s3 + $0x8] sm:$0xff] }
 0x326   : > { %v2881_v17 = vmax.f32 %v2849_v56, 0.0  ;;  %v3626_v25 = vpop.permute.xlu0 %3625  ;;  %v3333_v56 = vld [vmem:[%s15617_s3] sm:$0xff] }
 0x327   : > { %2914 = vst.msk [vmem:[#allocation2 + $0x171] sm:$0xff] %vm422_vm0, %v2882_v53  ;;  %v3741_v62 = vsel %vm916_vm2, %v3709_v26, %v3626_v25  ;;  %v3742_v53 = vsel %vm916_vm2, %v3710_v57, %v3628_v39  ;;  %v10666_v40 = vpack.c.bf16 %v3334_v9, %v3333_v56  ;;  %v3336_v25 = vld [vmem:[%s15617_s3 + $0x18] sm:$0xff]  ;;  %v3337_v56 = vld [vmem:[%s15617_s3 + $0x20] sm:$0xff]  ;;  %v3338_v9 = vld [vmem:[%s15617_s3 + $0x28] sm:$0xff] }
 0x328   : > { %2913 = vst.msk [vmem:[#allocation2 + $0x169] sm:$0xff] %vm422_vm0, %v2881_v17  ;;  %10180 = vmatprep.mubr.msk.f32.mxu1 %vm1389_vm3, %v3741_v62  ;;  %v10670_v17 = vpack.c.bf16 %v3336_v25, %v3335_v54  ;;  %v10674_v25 = vpack.c.bf16 %v3338_v9, %v3337_v56 }
 0x329   : > { %10181 = vmatmul.mubr.msk.f32.gmra.mrb[44].mxu1 %vm1389_vm3, %v3742_v53  ;;  %10667 = vmatprep.subr.bf16.mxu1 %v10666_v40 }
 0x32a   : > { %10669 = vmatpush3.bf16.msra.mxu1 %v10666_v40 }
 0x32b   : > { %10671 = vmatprep.subr.bf16.mxu1 %v10670_v17 }
 0x32d   : > { %v10065_v39 = vpop.f32.mrb[30].mxu1 }
 0x32e   : > { %v13168_v26 = vld [vmem:[#allocation2 + $0x171] sm:$0xff]  ;;  %10673 = vmatpush3.bf16.msra.mxu1 %v10670_v17  ;;  %v2023_v40 = vpop.f32.mrb[31].mxu1 }
 0x32f   : > { %15689 = vst [vmem:[#allocation31_spill] sm:$0xff] %v13168_v26  ;;  %3531 = vrot.lane.b32.xlu1 %v13168_v26, %s11329_s21  ;;  %v13172_v57 = vld [vmem:[#allocation2 + $0x169] sm:$0xff]  ;;  %v13182_v26 = vld [vmem:[#allocation2 + $0x172] sm:$0xff]  ;;  %10675 = vmatprep.subr.bf16.mxu1 %v10674_v25 }
 0x330   : > { %15690 = vst [vmem:[#allocation32_spill] sm:$0xff] %v13172_v57  ;;  %3529 = vrot.lane.b32.xlu0 %v13172_v57, %s11329_s21  ;;  %v10137_v62 = vpop.f32.mrb[30].mxu0  ;;  %v13187_v17 = vld [vmem:[#allocation2 + $0x16a] sm:$0xff] }
 0x331   : > { %v10988_v53 = vadd.f32 %v10137_v62, %v10065_v39  ;;  %v2773_v54 = vpop.f32.mrb[31].mxu0  ;;  %v3504_v21 = vpop.permute.xlu1 %3503  ;;  %15691 = vst [vmem:[#allocation33_spill] sm:$0xff] %v13187_v17  ;;  %v3339_v39 = vld [vmem:[%s15617_s3 + $0x30] sm:$0xff]  ;;  %v3340_v62 = vld [vmem:[%s15617_s3 + $0x38] sm:$0xff] }
 0x332   : > { %v10989_v28 = vadd.f32 %v2773_v54, %v2023_v40  ;;  %v3502_v12 = vpop.permute.xlu0 %3501  ;;  %10677 = vmatpush3.bf16.msra.mxu1 %v10674_v25  ;;  %v10678_v9 = vpack.c.bf16 %v3340_v62, %v3339_v39  ;;  %v13198_v40 = vld [vmem:[#allocation2 + $0xc0] sm:$0xff]  ;;  %v3342_v39 = vld [vmem:[%s15617_s3 + $0x48] sm:$0xff] }
 0x333   : > { %v2852_v57 = vadd.f32 %v10988_v53, %v12740_v48  ;;  %3659 = vrot.lane.b32.xlu1 %v13182_v26, %s11330_s13 }
 0x334   : > { %v2851_v49 = vadd.f32 %v10989_v28, %v12740_v48  ;;  %3657 = vrot.lane.b32.xlu0 %v13187_v17, %s11330_s13  ;;  %v13201_v48 = vld [vmem:[#allocation2 + $0xc8] sm:$0xff]  ;;  %v3711_v28 = vsel %vm422_vm0, %v13198_v40, %v3502_v12  ;;  %10679 = vmatprep.subr.bf16.mxu1 %v10678_v9 }
 0x335   : > { %v2884_v56 = vmax.f32 %v2852_v57, 0.0  ;;  %v3632_v54 = vpop.permute.xlu1 %3631  ;;  %15692 = vst [vmem:[#allocation34_spill] sm:$0xff] %v13201_v48  ;;  %v3712_v17 = vsel %vm422_vm0, %v13201_v48, %v3504_v21  ;;  %v3343_v21 = vld [vmem:[%s15617_s3 + $0x50] sm:$0xff]  ;;  %v2981_v48 = vld [vmem:[#allocation2 + $0x2] sm:$0xff] }
 0x336   : > { %v2883_v53 = vmax.f32 %v2851_v49, 0.0  ;;  %v3630_v25 = vpop.permute.xlu0 %3629  ;;  %10681 = vmatpush3.bf16.msra.mxu1 %v10678_v9  ;;  %v3341_v49 = vld [vmem:[%s15617_s3 + $0x40] sm:$0xff]  ;;  %v3744_v12 = vsel %vm916_vm2, %v3712_v17, %v3632_v54 }
 0x337   : > { %2916 = vst.msk [vmem:[#allocation2 + $0x189] sm:$0xff] %vm422_vm0, %v2884_v56  ;;  %v3743_v57 = vsel %vm916_vm2, %v3711_v28, %v3630_v25  ;;  %v10682_v62 = vpack.c.bf16 %v3342_v39, %v3341_v49  ;;  %v3344_v56 = vld [vmem:[%s15617_s3 + $0x58] sm:$0xff]  ;;  %v2950_v49 = vld [vmem:[#allocation2 + $0x9] sm:$0xff] }
 0x338   : > { %2915 = vst.msk [vmem:[#allocation2 + $0x181] sm:$0xff] %vm422_vm0, %v2883_v53  ;;  %10183 = vmatprep.mubr.msk.f32.mxu1 %vm1389_vm3, %v3743_v57  ;;  %v10686_v9 = vpack.c.bf16 %v3344_v56, %v3343_v21  ;;  %v13228_v39 = vld [vmem:[#allocation2 + $0xd8] sm:$0xff]  ;;  %v13230_v21 = vld [vmem:[#allocation2 + $0xe0] sm:$0xff] }
 0x339   : > { %10184 = vmatmul.mubr.msk.f32.gmra.mrb[46].mxu1 %vm1389_vm3, %v3744_v12  ;;  %10683 = vmatprep.subr.bf16.mxu1 %v10682_v62 }
 0x33a   : > { %10685 = vmatpush3.bf16.msra.mxu1 %v10682_v62  ;;  %v2949_v62 = vld [vmem:[#allocation2 + $0x1] sm:$0xff] }
 0x33b   : > { %10687 = vmatprep.subr.bf16.mxu1 %v10686_v9 }
 0x33e   : > { %v3408_v53 = vld [vmem:[#allocation2 + $0x189] sm:$0xff]  ;;  %10689 = vmatpush3.bf16.msra.mxu1 %v10686_v9 }
 0x33f   : > { %3535 = vrot.lane.b32.xlu1 %v3408_v53, %s11329_s21  ;;  %v3407_v17 = vld [vmem:[#allocation2 + $0x181] sm:$0xff]  ;;  %v3440_v25 = vld [vmem:[#allocation2 + $0x18a] sm:$0xff] }
 0x340   : > { %3533 = vrot.lane.b32.xlu0 %v3407_v17, %s11329_s21  ;;  %v3439_v57 = vld [vmem:[#allocation2 + $0x182] sm:$0xff] }
 0x341   : > { %v3508_v54 = vpop.permute.xlu1 %3507 }
 0x342   : > { %v3506_v28 = vpop.permute.xlu0 %3505  ;;  %v3714_v9 = vsel %vm422_vm0, %v13230_v21, %v3508_v54 }
 0x343   : > { %3663 = vrot.lane.b32.xlu1 %v3440_v25, %s11330_s13  ;;  %v3713_v56 = vsel %vm422_vm0, %v13228_v39, %v3506_v28 }
 0x344   : > { %3661 = vrot.lane.b32.xlu0 %v3439_v57, %s11330_s13  ;;  %v2982_v57 = vld [vmem:[#allocation2 + $0xa] sm:$0xff] }
 0x345   : > { %v3636_v12 = vpop.permute.xlu1 %3635 }
 0x346   : > { %v3634_v53 = vpop.permute.xlu0 %3633  ;;  %v3746_v25 = vsel %vm916_vm2, %v3714_v9, %v3636_v12 }
 0x347   : > { %v3745_v17 = vsel %vm916_vm2, %v3713_v56, %v3634_v53  ;;  %3047 = vrot.lane.b32.xlu1 %v2950_v49, %s11329_s21  ;;  %v13252_v49 = vld [vmem:[#allocation2 + $0xf0] sm:$0xff] }
 0x348   : > { %10186 = vmatprep.mubr.msk.f32.mxu1 %vm1389_vm3, %v3745_v17  ;;  %3045 = vrot.lane.b32.xlu0 %v2949_v62, %s11329_s21  ;;  %v13254_v62 = vld [vmem:[#allocation2 + $0xf8] sm:$0xff]  ;;  %v13282_v53 = vld [vmem:[#allocation2 + $0x110] sm:$0xff]  ;;  %v13310_v17 = vld [vmem:[#allocation2 + $0x128] sm:$0xff] }
 0x349   : > { %10187 = vmatmul.mubr.msk.f32.gmra.mrb[48].mxu1 %vm1389_vm3, %v3746_v25 }
 0x34b   : > { %3175 = vrot.lane.b32.xlu1 %v2982_v57, %s11330_s13 }
 0x34c   : > { %3173 = vrot.lane.b32.xlu0 %v2981_v48, %s11330_s13 }
 0x34f   : > { %3051 = vrot.lane.b32.xlu1 %v12770_v61, %s11329_s21 }
 0x350   : > { %3049 = vrot.lane.b32.xlu0 %v12774_v55, %s11329_s21 }
 0x351   : > { %v3512_v54 = vpop.permute.xlu1 %3511 }
 0x352   : > { %v3510_v28 = vpop.permute.xlu0 %3509  ;;  %v3716_v55 = vsel %vm422_vm0, %v13254_v62, %v3512_v54  ;;  %v13347_v54 = vld [vmem:[#allocation2 + $0x140] sm:$0xff] }
 0x353   : > { %3179 = vrot.lane.b32.xlu1 %v12782_v33, %s11330_s13  ;;  %v3715_v48 = vsel %vm422_vm0, %v13252_v49, %v3510_v28 }
 0x354   : > { %3177 = vrot.lane.b32.xlu0 %v12788_v18, %s11330_s13 }
 0x355   : > { %v3640_v12 = vpop.permute.xlu1 %3639 }
 0x356   : > { %v3638_v61 = vpop.permute.xlu0 %3637  ;;  %v3748_v33 = vsel %vm916_vm2, %v3716_v55, %v3640_v12 }
 0x357   : > { %v3747_v56 = vsel %vm916_vm2, %v3715_v48, %v3638_v61  ;;  %3055 = vrot.lane.b32.xlu1 %v12806_v51, %s11329_s21  ;;  %v13375_v61 = vld [vmem:[#allocation2 + $0x158] sm:$0xff] }
 0x358   : > { %10189 = vmatprep.mubr.msk.f32.mxu1 %vm1389_vm3, %v3747_v56  ;;  %3053 = vrot.lane.b32.xlu0 %v12810_v5, %s11329_s21  ;;  %v13280_v5 = vld [vmem:[#allocation2 + $0x108] sm:$0xff]  ;;  %v13403_v56 = vld [vmem:[#allocation2 + $0x170] sm:$0xff] }
 0x359   : > { %10190 = vmatmul.mubr.msk.f32.gmra.mrb[50].mxu1 %vm1389_vm3, %v3748_v33 }
 0x35b   : > { %3183 = vrot.lane.b32.xlu1 %v12816_v15, %s11330_s13 }
 0x35c   : > { %3181 = vrot.lane.b32.xlu0 %v12821_v50, %s11330_s13 }
 0x35f   : > { %3059 = vrot.lane.b32.xlu1 %v12828_v23, %s11329_s21 }
 0x360   : > { %3057 = vrot.lane.b32.xlu0 %v12832_v44, %s11329_s21 }
 0x361   : > { %v3516_v18 = vpop.permute.xlu1 %3515 }
 0x362   : > { %v3514_v51 = vpop.permute.xlu0 %3513  ;;  %v3718_v44 = vsel %vm422_vm0, %v13282_v53, %v3516_v18 }
 0x363   : > { %3187 = vrot.lane.b32.xlu1 %v12838_v8, %s11330_s13  ;;  %v3717_v50 = vsel %vm422_vm0, %v13280_v5, %v3514_v51 }
 0x364   : > { %3185 = vrot.lane.b32.xlu0 %v12843_v6, %s11330_s13 }
 0x365   : > { %v3644_v15 = vpop.permute.xlu1 %3643 }
 0x366   : > { %v3642_v23 = vpop.permute.xlu0 %3641  ;;  %v3750_v8 = vsel %vm916_vm2, %v3718_v44, %v3644_v15  ;;  %v15695_v15 = vld [vmem:[#allocation21_spill] sm:$0xff] }
 0x367   : > { %v3749_v9 = vsel %vm916_vm2, %v3717_v50, %v3642_v23  ;;  %3063 = vrot.lane.b32.xlu1 %v12850_v1, %s11329_s21  ;;  %v3375_v50 = vld [vmem:[#allocation2 + $0x180] sm:$0xff] }
 0x368   : > { %10192 = vmatprep.mubr.msk.f32.mxu1 %vm1389_vm3, %v3749_v9  ;;  %3061 = vrot.lane.b32.xlu0 %v12854_v41, %s11329_s21  ;;  %v13308_v41 = vld [vmem:[#allocation2 + $0x120] sm:$0xff] }
 0x369   : > { %10193 = vmatmul.mubr.msk.f32.gmra.mrb[52].mxu1 %vm1389_vm3, %v3750_v8 }
 0x36b   : > { %3191 = vrot.lane.b32.xlu1 %v12860_v34, %s11330_s13 }
 0x36c   : > { %3189 = vrot.lane.b32.xlu0 %v12865_v0, %s11330_s13 }
 0x36f   : > { %3067 = vrot.lane.b32.xlu1 %v12872_v10, %s11329_s21 }
 0x370   : > { %3065 = vrot.lane.b32.xlu0 %v12876_v63, %s11329_s21 }
 0x371   : > { %v3520_v6 = vpop.permute.xlu1 %3519 }
 0x372   : > { %v3518_v1 = vpop.permute.xlu0 %3517  ;;  %v3720_v63 = vsel %vm422_vm0, %v13310_v17, %v3520_v6  ;;  %v15697_v6 = vld [vmem:[#allocation25_spill] sm:$0xff] }
 0x373   : > { %3195 = vrot.lane.b32.xlu1 %v12882_v45, %s11330_s13  ;;  %v3719_v0 = vsel %vm422_vm0, %v13308_v41, %v3518_v1 }
 0x374   : > { %3193 = vrot.lane.b32.xlu0 %v12887_v58, %s11330_s13  ;;  %v4831_v58 = vld [vmem:[%s15617_s3 + $0xc0] sm:$0xff] }
 0x375   : > { %v3648_v34 = vpop.permute.xlu1 %3647 }
 0x376   : > { %v3646_v10 = vpop.permute.xlu0 %3645  ;;  %v3752_v45 = vsel %vm916_vm2, %v3720_v63, %v3648_v34  ;;  %v15698_v34 = vld [vmem:[#allocation26_spill] sm:$0xff] }
 0x377   : > { %v3751_v25 = vsel %vm916_vm2, %v3719_v0, %v3646_v10  ;;  %3071 = vrot.lane.b32.xlu1 %v12894_v24, %s11329_s21  ;;  %v4832_v24 = vld [vmem:[%s15617_s3 + $0xc8] sm:$0xff] }
 0x378   : > { %10195 = vmatprep.mubr.msk.f32.mxu1 %vm1389_vm3, %v3751_v25  ;;  %3069 = vrot.lane.b32.xlu0 %v12898_v59, %s11329_s21  ;;  %v13338_v59 = vpack.c.bf16 %v4832_v24, %v4831_v58  ;;  %v2918_v10 = vld [vmem:[#allocation2 + $0x8] sm:$0xff]  ;;  %v2917_v25 = vld [vmem:[#allocation2] sm:$0xff]  ;;  %v15700_v58 = vld [vmem:[#allocation28_spill] sm:$0xff] }
 0x379   : > { %10196 = vmatmul.mubr.msk.f32.gmra.mrb[54].mxu1 %vm1389_vm3, %v3752_v45  ;;  %v15699_v45 = vld [vmem:[#allocation27_spill] sm:$0xff] }
 0x37a   : > { %10691 = vmatprep.subr.bf16.mxu1 %v13338_v59  ;;  %v4833_v24 = vld [vmem:[%s15617_s3 + $0xd0] sm:$0xff] }
 0x37b   : > { %3199 = vrot.lane.b32.xlu1 %v12904_v3, %s11330_s13 }
 0x37c   : > { %3197 = vrot.lane.b32.xlu0 %v12909_v27, %s11330_s13  ;;  %v13345_v27 = vld [vmem:[#allocation2 + $0x138] sm:$0xff] }
 0x37f   : > { %3075 = vrot.lane.b32.xlu1 %v12916_v2, %s11329_s21 }
 0x380   : > { %3073 = vrot.lane.b32.xlu0 %v12920_v31, %s11329_s21 }
 0x381   : > { %v3524_v3 = vpop.permute.xlu1 %3523 }
 0x382   : > { %v3522_v57 = vpop.permute.xlu0 %3521  ;;  %v3722_v12 = vsel %vm422_vm0, %v13347_v54, %v3524_v3  ;;  %v4834_v3 = vld [vmem:[%s15617_s3 + $0xd8] sm:$0xff] }
 0x383   : > { %3203 = vrot.lane.b32.xlu1 %v12926_v43, %s11330_s13  ;;  %v3721_v31 = vsel %vm422_vm0, %v13345_v27, %v3522_v57 }
 0x384   : > { %3201 = vrot.lane.b32.xlu0 %v12931_v4, %s11330_s13 }
 0x385   : > { %v3652_v2 = vpop.permute.xlu1 %3651 }
 0x386   : > { %v3650_v28 = vpop.permute.xlu0 %3649  ;;  %v3754_v43 = vsel %vm916_vm2, %v3722_v12, %v3652_v2 }
 0x387   : > { %v3753_v48 = vsel %vm916_vm2, %v3721_v31, %v3650_v28  ;;  %3079 = vrot.lane.b32.xlu1 %v12938_v13, %s11329_s21 }
 0x388   : > { %10198 = vmatprep.mubr.msk.f32.mxu1 %vm1389_vm3, %v3753_v48  ;;  %3077 = vrot.lane.b32.xlu0 %v12942_v11, %s11329_s21  ;;  %v13373_v11 = vld [vmem:[#allocation2 + $0x150] sm:$0xff] }
 0x389   : > { %10199 = vmatmul.mubr.msk.f32.gmra.mrb[56].mxu1 %vm1389_vm3, %v3754_v43  ;;  %v15701_v48 = vld [vmem:[#allocation31_spill] sm:$0xff]  ;;  %v10694_v43 = vpack.c.bf16 %v4834_v3, %v4833_v24 }
 0x38b   : > { %3207 = vrot.lane.b32.xlu1 %v12947_v19, %s11330_s13 }
 0x38c   : > { %3205 = vrot.lane.b32.xlu0 %v12952_v46, %s11330_s13 }
 0x38f   : > { %3083 = vrot.lane.b32.xlu1 %v12964_v16, %s11329_s21 }
 0x390   : > { %3081 = vrot.lane.b32.xlu0 %v12968_v32, %s11329_s21 }
 0x391   : > { %v3528_v4 = vpop.permute.xlu1 %3527 }
 0x392   : > { %v3526_v13 = vpop.permute.xlu0 %3525  ;;  %v3724_v32 = vsel %vm422_vm0, %v13375_v61, %v3528_v4 }
 0x393   : > { %3211 = vrot.lane.b32.xlu1 %v12972_v35, %s11330_s13  ;;  %v3723_v46 = vsel %vm422_vm0, %v13373_v11, %v3526_v13  ;;  %v15702_v13 = vld [vmem:[#allocation32_spill] sm:$0xff] }
 0x394   : > { %3209 = vrot.lane.b32.xlu0 %v12977_v60, %s11330_s13 }
 0x395   : > { %v3656_v19 = vpop.permute.xlu1 %3655 }
 0x396   : > { %v3654_v16 = vpop.permute.xlu0 %3653  ;;  %v3756_v35 = vsel %vm916_vm2, %v3724_v32, %v3656_v19  ;;  %v4835_v19 = vld [vmem:[%s15617_s3 + $0xe0] sm:$0xff] }
 0x397   : > { %v3755_v55 = vsel %vm916_vm2, %v3723_v46, %v3654_v16  ;;  %3087 = vrot.lane.b32.xlu1 %v12996_v14, %s11329_s21  ;;  %v4836_v46 = vld [vmem:[%s15617_s3 + $0xe8] sm:$0xff] }
 0x398   : > { %10201 = vmatprep.mubr.msk.f32.mxu1 %vm1389_vm3, %v3755_v55  ;;  %3085 = vrot.lane.b32.xlu0 %v13000_v42, %s11329_s21  ;;  %v13401_v42 = vld [vmem:[#allocation2 + $0x168] sm:$0xff]  ;;  %v10698_v55 = vpack.c.bf16 %v4836_v46, %v4835_v19 }
 0x399   : > { %10202 = vmatmul.mubr.msk.f32.gmra.mrb[58].mxu1 %vm1389_vm3, %v3756_v35  ;;  %v15703_v35 = vld [vmem:[#allocation33_spill] sm:$0xff] }
 0x39b   : > { %3215 = vrot.lane.b32.xlu1 %v13004_v22, %s11330_s13 }
 0x39c   : > { %3213 = vrot.lane.b32.xlu0 %v13009_v29, %s11330_s13 }
 0x39f   : > { %3091 = vrot.lane.b32.xlu1 %v13028_v38, %s11329_s21 }
 0x3a0   : > { %3089 = vrot.lane.b32.xlu0 %v13032_v47, %s11329_s21 }
 0x3a1   : > { %v3532_v60 = vpop.permute.xlu1 %3531 }
 0x3a2   : > { %v3530_v14 = vpop.permute.xlu0 %3529  ;;  %v3726_v47 = vsel %vm422_vm0, %v13403_v56, %v3532_v60  ;;  %v4837_v60 = vld [vmem:[%s15617_s3 + $0xf0] sm:$0xff] }
 0x3a3   : > { %3219 = vrot.lane.b32.xlu1 %v13036_v37, %s11330_s13  ;;  %v3725_v29 = vsel %vm422_vm0, %v13401_v42, %v3530_v14  ;;  %v4838_v14 = vld [vmem:[%s15617_s3 + $0xf8] sm:$0xff] }
 0x3a4   : > { %3217 = vrot.lane.b32.xlu0 %v13041_v20, %s11330_s13  ;;  %v15693_v20 = vld [vmem:[#allocation19_spill] sm:$0xff] }
 0x3a5   : > { %v3660_v22 = vpop.permute.xlu1 %3659 }
 0x3a6   : > { %v3658_v38 = vpop.permute.xlu0 %3657  ;;  %v3758_v37 = vsel %vm916_vm2, %v3726_v47, %v3660_v22  ;;  %v2919_v22 = vld [vmem:[#allocation2 + $0x18] sm:$0xff] }
 0x3a7   : > { %v3757_v33 = vsel %vm916_vm2, %v3725_v29, %v3658_v38  ;;  %3095 = vrot.lane.b32.xlu1 %v13060_v52, %s11329_s21  ;;  %v15694_v52 = vld [vmem:[#allocation20_spill] sm:$0xff]  ;;  %v2920_v38 = vld [vmem:[#allocation2 + $0x20] sm:$0xff] }
 0x3a8   : > { %10204 = vmatprep.mubr.msk.f32.mxu1 %vm1389_vm3, %v3757_v33  ;;  %3093 = vrot.lane.b32.xlu0 %v13064_v7, %s11329_s21  ;;  %v15696_v7 = vld [vmem:[#allocation22_spill] sm:$0xff] }
 0x3a9   : > { %10205 = vmatmul.mubr.msk.f32.gmra.mrb[60].mxu1 %vm1389_vm3, %v3758_v37 }
 0x3ab   : > { %3223 = vrot.lane.b32.xlu1 %v13068_v30, %s11330_s13  ;;  %v3376_v30 = vld [vmem:[#allocation2 + $0x188] sm:$0xff] }
 0x3ac   : > { %3221 = vrot.lane.b32.xlu0 %v13073_v36, %s11330_s13 }
 0x3af   : > { %3099 = vrot.lane.b32.xlu1 %v15693_v20, %s11329_s21  ;;  %v4447_v20 = vld [vmem:[#allocation2 + $0x31] sm:$0xff] }
 0x3b0   : > { %3097 = vrot.lane.b32.xlu0 %v15694_v52, %s11329_s21  ;;  %v10702_v52 = vpack.c.bf16 %v4838_v14, %v4837_v60  ;;  %v4484_v60 = vld [vmem:[#allocation2 + $0x6a] sm:$0xff]  ;;  %v4483_v14 = vld [vmem:[#allocation2 + $0x62] sm:$0xff] }
 0x3b1   : > { %v3536_v18 = vpop.permute.xlu1 %3535 }
 0x3b2   : > { %v3534_v51 = vpop.permute.xlu0 %3533  ;;  %v3728_v9 = vsel %vm422_vm0, %v3376_v30, %v3536_v18  ;;  %v4479_v30 = vld [vmem:[#allocation2 + $0x32] sm:$0xff] }
 0x3b3   : > { %3227 = vrot.lane.b32.xlu1 %v15695_v15, %s11330_s13  ;;  %v3727_v44 = vsel %vm422_vm0, %v3375_v50, %v3534_v51  ;;  %v4839_v51 = vld [vmem:[%s15617_s3 + $0x100] sm:$0xff]  ;;  %v4840_v15 = vld [vmem:[%s15617_s3 + $0x108] sm:$0xff] }
 0x3b4   : > { %3225 = vrot.lane.b32.xlu0 %v15696_v7, %s11330_s13 }
 0x3b5   : > { %v3664_v23 = vpop.permute.xlu1 %3663 }
 0x3b6   : > { %v3662_v36 = vpop.permute.xlu0 %3661  ;;  %v3760_v1 = vsel %vm916_vm2, %v3728_v9, %v3664_v23  ;;  %v4480_v23 = vld [vmem:[#allocation2 + $0x3a] sm:$0xff] }
 0x3b7   : > { %v3759_v8 = vsel %vm916_vm2, %v3727_v44, %v3662_v36  ;;  %3103 = vrot.lane.b32.xlu1 %v15697_v6, %s11329_s21  ;;  %v10706_v44 = vpack.c.bf16 %v4840_v15, %v4839_v51  ;;  %v4841_v36 = vld [vmem:[%s15617_s3 + $0x110] sm:$0xff]  ;;  %v4842_v9 = vld [vmem:[%s15617_s3 + $0x118] sm:$0xff]  ;;  %v4486_v15 = vld [vmem:[#allocation2 + $0x82] sm:$0xff] }
 0x3b8   : > { %3101 = vrot.lane.b32.xlu0 %v15698_v34, %s11329_s21  ;;  %10207 = vmatprep.mubr.msk.f32.mxu1 %vm1389_vm3, %v3759_v8  ;;  %v15704_v6 = vld [vmem:[#allocation11_spill] sm:$0xff] }
 0x3b9   : > { %v3048_v0 = vpop.permute.xlu1 %3047  ;;  %10208 = vmatmul.mubr.msk.f32.gmra.mrb[62].mxu1 %vm1389_vm3, %v3760_v1 }
 0x3ba   : > { %v3046_v63 = vpop.permute.xlu0 %3045  ;;  %v3270_v57 = vsel %vm422_vm0, %v2918_v10, %v3048_v0  ;;  %v4450_v0 = vld [vmem:[#allocation2 + $0x51] sm:$0xff] }
 0x3bb   : > { %3231 = vrot.lane.b32.xlu1 %v15699_v45, %s11330_s13  ;;  %v3269_v31 = vsel %vm422_vm0, %v2917_v25, %v3046_v63  ;;  %v15705_v10 = vld [vmem:[#allocation12_spill] sm:$0xff]  ;;  %v4449_v45 = vld [vmem:[#allocation2 + $0x49] sm:$0xff] }
 0x3bc   : > { %3229 = vrot.lane.b32.xlu0 %v15700_v58, %s11330_s13  ;;  %v10710_v58 = vpack.c.bf16 %v4842_v9, %v4841_v36  ;;  %v4456_v36 = vld [vmem:[#allocation2 + $0x99] sm:$0xff]  ;;  %v15711_v9 = vld [vmem:[#allocation18_spill] sm:$0xff] }
 0x3bd   : > { %v3176_v2 = vpop.permute.xlu1 %3175 }
 0x3be   : > { %v3174_v28 = vpop.permute.xlu0 %3173  ;;  %v3302_v4 = vsel %vm916_vm2, %v3270_v57, %v3176_v2  ;;  %v4482_v2 = vld [vmem:[#allocation2 + $0x52] sm:$0xff] }
 0x3bf   : > { %v3301_v12 = vsel %vm916_vm2, %v3269_v31, %v3174_v28  ;;  %3107 = vrot.lane.b32.xlu1 %v15701_v48, %s11329_s21  ;;  %v4481_v31 = vld [vmem:[#allocation2 + $0x4a] sm:$0xff] }
 0x3c0   : > { %3105 = vrot.lane.b32.xlu0 %v15702_v13, %s11329_s21  ;;  %10234 = vmatprep.mubr.msk.f32.mxu1 %vm1389_vm3, %v3301_v12  ;;  %v15706_v12 = vld [vmem:[#allocation13_spill] sm:$0xff]  ;;  %v15707_v13 = vld [vmem:[#allocation14_spill] sm:$0xff] }
 0x3c1   : > { %v3052_v16 = vpop.permute.xlu1 %3051  ;;  %10235 = vmatmul.mubr.msk.f32.vlgmr.msra.gmra.mrb[32].mxu1 %vm1389_vm3, %v3302_v4  ;;  %v4452_v4 = vld [vmem:[#allocation2 + $0x69] sm:$0xff] }
 0x3c2   : > { %v3050_v32 = vpop.permute.xlu0 %3049  ;;  %10693 = vmatpush3.bf16.msra.mxu1 %v13338_v59  ;;  %v3272_v33 = vsel %vm422_vm0, %v2920_v38, %v3052_v16  ;;  %v4451_v16 = vld [vmem:[#allocation2 + $0x61] sm:$0xff] }
 0x3c3   : > { %3235 = vrot.lane.b32.xlu1 %v13182_v26, %s11330_s13  ;;  %10695 = vmatprep.subr.bf16.mxu1 %v10694_v43  ;;  %v3271_v59 = vsel %vm422_vm0, %v2919_v22, %v3050_v32  ;;  %v4448_v26 = vld [vmem:[#allocation2 + $0x39] sm:$0xff] }
 0x3c4   : > { %3233 = vrot.lane.b32.xlu0 %v15703_v35, %s11330_s13 }
 0x3c5   : > { %v3180_v29 = vpop.permute.xlu1 %3179 }
 0x3c6   : > { %v3178_v47 = vpop.permute.xlu0 %3177  ;;  %10697 = vmatpush3.bf16.msra.mxu1 %v10694_v43  ;;  %v3304_v18 = vsel %vm916_vm2, %v3272_v33, %v3180_v29  ;;  %v15708_v29 = vld [vmem:[#allocation15_spill] sm:$0xff] }
 0x3c7   : > { %v3303_v37 = vsel %vm916_vm2, %v3271_v59, %v3178_v47  ;;  %4545 = vrot.lane.b32.xlu1 %v4448_v26, %s11329_s21  ;;  %10699 = vmatprep.subr.bf16.mxu1 %v10698_v55  ;;  %v4454_v47 = vld [vmem:[#allocation2 + $0x81] sm:$0xff]  ;;  %v15709_v26 = vld [vmem:[#allocation16_spill] sm:$0xff] }
 0x3c8   : > { %4543 = vrot.lane.b32.xlu0 %v4447_v20, %s11329_s21  ;;  %10237 = vmatprep.mubr.msk.f32.mxu1 %vm1389_vm3, %v3303_v37  ;;  %v4453_v20 = vld [vmem:[#allocation2 + $0x79] sm:$0xff] }
 0x3c9   : > { %v3056_v7 = vpop.permute.xlu1 %3055  ;;  %10238 = vmatmul.mubr.msk.f32.gmra.mrb[34].mxu1 %vm1389_vm3, %v3304_v18 }
 0x3ca   : > { %v3054_v50 = vpop.permute.xlu0 %3053  ;;  %10701 = vmatpush3.bf16.msra.mxu1 %v10698_v55  ;;  %v3274_v63 = vsel %vm422_vm0, %v15705_v10, %v3056_v7  ;;  %v4485_v7 = vld [vmem:[#allocation2 + $0x7a] sm:$0xff] }
 0x3cb   : > { %4673 = vrot.lane.b32.xlu1 %v4480_v23, %s11330_s13  ;;  %10703 = vmatprep.subr.bf16.mxu1 %v10702_v52  ;;  %v3273_v1 = vsel %vm422_vm0, %v15704_v6, %v3054_v50  ;;  %v15710_v23 = vld [vmem:[#allocation17_spill] sm:$0xff] }
 0x3cc   : > { %4671 = vrot.lane.b32.xlu0 %v4479_v30, %s11330_s13 }
 0x3cd   : > { %v3184_v8 = vpop.permute.xlu1 %3183 }
 0x3ce   : > { %v3182_v34 = vpop.permute.xlu0 %3181  ;;  %10705 = vmatpush3.bf16.msra.mxu1 %v10702_v52  ;;  %v3306_v24 = vsel %vm916_vm2, %v3274_v63, %v3184_v8  ;;  %v4488_v63 = vld [vmem:[#allocation2 + $0x9a] sm:$0xff] }
 0x3cf   : > { %v3305_v25 = vsel %vm916_vm2, %v3273_v1, %v3182_v34  ;;  %4549 = vrot.lane.b32.xlu1 %v4450_v0, %s11329_s21  ;;  %10707 = vmatprep.subr.bf16.mxu1 %v10706_v44  ;;  %v4455_v1 = vld [vmem:[#allocation2 + $0x91] sm:$0xff] }
 0x3d0   : > { %4547 = vrot.lane.b32.xlu0 %v4449_v45, %s11329_s21  ;;  %10240 = vmatprep.mubr.msk.f32.mxu1 %vm1389_vm3, %v3305_v25  ;;  %v4487_v25 = vld [vmem:[#allocation2 + $0x92] sm:$0xff] }
 0x3d1   : > { %v3060_v3 = vpop.permute.xlu1 %3059  ;;  %10241 = vmatmul.mubr.msk.f32.gmra.mrb[36].mxu1 %vm1389_vm3, %v3306_v24 }
 0x3d2   : > { %v3058_v57 = vpop.permute.xlu0 %3057  ;;  %10709 = vmatpush3.bf16.msra.mxu1 %v10706_v44  ;;  %v3276_v19 = vsel %vm422_vm0, %v15707_v13, %v3060_v3  ;;  %v4490_v13 = vld [vmem:[#allocation2 + $0xb2] sm:$0xff] }
 0x3d3   : > { %4677 = vrot.lane.b32.xlu1 %v4482_v2, %s11330_s13  ;;  %10711 = vmatprep.subr.bf16.mxu1 %v10710_v58  ;;  %v3275_v48 = vsel %vm422_vm0, %v15706_v12, %v3058_v57  ;;  %v4458_v57 = vld [vmem:[#allocation2 + $0xb1] sm:$0xff]  ;;  %v4457_v12 = vld [vmem:[#allocation2 + $0xa9] sm:$0xff] }
 0x3d4   : > { %4675 = vrot.lane.b32.xlu0 %v4481_v31, %s11330_s13  ;;  %v15713_v2 = vld [vmem:[#allocation24_spill] sm:$0xff] }
 0x3d5   : > { %v3188_v28 = vpop.permute.xlu1 %3187 }
 0x3d6   : > { %v3186_v43 = vpop.permute.xlu0 %3185  ;;  %10713 = vmatpush3.bf16.msra.mxu1 %v10710_v58  ;;  %v3308_v32 = vsel %vm916_vm2, %v3276_v19, %v3188_v28  ;;  %v15712_v58 = vld [vmem:[#allocation23_spill] sm:$0xff] }
 0x3d7   : > { %v3307_v46 = vsel %vm916_vm2, %v3275_v48, %v3186_v43  ;;  %4553 = vrot.lane.b32.xlu1 %v4452_v4, %s11329_s21  ;;  %v4489_v19 = vld [vmem:[#allocation2 + $0xaa] sm:$0xff] }
 0x3d8   : > { %4551 = vrot.lane.b32.xlu0 %v4451_v16, %s11329_s21  ;;  %10243 = vmatprep.mubr.msk.f32.mxu1 %vm1389_vm3, %v3307_v46  ;;  %v15714_v16 = vld [vmem:[#allocation29_spill] sm:$0xff] }
 0x3d9   : > { %v3064_v55 = vpop.permute.xlu1 %3063  ;;  %10244 = vmatmul.mubr.msk.f32.gmra.mrb[38].mxu1 %vm1389_vm3, %v3308_v32 }
 0x3da   : > { %v3062_v35 = vpop.permute.xlu0 %3061  ;;  %v3278_v33 = vsel %vm422_vm0, %v15709_v26, %v3064_v55  ;;  %v4492_v26 = vld [vmem:[#allocation2 + $0xca] sm:$0xff] }
 0x3db   : > { %4681 = vrot.lane.b32.xlu1 %v4484_v60, %s11330_s13  ;;  %v3277_v38 = vsel %vm422_vm0, %v15708_v29, %v3062_v35  ;;  %v4460_v35 = vld [vmem:[#allocation2 + $0xc9] sm:$0xff]  ;;  %v4459_v29 = vld [vmem:[#allocation2 + $0xc1] sm:$0xff] }
 0x3dc   : > { %4679 = vrot.lane.b32.xlu0 %v4483_v14, %s11330_s13  ;;  %v15715_v60 = vld [vmem:[#allocation30_spill] sm:$0xff] }
 0x3dd   : > { %v3192_v22 = vpop.permute.xlu1 %3191 }
 0x3de   : > { %v3190_v59 = vpop.permute.xlu0 %3189  ;;  %v3310_v52 = vsel %vm916_vm2, %v3278_v33, %v3192_v22  ;;  %v4491_v33 = vld [vmem:[#allocation2 + $0xc2] sm:$0xff] }
 0x3df   : > { %v3309_v37 = vsel %vm916_vm2, %v3277_v38, %v3190_v59  ;;  %4557 = vrot.lane.b32.xlu1 %v4454_v47, %s11329_s21 }
 0x3e0   : > { %4555 = vrot.lane.b32.xlu0 %v4453_v20, %s11329_s21  ;;  %10246 = vmatprep.mubr.msk.f32.mxu1 %vm1389_vm3, %v3309_v37 }
 0x3e1   : > { %v3068_v18 = vpop.permute.xlu1 %3067  ;;  %10247 = vmatmul.mubr.msk.f32.gmra.mrb[40].mxu1 %vm1389_vm3, %v3310_v52 }
 0x3e2   : > { %v3066_v51 = vpop.permute.xlu0 %3065  ;;  %v3280_v8 = vsel %vm422_vm0, %v15711_v9, %v3068_v18  ;;  %v4462_v18 = vld [vmem:[#allocation2 + $0xe1] sm:$0xff] }
 0x3e3   : > { %4685 = vrot.lane.b32.xlu1 %v4486_v15, %s11330_s13  ;;  %v3279_v30 = vsel %vm422_vm0, %v15710_v23, %v3066_v51  ;;  %v15716_v51 = vld [vmem:[#allocation34_spill] sm:$0xff] }
 0x3e4   : > { %4683 = vrot.lane.b32.xlu0 %v4485_v7, %s11330_s13 }
 0x3e5   : > { %v3196_v50 = vpop.permute.xlu1 %3195 }
 0x3e6   : > { %v3194_v44 = vpop.permute.xlu0 %3193  ;;  %v3312_v34 = vsel %vm916_vm2, %v3280_v8, %v3196_v50  ;;  %v4461_v50 = vld [vmem:[#allocation2 + $0xd9] sm:$0xff] }
 0x3e7   : > { %v3311_v6 = vsel %vm916_vm2, %v3279_v30, %v3194_v44  ;;  %4561 = vrot.lane.b32.xlu1 %v4456_v36, %s11329_s21  ;;  %v4494_v44 = vld [vmem:[#allocation2 + $0xe2] sm:$0xff]  ;;  %v4493_v36 = vld [vmem:[#allocation2 + $0xda] sm:$0xff] }
 0x3e8   : > { %4559 = vrot.lane.b32.xlu0 %v4455_v1, %s11329_s21  ;;  %10249 = vmatprep.mubr.msk.f32.mxu1 %vm1389_vm3, %v3311_v6  ;;  %v4464_v1 = vld [vmem:[#allocation2 + $0xf9] sm:$0xff] }
 0x3e9   : > { %v3072_v0 = vpop.permute.xlu1 %3071  ;;  %10250 = vmatmul.mubr.msk.f32.gmra.mrb[42].mxu1 %vm1389_vm3, %v3312_v34 }
 0x3ea   : > { %v3070_v10 = vpop.permute.xlu0 %3069  ;;  %v3282_v31 = vsel %vm422_vm0, %v15713_v2, %v3072_v0 }
 0x3eb   : > { %4689 = vrot.lane.b32.xlu1 %v4488_v63, %s11330_s13  ;;  %v3281_v24 = vsel %vm422_vm0, %v15712_v58, %v3070_v10  ;;  %v4463_v10 = vld [vmem:[#allocation2 + $0xf1] sm:$0xff] }
 0x3ec   : > { %4687 = vrot.lane.b32.xlu0 %v4487_v25, %s11330_s13  ;;  %v4495_v58 = vld [vmem:[#allocation2 + $0xf2] sm:$0xff] }
 0x3ed   : > { %v3200_v45 = vpop.permute.xlu1 %3199 }
 0x3ee   : > { %v3198_v3 = vpop.permute.xlu0 %3197  ;;  %v3314_v48 = vsel %vm916_vm2, %v3282_v31, %v3200_v45  ;;  %v4496_v45 = vld [vmem:[#allocation2 + $0xfa] sm:$0xff] }
 0x3ef   : > { %v3313_v28 = vsel %vm916_vm2, %v3281_v24, %v3198_v3  ;;  %4565 = vrot.lane.b32.xlu1 %v4458_v57, %s11329_s21  ;;  %v4466_v57 = vld [vmem:[#allocation2 + $0x111] sm:$0xff] }
 0x3f0   : > { %4563 = vrot.lane.b32.xlu0 %v4457_v12, %s11329_s21  ;;  %10252 = vmatprep.mubr.msk.f32.mxu1 %vm1389_vm3, %v3313_v28  ;;  %v4465_v28 = vld [vmem:[#allocation2 + $0x109] sm:$0xff] }
 0x3f1   : > { %v3076_v43 = vpop.permute.xlu1 %3075  ;;  %10253 = vmatmul.mubr.msk.f32.gmra.mrb[44].mxu1 %vm1389_vm3, %v3314_v48 }
 0x3f2   : > { %v3074_v4 = vpop.permute.xlu0 %3073  ;;  %v3284_v14 = vsel %vm422_vm0, %v15715_v60, %v3076_v43  ;;  %v4498_v43 = vld [vmem:[#allocation2 + $0x112] sm:$0xff] }
 0x3f3   : > { %4693 = vrot.lane.b32.xlu1 %v4490_v13, %s11330_s13  ;;  %v3283_v32 = vsel %vm422_vm0, %v15714_v16, %v3074_v4  ;;  %v4497_v4 = vld [vmem:[#allocation2 + $0x10a] sm:$0xff] }
 0x3f4   : > { %4691 = vrot.lane.b32.xlu0 %v4489_v19, %s11330_s13 }
 0x3f5   : > { %v3204_v46 = vpop.permute.xlu1 %3203 }
 0x3f6   : > { %v3202_v55 = vpop.permute.xlu0 %3201  ;;  %v3316_v38 = vsel %vm916_vm2, %v3284_v14, %v3204_v46  ;;  %v4468_v46 = vld [vmem:[#allocation2 + $0x129] sm:$0xff] }
 0x3f7   : > { %v3315_v22 = vsel %vm916_vm2, %v3283_v32, %v3202_v55  ;;  %4569 = vrot.lane.b32.xlu1 %v4460_v35, %s11329_s21  ;;  %v4467_v55 = vld [vmem:[#allocation2 + $0x121] sm:$0xff]  ;;  %v4500_v14 = vld [vmem:[#allocation2 + $0x12a] sm:$0xff] }
 0x3f8   : > { %4567 = vrot.lane.b32.xlu0 %v4459_v29, %s11329_s21  ;;  %10255 = vmatprep.mubr.msk.f32.mxu1 %vm1389_vm3, %v3315_v22  ;;  %v4499_v22 = vld [vmem:[#allocation2 + $0x122] sm:$0xff] }
 0x3f9   : > { %v3080_v59 = vpop.permute.xlu1 %3079  ;;  %10256 = vmatmul.mubr.msk.f32.gmra.mrb[46].mxu1 %vm1389_vm3, %v3316_v38 }
 0x3fa   : > { %v3078_v47 = vpop.permute.xlu0 %3077  ;;  %v3286_v15 = vsel %vm422_vm0, %v15716_v51, %v3080_v59  ;;  %v4470_v59 = vld [vmem:[#allocation2 + $0x141] sm:$0xff] }
 0x3fb   : > { %4697 = vrot.lane.b32.xlu1 %v4492_v26, %s11330_s13  ;;  %v3285_v20 = vsel %vm422_vm0, %v13198_v40, %v3078_v47 }
 0x3fc   : > { %4695 = vrot.lane.b32.xlu0 %v4491_v33, %s11330_s13  ;;  %v4469_v33 = vld [vmem:[#allocation2 + $0x139] sm:$0xff] }
 0x3fd   : > { %v3208_v37 = vpop.permute.xlu1 %3207 }
 0x3fe   : > { %v3206_v52 = vpop.permute.xlu0 %3205  ;;  %v3318_v23 = vsel %vm916_vm2, %v3286_v15, %v3208_v37 }
 0x3ff   : > { %v3317_v7 = vsel %vm916_vm2, %v3285_v20, %v3206_v52  ;;  %4573 = vrot.lane.b32.xlu1 %v4462_v18, %s11329_s21  ;;  %v4502_v52 = vld [vmem:[#allocation2 + $0x142] sm:$0xff]  ;;  %v4501_v18 = vld [vmem:[#allocation2 + $0x13a] sm:$0xff] }
 0x400   : > { %4571 = vrot.lane.b32.xlu0 %v4461_v50, %s11329_s21  ;;  %10258 = vmatprep.mubr.msk.f32.mxu1 %vm1389_vm3, %v3317_v7  ;;  %v4472_v7 = vld [vmem:[#allocation2 + $0x159] sm:$0xff] }
 0x401   : > { %v3084_v30 = vpop.permute.xlu1 %3083  ;;  %10259 = vmatmul.mubr.msk.f32.gmra.mrb[48].mxu1 %vm1389_vm3, %v3318_v23 }
 0x402   : > { %v3082_v40 = vpop.permute.xlu0 %3081  ;;  %v3288_v34 = vsel %vm422_vm0, %v13230_v21, %v3084_v30  ;;  %v4471_v30 = vld [vmem:[#allocation2 + $0x151] sm:$0xff] }
 0x403   : > { %4701 = vrot.lane.b32.xlu1 %v4494_v44, %s11330_s13  ;;  %v3287_v8 = vsel %vm422_vm0, %v13228_v39, %v3082_v40 }
 0x404   : > { %4699 = vrot.lane.b32.xlu0 %v4493_v36, %s11330_s13  ;;  %v4504_v36 = vld [vmem:[#allocation2 + $0x15a] sm:$0xff] }
 0x405   : > { %v3212_v9 = vpop.permute.xlu1 %3211 }
 0x406   : > { %v3210_v6 = vpop.permute.xlu0 %3209  ;;  %v3320_v63 = vsel %vm916_vm2, %v3288_v34, %v3212_v9  ;;  %v4503_v9 = vld [vmem:[#allocation2 + $0x152] sm:$0xff] }
 0x407   : > { %v3319_v0 = vsel %vm916_vm2, %v3287_v8, %v3210_v6  ;;  %4577 = vrot.lane.b32.xlu1 %v4464_v1, %s11329_s21  ;;  %v4474_v1 = vld [vmem:[#allocation2 + $0x171] sm:$0xff] }
 0x408   : > { %4575 = vrot.lane.b32.xlu0 %v4463_v10, %s11329_s21  ;;  %10261 = vmatprep.mubr.msk.f32.mxu1 %vm1389_vm3, %v3319_v0  ;;  %v4473_v10 = vld [vmem:[#allocation2 + $0x169] sm:$0xff] }
 0x409   : > { %v3088_v25 = vpop.permute.xlu1 %3087  ;;  %10262 = vmatmul.mubr.msk.f32.gmra.mrb[50].mxu1 %vm1389_vm3, %v3320_v63 }
 0x40a   : > { %v3086_v39 = vpop.permute.xlu0 %3085  ;;  %v3290_v2 = vsel %vm422_vm0, %v13254_v62, %v3088_v25 }
 0x40b   : > { %4705 = vrot.lane.b32.xlu1 %v4496_v45, %s11330_s13  ;;  %v3289_v24 = vsel %vm422_vm0, %v13252_v49, %v3086_v39  ;;  %v4506_v39 = vld [vmem:[#allocation2 + $0x172] sm:$0xff]  ;;  %v4505_v45 = vld [vmem:[#allocation2 + $0x16a] sm:$0xff] }
 0x40c   : > { %4703 = vrot.lane.b32.xlu0 %v4495_v58, %s11330_s13 }
 0x40d   : > { %v3216_v21 = vpop.permute.xlu1 %3215 }
 0x40e   : > { %v3214_v3 = vpop.permute.xlu0 %3213  ;;  %v3322_v12 = vsel %vm916_vm2, %v3290_v2, %v3216_v21  ;;  %v4475_v2 = vld [vmem:[#allocation2 + $0x181] sm:$0xff] }
 0x40f   : > { %v3321_v31 = vsel %vm916_vm2, %v3289_v24, %v3214_v3  ;;  %4581 = vrot.lane.b32.xlu1 %v4466_v57, %s11329_s21  ;;  %v4476_v24 = vld [vmem:[#allocation2 + $0x189] sm:$0xff] }
 0x410   : > { %4579 = vrot.lane.b32.xlu0 %v4465_v28, %s11329_s21  ;;  %10264 = vmatprep.mubr.msk.f32.mxu1 %vm1389_vm3, %v3321_v31 }
 0x411   : > { %v3092_v48 = vpop.permute.xlu1 %3091  ;;  %10265 = vmatmul.mubr.msk.f32.gmra.mrb[52].mxu1 %vm1389_vm3, %v3322_v12  ;;  %v4508_v12 = vld [vmem:[#allocation2 + $0x18a] sm:$0xff] }
 0x412   : > { %v3090_v49 = vpop.permute.xlu0 %3089  ;;  %v3292_v16 = vsel %vm422_vm0, %v13282_v53, %v3092_v48  ;;  %v4507_v48 = vld [vmem:[#allocation2 + $0x182] sm:$0xff] }
 0x413   : > { %4709 = vrot.lane.b32.xlu1 %v4498_v43, %s11330_s13  ;;  %v3291_v13 = vsel %vm422_vm0, %v13280_v5, %v3090_v49  ;;  %v4415_v49 = vld [vmem:[#allocation2 + $0x30] sm:$0xff] }
 0x414   : > { %4707 = vrot.lane.b32.xlu0 %v4497_v4, %s11330_s13  ;;  %v4477_v4 = vld [vmem:[#allocation2 + $0x199] sm:$0xff] }
 0x415   : > { %v3220_v62 = vpop.permute.xlu1 %3219 }
 0x416   : > { %v3218_v19 = vpop.permute.xlu0 %3217  ;;  %v3324_v35 = vsel %vm916_vm2, %v3292_v16, %v3220_v62  ;;  %v4416_v62 = vld [vmem:[#allocation2 + $0x38] sm:$0xff] }
 0x417   : > { %v3323_v32 = vsel %vm916_vm2, %v3291_v13, %v3218_v19  ;;  %4585 = vrot.lane.b32.xlu1 %v4468_v46, %s11329_s21 }
 0x418   : > { %4583 = vrot.lane.b32.xlu0 %v4467_v55, %s11329_s21  ;;  %10267 = vmatprep.mubr.msk.f32.mxu1 %vm1389_vm3, %v3323_v32  ;;  %v4510_v55 = vld [vmem:[#allocation2 + $0x1a2] sm:$0xff] }
 0x419   : > { %v3096_v60 = vpop.permute.xlu1 %3095  ;;  %10268 = vmatmul.mubr.msk.f32.gmra.mrb[54].mxu1 %vm1389_vm3, %v3324_v35 }
 0x41a   : > { %v3094_v5 = vpop.permute.xlu0 %3093  ;;  %v3294_v47 = vsel %vm422_vm0, %v13310_v17, %v3096_v60  ;;  %v4509_v60 = vld [vmem:[#allocation2 + $0x19a] sm:$0xff] }
 0x41b   : > { %4713 = vrot.lane.b32.xlu1 %v4500_v14, %s11330_s13  ;;  %v3293_v29 = vsel %vm422_vm0, %v13308_v41, %v3094_v5  ;;  %v4417_v14 = vld [vmem:[#allocation2 + $0x48] sm:$0xff] }
 0x41c   : > { %4711 = vrot.lane.b32.xlu0 %v4499_v22, %s11330_s13 }
 0x41d   : > { %v3224_v53 = vpop.permute.xlu1 %3223 }
 0x41e   : > { %v3222_v38 = vpop.permute.xlu0 %3221  ;;  %v3326_v37 = vsel %vm916_vm2, %v3294_v47, %v3224_v53  ;;  %v4418_v53 = vld [vmem:[#allocation2 + $0x50] sm:$0xff] }
 0x41f   : > { %v3325_v26 = vsel %vm916_vm2, %v3293_v29, %v3222_v38  ;;  %4589 = vrot.lane.b32.xlu1 %v4470_v59, %s11329_s21 }
 0x420   : > { %4587 = vrot.lane.b32.xlu0 %v4469_v33, %s11329_s21  ;;  %10270 = vmatprep.mubr.msk.f32.mxu1 %vm1389_vm3, %v3325_v26 }
 0x421   : > { %v3100_v20 = vpop.permute.xlu1 %3099  ;;  %10271 = vmatmul.mubr.msk.f32.gmra.mrb[56].mxu1 %vm1389_vm3, %v3326_v37 }
 0x422   : > { %v3098_v41 = vpop.permute.xlu0 %3097  ;;  %v3296_v50 = vsel %vm422_vm0, %v13347_v54, %v3100_v20  ;;  %v4419_v20 = vld [vmem:[#allocation2 + $0x60] sm:$0xff] }
 0x423   : > { %4717 = vrot.lane.b32.xlu1 %v4502_v52, %s11330_s13  ;;  %v3295_v51 = vsel %vm422_vm0, %v13345_v27, %v3098_v41  ;;  %v4420_v52 = vld [vmem:[#allocation2 + $0x68] sm:$0xff] }
 0x424   : > { %4715 = vrot.lane.b32.xlu0 %v4501_v18, %s11330_s13 }
 0x425   : > { %v3228_v17 = vpop.permute.xlu1 %3227 }
 0x426   : > { %v3226_v15 = vpop.permute.xlu0 %3225  ;;  %v3328_v40 = vsel %vm916_vm2, %v3296_v50, %v3228_v17 }
 0x427   : > { %v3327_v23 = vsel %vm916_vm2, %v3295_v51, %v3226_v15  ;;  %4593 = vrot.lane.b32.xlu1 %v4472_v7, %s11329_s21 }
 0x428   : > { %4591 = vrot.lane.b32.xlu0 %v4471_v30, %s11329_s21  ;;  %10273 = vmatprep.mubr.msk.f32.mxu1 %vm1389_vm3, %v3327_v23  ;;  %v4421_v30 = vld [vmem:[#allocation2 + $0x78] sm:$0xff] }
 0x429   : > { %v3104_v44 = vpop.permute.xlu1 %3103  ;;  %10274 = vmatmul.mubr.msk.f32.gmra.mrb[58].mxu1 %vm1389_vm3, %v3328_v40 }
 0x42a   : > { %v3102_v27 = vpop.permute.xlu0 %3101  ;;  %v3298_v34 = vsel %vm422_vm0, %v13375_v61, %v3104_v44  ;;  %v4422_v44 = vld [vmem:[#allocation2 + $0x80] sm:$0xff] }
 0x42b   : > { %4721 = vrot.lane.b32.xlu1 %v4504_v36, %s11330_s13  ;;  %v3297_v8 = vsel %vm422_vm0, %v13373_v11, %v3102_v27 }
 0x42c   : > { %4719 = vrot.lane.b32.xlu0 %v4503_v9, %s11330_s13 }
 0x42d   : > { %v3232_v54 = vpop.permute.xlu1 %3231 }
 0x42e   : > { %v3230_v6 = vpop.permute.xlu0 %3229  ;;  %v3330_v63 = vsel %vm916_vm2, %v3298_v34, %v3232_v54  ;;  %v4423_v34 = vld [vmem:[#allocation2 + $0x90] sm:$0xff] }
 0x42f   : > { %v3329_v0 = vsel %vm916_vm2, %v3297_v8, %v3230_v6  ;;  %4597 = vrot.lane.b32.xlu1 %v4474_v1, %s11329_s21 }
 0x430   : > { %4595 = vrot.lane.b32.xlu0 %v4473_v10, %s11329_s21  ;;  %10276 = vmatprep.mubr.msk.f32.mxu1 %vm1389_vm3, %v3329_v0  ;;  %v4424_v10 = vld [vmem:[#allocation2 + $0x98] sm:$0xff] }
 0x431   : > { %v3108_v25 = vpop.permute.xlu1 %3107  ;;  %10277 = vmatmul.mubr.msk.f32.gmra.mrb[60].mxu1 %vm1389_vm3, %v3330_v63 }
 0x432   : > { %v3106_v11 = vpop.permute.xlu0 %3105  ;;  %v3300_v3 = vsel %vm422_vm0, %v13403_v56, %v3108_v25  ;;  %v4478_v56 = vld [vmem:[#allocation2 + $0x1a1] sm:$0xff] }
 0x433   : > { %4725 = vrot.lane.b32.xlu1 %v4506_v39, %s11330_s13  ;;  %v3299_v58 = vsel %vm422_vm0, %v13401_v42, %v3106_v11 }
 0x434   : > { %4723 = vrot.lane.b32.xlu0 %v4505_v45, %s11330_s13 }
 0x435   : > { %v3236_v61 = vpop.permute.xlu1 %3235 }
 0x436   : > { %v3234_v21 = vpop.permute.xlu0 %3233  ;;  %v3332_v31 = vsel %vm916_vm2, %v3300_v3, %v3236_v61  ;;  %v4426_v3 = vld [vmem:[#allocation2 + $0xb0] sm:$0xff] }
 0x437   : > { %v3331_v57 = vsel %vm916_vm2, %v3299_v58, %v3234_v21  ;;  %4601 = vrot.lane.b32.xlu1 %v4476_v24, %s11329_s21  ;;  %v4425_v21 = vld [vmem:[#allocation2 + $0xa8] sm:$0xff] }
 0x438   : > { %4599 = vrot.lane.b32.xlu0 %v4475_v2, %s11329_s21  ;;  %10279 = vmatprep.mubr.msk.f32.mxu1 %vm1389_vm3, %v3331_v57 }
 0x439   : > { %v4546_v28 = vpop.permute.xlu1 %4545  ;;  %10280 = vmatmul.mubr.msk.f32.gmra.mrb[62].mxu1 %vm1389_vm3, %v3332_v31 }
 0x43a   : > { %v4544_v42 = vpop.permute.xlu0 %4543  ;;  %v4768_v46 = vsel %vm422_vm0, %v4416_v62, %v4546_v28 }
 0x43b   : > { %4729 = vrot.lane.b32.xlu1 %v4508_v12, %s11330_s13  ;;  %v4767_v13 = vsel %vm422_vm0, %v4415_v49, %v4544_v42 }
 0x43c   : > { %4727 = vrot.lane.b32.xlu0 %v4507_v48, %s11330_s13 }
 0x43d   : > { %v4674_v43 = vpop.permute.xlu1 %4673 }
 0x43e   : > { %v4672_v19 = vpop.permute.xlu0 %4671  ;;  %v4800_v32 = vsel %vm916_vm2, %v4768_v46, %v4674_v43  ;;  %v4428_v43 = vld [vmem:[#allocation2 + $0xc8] sm:$0xff] }
 0x43f   : > { %v4799_v16 = vsel %vm916_vm2, %v4767_v13, %v4672_v19  ;;  %4605 = vrot.lane.b32.xlu1 %v4478_v56, %s11329_s21  ;;  %v4427_v56 = vld [vmem:[#allocation2 + $0xc0] sm:$0xff] }
 0x440   : > { %4603 = vrot.lane.b32.xlu0 %v4477_v4, %s11329_s21  ;;  %10306 = vmatprep.mubr.msk.f32.mxu1 %vm1389_vm3, %v4799_v16 }
 0x441   : > { %v4550_v35 = vpop.permute.xlu1 %4549  ;;  %10307 = vmatmul.mubr.msk.f32.vlgmr.msra.gmra.mrb[32].mxu1 %vm1389_vm3, %v4800_v32 }
 0x442   : > { %v4548_v5 = vpop.permute.xlu0 %4547  ;;  %v4770_v59 = vsel %vm422_vm0, %v4418_v53, %v4550_v35 }
 0x443   : > { %4733 = vrot.lane.b32.xlu1 %v4510_v55, %s11330_s13  ;;  %v4769_v29 = vsel %vm422_vm0, %v4417_v14, %v4548_v5  ;;  %v4429_v55 = vld [vmem:[#allocation2 + $0xd8] sm:$0xff] }
 0x444   : > { %4731 = vrot.lane.b32.xlu0 %v4509_v60, %s11330_s13  ;;  %v4430_v60 = vld [vmem:[#allocation2 + $0xe0] sm:$0xff] }
 0x445   : > { %v4678_v22 = vpop.permute.xlu1 %4677 }
 0x446   : > { %v4676_v38 = vpop.permute.xlu0 %4675  ;;  %v4802_v26 = vsel %vm916_vm2, %v4770_v59, %v4678_v22 }
 0x447   : > { %v4801_v47 = vsel %vm916_vm2, %v4769_v29, %v4676_v38 }
 0x448   : > { %10309 = vmatprep.mubr.msk.f32.mxu1 %vm1389_vm3, %v4801_v47  ;;  %v4431_v47 = vld [vmem:[#allocation2 + $0xf0] sm:$0xff] }
 0x449   : > { %v4554_v33 = vpop.permute.xlu1 %4553  ;;  %10310 = vmatmul.mubr.msk.f32.gmra.mrb[34].mxu1 %vm1389_vm3, %v4802_v26 }
 0x44a   : > { %v4552_v37 = vpop.permute.xlu0 %4551  ;;  %v4772_v51 = vsel %vm422_vm0, %v4420_v52, %v4554_v33  ;;  %v4432_v33 = vld [vmem:[#allocation2 + $0xf8] sm:$0xff] }
 0x44b   : > { %v4771_v18 = vsel %vm422_vm0, %v4419_v20, %v4552_v37 }
 0x44d   : > { %v4682_v41 = vpop.permute.xlu1 %4681 }
 0x44e   : > { %v4680_v17 = vpop.permute.xlu0 %4679  ;;  %v4804_v7 = vsel %vm916_vm2, %v4772_v51, %v4682_v41 }
 0x44f   : > { %v4803_v15 = vsel %vm916_vm2, %v4771_v18, %v4680_v17 }
 0x450   : > { %10312 = vmatprep.mubr.msk.f32.mxu1 %vm1389_vm3, %v4803_v15  ;;  %v4433_v15 = vld [vmem:[#allocation2 + $0x108] sm:$0xff] }
 0x451   : > { %v4558_v50 = vpop.permute.xlu1 %4557  ;;  %10313 = vmatmul.mubr.msk.f32.gmra.mrb[36].mxu1 %vm1389_vm3, %v4804_v7 }
 0x452   : > { %v4556_v23 = vpop.permute.xlu0 %4555  ;;  %v4774_v9 = vsel %vm422_vm0, %v4422_v44, %v4558_v50  ;;  %v4434_v50 = vld [vmem:[#allocation2 + $0x110] sm:$0xff] }
 0x453   : > { %v4773_v27 = vsel %vm422_vm0, %v4421_v30, %v4556_v23 }
 0x455   : > { %v4686_v40 = vpop.permute.xlu1 %4685 }
 0x456   : > { %v4684_v36 = vpop.permute.xlu0 %4683  ;;  %v4806_v8 = vsel %vm916_vm2, %v4774_v9, %v4686_v40 }
 0x457   : > { %v4805_v54 = vsel %vm916_vm2, %v4773_v27, %v4684_v36 }
 0x458   : > { %10315 = vmatprep.mubr.msk.f32.mxu1 %vm1389_vm3, %v4805_v54  ;;  %v4435_v54 = vld [vmem:[#allocation2 + $0x120] sm:$0xff] }
 0x459   : > { %v4562_v6 = vpop.permute.xlu1 %4561  ;;  %10316 = vmatmul.mubr.msk.f32.gmra.mrb[38].mxu1 %vm1389_vm3, %v4806_v8 }
 0x45a   : > { %v4560_v1 = vpop.permute.xlu0 %4559  ;;  %v4776_v11 = vsel %vm422_vm0, %v4424_v10, %v4562_v6  ;;  %v4436_v6 = vld [vmem:[#allocation2 + $0x128] sm:$0xff] }
 0x45b   : > { %v4775_v63 = vsel %vm422_vm0, %v4423_v34, %v4560_v1 }
 0x45d   : > { %v4690_v0 = vpop.permute.xlu1 %4689 }
 0x45e   : > { %v4688_v25 = vpop.permute.xlu0 %4687  ;;  %v4808_v45 = vsel %vm916_vm2, %v4776_v11, %v4690_v0 }
 0x45f   : > { %v4807_v39 = vsel %vm916_vm2, %v4775_v63, %v4688_v25 }
 0x460   : > { %10318 = vmatprep.mubr.msk.f32.mxu1 %vm1389_vm3, %v4807_v39  ;;  %v4437_v39 = vld [vmem:[#allocation2 + $0x138] sm:$0xff] }
 0x461   : > { %v4566_v61 = vpop.permute.xlu1 %4565  ;;  %10319 = vmatmul.mubr.msk.f32.gmra.mrb[40].mxu1 %vm1389_vm3, %v4808_v45 }
 0x462   : > { %v4564_v58 = vpop.permute.xlu0 %4563  ;;  %v4778_v31 = vsel %vm422_vm0, %v4426_v3, %v4566_v61  ;;  %v4438_v61 = vld [vmem:[#allocation2 + $0x140] sm:$0xff] }
 0x463   : > { %v4777_v57 = vsel %vm422_vm0, %v4425_v21, %v4564_v58 }
 0x465   : > { %v4694_v24 = vpop.permute.xlu1 %4693 }
 0x466   : > { %v4692_v2 = vpop.permute.xlu0 %4691  ;;  %v4810_v42 = vsel %vm916_vm2, %v4778_v31, %v4694_v24  ;;  %v5331_v31 = vld [vmem:[#allocation2 + $0x1] sm:$0xff] }
 0x467   : > { %v4809_v28 = vsel %vm916_vm2, %v4777_v57, %v4692_v2  ;;  %5427 = vrot.lane.b32.xlu0 %v5331_v31, %s11329_s21  ;;  %v6154_v31 = vld [vmem:[%s15619_s5 + $0xb8] sm:$0xff] }
 0x468   : > { %10321 = vmatprep.mubr.msk.f32.mxu1 %vm1389_vm3, %v4809_v28 }
 0x469   : > { %v4570_v12 = vpop.permute.xlu1 %4569  ;;  %10322 = vmatmul.mubr.msk.f32.gmra.mrb[42].mxu1 %vm1389_vm3, %v4810_v42  ;;  %v5332_v42 = vld [vmem:[#allocation2 + $0x9] sm:$0xff] }
 0x46a   : > { %v4568_v48 = vpop.permute.xlu0 %4567  ;;  %v4780_v13 = vsel %vm422_vm0, %v4428_v43, %v4570_v12  ;;  %5429 = vrot.lane.b32.xlu1 %v5332_v42, %s11329_s21  ;;  %v5363_v12 = vld [vmem:[#allocation2 + $0x2] sm:$0xff]  ;;  %v4440_v43 = vld [vmem:[#allocation2 + $0x158] sm:$0xff] }
 0x46b   : > { %v4779_v4 = vsel %vm422_vm0, %v4427_v56, %v4568_v48  ;;  %v5364_v48 = vld [vmem:[#allocation2 + $0xa] sm:$0xff]  ;;  %5555 = vrot.lane.b32.xlu0 %v5363_v12, %s11330_s13 }
 0x46c   : > { %v4439_v56 = vld [vmem:[#allocation2 + $0x150] sm:$0xff] }
 0x46d   : > { %v4698_v49 = vpop.permute.xlu1 %4697 }
 0x46e   : > { %v4696_v62 = vpop.permute.xlu0 %4695  ;;  %v4812_v46 = vsel %vm916_vm2, %v4780_v13, %v4698_v49  ;;  %5557 = vrot.lane.b32.xlu1 %v5364_v48, %s11330_s13 }
 0x46f   : > { %v4811_v19 = vsel %vm916_vm2, %v4779_v4, %v4696_v62 }
 0x470   : > { %10324 = vmatprep.mubr.msk.f32.mxu1 %vm1389_vm3, %v4811_v19 }
 0x471   : > { %v4574_v16 = vpop.permute.xlu1 %4573  ;;  %10325 = vmatmul.mubr.msk.f32.gmra.mrb[44].mxu1 %vm1389_vm3, %v4812_v46 }
 0x472   : > { %v4572_v32 = vpop.permute.xlu0 %4571  ;;  %v4782_v22 = vsel %vm422_vm0, %v4430_v60, %v4574_v16  ;;  %v4442_v60 = vld [vmem:[#allocation2 + $0x170] sm:$0xff] }
 0x473   : > { %v4781_v5 = vsel %vm422_vm0, %v4429_v55, %v4572_v32  ;;  %v4441_v55 = vld [vmem:[#allocation2 + $0x168] sm:$0xff] }
 0x475   : > { %v4702_v35 = vpop.permute.xlu1 %4701 }
 0x476   : > { %v4700_v14 = vpop.permute.xlu0 %4699  ;;  %v4814_v29 = vsel %vm916_vm2, %v4782_v22, %v4702_v35 }
 0x477   : > { %v4813_v53 = vsel %vm916_vm2, %v4781_v5, %v4700_v14 }
 0x478   : > { %10327 = vmatprep.mubr.msk.f32.mxu1 %vm1389_vm3, %v4813_v53 }
 0x479   : > { %v4578_v38 = vpop.permute.xlu1 %4577  ;;  %10328 = vmatmul.mubr.msk.f32.gmra.mrb[46].mxu1 %vm1389_vm3, %v4814_v29 }
 0x47a   : > { %v4576_v59 = vpop.permute.xlu0 %4575  ;;  %v4784_v41 = vsel %vm422_vm0, %v4432_v33, %v4578_v38  ;;  %v4444_v33 = vld [vmem:[#allocation2 + $0x188] sm:$0xff] }
 0x47b   : > { %v4783_v37 = vsel %vm422_vm0, %v4431_v47, %v4576_v59  ;;  %v4443_v47 = vld [vmem:[#allocation2 + $0x180] sm:$0xff] }
 0x47d   : > { %v4706_v26 = vpop.permute.xlu1 %4705 }
 0x47e   : > { %v4704_v20 = vpop.permute.xlu0 %4703  ;;  %v4816_v18 = vsel %vm916_vm2, %v4784_v41, %v4706_v26 }
 0x47f   : > { %v4815_v52 = vsel %vm916_vm2, %v4783_v37, %v4704_v20 }
 0x480   : > { %10330 = vmatprep.mubr.msk.f32.mxu1 %vm1389_vm3, %v4815_v52 }
 0x481   : > { %v4582_v17 = vpop.permute.xlu1 %4581  ;;  %10331 = vmatmul.mubr.msk.f32.gmra.mrb[48].mxu1 %vm1389_vm3, %v4816_v18 }
 0x482   : > { %v4580_v51 = vpop.permute.xlu0 %4579  ;;  %v4786_v40 = vsel %vm422_vm0, %v4434_v50, %v4582_v17  ;;  %v4446_v17 = vld [vmem:[#allocation2 + $0x1a0] sm:$0xff] }
 0x483   : > { %v4785_v23 = vsel %vm422_vm0, %v4433_v15, %v4580_v51  ;;  %v4445_v51 = vld [vmem:[#allocation2 + $0x198] sm:$0xff] }
 0x485   : > { %v4710_v7 = vpop.permute.xlu1 %4709 }
 0x486   : > { %v4708_v30 = vpop.permute.xlu0 %4707  ;;  %v4818_v27 = vsel %vm916_vm2, %v4786_v40, %v4710_v7 }
 0x487   : > { %v4817_v44 = vsel %vm916_vm2, %v4785_v23, %v4708_v30 }
 0x488   : > { %10333 = vmatprep.mubr.msk.f32.mxu1 %vm1389_vm3, %v4817_v44 }
 0x489   : > { %v4586_v36 = vpop.permute.xlu1 %4585  ;;  %10334 = vmatmul.mubr.msk.f32.gmra.mrb[50].mxu1 %vm1389_vm3, %v4818_v27 }
 0x48a   : > { %v4584_v9 = vpop.permute.xlu0 %4583  ;;  %v4788_v0 = vsel %vm422_vm0, %v4436_v6, %v4586_v36  ;;  %v6143_v36 = vld [vmem:[%s15619_s5 + $0x60] sm:$0xff]  ;;  %v6146_v6 = vld [vmem:[%s15619_s5 + $0x78] sm:$0xff] }
 0x48b   : > { %v4787_v1 = vsel %vm422_vm0, %v4435_v54, %v4584_v9  ;;  %v6144_v9 = vld [vmem:[%s15619_s5 + $0x68] sm:$0xff] }
 0x48c   : > { %v10714_v54 = vpack.c.bf16 %v6144_v9, %v6143_v36 }
 0x48d   : > { %v4714_v8 = vpop.permute.xlu1 %4713 }
 0x48e   : > { %v4712_v34 = vpop.permute.xlu0 %4711  ;;  %v4820_v63 = vsel %vm916_vm2, %v4788_v0, %v4714_v8  ;;  %10715 = vmatprep.subr.bf16.mxu0 %v10714_v54  ;;  %v6145_v8 = vld [vmem:[%s15619_s5 + $0x70] sm:$0xff]  ;;  %v6148_v0 = vld [vmem:[%s15619_s5 + $0x88] sm:$0xff] }
 0x48f   : > { %v4819_v10 = vsel %vm916_vm2, %v4787_v1, %v4712_v34  ;;  %10717 = vmatpush3.bf16.msra.mxu0 %v10714_v54  ;;  %v10718_v1 = vpack.c.bf16 %v6146_v6, %v6145_v8  ;;  %v6147_v34 = vld [vmem:[%s15619_s5 + $0x80] sm:$0xff] }
 0x490   : > { %10336 = vmatprep.mubr.msk.f32.mxu1 %vm1389_vm3, %v4819_v10  ;;  %v10722_v10 = vpack.c.bf16 %v6148_v0, %v6147_v34 }
 0x491   : > { %v4590_v25 = vpop.permute.xlu1 %4589  ;;  %10337 = vmatmul.mubr.msk.f32.gmra.mrb[52].mxu1 %vm1389_vm3, %v4820_v63  ;;  %10719 = vmatprep.subr.bf16.mxu0 %v10718_v1  ;;  %v6149_v63 = vld [vmem:[%s15619_s5 + $0x90] sm:$0xff] }
 0x492   : > { %v4588_v11 = vpop.permute.xlu0 %4587  ;;  %v4790_v24 = vsel %vm422_vm0, %v4438_v61, %v4590_v25  ;;  %v6150_v25 = vld [vmem:[%s15619_s5 + $0x98] sm:$0xff]  ;;  %v6152_v61 = vld [vmem:[%s15619_s5 + $0xa8] sm:$0xff] }
 0x493   : > { %v4789_v58 = vsel %vm422_vm0, %v4437_v39, %v4588_v11  ;;  %10721 = vmatpush3.bf16.msra.mxu0 %v10718_v1  ;;  %v10726_v11 = vpack.c.bf16 %v6150_v25, %v6149_v63  ;;  %v13797_v39 = vld [vmem:[%s15618_s4] ss:$0 sm:$0xff] }
 0x494   : > { %10723 = vmatprep.subr.bf16.mxu0 %v10722_v10 }
 0x495   : > { %v4718_v45 = vpop.permute.xlu1 %4717 }
 0x496   : > { %v4716_v21 = vpop.permute.xlu0 %4715  ;;  %v4822_v57 = vsel %vm916_vm2, %v4790_v24, %v4718_v45  ;;  %v6151_v45 = vld [vmem:[%s15619_s5 + $0xa0] sm:$0xff] }
 0x497   : > { %v4821_v3 = vsel %vm916_vm2, %v4789_v58, %v4716_v21  ;;  %10725 = vmatpush3.bf16.msra.mxu0 %v10722_v10  ;;  %v10730_v58 = vpack.c.bf16 %v6152_v61, %v6151_v45 }
 0x498   : > { %10339 = vmatprep.mubr.msk.f32.mxu1 %vm1389_vm3, %v4821_v3  ;;  %10727 = vmatprep.subr.bf16.mxu0 %v10726_v11 }
 0x499   : > { %v4594_v2 = vpop.permute.xlu1 %4593  ;;  %10340 = vmatmul.mubr.msk.f32.gmra.mrb[54].mxu1 %vm1389_vm3, %v4822_v57 }
 0x49a   : > { %v4592_v28 = vpop.permute.xlu0 %4591  ;;  %v4792_v13 = vsel %vm422_vm0, %v4440_v43, %v4594_v2  ;;  %v6153_v2 = vld [vmem:[%s15619_s5 + $0xb0] sm:$0xff] }
 0x49b   : > { %v4791_v4 = vsel %vm422_vm0, %v4439_v56, %v4592_v28  ;;  %10729 = vmatpush3.bf16.msra.mxu0 %v10726_v11  ;;  %v10734_v42 = vpack.c.bf16 %v6154_v31, %v6153_v2 }
 0x49c   : > { %10731 = vmatprep.subr.bf16.mxu0 %v10730_v58 }
 0x49d   : > { %v4722_v49 = vpop.permute.xlu1 %4721 }
 0x49e   : > { %v4720_v62 = vpop.permute.xlu0 %4719  ;;  %v4824_v46 = vsel %vm916_vm2, %v4792_v13, %v4722_v49 }
 0x49f   : > { %v4823_v19 = vsel %vm916_vm2, %v4791_v4, %v4720_v62  ;;  %10733 = vmatpush3.bf16.msra.mxu0 %v10730_v58 }
 0x4a0   : > { %10342 = vmatprep.mubr.msk.f32.mxu1 %vm1389_vm3, %v4823_v19  ;;  %10735 = vmatprep.subr.bf16.mxu0 %v10734_v42 }
 0x4a1   : > { %v4598_v16 = vpop.permute.xlu1 %4597  ;;  %10343 = vmatmul.mubr.msk.f32.gmra.mrb[56].mxu1 %vm1389_vm3, %v4824_v46 }
 0x4a2   : > { %v4596_v32 = vpop.permute.xlu0 %4595  ;;  %v4794_v22 = vsel %vm422_vm0, %v4442_v60, %v4598_v16 }
 0x4a3   : > { %v4793_v5 = vsel %vm422_vm0, %v4441_v55, %v4596_v32  ;;  %10737 = vmatpush3.bf16.msra.mxu0 %v10734_v42 }
 0x4a5   : > { %v4726_v35 = vpop.permute.xlu1 %4725 }
 0x4a6   : > { %v4724_v14 = vpop.permute.xlu0 %4723  ;;  %v4826_v29 = vsel %vm916_vm2, %v4794_v22, %v4726_v35 }
 0x4a7   : > { %v4825_v53 = vsel %vm916_vm2, %v4793_v5, %v4724_v14 }
 0x4a8   : > { %10345 = vmatprep.mubr.msk.f32.mxu1 %vm1389_vm3, %v4825_v53 }
 0x4a9   : > { %v4602_v38 = vpop.permute.xlu1 %4601  ;;  %10346 = vmatmul.mubr.msk.f32.gmra.mrb[58].mxu1 %vm1389_vm3, %v4826_v29 }
 0x4aa   : > { %v4600_v59 = vpop.permute.xlu0 %4599  ;;  %v4796_v41 = vsel %vm422_vm0, %v4444_v33, %v4602_v38 }
 0x4ab   : > { %v4795_v37 = vsel %vm422_vm0, %v4443_v47, %v4600_v59 }
 0x4ad   : > { %v4730_v26 = vpop.permute.xlu1 %4729 }
 0x4ae   : > { %v4728_v20 = vpop.permute.xlu0 %4727  ;;  %v4828_v18 = vsel %vm916_vm2, %v4796_v41, %v4730_v26 }
 0x4af   : > { %v4827_v52 = vsel %vm916_vm2, %v4795_v37, %v4728_v20 }
 0x4b0   : > { %10348 = vmatprep.mubr.msk.f32.mxu1 %vm1389_vm3, %v4827_v52 }
 0x4b1   : > { %10349 = vmatmul.mubr.msk.f32.gmra.mrb[60].mxu1 %vm1389_vm3, %v4828_v18  ;;  %v4606_v15 = vpop.permute.xlu1 %4605 }
 0x4b2   : > { %v4604_v7 = vpop.permute.xlu0 %4603  ;;  %v4798_v50 = vsel %vm422_vm0, %v4446_v17, %v4606_v15 }
 0x4b3   : > { %v4797_v23 = vsel %vm422_vm0, %v4445_v51, %v4604_v7 }
 0x4b5   : > { %v4734_v30 = vpop.permute.xlu1 %4733 }
 0x4b6   : > { %v4732_v40 = vpop.permute.xlu0 %4731  ;;  %v4830_v44 = vsel %vm916_vm2, %v4798_v50, %v4734_v30 }
 0x4b7   : > { %v4829_v27 = vsel %vm916_vm2, %v4797_v23, %v4732_v40 }
 0x4b8   : > { %10351 = vmatprep.mubr.msk.f32.mxu1 %vm1389_vm3, %v4829_v27 }
 0x4b9   : > { %10352 = vmatmul.mubr.msk.f32.gmra.mrb[62].mxu1 %vm1389_vm3, %v4830_v44 }
 0x514   : > { %v10308_v21 = vpop.f32.mrb[32].mxu1 }
 0x515   : > { %v5204_v24 = vadd.f32 %v10308_v21, %v13797_v39  ;;  %v5005_v3 = vpop.f32.mrb[33].mxu1 }
 0x516   : > { %v5203_v57 = vadd.f32 %v13797_v39, %v5005_v3 }
 0x517   : > { %v5236_v28 = vmax.f32 %v5204_v24, 0.0 }
 0x518   : > { %v5235_v12 = vmax.f32 %v5203_v57, 0.0 }
 0x519   : > { %5268 = vst.msk [vmem:[#allocation2 + $0x21] sm:$0xff] %vm422_vm0, %v5236_v28 }
 0x51a   : > { %5267 = vst.msk [vmem:[#allocation2 + $0x19] sm:$0xff] %vm422_vm0, %v5235_v12 }
 0x51c   : > { %v10311_v48 = vpop.f32.mrb[34].mxu1 }
 0x51d   : > { %v5206_v56 = vadd.f32 %v10311_v48, %v13797_v39  ;;  %v5015_v49 = vpop.f32.mrb[35].mxu1 }
 0x51e   : > { %v5205_v43 = vadd.f32 %v13797_v39, %v5015_v49 }
 0x51f   : > { %v5238_v4 = vmax.f32 %v5206_v56, 0.0 }
 0x520   : > { %v5237_v62 = vmax.f32 %v5205_v43, 0.0  ;;  %v5760_v13 = vld [vmem:[#allocation2 + $0x21] sm:$0xff] }
 0x521   : > { %5270 = vst.msk [vmem:[#allocation2 + $0x39] sm:$0xff] %vm422_vm0, %v5238_v4  ;;  %5857 = vrot.lane.b32.xlu1 %v5760_v13, %s11329_s21  ;;  %v5759_v19 = vld [vmem:[#allocation2 + $0x19] sm:$0xff]  ;;  %v5792_v16 = vld [vmem:[#allocation2 + $0x22] sm:$0xff] }
 0x522   : > { %5269 = vst.msk [vmem:[#allocation2 + $0x31] sm:$0xff] %vm422_vm0, %v5237_v62  ;;  %5855 = vrot.lane.b32.xlu0 %v5759_v19, %s11329_s21  ;;  %v5791_v35 = vld [vmem:[#allocation2 + $0x1a] sm:$0xff] }
 0x524   : > { %v10314_v46 = vpop.f32.mrb[36].mxu1 }
 0x525   : > { %v5208_v32 = vadd.f32 %v10314_v46, %v13797_v39  ;;  %5985 = vrot.lane.b32.xlu1 %v5792_v16, %s11330_s13  ;;  %v5025_v55 = vpop.f32.mrb[37].mxu1 }
 0x526   : > { %v5207_v60 = vadd.f32 %v13797_v39, %v5025_v55  ;;  %5983 = vrot.lane.b32.xlu0 %v5791_v35, %s11330_s13 }
 0x527   : > { %v5240_v5 = vmax.f32 %v5208_v32, 0.0 }
 0x528   : > { %v5239_v14 = vmax.f32 %v5207_v60, 0.0  ;;  %v5762_v26 = vld [vmem:[#allocation2 + $0x39] sm:$0xff] }
 0x529   : > { %5272 = vst.msk [vmem:[#allocation2 + $0x51] sm:$0xff] %vm422_vm0, %v5240_v5  ;;  %5433 = vrot.lane.b32.xlu1 %v5760_v13, %s11329_s21  ;;  %v5761_v33 = vld [vmem:[#allocation2 + $0x31] sm:$0xff]  ;;  %v5794_v20 = vld [vmem:[#allocation2 + $0x3a] sm:$0xff] }
 0x52a   : > { %5271 = vst.msk [vmem:[#allocation2 + $0x49] sm:$0xff] %vm422_vm0, %v5239_v14  ;;  %5431 = vrot.lane.b32.xlu0 %v5759_v19, %s11329_s21  ;;  %v5793_v18 = vld [vmem:[#allocation2 + $0x32] sm:$0xff] }
 0x52c   : > { %v10317_v22 = vpop.f32.mrb[38].mxu1 }
 0x52d   : > { %v5210_v53 = vadd.f32 %v10317_v22, %v13797_v39  ;;  %5561 = vrot.lane.b32.xlu1 %v5792_v16, %s11330_s13  ;;  %v5035_v29 = vpop.f32.mrb[39].mxu1 }
 0x52e   : > { %v5209_v38 = vadd.f32 %v13797_v39, %v5035_v29  ;;  %5559 = vrot.lane.b32.xlu0 %v5791_v35, %s11330_s13 }
 0x52f   : > { %v5242_v59 = vmax.f32 %v5210_v53, 0.0 }
 0x530   : > { %v5241_v47 = vmax.f32 %v5209_v38, 0.0  ;;  %v5764_v27 = vld [vmem:[#allocation2 + $0x51] sm:$0xff] }
 0x531   : > { %5274 = vst.msk [vmem:[#allocation2 + $0x69] sm:$0xff] %vm422_vm0, %v5242_v59  ;;  %5861 = vrot.lane.b32.xlu1 %v5762_v26, %s11329_s21  ;;  %v5763_v36 = vld [vmem:[#allocation2 + $0x49] sm:$0xff]  ;;  %v13853_v54 = vld [vmem:[#allocation2 + $0x52] sm:$0xff] }
 0x532   : > { %5273 = vst.msk [vmem:[#allocation2 + $0x61] sm:$0xff] %vm422_vm0, %v5241_v47  ;;  %5859 = vrot.lane.b32.xlu0 %v5761_v33, %s11329_s21  ;;  %v5795_v1 = vld [vmem:[#allocation2 + $0x4a] sm:$0xff] }
 0x534   : > { %v10320_v37 = vpop.f32.mrb[40].mxu1 }
 0x535   : > { %v5212_v41 = vadd.f32 %v10320_v37, %v13797_v39  ;;  %5989 = vrot.lane.b32.xlu1 %v5794_v20, %s11330_s13  ;;  %v5045_v52 = vpop.f32.mrb[41].mxu1 }
 0x536   : > { %v5211_v17 = vadd.f32 %v13797_v39, %v5045_v52  ;;  %5987 = vrot.lane.b32.xlu0 %v5793_v18, %s11330_s13 }
 0x537   : > { %v5244_v51 = vmax.f32 %v5212_v41, 0.0 }
 0x538   : > { %v5243_v15 = vmax.f32 %v5211_v17, 0.0  ;;  %v13864_v25 = vld [vmem:[#allocation2 + $0x69] sm:$0xff] }
 0x539   : > { %5276 = vst.msk [vmem:[#allocation2 + $0x81] sm:$0xff] %vm422_vm0, %v5244_v51  ;;  %5437 = vrot.lane.b32.xlu1 %v5762_v26, %s11329_s21  ;;  %v13871_v24 = vld [vmem:[#allocation2 + $0x6a] sm:$0xff]  ;;  %v13876_v3 = vld [vmem:[#allocation2 + $0x61] sm:$0xff] }
 0x53a   : > { %5275 = vst.msk [vmem:[#allocation2 + $0x79] sm:$0xff] %vm422_vm0, %v5243_v15  ;;  %5435 = vrot.lane.b32.xlu0 %v5761_v33, %s11329_s21  ;;  %v13886_v42 = vld [vmem:[#allocation2 + $0x62] sm:$0xff] }
 0x53c   : > { %v10323_v7 = vpop.f32.mrb[42].mxu1 }
 0x53d   : > { %v5214_v50 = vadd.f32 %v10323_v7, %v13797_v39  ;;  %5565 = vrot.lane.b32.xlu1 %v5794_v20, %s11330_s13  ;;  %v5055_v23 = vpop.f32.mrb[43].mxu1 }
 0x53e   : > { %v5213_v30 = vadd.f32 %v13797_v39, %v5055_v23  ;;  %5563 = vrot.lane.b32.xlu0 %v5793_v18, %s11330_s13 }
 0x53f   : > { %v5246_v40 = vmax.f32 %v5214_v50, 0.0 }
 0x540   : > { %v5245_v44 = vmax.f32 %v5213_v30, 0.0  ;;  %v13881_v2 = vld [vmem:[#allocation2 + $0x81] sm:$0xff] }
 0x541   : > { %5278 = vst.msk [vmem:[#allocation2 + $0x99] sm:$0xff] %vm422_vm0, %v5246_v40  ;;  %5865 = vrot.lane.b32.xlu1 %v5764_v27, %s11329_s21  ;;  %v13891_v49 = vld [vmem:[#allocation2 + $0x82] sm:$0xff]  ;;  %v13896_v43 = vld [vmem:[#allocation2 + $0x79] sm:$0xff] }
 0x542   : > { %5277 = vst.msk [vmem:[#allocation2 + $0x91] sm:$0xff] %vm422_vm0, %v5245_v44  ;;  %5863 = vrot.lane.b32.xlu0 %v5763_v36, %s11329_s21  ;;  %v13906_v46 = vld [vmem:[#allocation2 + $0x7a] sm:$0xff] }
 0x544   : > { %v10326_v9 = vpop.f32.mrb[44].mxu1 }
 0x545   : > { %v5216_v8 = vadd.f32 %v10326_v9, %v13797_v39  ;;  %5993 = vrot.lane.b32.xlu1 %v13853_v54, %s11330_s13  ;;  %v5065_v6 = vpop.f32.mrb[45].mxu1 }
 0x546   : > { %v5215_v34 = vadd.f32 %v13797_v39, %v5065_v6  ;;  %5991 = vrot.lane.b32.xlu0 %v5795_v1, %s11330_s13 }
 0x547   : > { %v5248_v0 = vmax.f32 %v5216_v8, 0.0 }
 0x548   : > { %v5247_v10 = vmax.f32 %v5215_v34, 0.0  ;;  %v13901_v62 = vld [vmem:[#allocation2 + $0x99] sm:$0xff] }
 0x549   : > { %5280 = vst.msk [vmem:[#allocation2 + $0xb1] sm:$0xff] %vm422_vm0, %v5248_v0  ;;  %5441 = vrot.lane.b32.xlu1 %v5764_v27, %s11329_s21  ;;  %v13911_v35 = vld [vmem:[#allocation2 + $0x9a] sm:$0xff]  ;;  %v13916_v60 = vld [vmem:[#allocation2 + $0x91] sm:$0xff] }
 0x54a   : > { %5279 = vst.msk [vmem:[#allocation2 + $0xa9] sm:$0xff] %vm422_vm0, %v5247_v10  ;;  %5439 = vrot.lane.b32.xlu0 %v5763_v36, %s11329_s21  ;;  %v13926_v29 = vld [vmem:[#allocation2 + $0x92] sm:$0xff] }
 0x54c   : > { %v10329_v63 = vpop.f32.mrb[46].mxu1 }
 0x54d   : > { %v5218_v11 = vadd.f32 %v10329_v63, %v13797_v39  ;;  %5869 = vrot.lane.b32.xlu1 %v13864_v25, %s11329_s21  ;;  %v5075_v45 = vpop.f32.mrb[47].mxu1 }
 0x54e   : > { %v5217_v61 = vadd.f32 %v13797_v39, %v5075_v45  ;;  %5567 = vrot.lane.b32.xlu0 %v5795_v1, %s11330_s13 }
 0x54f   : > { %v5250_v58 = vmax.f32 %v5218_v11, 0.0 }
 0x550   : > { %v5249_v21 = vmax.f32 %v5217_v61, 0.0  ;;  %v13921_v14 = vld [vmem:[#allocation2 + $0xb1] sm:$0xff] }
 0x551   : > { %5282 = vst.msk [vmem:[#allocation2 + $0xc9] sm:$0xff] %vm422_vm0, %v5250_v58  ;;  %5997 = vrot.lane.b32.xlu1 %v13871_v24, %s11330_s13  ;;  %v13931_v26 = vld [vmem:[#allocation2 + $0xb2] sm:$0xff]  ;;  %v13936_v33 = vld [vmem:[#allocation2 + $0xa9] sm:$0xff] }
 0x552   : > { %5281 = vst.msk [vmem:[#allocation2 + $0xc1] sm:$0xff] %vm422_vm0, %v5249_v21  ;;  %5867 = vrot.lane.b32.xlu0 %v13876_v3, %s11329_s21  ;;  %v13946_v18 = vld [vmem:[#allocation2 + $0xaa] sm:$0xff] }
 0x554   : > { %v10332_v57 = vpop.f32.mrb[48].mxu1 }
 0x555   : > { %v5220_v31 = vadd.f32 %v10332_v57, %v13797_v39  ;;  %5873 = vrot.lane.b32.xlu1 %v13881_v2, %s11329_s21  ;;  %v5085_v28 = vpop.f32.mrb[49].mxu1 }
 0x556   : > { %v5219_v12 = vadd.f32 %v13797_v39, %v5085_v28  ;;  %5995 = vrot.lane.b32.xlu0 %v13886_v42, %s11330_s13 }
 0x557   : > { %v5252_v48 = vmax.f32 %v5220_v31, 0.0 }
 0x558   : > { %v5251_v56 = vmax.f32 %v5219_v12, 0.0  ;;  %v13941_v20 = vld [vmem:[#allocation2 + $0xc9] sm:$0xff] }
 0x559   : > { %5284 = vst.msk [vmem:[#allocation2 + $0xe1] sm:$0xff] %vm422_vm0, %v5252_v48  ;;  %6001 = vrot.lane.b32.xlu1 %v13891_v49, %s11330_s13  ;;  %v13951_v7 = vld [vmem:[#allocation2 + $0xca] sm:$0xff]  ;;  %v13956_v50 = vld [vmem:[#allocation2 + $0xc1] sm:$0xff] }
 0x55a   : > { %5283 = vst.msk [vmem:[#allocation2 + $0xd9] sm:$0xff] %vm422_vm0, %v5251_v56  ;;  %5871 = vrot.lane.b32.xlu0 %v13896_v43, %s11329_s21  ;;  %v13966_v27 = vld [vmem:[#allocation2 + $0xc2] sm:$0xff] }
 0x55c   : > { %v10335_v4 = vpop.f32.mrb[50].mxu1 }
 0x55d   : > { %v5222_v13 = vadd.f32 %v10335_v4, %v13797_v39  ;;  %5877 = vrot.lane.b32.xlu1 %v13901_v62, %s11329_s21  ;;  %v5095_v19 = vpop.f32.mrb[51].mxu1 }
 0x55e   : > { %v5221_v16 = vadd.f32 %v13797_v39, %v5095_v19  ;;  %5999 = vrot.lane.b32.xlu0 %v13906_v46, %s11330_s13  ;;  %v14011_v19 = vpop.permute.xlu1 %5429 }
 0x55f   : > { %v5254_v32 = vmax.f32 %v5222_v13, 0.0 }
 0x560   : > { %v5253_v55 = vmax.f32 %v5221_v16, 0.0  ;;  %v13961_v30 = vld [vmem:[#allocation2 + $0xe1] sm:$0xff] }
 0x561   : > { %5286 = vst.msk [vmem:[#allocation2 + $0xf9] sm:$0xff] %vm422_vm0, %v5254_v32  ;;  %6005 = vrot.lane.b32.xlu1 %v13911_v35, %s11330_s13  ;;  %v13971_v6 = vld [vmem:[#allocation2 + $0xe2] sm:$0xff]  ;;  %v13976_v1 = vld [vmem:[#allocation2 + $0xd9] sm:$0xff] }
 0x562   : > { %5285 = vst.msk [vmem:[#allocation2 + $0xf1] sm:$0xff] %vm422_vm0, %v5253_v55  ;;  %5875 = vrot.lane.b32.xlu0 %v13916_v60, %s11329_s21  ;;  %v13986_v11 = vld [vmem:[#allocation2 + $0xda] sm:$0xff] }
 0x564   : > { %v10338_v5 = vpop.f32.mrb[52].mxu1 }
 0x565   : > { %v5224_v22 = vadd.f32 %v10338_v5, %v13797_v39  ;;  %5881 = vrot.lane.b32.xlu1 %v13921_v14, %s11329_s21  ;;  %v5105_v53 = vpop.f32.mrb[53].mxu1  ;;  %v14021_v5 = vpop.permute.xlu0 %5427 }
 0x566   : > { %v5223_v38 = vadd.f32 %v13797_v39, %v5105_v53  ;;  %6003 = vrot.lane.b32.xlu0 %v13926_v29, %s11330_s13 }
 0x567   : > { %v5256_v59 = vmax.f32 %v5224_v22, 0.0 }
 0x568   : > { %v5255_v47 = vmax.f32 %v5223_v38, 0.0  ;;  %v13981_v0 = vld [vmem:[#allocation2 + $0xf9] sm:$0xff] }
 0x569   : > { %5288 = vst.msk [vmem:[#allocation2 + $0x111] sm:$0xff] %vm422_vm0, %v5256_v59  ;;  %6009 = vrot.lane.b32.xlu1 %v13931_v26, %s11330_s13  ;;  %v13991_v21 = vld [vmem:[#allocation2 + $0xfa] sm:$0xff]  ;;  %v13996_v57 = vld [vmem:[#allocation2 + $0xf1] sm:$0xff] }
 0x56a   : > { %5287 = vst.msk [vmem:[#allocation2 + $0x109] sm:$0xff] %vm422_vm0, %v5255_v47  ;;  %5879 = vrot.lane.b32.xlu0 %v13936_v33, %s11329_s21  ;;  %v14006_v56 = vld [vmem:[#allocation2 + $0xf2] sm:$0xff]  ;;  %v14030_v47 = vpop.permute.xlu1 %5557 }
 0x56b   : > { %15717 = vst [vmem:[#allocation19_spill] sm:$0xff] %v14030_v47 }
 0x56c   : > { %v10341_v37 = vpop.f32.mrb[54].mxu1 }
 0x56d   : > { %v5226_v41 = vadd.f32 %v10341_v37, %v13797_v39  ;;  %5885 = vrot.lane.b32.xlu1 %v13941_v20, %s11329_s21  ;;  %v5115_v52 = vpop.f32.mrb[55].mxu1 }
 0x56e   : > { %v5225_v17 = vadd.f32 %v13797_v39, %v5115_v52  ;;  %6007 = vrot.lane.b32.xlu0 %v13946_v18, %s11330_s13 }
 0x56f   : > { %v5258_v51 = vmax.f32 %v5226_v41, 0.0 }
 0x570   : > { %v5257_v15 = vmax.f32 %v5225_v17, 0.0  ;;  %v14001_v28 = vld [vmem:[#allocation2 + $0x111] sm:$0xff]  ;;  %v14037_v17 = vpop.permute.xlu0 %5555 }
 0x571   : > { %5290 = vst.msk [vmem:[#allocation2 + $0x129] sm:$0xff] %vm422_vm0, %v5258_v51  ;;  %6013 = vrot.lane.b32.xlu1 %v13951_v7, %s11330_s13  ;;  %v14013_v32 = vld [vmem:[#allocation2 + $0x112] sm:$0xff]  ;;  %v14018_v55 = vld [vmem:[#allocation2 + $0x109] sm:$0xff] }
 0x572   : > { %5289 = vst.msk [vmem:[#allocation2 + $0x121] sm:$0xff] %vm422_vm0, %v5257_v15  ;;  %5883 = vrot.lane.b32.xlu0 %v13956_v50, %s11329_s21  ;;  %v14032_v37 = vld [vmem:[#allocation2 + $0x10a] sm:$0xff] }
 0x574   : > { %v10344_v23 = vpop.f32.mrb[56].mxu1 }
 0x575   : > { %v5228_v40 = vadd.f32 %v10344_v23, %v13797_v39  ;;  %5889 = vrot.lane.b32.xlu1 %v13961_v30, %s11329_s21  ;;  %v5125_v44 = vpop.f32.mrb[57].mxu1 }
 0x576   : > { %v5227_v36 = vadd.f32 %v13797_v39, %v5125_v44  ;;  %6011 = vrot.lane.b32.xlu0 %v13966_v27, %s11330_s13 }
 0x577   : > { %v5260_v9 = vmax.f32 %v5228_v40, 0.0 }
 0x578   : > { %v5259_v8 = vmax.f32 %v5227_v36, 0.0  ;;  %v14025_v53 = vld [vmem:[#allocation2 + $0x129] sm:$0xff] }
 0x579   : > { %5292 = vst.msk [vmem:[#allocation2 + $0x141] sm:$0xff] %vm422_vm0, %v5260_v9  ;;  %6017 = vrot.lane.b32.xlu1 %v13971_v6, %s11330_s13  ;;  %v14039_v15 = vld [vmem:[#allocation2 + $0x12a] sm:$0xff]  ;;  %v14044_v23 = vld [vmem:[#allocation2 + $0x121] sm:$0xff] }
 0x57a   : > { %5291 = vst.msk [vmem:[#allocation2 + $0x139] sm:$0xff] %vm422_vm0, %v5259_v8  ;;  %5887 = vrot.lane.b32.xlu0 %v13976_v1, %s11329_s21  ;;  %v14053_v36 = vld [vmem:[#allocation2 + $0x122] sm:$0xff] }
 0x57b   : > { %v5715_v9 = vld [vmem:[%s15619_s5] sm:$0xff]  ;;  %v5716_v8 = vld [vmem:[%s15619_s5 + $0x8] sm:$0xff] }
 0x57c   : > { %v10347_v34 = vpop.f32.mrb[58].mxu1 }
 0x57d   : > { %v5230_v10 = vadd.f32 %v10347_v34, %v13797_v39  ;;  %5893 = vrot.lane.b32.xlu1 %v13981_v0, %s11329_s21  ;;  %v5135_v63 = vpop.f32.mrb[59].mxu1  ;;  %v14063_v34 = vld [vmem:[#allocation2 + $0x18] sm:$0xff] }
 0x57e   : > { %v5229_v45 = vadd.f32 %v13797_v39, %v5135_v63  ;;  %6015 = vrot.lane.b32.xlu0 %v13986_v11, %s11330_s13  ;;  %15718 = vst [vmem:[#allocation20_spill] sm:$0xff] %v14063_v34  ;;  %v10738_v63 = vpack.c.bf16 %v5716_v8, %v5715_v9 }
 0x57f   : > { %v5262_v61 = vmax.f32 %v5230_v10, 0.0 }
 0x580   : > { %v5261_v58 = vmax.f32 %v5229_v45, 0.0  ;;  %v14049_v44 = vld [vmem:[#allocation2 + $0x141] sm:$0xff]  ;;  %10739 = vmatprep.subr.bf16.mxu0 %v10738_v63 }
 0x581   : > { %5294 = vst.msk [vmem:[#allocation2 + $0x159] sm:$0xff] %vm422_vm0, %v5262_v61  ;;  %6021 = vrot.lane.b32.xlu1 %v13991_v21, %s11330_s13  ;;  %v14065_v45 = vld [vmem:[#allocation2 + $0x20] sm:$0xff] }
 0x582   : > { %5293 = vst.msk [vmem:[#allocation2 + $0x151] sm:$0xff] %vm422_vm0, %v5261_v58  ;;  %5891 = vrot.lane.b32.xlu0 %v13996_v57, %s11329_s21  ;;  %15719 = vst [vmem:[#allocation21_spill] sm:$0xff] %v14065_v45 }
 0x584   : > { %v10350_v31 = vpop.f32.mrb[60].mxu1 }
 0x585   : > { %v5232_v12 = vadd.f32 %v10350_v31, %v13797_v39  ;;  %5897 = vrot.lane.b32.xlu1 %v14001_v28, %s11329_s21  ;;  %v5145_v48 = vpop.f32.mrb[61].mxu1  ;;  %v14069_v31 = vld [vmem:[#allocation2 + $0x142] sm:$0xff] }
 0x586   : > { %v5231_v4 = vadd.f32 %v13797_v39, %v5145_v48  ;;  %6019 = vrot.lane.b32.xlu0 %v14006_v56, %s11330_s13 }
 0x587   : > { %v5264_v13 = vmax.f32 %v5232_v12, 0.0 }
 0x588   : > { %v5263_v16 = vmax.f32 %v5231_v4, 0.0  ;;  %v14076_v4 = vld [vmem:[#allocation2 + $0x139] sm:$0xff] }
 0x589   : > { %5296 = vst.msk [vmem:[#allocation2 + $0x171] sm:$0xff] %vm422_vm0, %v5264_v13  ;;  %6025 = vrot.lane.b32.xlu1 %v14013_v32, %s11330_s13 }
 0x58a   : > { %5295 = vst.msk [vmem:[#allocation2 + $0x169] sm:$0xff] %vm422_vm0, %v5263_v16  ;;  %5895 = vrot.lane.b32.xlu0 %v14018_v55, %s11329_s21 }
 0x58c   : > { %v10353_v22 = vpop.f32.mrb[62].mxu1 }
 0x58d   : > { %v5234_v38 = vadd.f32 %v10353_v22, %v13797_v39  ;;  %5901 = vrot.lane.b32.xlu1 %v14025_v53, %s11329_s21  ;;  %v5155_v59 = vpop.f32.mrb[63].mxu1  ;;  %v5717_v22 = vld [vmem:[%s15619_s5 + $0x10] sm:$0xff] }
 0x58e   : > { %v5233_v41 = vadd.f32 %v13797_v39, %v5155_v59  ;;  %6023 = vrot.lane.b32.xlu0 %v14032_v37, %s11330_s13 }
 0x58f   : > { %v5266_v52 = vmax.f32 %v5234_v38, 0.0  ;;  %v5718_v38 = vld [vmem:[%s15619_s5 + $0x18] sm:$0xff] }
 0x590   : > { %v5265_v51 = vmax.f32 %v5233_v41, 0.0  ;;  %v14093_v41 = vld [vmem:[#allocation2 + $0x159] sm:$0xff] }
 0x591   : > { %5298 = vst.msk [vmem:[#allocation2 + $0x189] sm:$0xff] %vm422_vm0, %v5266_v52  ;;  %6029 = vrot.lane.b32.xlu1 %v14039_v15, %s11330_s13  ;;  %v10742_v52 = vpack.c.bf16 %v5718_v38, %v5717_v22  ;;  %v14125_v22 = vld [vmem:[#allocation2 + $0x171] sm:$0xff]  ;;  %v14152_v47 = vld [vmem:[#allocation2 + $0x169] sm:$0xff] }
 0x592   : > { %5297 = vst.msk [vmem:[#allocation2 + $0x181] sm:$0xff] %vm422_vm0, %v5265_v51  ;;  %5899 = vrot.lane.b32.xlu0 %v14044_v23, %s11329_s21  ;;  %v14097_v51 = vld [vmem:[#allocation2 + $0x13a] sm:$0xff] }
 0x593   : > { %v5858_v39 = vpop.permute.xlu1 %5857 }
 0x594   : > { %v5856_v40 = vpop.permute.xlu0 %5855  ;;  %v6080_v12 = vsel %vm422_vm0, %v14065_v45, %v5858_v39  ;;  %v5719_v39 = vld [vmem:[%s15619_s5 + $0x20] sm:$0xff] }
 0x595   : > { %5905 = vrot.lane.b32.xlu1 %v14049_v44, %s11329_s21  ;;  %v6079_v61 = vsel %vm422_vm0, %v14063_v34, %v5856_v40  ;;  %v5720_v40 = vld [vmem:[%s15619_s5 + $0x28] sm:$0xff] }
 0x596   : > { %6027 = vrot.lane.b32.xlu0 %v14053_v36, %s11330_s13  ;;  %v10746_v8 = vpack.c.bf16 %v5720_v40, %v5719_v39  ;;  %v5723_v39 = vld [vmem:[%s15619_s5 + $0x40] sm:$0xff]  ;;  %v5724_v40 = vld [vmem:[%s15619_s5 + $0x48] sm:$0xff] }
 0x597   : > { %v5986_v10 = vpop.permute.xlu1 %5985 }
 0x598   : > { %v5984_v58 = vpop.permute.xlu0 %5983  ;;  %v6112_v13 = vsel %vm916_vm2, %v6080_v12, %v5986_v10  ;;  %v5721_v12 = vld [vmem:[%s15619_s5 + $0x30] sm:$0xff] }
 0x599   : > { %v6111_v48 = vsel %vm916_vm2, %v6079_v61, %v5984_v58  ;;  %6033 = vrot.lane.b32.xlu1 %v14069_v31, %s11330_s13  ;;  %v14115_v61 = vld [vmem:[#allocation2 + $0x151] sm:$0xff] }
 0x59a   : > { %10378 = vmatprep.mubr.msk.f32.mxu0 %vm1389_vm3, %v6111_v48  ;;  %5903 = vrot.lane.b32.xlu0 %v14076_v4, %s11329_s21  ;;  %v5722_v48 = vld [vmem:[%s15619_s5 + $0x38] sm:$0xff] }
 0x59b   : > { %v14082_v16 = vpop.permute.xlu1 %5433  ;;  %10379 = vmatmul.mubr.msk.f32.vlgmr.msra.gmra.mrb[32].mxu0 %vm1389_vm3, %v6112_v13  ;;  %v10750_v38 = vpack.c.bf16 %v5722_v48, %v5721_v12  ;;  %v10754_v12 = vpack.c.bf16 %v5724_v40, %v5723_v39  ;;  %v14141_v48 = vld [vmem:[#allocation2 + $0x38] sm:$0xff] }
 0x59c   : > { %15720 = vst [vmem:[#allocation22_spill] sm:$0xff] %v14082_v16  ;;  %v14091_v59 = vpop.permute.xlu0 %5431  ;;  %10741 = vmatpush3.bf16.msra.mxu0 %v10738_v63  ;;  %v14111_v63 = vld [vmem:[#allocation2 + $0x15a] sm:$0xff]  ;;  %15724 = vst [vmem:[#allocation28_spill] sm:$0xff] %v14141_v48 }
 0x59d   : > { %15721 = vst [vmem:[#allocation25_spill] sm:$0xff] %v14091_v59  ;;  %5909 = vrot.lane.b32.xlu1 %v14093_v41, %s11329_s21  ;;  %10743 = vmatprep.subr.bf16.mxu0 %v10742_v52 }
 0x59e   : > { %6031 = vrot.lane.b32.xlu0 %v14097_v51, %s11330_s13 }
 0x59f   : > { %v14107_v9 = vpop.permute.xlu1 %5561 }
 0x5a0   : > { %15722 = vst [vmem:[#allocation26_spill] sm:$0xff] %v14107_v9  ;;  %v14109_v10 = vpop.permute.xlu0 %5559  ;;  %10745 = vmatpush3.bf16.msra.mxu0 %v10742_v52  ;;  %v14129_v52 = vld [vmem:[#allocation2 + $0x152] sm:$0xff] }
 0x5a1   : > { %15723 = vst [vmem:[#allocation27_spill] sm:$0xff] %v14109_v10  ;;  %6037 = vrot.lane.b32.xlu1 %v14111_v63, %s11330_s13  ;;  %10747 = vmatprep.subr.bf16.mxu0 %v10746_v8  ;;  %v14139_v9 = vld [vmem:[#allocation2 + $0x30] sm:$0xff] }
 0x5a2   : > { %5907 = vrot.lane.b32.xlu0 %v14115_v61, %s11329_s21  ;;  %v14145_v10 = vld [vmem:[#allocation2 + $0x172] sm:$0xff] }
 0x5a3   : > { %v5862_v58 = vpop.permute.xlu1 %5861 }
 0x5a4   : > { %v5860_v13 = vpop.permute.xlu0 %5859  ;;  %10749 = vmatpush3.bf16.msra.mxu0 %v10746_v8  ;;  %v6082_v34 = vsel %vm422_vm0, %v14141_v48, %v5862_v58  ;;  %v5822_v48 = vld [vmem:[#allocation2 + $0x18a] sm:$0xff] }
 0x5a5   : > { %5913 = vrot.lane.b32.xlu1 %v14125_v22, %s11329_s21  ;;  %10751 = vmatprep.subr.bf16.mxu0 %v10750_v38  ;;  %v6081_v45 = vsel %vm422_vm0, %v14139_v9, %v5860_v13  ;;  %v5725_v13 = vld [vmem:[%s15619_s5 + $0x50] sm:$0xff] }
 0x5a6   : > { %6035 = vrot.lane.b32.xlu0 %v14129_v52, %s11330_s13 }
 0x5a7   : > { %v5990_v8 = vpop.permute.xlu1 %5989 }
 0x5a8   : > { %v5988_v16 = vpop.permute.xlu0 %5987  ;;  %10753 = vmatpush3.bf16.msra.mxu0 %v10750_v38  ;;  %v6114_v39 = vsel %vm916_vm2, %v6082_v34, %v5990_v8  ;;  %v5790_v34 = vld [vmem:[#allocation2 + $0x189] sm:$0xff] }
 0x5a9   : > { %v6113_v59 = vsel %vm916_vm2, %v6081_v45, %v5988_v16  ;;  %6041 = vrot.lane.b32.xlu1 %v14145_v10, %s11330_s13  ;;  %10755 = vmatprep.subr.bf16.mxu0 %v10754_v12  ;;  %v5726_v45 = vld [vmem:[%s15619_s5 + $0x58] sm:$0xff] }
 0x5aa   : > { %10381 = vmatprep.mubr.msk.f32.mxu0 %vm1389_vm3, %v6113_v59  ;;  %5911 = vrot.lane.b32.xlu0 %v14152_v47, %s11329_s21  ;;  %v10758_v58 = vpack.c.bf16 %v5726_v45, %v5725_v13  ;;  %v14170_v59 = vld [vmem:[#allocation2 + $0x16a] sm:$0xff]  ;;  %v5821_v45 = vld [vmem:[#allocation2 + $0x182] sm:$0xff] }
 0x5ab   : > { %v14164_v16 = vpop.permute.xlu1 %5437  ;;  %10382 = vmatmul.mubr.msk.f32.gmra.mrb[34].mxu0 %vm1389_vm3, %v6114_v39  ;;  %v5789_v39 = vld [vmem:[#allocation2 + $0x181] sm:$0xff] }
 0x5ac   : > { %15725 = vst [vmem:[#allocation31_spill] sm:$0xff] %v14164_v16  ;;  %v14167_v38 = vpop.permute.xlu0 %5435  ;;  %10757 = vmatpush3.bf16.msra.mxu0 %v10754_v12  ;;  %v14185_v16 = vld [vmem:[#allocation2 + $0x50] sm:$0xff] }
 0x5ad   : > { %5917 = vrot.lane.b32.xlu1 %v5790_v34, %s11329_s21  ;;  %10759 = vmatprep.subr.bf16.mxu0 %v10758_v58  ;;  %v14183_v34 = vld [vmem:[#allocation2 + $0x48] sm:$0xff] }
 0x5ae   : > { %6039 = vrot.lane.b32.xlu0 %v14170_v59, %s11330_s13 }
 0x5af   : > { %v14174_v40 = vpop.permute.xlu1 %5565 }
 0x5b0   : > { %15726 = vst [vmem:[#allocation32_spill] sm:$0xff] %v14174_v40  ;;  %v14176_v8 = vpop.permute.xlu0 %5563  ;;  %10761 = vmatpush3.bf16.msra.mxu0 %v10758_v58 }
 0x5b1   : > { %15727 = vst [vmem:[#allocation33_spill] sm:$0xff] %v14176_v8  ;;  %6045 = vrot.lane.b32.xlu1 %v5822_v48, %s11330_s13 }
 0x5b2   : > { %5915 = vrot.lane.b32.xlu0 %v5789_v39, %s11329_s21 }
 0x5b3   : > { %v5866_v12 = vpop.permute.xlu1 %5865 }
 0x5b4   : > { %v5864_v13 = vpop.permute.xlu0 %5863  ;;  %v6084_v39 = vsel %vm422_vm0, %v14185_v16, %v5866_v12 }
 0x5b5   : > { %5569 = vrot.lane.b32.xlu1 %v13853_v54, %s11330_s13  ;;  %v6083_v58 = vsel %vm422_vm0, %v14183_v34, %v5864_v13 }
 0x5b6   : > { %6043 = vrot.lane.b32.xlu0 %v5821_v45, %s11330_s13 }
 0x5b7   : > { %v5994_v40 = vpop.permute.xlu1 %5993 }
 0x5b8   : > { %v5992_v48 = vpop.permute.xlu0 %5991  ;;  %v6116_v54 = vsel %vm916_vm2, %v6084_v39, %v5994_v40 }
 0x5b9   : > { %v6115_v8 = vsel %vm916_vm2, %v6083_v58, %v5992_v48  ;;  %5445 = vrot.lane.b32.xlu1 %v13864_v25, %s11329_s21 }
 0x5ba   : > { %10384 = vmatprep.mubr.msk.f32.mxu0 %vm1389_vm3, %v6115_v8  ;;  %5443 = vrot.lane.b32.xlu0 %v13876_v3, %s11329_s21  ;;  %v14219_v8 = vld [vmem:[#allocation2 + $0x68] sm:$0xff] }
 0x5bb   : > { %v14198_v45 = vpop.permute.xlu1 %5441  ;;  %10385 = vmatmul.mubr.msk.f32.gmra.mrb[36].mxu0 %vm1389_vm3, %v6116_v54  ;;  %v14237_v54 = vld [vmem:[#allocation2 + $0x78] sm:$0xff] }
 0x5bc   : > { %v14201_v13 = vpop.permute.xlu0 %5439 }
 0x5bd   : > { %5573 = vrot.lane.b32.xlu1 %v13871_v24, %s11330_s13  ;;  %v14217_v24 = vld [vmem:[#allocation2 + $0x60] sm:$0xff] }
 0x5be   : > { %5571 = vrot.lane.b32.xlu0 %v13886_v42, %s11330_s13 }
 0x5bf   : > { %v5870_v25 = vpop.permute.xlu1 %5869 }
 0x5c0   : > { %v14207_v12 = vpop.permute.xlu0 %5567 }
 0x5c1   : > { %5449 = vrot.lane.b32.xlu1 %v13881_v2, %s11329_s21 }
 0x5c2   : > { %5447 = vrot.lane.b32.xlu0 %v13896_v43, %s11329_s21  ;;  %v6086_v43 = vsel %vm422_vm0, %v14219_v8, %v5870_v25  ;;  %v14239_v25 = vld [vmem:[#allocation2 + $0x80] sm:$0xff] }
 0x5c3   : > { %v5998_v3 = vpop.permute.xlu1 %5997 }
 0x5c4   : > { %v5868_v40 = vpop.permute.xlu0 %5867 }
 0x5c5   : > { %5577 = vrot.lane.b32.xlu1 %v13891_v49, %s11330_s13  ;;  %v6085_v58 = vsel %vm422_vm0, %v14217_v24, %v5868_v40  ;;  %v6118_v49 = vsel %vm916_vm2, %v6086_v43, %v5998_v3  ;;  %v14259_v43 = vld [vmem:[#allocation2 + $0x98] sm:$0xff] }
 0x5c6   : > { %5575 = vrot.lane.b32.xlu0 %v13906_v46, %s11330_s13 }
 0x5c7   : > { %v5874_v42 = vpop.permute.xlu1 %5873 }
 0x5c8   : > { %v5996_v2 = vpop.permute.xlu0 %5995 }
 0x5c9   : > { %v6117_v48 = vsel %vm916_vm2, %v6085_v58, %v5996_v2  ;;  %5453 = vrot.lane.b32.xlu1 %v13901_v62, %s11329_s21 }
 0x5ca   : > { %10387 = vmatprep.mubr.msk.f32.mxu0 %vm1389_vm3, %v6117_v48  ;;  %5451 = vrot.lane.b32.xlu0 %v13916_v60, %s11329_s21  ;;  %v6088_v60 = vsel %vm422_vm0, %v14239_v25, %v5874_v42  ;;  %v14257_v42 = vld [vmem:[#allocation2 + $0x90] sm:$0xff] }
 0x5cb   : > { %10388 = vmatmul.mubr.msk.f32.gmra.mrb[38].mxu0 %vm1389_vm3, %v6118_v49  ;;  %v6002_v46 = vpop.permute.xlu1 %6001 }
 0x5cc   : > { %v5872_v39 = vpop.permute.xlu0 %5871 }
 0x5cd   : > { %5581 = vrot.lane.b32.xlu1 %v13911_v35, %s11330_s13  ;;  %v6087_v3 = vsel %vm422_vm0, %v14237_v54, %v5872_v39  ;;  %v6120_v35 = vsel %vm916_vm2, %v6088_v60, %v6002_v46 }
 0x5ce   : > { %5579 = vrot.lane.b32.xlu0 %v13926_v29, %s11330_s13 }
 0x5cf   : > { %v5878_v62 = vpop.permute.xlu1 %5877 }
 0x5d0   : > { %v6000_v40 = vpop.permute.xlu0 %5999 }
 0x5d1   : > { %v6119_v58 = vsel %vm916_vm2, %v6087_v3, %v6000_v40  ;;  %5457 = vrot.lane.b32.xlu1 %v13921_v14, %s11329_s21  ;;  %v14279_v3 = vld [vmem:[#allocation2 + $0xb0] sm:$0xff] }
 0x5d2   : > { %10390 = vmatprep.mubr.msk.f32.mxu0 %vm1389_vm3, %v6119_v58  ;;  %5455 = vrot.lane.b32.xlu0 %v13936_v33, %s11329_s21  ;;  %v6090_v33 = vsel %vm422_vm0, %v14259_v43, %v5878_v62  ;;  %v14277_v62 = vld [vmem:[#allocation2 + $0xa8] sm:$0xff] }
 0x5d3   : > { %10391 = vmatmul.mubr.msk.f32.gmra.mrb[40].mxu0 %vm1389_vm3, %v6120_v35  ;;  %v6006_v29 = vpop.permute.xlu1 %6005 }
 0x5d4   : > { %v5876_v2 = vpop.permute.xlu0 %5875 }
 0x5d5   : > { %5585 = vrot.lane.b32.xlu1 %v13931_v26, %s11330_s13  ;;  %v6089_v48 = vsel %vm422_vm0, %v14257_v42, %v5876_v2  ;;  %v6122_v26 = vsel %vm916_vm2, %v6090_v33, %v6006_v29  ;;  %v14297_v29 = vld [vmem:[#allocation2 + $0xc0] sm:$0xff]  ;;  %v14299_v2 = vld [vmem:[#allocation2 + $0xc8] sm:$0xff] }
 0x5d6   : > { %5583 = vrot.lane.b32.xlu0 %v13946_v18, %s11330_s13 }
 0x5d7   : > { %v5882_v14 = vpop.permute.xlu1 %5881 }
 0x5d8   : > { %v6004_v49 = vpop.permute.xlu0 %6003 }
 0x5d9   : > { %v6121_v46 = vsel %vm916_vm2, %v6089_v48, %v6004_v49  ;;  %5461 = vrot.lane.b32.xlu1 %v13941_v20, %s11329_s21 }
 0x5da   : > { %10393 = vmatprep.mubr.msk.f32.mxu0 %vm1389_vm3, %v6121_v46  ;;  %5459 = vrot.lane.b32.xlu0 %v13956_v50, %s11329_s21  ;;  %v6092_v50 = vsel %vm422_vm0, %v14279_v3, %v5882_v14  ;;  %v14317_v46 = vld [vmem:[#allocation2 + $0xd8] sm:$0xff] }
 0x5db   : > { %10394 = vmatmul.mubr.msk.f32.gmra.mrb[42].mxu0 %vm1389_vm3, %v6122_v26  ;;  %v6010_v18 = vpop.permute.xlu1 %6009  ;;  %v14319_v26 = vld [vmem:[#allocation2 + $0xe0] sm:$0xff] }
 0x5dc   : > { %v5880_v39 = vpop.permute.xlu0 %5879 }
 0x5dd   : > { %5589 = vrot.lane.b32.xlu1 %v13951_v7, %s11330_s13  ;;  %v6091_v40 = vsel %vm422_vm0, %v14277_v62, %v5880_v39  ;;  %v6124_v7 = vsel %vm916_vm2, %v6092_v50, %v6010_v18  ;;  %v14339_v50 = vld [vmem:[#allocation2 + $0xf8] sm:$0xff] }
 0x5de   : > { %5587 = vrot.lane.b32.xlu0 %v13966_v27, %s11330_s13 }
 0x5df   : > { %v5886_v20 = vpop.permute.xlu1 %5885 }
 0x5e0   : > { %v6008_v60 = vpop.permute.xlu0 %6007 }
 0x5e1   : > { %v6123_v58 = vsel %vm916_vm2, %v6091_v40, %v6008_v60  ;;  %5465 = vrot.lane.b32.xlu1 %v13961_v30, %s11329_s21  ;;  %v14337_v60 = vld [vmem:[#allocation2 + $0xf0] sm:$0xff] }
 0x5e2   : > { %10396 = vmatprep.mubr.msk.f32.mxu0 %vm1389_vm3, %v6123_v58  ;;  %5463 = vrot.lane.b32.xlu0 %v13976_v1, %s11329_s21  ;;  %v6094_v1 = vsel %vm422_vm0, %v14299_v2, %v5886_v20 }
 0x5e3   : > { %10397 = vmatmul.mubr.msk.f32.gmra.mrb[44].mxu0 %vm1389_vm3, %v6124_v7  ;;  %v6014_v27 = vpop.permute.xlu1 %6013 }
 0x5e4   : > { %v5884_v35 = vpop.permute.xlu0 %5883 }
 0x5e5   : > { %5593 = vrot.lane.b32.xlu1 %v13971_v6, %s11330_s13  ;;  %v6093_v14 = vsel %vm422_vm0, %v14297_v29, %v5884_v35  ;;  %v6126_v6 = vsel %vm916_vm2, %v6094_v1, %v6014_v27  ;;  %v7214_v35 = vld [vmem:[%s15619_s5 + $0xc8] sm:$0xff]  ;;  %v14368_v1 = vld [vmem:[#allocation2 + $0x110] sm:$0xff] }
 0x5e6   : > { %5591 = vrot.lane.b32.xlu0 %v13986_v11, %s11330_s13 }
 0x5e7   : > { %v5890_v30 = vpop.permute.xlu1 %5889 }
 0x5e8   : > { %v6012_v48 = vpop.permute.xlu0 %6011 }
 0x5e9   : > { %v6125_v49 = vsel %vm916_vm2, %v6093_v14, %v6012_v48  ;;  %5469 = vrot.lane.b32.xlu1 %v13981_v0, %s11329_s21 }
 0x5ea   : > { %10399 = vmatprep.mubr.msk.f32.mxu0 %vm1389_vm3, %v6125_v49  ;;  %5467 = vrot.lane.b32.xlu0 %v13996_v57, %s11329_s21  ;;  %v6096_v57 = vsel %vm422_vm0, %v14319_v26, %v5890_v30 }
 0x5eb   : > { %10400 = vmatmul.mubr.msk.f32.gmra.mrb[46].mxu0 %vm1389_vm3, %v6126_v6  ;;  %v6018_v11 = vpop.permute.xlu1 %6017 }
 0x5ec   : > { %v5888_v33 = vpop.permute.xlu0 %5887 }
 0x5ed   : > { %5597 = vrot.lane.b32.xlu1 %v13991_v21, %s11330_s13  ;;  %v6095_v18 = vsel %vm422_vm0, %v14317_v46, %v5888_v33  ;;  %v6128_v21 = vsel %vm916_vm2, %v6096_v57, %v6018_v11 }
 0x5ee   : > { %5595 = vrot.lane.b32.xlu0 %v14006_v56, %s11330_s13 }
 0x5ef   : > { %v5894_v0 = vpop.permute.xlu1 %5893 }
 0x5f0   : > { %v6016_v39 = vpop.permute.xlu0 %6015 }
 0x5f1   : > { %v6127_v20 = vsel %vm916_vm2, %v6095_v18, %v6016_v39  ;;  %5473 = vrot.lane.b32.xlu1 %v14001_v28, %s11329_s21  ;;  %v14386_v18 = vld [vmem:[#allocation2 + $0x120] sm:$0xff]  ;;  %v14388_v39 = vld [vmem:[#allocation2 + $0x128] sm:$0xff] }
 0x5f2   : > { %10402 = vmatprep.mubr.msk.f32.mxu0 %vm1389_vm3, %v6127_v20  ;;  %5471 = vrot.lane.b32.xlu0 %v14018_v55, %s11329_s21  ;;  %v6098_v55 = vsel %vm422_vm0, %v14339_v50, %v5894_v0 }
 0x5f3   : > { %10403 = vmatmul.mubr.msk.f32.gmra.mrb[48].mxu0 %vm1389_vm3, %v6128_v21  ;;  %v6022_v56 = vpop.permute.xlu1 %6021 }
 0x5f4   : > { %v5892_v40 = vpop.permute.xlu0 %5891 }
 0x5f5   : > { %5601 = vrot.lane.b32.xlu1 %v14013_v32, %s11330_s13  ;;  %v6097_v58 = vsel %vm422_vm0, %v14337_v60, %v5892_v40  ;;  %v6130_v32 = vsel %vm916_vm2, %v6098_v55, %v6022_v56  ;;  %v14406_v40 = vld [vmem:[#allocation2 + $0x138] sm:$0xff] }
 0x5f6   : > { %5599 = vrot.lane.b32.xlu0 %v14032_v37, %s11330_s13  ;;  %v7213_v37 = vld [vmem:[%s15619_s5 + $0xc0] sm:$0xff] }
 0x5f7   : > { %v5898_v28 = vpop.permute.xlu1 %5897  ;;  %v14359_v14 = vpack.c.bf16 %v7214_v35, %v7213_v37  ;;  %v14428_v37 = vld [vmem:[#allocation2 + $0x158] sm:$0xff] }
 0x5f8   : > { %v6020_v7 = vpop.permute.xlu0 %6019  ;;  %v6100_v11 = vsel %vm422_vm0, %v14368_v1, %v5898_v28  ;;  %v14408_v28 = vld [vmem:[#allocation2 + $0x140] sm:$0xff] }
 0x5f9   : > { %v6129_v27 = vsel %vm916_vm2, %v6097_v58, %v6020_v7  ;;  %5477 = vrot.lane.b32.xlu1 %v14025_v53, %s11329_s21  ;;  %10763 = vmatprep.subr.bf16.mxu0 %v14359_v14 }
 0x5fa   : > { %10405 = vmatprep.mubr.msk.f32.mxu0 %vm1389_vm3, %v6129_v27  ;;  %5475 = vrot.lane.b32.xlu0 %v14044_v23, %s11329_s21  ;;  %v14366_v23 = vld [vmem:[#allocation2 + $0x108] sm:$0xff] }
 0x5fb   : > { %10406 = vmatmul.mubr.msk.f32.gmra.mrb[50].mxu0 %vm1389_vm3, %v6130_v32  ;;  %v6026_v30 = vpop.permute.xlu1 %6025  ;;  %v14426_v32 = vld [vmem:[#allocation2 + $0x150] sm:$0xff] }
 0x5fc   : > { %v5896_v53 = vpop.permute.xlu0 %5895 }
 0x5fd   : > { %5605 = vrot.lane.b32.xlu1 %v14039_v15, %s11330_s13  ;;  %v6099_v49 = vsel %vm422_vm0, %v14366_v23, %v5896_v53  ;;  %v6132_v15 = vsel %vm916_vm2, %v6100_v11, %v6026_v30  ;;  %v6862_v11 = vld [vmem:[#allocation2 + $0x3a] sm:$0xff] }
 0x5fe   : > { %5603 = vrot.lane.b32.xlu0 %v14053_v36, %s11330_s13 }
 0x5ff   : > { %v5902_v48 = vpop.permute.xlu1 %5901 }
 0x600   : > { %v6024_v6 = vpop.permute.xlu0 %6023 }
 0x601   : > { %v6131_v33 = vsel %vm916_vm2, %v6099_v49, %v6024_v6  ;;  %5481 = vrot.lane.b32.xlu1 %v14049_v44, %s11329_s21 }
 0x602   : > { %10408 = vmatprep.mubr.msk.f32.mxu0 %vm1389_vm3, %v6131_v33  ;;  %5479 = vrot.lane.b32.xlu0 %v14076_v4, %s11329_s21  ;;  %v6102_v4 = vsel %vm422_vm0, %v14388_v39, %v5902_v48  ;;  %v6861_v33 = vld [vmem:[#allocation2 + $0x32] sm:$0xff] }
 0x603   : > { %10409 = vmatmul.mubr.msk.f32.gmra.mrb[52].mxu0 %vm1389_vm3, %v6132_v15  ;;  %v6030_v36 = vpop.permute.xlu1 %6029  ;;  %v14442_v15 = vld [vmem:[#allocation2 + $0x168] sm:$0xff] }
 0x604   : > { %v5900_v0 = vpop.permute.xlu0 %5899 }
 0x605   : > { %5609 = vrot.lane.b32.xlu1 %v14069_v31, %s11330_s13  ;;  %v6101_v57 = vsel %vm422_vm0, %v14386_v18, %v5900_v0  ;;  %v6134_v31 = vsel %vm916_vm2, %v6102_v4, %v6030_v36  ;;  %v14444_v0 = vld [vmem:[#allocation2 + $0x170] sm:$0xff] }
 0x606   : > { %5607 = vrot.lane.b32.xlu0 %v14097_v51, %s11330_s13 }
 0x607   : > { %v5906_v44 = vpop.permute.xlu1 %5905 }
 0x608   : > { %v6028_v20 = vpop.permute.xlu0 %6027 }
 0x609   : > { %v6133_v21 = vsel %vm916_vm2, %v6101_v57, %v6028_v20  ;;  %5485 = vrot.lane.b32.xlu1 %v14093_v41, %s11329_s21  ;;  %v6832_v20 = vld [vmem:[#allocation2 + $0x51] sm:$0xff] }
 0x60a   : > { %10411 = vmatprep.mubr.msk.f32.mxu0 %vm1389_vm3, %v6133_v21  ;;  %5483 = vrot.lane.b32.xlu0 %v14115_v61, %s11329_s21  ;;  %v6104_v61 = vsel %vm422_vm0, %v14408_v28, %v5906_v44 }
 0x60b   : > { %10412 = vmatmul.mubr.msk.f32.gmra.mrb[54].mxu0 %vm1389_vm3, %v6134_v31  ;;  %v6034_v51 = vpop.permute.xlu1 %6033  ;;  %v6831_v31 = vld [vmem:[#allocation2 + $0x49] sm:$0xff] }
 0x60c   : > { %v5904_v56 = vpop.permute.xlu0 %5903 }
 0x60d   : > { %5613 = vrot.lane.b32.xlu1 %v14111_v63, %s11330_s13  ;;  %v6103_v58 = vsel %vm422_vm0, %v14406_v40, %v5904_v56  ;;  %v6136_v63 = vsel %vm916_vm2, %v6104_v61, %v6034_v51  ;;  %v6863_v61 = vld [vmem:[#allocation2 + $0x4a] sm:$0xff] }
 0x60e   : > { %5611 = vrot.lane.b32.xlu0 %v14129_v52, %s11330_s13 }
 0x60f   : > { %v5910_v41 = vpop.permute.xlu1 %5909 }
 0x610   : > { %v6032_v7 = vpop.permute.xlu0 %6031  ;;  %v6106_v53 = vsel %vm422_vm0, %v14428_v37, %v5910_v41 }
 0x611   : > { %v6135_v55 = vsel %vm916_vm2, %v6103_v58, %v6032_v7  ;;  %5489 = vrot.lane.b32.xlu1 %v14125_v22, %s11329_s21  ;;  %v6864_v58 = vld [vmem:[#allocation2 + $0x52] sm:$0xff]  ;;  %v5299_v7 = vld [vmem:[#allocation2] sm:$0xff] }
 0x612   : > { %10414 = vmatprep.mubr.msk.f32.mxu0 %vm1389_vm3, %v6135_v55  ;;  %5487 = vrot.lane.b32.xlu0 %v14152_v47, %s11329_s21  ;;  %v6830_v47 = vld [vmem:[#allocation2 + $0x39] sm:$0xff] }
 0x613   : > { %10415 = vmatmul.mubr.msk.f32.gmra.mrb[56].mxu0 %vm1389_vm3, %v6136_v63  ;;  %v6038_v52 = vpop.permute.xlu1 %6037  ;;  %v14458_v55 = vld [vmem:[#allocation2 + $0x180] sm:$0xff] }
 0x614   : > { %v5908_v27 = vpop.permute.xlu0 %5907 }
 0x615   : > { %5617 = vrot.lane.b32.xlu1 %v14145_v10, %s11330_s13  ;;  %v6105_v35 = vsel %vm422_vm0, %v14426_v32, %v5908_v27  ;;  %v6829_v10 = vld [vmem:[#allocation2 + $0x31] sm:$0xff]  ;;  %v5300_v27 = vld [vmem:[#allocation2 + $0x8] sm:$0xff] }
 0x616   : > { %5615 = vrot.lane.b32.xlu0 %v14170_v59, %s11330_s13  ;;  %v6138_v59 = vsel %vm916_vm2, %v6106_v53, %v6038_v52  ;;  %v5651_v52 = vsel %vm422_vm0, %v5299_v7, %v14021_v5  ;;  %v7215_v5 = vld [vmem:[%s15619_s5 + $0xd0] sm:$0xff] }
 0x617   : > { %v5914_v22 = vpop.permute.xlu1 %5913 }
 0x618   : > { %v6036_v30 = vpop.permute.xlu0 %6035  ;;  %v6108_v4 = vsel %vm422_vm0, %v14444_v0, %v5914_v22  ;;  %v14464_v22 = vld [vmem:[#allocation2 + $0x188] sm:$0xff] }
 0x619   : > { %v6137_v48 = vsel %vm916_vm2, %v6105_v35, %v6036_v30  ;;  %6927 = vrot.lane.b32.xlu1 %v6830_v47, %s11329_s21  ;;  %v6834_v47 = vld [vmem:[#allocation2 + $0x69] sm:$0xff] }
 0x61a   : > { %10417 = vmatprep.mubr.msk.f32.mxu0 %vm1389_vm3, %v6137_v48  ;;  %6925 = vrot.lane.b32.xlu0 %v6829_v10, %s11329_s21  ;;  %v6833_v10 = vld [vmem:[#allocation2 + $0x61] sm:$0xff] }
 0x61b   : > { %10418 = vmatmul.mubr.msk.f32.gmra.mrb[58].mxu0 %vm1389_vm3, %v6138_v59  ;;  %v6042_v49 = vpop.permute.xlu1 %6041 }
 0x61c   : > { %v5912_v6 = vpop.permute.xlu0 %5911  ;;  %v6140_v51 = vsel %vm916_vm2, %v6108_v4, %v6042_v49  ;;  %v7216_v49 = vld [vmem:[%s15619_s5 + $0xd8] sm:$0xff]  ;;  %v15728_v4 = vld [vmem:[#allocation19_spill] sm:$0xff] }
 0x61d   : > { %7055 = vrot.lane.b32.xlu1 %v6862_v11, %s11330_s13  ;;  %v6107_v44 = vsel %vm422_vm0, %v14442_v15, %v5912_v6  ;;  %v5652_v6 = vsel %vm422_vm0, %v5300_v27, %v14011_v19  ;;  %v5683_v11 = vsel %vm916_vm2, %v5651_v52, %v14037_v17  ;;  %v15730_v19 = vld [vmem:[#allocation20_spill] sm:$0xff]  ;;  %v7217_v17 = vld [vmem:[%s15619_s5 + $0xe0] sm:$0xff]  ;;  %v15732_v27 = vld [vmem:[#allocation22_spill] sm:$0xff] }
 0x61e   : > { %7053 = vrot.lane.b32.xlu0 %v6861_v33, %s11330_s13  ;;  %v6836_v52 = vld [vmem:[#allocation2 + $0x81] sm:$0xff] }
 0x61f   : > { %v5918_v36 = vpop.permute.xlu1 %5917 }
 0x620   : > { %v6040_v57 = vpop.permute.xlu0 %6039  ;;  %v6110_v53 = vsel %vm422_vm0, %v14464_v22, %v5918_v36 }
 0x621   : > { %v6139_v21 = vsel %vm916_vm2, %v6107_v44, %v6040_v57  ;;  %6931 = vrot.lane.b32.xlu1 %v6832_v20, %s11329_s21  ;;  %v6866_v44 = vld [vmem:[#allocation2 + $0x6a] sm:$0xff]  ;;  %v6865_v57 = vld [vmem:[#allocation2 + $0x62] sm:$0xff]  ;;  %v10766_v20 = vpack.c.bf16 %v7216_v49, %v7215_v5  ;;  %v7220_v5 = vld [vmem:[%s15619_s5 + $0xf8] sm:$0xff] }
 0x622   : > { %10420 = vmatprep.mubr.msk.f32.mxu0 %vm1389_vm3, %v6139_v21  ;;  %6929 = vrot.lane.b32.xlu0 %v6831_v31, %s11329_s21  ;;  %v5684_v21 = vsel %vm916_vm2, %v5652_v6, %v15728_v4  ;;  %v15729_v31 = vld [vmem:[#allocation25_spill] sm:$0xff] }
 0x623   : > { %10421 = vmatmul.mubr.msk.f32.gmra.mrb[60].mxu0 %vm1389_vm3, %v6140_v51  ;;  %v6046_v56 = vpop.permute.xlu1 %6045  ;;  %v5653_v51 = vsel %vm422_vm0, %v15730_v19, %v15729_v31  ;;  %v15735_v49 = vld [vmem:[#allocation33_spill] sm:$0xff]  ;;  %v15738_v19 = vld [vmem:[#allocation32_spill] sm:$0xff] }
 0x624   : > { %v5916_v41 = vpop.permute.xlu0 %5915  ;;  %v6142_v59 = vsel %vm916_vm2, %v6110_v53, %v6046_v56  ;;  %v7218_v56 = vld [vmem:[%s15619_s5 + $0xe8] sm:$0xff] }
 0x625   : > { %7059 = vrot.lane.b32.xlu1 %v6864_v58, %s11330_s13  ;;  %v6109_v35 = vsel %vm422_vm0, %v14458_v55, %v5916_v41  ;;  %v15731_v41 = vld [vmem:[#allocation27_spill] sm:$0xff]  ;;  %v10770_v53 = vpack.c.bf16 %v7218_v56, %v7217_v17  ;;  %v5657_v17 = vsel %vm422_vm0, %v14183_v34, %v14201_v13  ;;  %v7222_v56 = vld [vmem:[%s15619_s5 + $0x108] sm:$0xff]  ;;  %v6838_v34 = vld [vmem:[#allocation2 + $0x99] sm:$0xff]  ;;  %v5658_v13 = vsel %vm422_vm0, %v14185_v16, %v14198_v45 }
 0x626   : > { %7057 = vrot.lane.b32.xlu0 %v6863_v61, %s11330_s13  ;;  %v5685_v58 = vsel %vm916_vm2, %v5653_v51, %v15731_v41  ;;  %v5689_v41 = vsel %vm916_vm2, %v5657_v17, %v14207_v12  ;;  %v7224_v16 = vld [vmem:[%s15619_s5 + $0x118] sm:$0xff]  ;;  %v6841_v17 = vld [vmem:[#allocation2 + $0xc1] sm:$0xff] }
 0x627   : > { %v14460_v63 = vpop.permute.xlu1 %5569 }
 0x628   : > { %v6044_v30 = vpop.permute.xlu0 %6043  ;;  %v5690_v12 = vsel %vm916_vm2, %v5658_v13, %v14460_v63  ;;  %v6870_v63 = vld [vmem:[#allocation2 + $0x9a] sm:$0xff] }
 0x629   : > { %v6141_v48 = vsel %vm916_vm2, %v6109_v35, %v6044_v30  ;;  %6935 = vrot.lane.b32.xlu1 %v6834_v47, %s11329_s21  ;;  %v15733_v35 = vld [vmem:[#allocation21_spill] sm:$0xff] }
 0x62a   : > { %6933 = vrot.lane.b32.xlu0 %v6833_v10, %s11329_s21  ;;  %10423 = vmatprep.mubr.msk.f32.mxu0 %vm1389_vm3, %v6141_v48  ;;  %v5654_v30 = vsel %vm422_vm0, %v15733_v35, %v15732_v27  ;;  %v6835_v47 = vld [vmem:[#allocation2 + $0x79] sm:$0xff]  ;;  %v15734_v48 = vld [vmem:[#allocation26_spill] sm:$0xff]  ;;  %v6837_v27 = vld [vmem:[#allocation2 + $0x91] sm:$0xff] }
 0x62b   : > { %v14485_v33 = vpop.permute.xlu1 %5445  ;;  %10424 = vmatmul.mubr.msk.f32.gmra.mrb[62].mxu0 %vm1389_vm3, %v6142_v59  ;;  %v5686_v10 = vsel %vm916_vm2, %v5654_v30, %v15734_v48  ;;  %v5655_v59 = vsel %vm422_vm0, %v14139_v9, %v14167_v38  ;;  %v6868_v9 = vld [vmem:[#allocation2 + $0x82] sm:$0xff]  ;;  %v15736_v38 = vld [vmem:[#allocation31_spill] sm:$0xff] }
 0x62c   : > { %v5444_v36 = vpop.permute.xlu0 %5443  ;;  %10450 = vmatprep.mubr.msk.f32.mxu0 %vm1389_vm3, %v5683_v11  ;;  %v5687_v6 = vsel %vm916_vm2, %v5655_v59, %v15735_v49  ;;  %v6844_v13 = vld [vmem:[#allocation2 + $0xe1] sm:$0xff] }
 0x62d   : > { %7063 = vrot.lane.b32.xlu1 %v6866_v44, %s11330_s13  ;;  %v5659_v30 = vsel %vm422_vm0, %v14217_v24, %v5444_v36  ;;  %v5660_v24 = vsel %vm422_vm0, %v14219_v8, %v14485_v33  ;;  %v6869_v36 = vld [vmem:[#allocation2 + $0x92] sm:$0xff] }
 0x62e   : > { %7061 = vrot.lane.b32.xlu0 %v6865_v57, %s11330_s13  ;;  %v15737_v57 = vld [vmem:[#allocation28_spill] sm:$0xff] }
 0x62f   : > { %v14504_v7 = vpop.permute.xlu1 %5573  ;;  %10451 = vmatmul.mubr.msk.f32.vlgmr.msra.gmra.mrb[32].mxu0 %vm1389_vm3, %v5684_v21  ;;  %v5656_v4 = vsel %vm422_vm0, %v15737_v57, %v15736_v38  ;;  %v6867_v21 = vld [vmem:[#allocation2 + $0x7a] sm:$0xff]  ;;  %v6840_v8 = vld [vmem:[#allocation2 + $0xb1] sm:$0xff] }
 0x630   : > { %v5572_v61 = vpop.permute.xlu0 %5571  ;;  %10453 = vmatprep.mubr.msk.f32.mxu0 %vm1389_vm3, %v5685_v58  ;;  %10765 = vmatpush3.bf16.msra.mxu0 %v14359_v14  ;;  %v7219_v14 = vld [vmem:[%s15619_s5 + $0xf0] sm:$0xff]  ;;  %v5688_v51 = vsel %vm916_vm2, %v5656_v4, %v15738_v19 }
 0x631   : > { %6939 = vrot.lane.b32.xlu1 %v6836_v52, %s11329_s21  ;;  %10767 = vmatprep.subr.bf16.mxu0 %v10766_v20  ;;  %v10774_v31 = vpack.c.bf16 %v7220_v5, %v7219_v14  ;;  %v5691_v45 = vsel %vm916_vm2, %v5659_v30, %v5572_v61  ;;  %v5692_v61 = vsel %vm916_vm2, %v5660_v24, %v14504_v7  ;;  %v6839_v7 = vld [vmem:[#allocation2 + $0xa9] sm:$0xff] }
 0x632   : > { %6937 = vrot.lane.b32.xlu0 %v6835_v47, %s11329_s21  ;;  %v7223_v47 = vld [vmem:[%s15619_s5 + $0x110] sm:$0xff] }
 0x633   : > { %v5450_v11 = vpop.permute.xlu1 %5449  ;;  %10454 = vmatmul.mubr.msk.f32.gmra.mrb[34].mxu0 %vm1389_vm3, %v5686_v10  ;;  %v10782_v10 = vpack.c.bf16 %v7224_v16, %v7223_v47  ;;  %v6871_v57 = vld [vmem:[#allocation2 + $0xaa] sm:$0xff]  ;;  %v6876_v16 = vld [vmem:[#allocation2 + $0xe2] sm:$0xff] }
 0x634   : > { %v5448_v44 = vpop.permute.xlu0 %5447  ;;  %10456 = vmatprep.mubr.msk.f32.mxu0 %vm1389_vm3, %v5687_v6  ;;  %10769 = vmatpush3.bf16.msra.mxu0 %v10766_v20  ;;  %v7221_v20 = vld [vmem:[%s15619_s5 + $0x100] sm:$0xff]  ;;  %v5662_v33 = vsel %vm422_vm0, %v14239_v25, %v5450_v11  ;;  %v6872_v25 = vld [vmem:[#allocation2 + $0xb2] sm:$0xff]  ;;  %v6842_v19 = vld [vmem:[#allocation2 + $0xc9] sm:$0xff] }
 0x635   : > { %7067 = vrot.lane.b32.xlu1 %v6868_v9, %s11330_s13  ;;  %10771 = vmatprep.subr.bf16.mxu0 %v10770_v53  ;;  %v10778_v35 = vpack.c.bf16 %v7222_v56, %v7221_v20  ;;  %v5661_v59 = vsel %vm422_vm0, %v14237_v54, %v5448_v44 }
 0x636   : > { %7065 = vrot.lane.b32.xlu0 %v6867_v21, %s11330_s13 }
 0x637   : > { %v5578_v58 = vpop.permute.xlu1 %5577  ;;  %10457 = vmatmul.mubr.msk.f32.gmra.mrb[36].mxu0 %vm1389_vm3, %v5688_v51 }
 0x638   : > { %v5576_v52 = vpop.permute.xlu0 %5575  ;;  %10459 = vmatprep.mubr.msk.f32.mxu0 %vm1389_vm3, %v5689_v41  ;;  %10773 = vmatpush3.bf16.msra.mxu0 %v10770_v53  ;;  %v5694_v54 = vsel %vm916_vm2, %v5662_v33, %v5578_v58  ;;  %v6874_v41 = vld [vmem:[#allocation2 + $0xca] sm:$0xff]  ;;  %v6873_v58 = vld [vmem:[#allocation2 + $0xc2] sm:$0xff] }
 0x639   : > { %6943 = vrot.lane.b32.xlu1 %v6838_v34, %s11329_s21  ;;  %10775 = vmatprep.subr.bf16.mxu0 %v10774_v31  ;;  %v5693_v14 = vsel %vm916_vm2, %v5661_v59, %v5576_v52  ;;  %v6848_v33 = vld [vmem:[#allocation2 + $0x111] sm:$0xff] }
 0x63a   : > { %6941 = vrot.lane.b32.xlu0 %v6837_v27, %s11329_s21 }
 0x63b   : > { %v5454_v53 = vpop.permute.xlu1 %5453  ;;  %10460 = vmatmul.mubr.msk.f32.gmra.mrb[38].mxu0 %vm1389_vm3, %v5690_v12  ;;  %v6843_v12 = vld [vmem:[#allocation2 + $0xd9] sm:$0xff] }
 0x63c   : > { %v5452_v48 = vpop.permute.xlu0 %5451  ;;  %10462 = vmatprep.mubr.msk.f32.mxu0 %vm1389_vm3, %v5691_v45  ;;  %10777 = vmatpush3.bf16.msra.mxu0 %v10774_v31  ;;  %v5664_v11 = vsel %vm422_vm0, %v14259_v43, %v5454_v53  ;;  %v6875_v45 = vld [vmem:[#allocation2 + $0xda] sm:$0xff] }
 0x63d   : > { %7071 = vrot.lane.b32.xlu1 %v6870_v63, %s11330_s13  ;;  %10779 = vmatprep.subr.bf16.mxu0 %v10778_v35  ;;  %v5663_v6 = vsel %vm422_vm0, %v14257_v42, %v5452_v48  ;;  %v6846_v63 = vld [vmem:[#allocation2 + $0xf9] sm:$0xff] }
 0x63e   : > { %7069 = vrot.lane.b32.xlu0 %v6869_v36, %s11330_s13 }
 0x63f   : > { %v5582_v5 = vpop.permute.xlu1 %5581  ;;  %10463 = vmatmul.mubr.msk.f32.gmra.mrb[40].mxu0 %vm1389_vm3, %v5692_v61 }
 0x640   : > { %v5580_v49 = vpop.permute.xlu0 %5579  ;;  %10465 = vmatprep.mubr.msk.f32.mxu0 %vm1389_vm3, %v5693_v14  ;;  %10781 = vmatpush3.bf16.msra.mxu0 %v10778_v35  ;;  %v5696_v42 = vsel %vm916_vm2, %v5664_v11, %v5582_v5  ;;  %v6878_v14 = vld [vmem:[#allocation2 + $0xfa] sm:$0xff]  ;;  %v6877_v5 = vld [vmem:[#allocation2 + $0xf2] sm:$0xff] }
 0x641   : > { %6947 = vrot.lane.b32.xlu1 %v6840_v8, %s11329_s21  ;;  %10783 = vmatprep.subr.bf16.mxu0 %v10782_v10  ;;  %v5695_v44 = vsel %vm916_vm2, %v5663_v6, %v5580_v49  ;;  %v6847_v6 = vld [vmem:[#allocation2 + $0x109] sm:$0xff] }
 0x642   : > { %6945 = vrot.lane.b32.xlu0 %v6839_v7, %s11329_s21 }
 0x643   : > { %v5458_v9 = vpop.permute.xlu1 %5457  ;;  %10466 = vmatmul.mubr.msk.f32.gmra.mrb[42].mxu0 %vm1389_vm3, %v5694_v54 }
 0x644   : > { %v5456_v38 = vpop.permute.xlu0 %5455  ;;  %10468 = vmatprep.mubr.msk.f32.mxu0 %vm1389_vm3, %v5695_v44  ;;  %10785 = vmatpush3.bf16.msra.mxu0 %v10782_v10  ;;  %v5666_v51 = vsel %vm422_vm0, %v14279_v3, %v5458_v9  ;;  %v6845_v10 = vld [vmem:[#allocation2 + $0xf1] sm:$0xff] }
 0x645   : > { %7075 = vrot.lane.b32.xlu1 %v6872_v25, %s11330_s13  ;;  %v5665_v21 = vsel %vm422_vm0, %v14277_v62, %v5456_v38  ;;  %v6880_v38 = vld [vmem:[#allocation2 + $0x112] sm:$0xff]  ;;  %v6879_v25 = vld [vmem:[#allocation2 + $0x10a] sm:$0xff] }
 0x646   : > { %7073 = vrot.lane.b32.xlu0 %v6871_v57, %s11330_s13 }
 0x647   : > { %v5586_v4 = vpop.permute.xlu1 %5585  ;;  %10469 = vmatmul.mubr.msk.f32.gmra.mrb[44].mxu0 %vm1389_vm3, %v5696_v42  ;;  %v6850_v42 = vld [vmem:[#allocation2 + $0x129] sm:$0xff] }
 0x648   : > { %v5584_v31 = vpop.permute.xlu0 %5583  ;;  %v5698_v20 = vsel %vm916_vm2, %v5666_v51, %v5586_v4 }
 0x649   : > { %v5697_v43 = vsel %vm916_vm2, %v5665_v21, %v5584_v31  ;;  %6951 = vrot.lane.b32.xlu1 %v6842_v19, %s11329_s21  ;;  %v6849_v31 = vld [vmem:[#allocation2 + $0x121] sm:$0xff] }
 0x64a   : > { %6949 = vrot.lane.b32.xlu0 %v6841_v17, %s11329_s21  ;;  %10471 = vmatprep.mubr.msk.f32.mxu0 %vm1389_vm3, %v5697_v43  ;;  %v6882_v43 = vld [vmem:[#allocation2 + $0x12a] sm:$0xff]  ;;  %v6881_v17 = vld [vmem:[#allocation2 + $0x122] sm:$0xff] }
 0x64b   : > { %v5462_v56 = vpop.permute.xlu1 %5461  ;;  %10472 = vmatmul.mubr.msk.f32.gmra.mrb[46].mxu0 %vm1389_vm3, %v5698_v20 }
 0x64c   : > { %v5460_v62 = vpop.permute.xlu0 %5459  ;;  %v5668_v27 = vsel %vm422_vm0, %v14299_v2, %v5462_v56 }
 0x64d   : > { %7079 = vrot.lane.b32.xlu1 %v6874_v41, %s11330_s13  ;;  %v5667_v52 = vsel %vm422_vm0, %v14297_v29, %v5460_v62  ;;  %v6852_v62 = vld [vmem:[#allocation2 + $0x141] sm:$0xff] }
 0x64e   : > { %7077 = vrot.lane.b32.xlu0 %v6873_v58, %s11330_s13 }
 0x64f   : > { %v5590_v3 = vpop.permute.xlu1 %5589 }
 0x650   : > { %v5588_v34 = vpop.permute.xlu0 %5587  ;;  %v5700_v30 = vsel %vm916_vm2, %v5668_v27, %v5590_v3  ;;  %v6851_v3 = vld [vmem:[#allocation2 + $0x139] sm:$0xff] }
 0x651   : > { %v5699_v35 = vsel %vm916_vm2, %v5667_v52, %v5588_v34  ;;  %6955 = vrot.lane.b32.xlu1 %v6844_v13, %s11329_s21  ;;  %v6884_v13 = vld [vmem:[#allocation2 + $0x142] sm:$0xff]  ;;  %v6883_v27 = vld [vmem:[#allocation2 + $0x13a] sm:$0xff] }
 0x652   : > { %6953 = vrot.lane.b32.xlu0 %v6843_v12, %s11329_s21  ;;  %10474 = vmatprep.mubr.msk.f32.mxu0 %vm1389_vm3, %v5699_v35 }
 0x653   : > { %v5466_v47 = vpop.permute.xlu1 %5465  ;;  %10475 = vmatmul.mubr.msk.f32.gmra.mrb[48].mxu0 %vm1389_vm3, %v5700_v30  ;;  %v6854_v30 = vld [vmem:[#allocation2 + $0x159] sm:$0xff] }
 0x654   : > { %v5464_v29 = vpop.permute.xlu0 %5463  ;;  %v5670_v24 = vsel %vm422_vm0, %v14319_v26, %v5466_v47 }
 0x655   : > { %7083 = vrot.lane.b32.xlu1 %v6876_v16, %s11330_s13  ;;  %v5669_v53 = vsel %vm422_vm0, %v14317_v46, %v5464_v29  ;;  %v6853_v16 = vld [vmem:[#allocation2 + $0x151] sm:$0xff] }
 0x656   : > { %7081 = vrot.lane.b32.xlu0 %v6875_v45, %s11330_s13 }
 0x657   : > { %v5594_v2 = vpop.permute.xlu1 %5593 }
 0x658   : > { %v5592_v48 = vpop.permute.xlu0 %5591  ;;  %v5702_v61 = vsel %vm916_vm2, %v5670_v24, %v5594_v2 }
 0x659   : > { %v5701_v36 = vsel %vm916_vm2, %v5669_v53, %v5592_v48  ;;  %6959 = vrot.lane.b32.xlu1 %v6846_v63, %s11329_s21  ;;  %v6886_v53 = vld [vmem:[#allocation2 + $0x15a] sm:$0xff]  ;;  %v6885_v48 = vld [vmem:[#allocation2 + $0x152] sm:$0xff] }
 0x65a   : > { %6957 = vrot.lane.b32.xlu0 %v6845_v10, %s11329_s21  ;;  %10477 = vmatprep.mubr.msk.f32.mxu0 %vm1389_vm3, %v5701_v36  ;;  %v6856_v36 = vld [vmem:[#allocation2 + $0x171] sm:$0xff] }
 0x65b   : > { %v5470_v59 = vpop.permute.xlu1 %5469  ;;  %10478 = vmatmul.mubr.msk.f32.gmra.mrb[50].mxu0 %vm1389_vm3, %v5702_v61 }
 0x65c   : > { %v5468_v46 = vpop.permute.xlu0 %5467  ;;  %v5672_v7 = vsel %vm422_vm0, %v14339_v50, %v5470_v59  ;;  %v6855_v59 = vld [vmem:[#allocation2 + $0x169] sm:$0xff] }
 0x65d   : > { %7087 = vrot.lane.b32.xlu1 %v6878_v14, %s11330_s13  ;;  %v5671_v49 = vsel %vm422_vm0, %v14337_v60, %v5468_v46 }
 0x65e   : > { %7085 = vrot.lane.b32.xlu0 %v6877_v5, %s11330_s13  ;;  %v6888_v5 = vld [vmem:[#allocation2 + $0x172] sm:$0xff] }
 0x65f   : > { %v5598_v26 = vpop.permute.xlu1 %5597 }
 0x660   : > { %v5596_v8 = vpop.permute.xlu0 %5595  ;;  %v5704_v44 = vsel %vm916_vm2, %v5672_v7, %v5598_v26  ;;  %v6887_v26 = vld [vmem:[#allocation2 + $0x16a] sm:$0xff] }
 0x661   : > { %v5703_v54 = vsel %vm916_vm2, %v5671_v49, %v5596_v8  ;;  %6963 = vrot.lane.b32.xlu1 %v6848_v33, %s11329_s21  ;;  %v6858_v33 = vld [vmem:[#allocation2 + $0x189] sm:$0xff] }
 0x662   : > { %6961 = vrot.lane.b32.xlu0 %v6847_v6, %s11329_s21  ;;  %10480 = vmatprep.mubr.msk.f32.mxu0 %vm1389_vm3, %v5703_v54  ;;  %v6857_v6 = vld [vmem:[#allocation2 + $0x181] sm:$0xff] }
 0x663   : > { %v5474_v9 = vpop.permute.xlu1 %5473  ;;  %10481 = vmatmul.mubr.msk.f32.gmra.mrb[52].mxu0 %vm1389_vm3, %v5704_v44 }
 0x664   : > { %v5472_v60 = vpop.permute.xlu0 %5471  ;;  %v5674_v4 = vsel %vm422_vm0, %v14368_v1, %v5474_v9 }
 0x665   : > { %7091 = vrot.lane.b32.xlu1 %v6880_v38, %s11330_s13  ;;  %v5673_v11 = vsel %vm422_vm0, %v14366_v23, %v5472_v60  ;;  %v6890_v38 = vld [vmem:[#allocation2 + $0x18a] sm:$0xff] }
 0x666   : > { %7089 = vrot.lane.b32.xlu0 %v6879_v25, %s11330_s13  ;;  %v6889_v25 = vld [vmem:[#allocation2 + $0x182] sm:$0xff] }
 0x667   : > { %v5602_v50 = vpop.permute.xlu1 %5601 }
 0x668   : > { %v5600_v57 = vpop.permute.xlu0 %5599  ;;  %v5706_v19 = vsel %vm916_vm2, %v5674_v4, %v5602_v50  ;;  %v6797_v50 = vld [vmem:[#allocation2 + $0x30] sm:$0xff] }
 0x669   : > { %v5705_v21 = vsel %vm916_vm2, %v5673_v11, %v5600_v57  ;;  %6967 = vrot.lane.b32.xlu1 %v6850_v42, %s11329_s21  ;;  %v6859_v57 = vld [vmem:[#allocation2 + $0x199] sm:$0xff] }
 0x66a   : > { %6965 = vrot.lane.b32.xlu0 %v6849_v31, %s11329_s21  ;;  %10483 = vmatprep.mubr.msk.f32.mxu0 %vm1389_vm3, %v5705_v21  ;;  %v6798_v42 = vld [vmem:[#allocation2 + $0x38] sm:$0xff] }
 0x66b   : > { %v5478_v51 = vpop.permute.xlu1 %5477  ;;  %10484 = vmatmul.mubr.msk.f32.gmra.mrb[54].mxu0 %vm1389_vm3, %v5706_v19 }
 0x66c   : > { %v5476_v23 = vpop.permute.xlu0 %5475  ;;  %v5676_v41 = vsel %vm422_vm0, %v14388_v39, %v5478_v51 }
 0x66d   : > { %7095 = vrot.lane.b32.xlu1 %v6882_v43, %s11330_s13  ;;  %v5675_v20 = vsel %vm422_vm0, %v14386_v18, %v5476_v23  ;;  %v6892_v23 = vld [vmem:[#allocation2 + $0x1a2] sm:$0xff] }
 0x66e   : > { %7093 = vrot.lane.b32.xlu0 %v6881_v17, %s11330_s13  ;;  %v6891_v17 = vld [vmem:[#allocation2 + $0x19a] sm:$0xff] }
 0x66f   : > { %v5606_v1 = vpop.permute.xlu1 %5605 }
 0x670   : > { %v5604_v56 = vpop.permute.xlu0 %5603  ;;  %v5708_v52 = vsel %vm916_vm2, %v5676_v41, %v5606_v1 }
 0x671   : > { %v5707_v58 = vsel %vm916_vm2, %v5675_v20, %v5604_v56  ;;  %6971 = vrot.lane.b32.xlu1 %v6852_v62, %s11329_s21  ;;  %v6799_v20 = vld [vmem:[#allocation2 + $0x48] sm:$0xff]  ;;  %v6800_v62 = vld [vmem:[#allocation2 + $0x50] sm:$0xff] }
 0x672   : > { %6969 = vrot.lane.b32.xlu0 %v6851_v3, %s11329_s21  ;;  %10486 = vmatprep.mubr.msk.f32.mxu0 %vm1389_vm3, %v5707_v58 }
 0x673   : > { %v5482_v34 = vpop.permute.xlu1 %5481  ;;  %10487 = vmatmul.mubr.msk.f32.gmra.mrb[56].mxu0 %vm1389_vm3, %v5708_v52 }
 0x674   : > { %v5480_v18 = vpop.permute.xlu0 %5479  ;;  %v5678_v47 = vsel %vm422_vm0, %v14408_v28, %v5482_v34 }
 0x675   : > { %7099 = vrot.lane.b32.xlu1 %v6884_v13, %s11330_s13  ;;  %v5677_v35 = vsel %vm422_vm0, %v14406_v40, %v5480_v18 }
 0x676   : > { %7097 = vrot.lane.b32.xlu0 %v6883_v27, %s11330_s13  ;;  %v6801_v27 = vld [vmem:[#allocation2 + $0x60] sm:$0xff] }
 0x677   : > { %v5610_v39 = vpop.permute.xlu1 %5609 }
 0x678   : > { %v5608_v12 = vpop.permute.xlu0 %5607  ;;  %v5710_v45 = vsel %vm916_vm2, %v5678_v47, %v5610_v39 }
 0x679   : > { %v5709_v29 = vsel %vm916_vm2, %v5677_v35, %v5608_v12  ;;  %6975 = vrot.lane.b32.xlu1 %v6854_v30, %s11329_s21  ;;  %v6802_v35 = vld [vmem:[#allocation2 + $0x68] sm:$0xff] }
 0x67a   : > { %6973 = vrot.lane.b32.xlu0 %v6853_v16, %s11329_s21  ;;  %10489 = vmatprep.mubr.msk.f32.mxu0 %vm1389_vm3, %v5709_v29 }
 0x67b   : > { %v5486_v2 = vpop.permute.xlu1 %5485  ;;  %10490 = vmatmul.mubr.msk.f32.gmra.mrb[58].mxu0 %vm1389_vm3, %v5710_v45 }
 0x67c   : > { %v5484_v40 = vpop.permute.xlu0 %5483  ;;  %v5680_v10 = vsel %vm422_vm0, %v14428_v37, %v5486_v2 }
 0x67d   : > { %7103 = vrot.lane.b32.xlu1 %v6886_v53, %s11330_s13  ;;  %v5679_v63 = vsel %vm422_vm0, %v14426_v32, %v5484_v40  ;;  %v6803_v40 = vld [vmem:[#allocation2 + $0x78] sm:$0xff] }
 0x67e   : > { %7101 = vrot.lane.b32.xlu0 %v6885_v48, %s11330_s13  ;;  %v6804_v48 = vld [vmem:[#allocation2 + $0x80] sm:$0xff] }
 0x67f   : > { %v5614_v28 = vpop.permute.xlu1 %5613 }
 0x680   : > { %v5612_v24 = vpop.permute.xlu0 %5611  ;;  %v5712_v46 = vsel %vm916_vm2, %v5680_v10, %v5614_v28 }
 0x681   : > { %v5711_v61 = vsel %vm916_vm2, %v5679_v63, %v5612_v24  ;;  %6979 = vrot.lane.b32.xlu1 %v6856_v36, %s11329_s21 }
 0x682   : > { %6977 = vrot.lane.b32.xlu0 %v6855_v59, %s11329_s21  ;;  %10492 = vmatprep.mubr.msk.f32.mxu0 %vm1389_vm3, %v5711_v61 }
 0x683   : > { %v5490_v14 = vpop.permute.xlu1 %5489  ;;  %10493 = vmatmul.mubr.msk.f32.gmra.mrb[60].mxu0 %vm1389_vm3, %v5712_v46  ;;  %v6805_v46 = vld [vmem:[#allocation2 + $0x90] sm:$0xff] }
 0x684   : > { %v5488_v32 = vpop.permute.xlu0 %5487  ;;  %v5682_v7 = vsel %vm422_vm0, %v14444_v0, %v5490_v14  ;;  %v6860_v0 = vld [vmem:[#allocation2 + $0x1a1] sm:$0xff] }
 0x685   : > { %7107 = vrot.lane.b32.xlu1 %v6888_v5, %s11330_s13  ;;  %v5681_v49 = vsel %vm422_vm0, %v14442_v15, %v5488_v32  ;;  %v6806_v32 = vld [vmem:[#allocation2 + $0x98] sm:$0xff] }
 0x686   : > { %7105 = vrot.lane.b32.xlu0 %v6887_v26, %s11330_s13 }
 0x687   : > { %v5618_v37 = vpop.permute.xlu1 %5617 }
 0x688   : > { %v5616_v8 = vpop.permute.xlu0 %5615  ;;  %v5714_v44 = vsel %vm916_vm2, %v5682_v7, %v5618_v37 }
 0x689   : > { %v5713_v54 = vsel %vm916_vm2, %v5681_v49, %v5616_v8  ;;  %6983 = vrot.lane.b32.xlu1 %v6858_v33, %s11329_s21 }
 0x68a   : > { %6981 = vrot.lane.b32.xlu0 %v6857_v6, %s11329_s21  ;;  %10495 = vmatprep.mubr.msk.f32.mxu0 %vm1389_vm3, %v5713_v54  ;;  %v6807_v54 = vld [vmem:[#allocation2 + $0xa8] sm:$0xff] }
 0x68b   : > { %v6928_v9 = vpop.permute.xlu1 %6927  ;;  %10496 = vmatmul.mubr.msk.f32.gmra.mrb[62].mxu0 %vm1389_vm3, %v5714_v44  ;;  %v6808_v44 = vld [vmem:[#allocation2 + $0xb0] sm:$0xff] }
 0x68c   : > { %v6926_v60 = vpop.permute.xlu0 %6925  ;;  %v7150_v31 = vsel %vm422_vm0, %v6798_v42, %v6928_v9 }
 0x68d   : > { %7111 = vrot.lane.b32.xlu1 %v6890_v38, %s11330_s13  ;;  %v7149_v4 = vsel %vm422_vm0, %v6797_v50, %v6926_v60 }
 0x68e   : > { %7109 = vrot.lane.b32.xlu0 %v6889_v25, %s11330_s13 }
 0x68f   : > { %v7056_v11 = vpop.permute.xlu1 %7055 }
 0x690   : > { %v7054_v21 = vpop.permute.xlu0 %7053  ;;  %v7182_v51 = vsel %vm916_vm2, %v7150_v31, %v7056_v11 }
 0x691   : > { %v7181_v19 = vsel %vm916_vm2, %v7149_v4, %v7054_v21  ;;  %6987 = vrot.lane.b32.xlu1 %v6860_v0, %s11329_s21  ;;  %v6810_v4 = vld [vmem:[#allocation2 + $0xc8] sm:$0xff] }
 0x692   : > { %6985 = vrot.lane.b32.xlu0 %v6859_v57, %s11329_s21  ;;  %10522 = vmatprep.mubr.msk.f32.mxu0 %vm1389_vm3, %v7181_v19  ;;  %v6809_v57 = vld [vmem:[#allocation2 + $0xc0] sm:$0xff] }
 0x693   : > { %v6932_v43 = vpop.permute.xlu1 %6931  ;;  %10523 = vmatmul.mubr.msk.f32.vlgmr.msra.gmra.mrb[32].mxu0 %vm1389_vm3, %v7182_v51 }
 0x694   : > { %v6930_v1 = vpop.permute.xlu0 %6929  ;;  %v7152_v3 = vsel %vm422_vm0, %v6800_v62, %v6932_v43 }
 0x695   : > { %7115 = vrot.lane.b32.xlu1 %v6892_v23, %s11330_s13  ;;  %v7151_v41 = vsel %vm422_vm0, %v6799_v20, %v6930_v1  ;;  %v6811_v1 = vld [vmem:[#allocation2 + $0xd8] sm:$0xff] }
 0x696   : > { %7113 = vrot.lane.b32.xlu0 %v6891_v17, %s11330_s13 }
 0x697   : > { %v7060_v56 = vpop.permute.xlu1 %7059 }
 0x698   : > { %v7058_v58 = vpop.permute.xlu0 %7057  ;;  %v7184_v34 = vsel %vm916_vm2, %v7152_v3, %v7060_v56  ;;  %v6812_v56 = vld [vmem:[#allocation2 + $0xe0] sm:$0xff] }
 0x699   : > { %v7183_v52 = vsel %vm916_vm2, %v7151_v41, %v7058_v58 }
 0x69a   : > { %10525 = vmatprep.mubr.msk.f32.mxu0 %vm1389_vm3, %v7183_v52 }
 0x69b   : > { %v6936_v18 = vpop.permute.xlu1 %6935  ;;  %10526 = vmatmul.mubr.msk.f32.gmra.mrb[34].mxu0 %vm1389_vm3, %v7184_v34 }
 0x69c   : > { %v6934_v13 = vpop.permute.xlu0 %6933  ;;  %v7154_v47 = vsel %vm422_vm0, %v6802_v35, %v6936_v18 }
 0x69d   : > { %v7153_v12 = vsel %vm422_vm0, %v6801_v27, %v6934_v13  ;;  %v6813_v13 = vld [vmem:[#allocation2 + $0xf0] sm:$0xff] }
 0x69f   : > { %v7064_v39 = vpop.permute.xlu1 %7063 }
 0x6a0   : > { %v7062_v30 = vpop.permute.xlu0 %7061  ;;  %v7186_v16 = vsel %vm916_vm2, %v7154_v47, %v7064_v39  ;;  %v6814_v39 = vld [vmem:[#allocation2 + $0xf8] sm:$0xff] }
 0x6a1   : > { %v7185_v29 = vsel %vm916_vm2, %v7153_v12, %v7062_v30 }
 0x6a2   : > { %10528 = vmatprep.mubr.msk.f32.mxu0 %vm1389_vm3, %v7185_v29 }
 0x6a3   : > { %v6940_v45 = vpop.permute.xlu1 %6939  ;;  %10529 = vmatmul.mubr.msk.f32.gmra.mrb[36].mxu0 %vm1389_vm3, %v7186_v16 }
 0x6a4   : > { %v6938_v2 = vpop.permute.xlu0 %6937  ;;  %v7156_v24 = vsel %vm422_vm0, %v6804_v48, %v6940_v45 }
 0x6a5   : > { %v7155_v28 = vsel %vm422_vm0, %v6803_v40, %v6938_v2  ;;  %v6815_v2 = vld [vmem:[#allocation2 + $0x108] sm:$0xff] }
 0x6a7   : > { %v7068_v53 = vpop.permute.xlu1 %7067 }
 0x6a8   : > { %v7066_v63 = vpop.permute.xlu0 %7065  ;;  %v7188_v10 = vsel %vm916_vm2, %v7156_v24, %v7068_v53  ;;  %v6816_v53 = vld [vmem:[#allocation2 + $0x110] sm:$0xff] }
 0x6a9   : > { %v7187_v36 = vsel %vm916_vm2, %v7155_v28, %v7066_v63 }
 0x6aa   : > { %10531 = vmatprep.mubr.msk.f32.mxu0 %vm1389_vm3, %v7187_v36 }
 0x6ab   : > { %v6944_v61 = vpop.permute.xlu1 %6943  ;;  %10532 = vmatmul.mubr.msk.f32.gmra.mrb[38].mxu0 %vm1389_vm3, %v7188_v10 }
 0x6ac   : > { %v6942_v59 = vpop.permute.xlu0 %6941  ;;  %v7158_v37 = vsel %vm422_vm0, %v6806_v32, %v6944_v61 }
 0x6ad   : > { %v7157_v5 = vsel %vm422_vm0, %v6805_v46, %v6942_v59  ;;  %v6817_v59 = vld [vmem:[#allocation2 + $0x120] sm:$0xff] }
 0x6af   : > { %v7072_v14 = vpop.permute.xlu1 %7071 }
 0x6b0   : > { %v7070_v26 = vpop.permute.xlu0 %7069  ;;  %v7190_v8 = vsel %vm916_vm2, %v7158_v37, %v7072_v14  ;;  %v6818_v14 = vld [vmem:[#allocation2 + $0x128] sm:$0xff] }
 0x6b1   : > { %v7189_v49 = vsel %vm916_vm2, %v7157_v5, %v7070_v26 }
 0x6b2   : > { %10534 = vmatprep.mubr.msk.f32.mxu0 %vm1389_vm3, %v7189_v49 }
 0x6b3   : > { %v6948_v33 = vpop.permute.xlu1 %6947  ;;  %10535 = vmatmul.mubr.msk.f32.gmra.mrb[40].mxu0 %vm1389_vm3, %v7190_v8 }
 0x6b4   : > { %v6946_v7 = vpop.permute.xlu0 %6945  ;;  %v7160_v38 = vsel %vm422_vm0, %v6808_v44, %v6948_v33 }
 0x6b5   : > { %v7159_v9 = vsel %vm422_vm0, %v6807_v54, %v6946_v7  ;;  %v6819_v7 = vld [vmem:[#allocation2 + $0x138] sm:$0xff] }
 0x6b7   : > { %v7076_v6 = vpop.permute.xlu1 %7075 }
 0x6b8   : > { %v7074_v60 = vpop.permute.xlu0 %7073  ;;  %v7192_v0 = vsel %vm916_vm2, %v7160_v38, %v7076_v6  ;;  %v6820_v6 = vld [vmem:[#allocation2 + $0x140] sm:$0xff] }
 0x6b9   : > { %v7191_v25 = vsel %vm916_vm2, %v7159_v9, %v7074_v60 }
 0x6ba   : > { %10537 = vmatprep.mubr.msk.f32.mxu0 %vm1389_vm3, %v7191_v25 }
 0x6bb   : > { %v6952_v50 = vpop.permute.xlu1 %6951  ;;  %10538 = vmatmul.mubr.msk.f32.gmra.mrb[42].mxu0 %vm1389_vm3, %v7192_v0 }
 0x6bc   : > { %v6950_v11 = vpop.permute.xlu0 %6949  ;;  %v7162_v19 = vsel %vm422_vm0, %v6810_v4, %v6952_v50 }
 0x6bd   : > { %v7161_v21 = vsel %vm422_vm0, %v6809_v57, %v6950_v11  ;;  %v6821_v11 = vld [vmem:[#allocation2 + $0x150] sm:$0xff] }
 0x6bf   : > { %v7080_v42 = vpop.permute.xlu1 %7079 }
 0x6c0   : > { %v7078_v31 = vpop.permute.xlu0 %7077  ;;  %v7194_v23 = vsel %vm916_vm2, %v7162_v19, %v7080_v42  ;;  %v6822_v42 = vld [vmem:[#allocation2 + $0x158] sm:$0xff] }
 0x6c1   : > { %v7193_v51 = vsel %vm916_vm2, %v7161_v21, %v7078_v31 }
 0x6c2   : > { %10540 = vmatprep.mubr.msk.f32.mxu0 %vm1389_vm3, %v7193_v51 }
 0x6c3   : > { %v6956_v43 = vpop.permute.xlu1 %6955  ;;  %10541 = vmatmul.mubr.msk.f32.gmra.mrb[44].mxu0 %vm1389_vm3, %v7194_v23 }
 0x6c4   : > { %v6954_v17 = vpop.permute.xlu0 %6953  ;;  %v7164_v58 = vsel %vm422_vm0, %v6812_v56, %v6956_v43 }
 0x6c5   : > { %v7163_v62 = vsel %vm422_vm0, %v6811_v1, %v6954_v17  ;;  %v6824_v1 = vld [vmem:[#allocation2 + $0x170] sm:$0xff] }
 0x6c7   : > { %v7084_v20 = vpop.permute.xlu1 %7083 }
 0x6c8   : > { %v7082_v41 = vpop.permute.xlu0 %7081  ;;  %v7196_v52 = vsel %vm916_vm2, %v7164_v58, %v7084_v20 }
 0x6c9   : > { %v7195_v3 = vsel %vm916_vm2, %v7163_v62, %v7082_v41 }
 0x6ca   : > { %10543 = vmatprep.mubr.msk.f32.mxu0 %vm1389_vm3, %v7195_v3 }
 0x6cb   : > { %v6960_v34 = vpop.permute.xlu1 %6959  ;;  %10544 = vmatmul.mubr.msk.f32.gmra.mrb[46].mxu0 %vm1389_vm3, %v7196_v52 }
 0x6cc   : > { %v6958_v18 = vpop.permute.xlu0 %6957  ;;  %v7166_v30 = vsel %vm422_vm0, %v6814_v39, %v6960_v34 }
 0x6cd   : > { %v7165_v35 = vsel %vm422_vm0, %v6813_v13, %v6958_v18 }
 0x6cf   : > { %v7088_v27 = vpop.permute.xlu1 %7087 }
 0x6d0   : > { %v7086_v12 = vpop.permute.xlu0 %7085  ;;  %v7198_v29 = vsel %vm916_vm2, %v7166_v30, %v7088_v27 }
 0x6d1   : > { %v7197_v47 = vsel %vm916_vm2, %v7165_v35, %v7086_v12  ;;  %v6828_v12 = vld [vmem:[#allocation2 + $0x1a0] sm:$0xff] }
 0x6d2   : > { %10546 = vmatprep.mubr.msk.f32.mxu0 %vm1389_vm3, %v7197_v47  ;;  %v6827_v47 = vld [vmem:[#allocation2 + $0x198] sm:$0xff] }
 0x6d3   : > { %v6964_v16 = vpop.permute.xlu1 %6963  ;;  %10547 = vmatmul.mubr.msk.f32.gmra.mrb[48].mxu0 %vm1389_vm3, %v7198_v29 }
 0x6d4   : > { %v6962_v45 = vpop.permute.xlu0 %6961  ;;  %v7168_v63 = vsel %vm422_vm0, %v6816_v53, %v6964_v16 }
 0x6d5   : > { %v7167_v48 = vsel %vm422_vm0, %v6815_v2, %v6962_v45 }
 0x6d7   : > { %v7092_v40 = vpop.permute.xlu1 %7091 }
 0x6d8   : > { %v7090_v28 = vpop.permute.xlu0 %7089  ;;  %v7200_v36 = vsel %vm916_vm2, %v7168_v63, %v7092_v40  ;;  %v14809_v40 = vld [vmem:[%s15620_s6] ss:$0 sm:$0xff] }
 0x6d9   : > { %v7199_v24 = vsel %vm916_vm2, %v7167_v48, %v7090_v28 }
 0x6da   : > { %10549 = vmatprep.mubr.msk.f32.mxu0 %vm1389_vm3, %v7199_v24 }
 0x6db   : > { %v6968_v10 = vpop.permute.xlu1 %6967  ;;  %10550 = vmatmul.mubr.msk.f32.gmra.mrb[50].mxu0 %vm1389_vm3, %v7200_v36 }
 0x6dc   : > { %v6966_v61 = vpop.permute.xlu0 %6965  ;;  %v7170_v26 = vsel %vm422_vm0, %v6818_v14, %v6968_v10 }
 0x6dd   : > { %v7169_v32 = vsel %vm422_vm0, %v6817_v59, %v6966_v61 }
 0x6df   : > { %v7096_v46 = vpop.permute.xlu1 %7095 }
 0x6e0   : > { %v7094_v5 = vpop.permute.xlu0 %7093  ;;  %v7202_v49 = vsel %vm916_vm2, %v7170_v26, %v7096_v46 }
 0x6e1   : > { %v7201_v37 = vsel %vm916_vm2, %v7169_v32, %v7094_v5 }
 0x6e2   : > { %10552 = vmatprep.mubr.msk.f32.mxu0 %vm1389_vm3, %v7201_v37 }
 0x6e3   : > { %v6972_v8 = vpop.permute.xlu1 %6971  ;;  %10553 = vmatmul.mubr.msk.f32.gmra.mrb[52].mxu0 %vm1389_vm3, %v7202_v49 }
 0x6e4   : > { %v6970_v33 = vpop.permute.xlu0 %6969  ;;  %v7172_v60 = vsel %vm422_vm0, %v6820_v6, %v6972_v8 }
 0x6e5   : > { %v7171_v44 = vsel %vm422_vm0, %v6819_v7, %v6970_v33 }
 0x6e7   : > { %v7100_v54 = vpop.permute.xlu1 %7099 }
 0x6e8   : > { %v7098_v9 = vpop.permute.xlu0 %7097  ;;  %v7204_v25 = vsel %vm916_vm2, %v7172_v60, %v7100_v54 }
 0x6e9   : > { %v7203_v38 = vsel %vm916_vm2, %v7171_v44, %v7098_v9 }
 0x6ea   : > { %10555 = vmatprep.mubr.msk.f32.mxu0 %vm1389_vm3, %v7203_v38 }
 0x6eb   : > { %v6976_v0 = vpop.permute.xlu1 %6975  ;;  %10556 = vmatmul.mubr.msk.f32.gmra.mrb[54].mxu0 %vm1389_vm3, %v7204_v25 }
 0x6ec   : > { %v6974_v50 = vpop.permute.xlu0 %6973  ;;  %v7174_v31 = vsel %vm422_vm0, %v6822_v42, %v6976_v0 }
 0x6ed   : > { %v7173_v4 = vsel %vm422_vm0, %v6821_v11, %v6974_v50 }
 0x6ef   : > { %v7104_v57 = vpop.permute.xlu1 %7103 }
 0x6f0   : > { %v7102_v21 = vpop.permute.xlu0 %7101  ;;  %v7206_v51 = vsel %vm916_vm2, %v7174_v31, %v7104_v57 }
 0x6f1   : > { %v7205_v19 = vsel %vm916_vm2, %v7173_v4, %v7102_v21 }
 0x6f2   : > { %10558 = vmatprep.mubr.msk.f32.mxu0 %vm1389_vm3, %v7205_v19 }
 0x6f3   : > { %v6980_v23 = vpop.permute.xlu1 %6979  ;;  %10559 = vmatmul.mubr.msk.f32.gmra.mrb[56].mxu0 %vm1389_vm3, %v7206_v51 }
 0x6f4   : > { %v6978_v43 = vpop.permute.xlu0 %6977  ;;  %v7176_v62 = vsel %vm422_vm0, %v6824_v1, %v6980_v23 }
 0x6f5   : > { %v7175_v20 = vsel %vm422_vm0, %v14442_v15, %v6978_v43 }
 0x6f7   : > { %v7108_v17 = vpop.permute.xlu1 %7107 }
 0x6f8   : > { %v7106_v56 = vpop.permute.xlu0 %7105  ;;  %v7208_v58 = vsel %vm916_vm2, %v7176_v62, %v7108_v17 }
 0x6f9   : > { %v7207_v41 = vsel %vm916_vm2, %v7175_v20, %v7106_v56 }
 0x6fa   : > { %10561 = vmatprep.mubr.msk.f32.mxu0 %vm1389_vm3, %v7207_v41 }
 0x6fb   : > { %v6984_v3 = vpop.permute.xlu1 %6983  ;;  %10562 = vmatmul.mubr.msk.f32.gmra.mrb[58].mxu0 %vm1389_vm3, %v7208_v58 }
 0x6fc   : > { %v6982_v52 = vpop.permute.xlu0 %6981  ;;  %v7178_v15 = vsel %vm422_vm0, %v14464_v22, %v6984_v3 }
 0x6fd   : > { %v7177_v18 = vsel %vm422_vm0, %v14458_v55, %v6982_v52 }
 0x6ff   : > { %v7112_v34 = vpop.permute.xlu1 %7111 }
 0x700   : > { %v7110_v13 = vpop.permute.xlu0 %7109  ;;  %v7210_v39 = vsel %vm916_vm2, %v7178_v15, %v7112_v34 }
 0x701   : > { %v7209_v27 = vsel %vm916_vm2, %v7177_v18, %v7110_v13 }
 0x702   : > { %10564 = vmatprep.mubr.msk.f32.mxu0 %vm1389_vm3, %v7209_v27 }
 0x703   : > { %v6988_v35 = vpop.permute.xlu1 %6987  ;;  %10565 = vmatmul.mubr.msk.f32.gmra.mrb[60].mxu0 %vm1389_vm3, %v7210_v39 }
 0x704   : > { %v6986_v30 = vpop.permute.xlu0 %6985  ;;  %v7180_v29 = vsel %vm422_vm0, %v6828_v12, %v6988_v35 }
 0x705   : > { %v7179_v55 = vsel %vm422_vm0, %v6827_v47, %v6986_v30 }
 0x707   : > { %v7116_v16 = vpop.permute.xlu1 %7115 }
 0x708   : > { %v7114_v45 = vpop.permute.xlu0 %7113  ;;  %v7212_v2 = vsel %vm916_vm2, %v7180_v29, %v7116_v16 }
 0x709   : > { %v7211_v22 = vsel %vm916_vm2, %v7179_v55, %v7114_v45 }
 0x70a   : > { %10567 = vmatprep.mubr.msk.f32.mxu0 %vm1389_vm3, %v7211_v22 }
 0x70b   : > { %10568 = vmatmul.mubr.msk.f32.gmra.mrb[62].mxu0 %vm1389_vm3, %v7212_v2 }
 0x766   : > { %v10524_v53 = vpop.f32.mrb[32].mxu0 }
 0x767   : > { %v7586_v48 = vadd.f32 %v10524_v53, %v14809_v40  ;;  %v7387_v28 = vpop.f32.mrb[33].mxu0 }
 0x768   : > { %v7585_v63 = vadd.f32 %v14809_v40, %v7387_v28 }
 0x769   : > { %v7618_v24 = vmax.f32 %v7586_v48, 0.0 }
 0x76a   : > { %v7617_v36 = vmax.f32 %v7585_v63, 0.0 }
 0x76b   : > { %7650 = vst.msk [vmem:[#allocation3 + $0x8] sm:$0xff] %vm422_vm0, %v7618_v24 }
 0x76c   : > { %7649 = vst.msk [vmem:[#allocation3] sm:$0xff] %vm422_vm0, %v7617_v36 }
 0x76e   : > { %v10527_v10 = vpop.f32.mrb[34].mxu0 }
 0x76f   : > { %v7588_v61 = vadd.f32 %v10527_v10, %v14809_v40  ;;  %v7397_v59 = vpop.f32.mrb[35].mxu0 }
 0x770   : > { %v7587_v46 = vadd.f32 %v14809_v40, %v7397_v59 }
 0x771   : > { %v7620_v14 = vmax.f32 %v7588_v61, 0.0 }
 0x772   : > { %v7619_v32 = vmax.f32 %v7587_v46, 0.0 }
 0x773   : > { %7652 = vst.msk [vmem:[#allocation3 + $0x18] sm:$0xff] %vm422_vm0, %v7620_v14 }
 0x774   : > { %7651 = vst.msk [vmem:[#allocation3 + $0x10] sm:$0xff] %vm422_vm0, %v7619_v32 }
 0x776   : > { %v10530_v5 = vpop.f32.mrb[36].mxu0 }
 0x777   : > { %v7590_v26 = vadd.f32 %v10530_v5, %v14809_v40  ;;  %v7407_v37 = vpop.f32.mrb[37].mxu0 }
 0x778   : > { %v7589_v49 = vadd.f32 %v14809_v40, %v7407_v37 }
 0x779   : > { %v7622_v8 = vmax.f32 %v7590_v26, 0.0 }
 0x77a   : > { %v7621_v33 = vmax.f32 %v7589_v49, 0.0 }
 0x77b   : > { %7654 = vst.msk [vmem:[#allocation3 + $0x28] sm:$0xff] %vm422_vm0, %v7622_v8 }
 0x77c   : > { %7653 = vst.msk [vmem:[#allocation3 + $0x20] sm:$0xff] %vm422_vm0, %v7621_v33 }
 0x77e   : > { %v10533_v7 = vpop.f32.mrb[38].mxu0 }
 0x77f   : > { %v7592_v54 = vadd.f32 %v10533_v7, %v14809_v40  ;;  %v7417_v6 = vpop.f32.mrb[39].mxu0 }
 0x780   : > { %v7591_v44 = vadd.f32 %v14809_v40, %v7417_v6 }
 0x781   : > { %v7624_v9 = vmax.f32 %v7592_v54, 0.0 }
 0x782   : > { %v7623_v60 = vmax.f32 %v7591_v44, 0.0 }
 0x783   : > { %7656 = vst.msk [vmem:[#allocation3 + $0x38] sm:$0xff] %vm422_vm0, %v7624_v9 }
 0x784   : > { %7655 = vst.msk [vmem:[#allocation3 + $0x30] sm:$0xff] %vm422_vm0, %v7623_v60 }
 0x786   : > { %v10536_v38 = vpop.f32.mrb[40].mxu0 }
 0x787   : > { %v7594_v25 = vadd.f32 %v10536_v38, %v14809_v40  ;;  %v7427_v0 = vpop.f32.mrb[41].mxu0 }
 0x788   : > { %v7593_v50 = vadd.f32 %v14809_v40, %v7427_v0 }
 0x789   : > { %v7626_v11 = vmax.f32 %v7594_v25, 0.0 }
 0x78a   : > { %v7625_v57 = vmax.f32 %v7593_v50, 0.0 }
 0x78b   : > { %7658 = vst.msk [vmem:[#allocation3 + $0x48] sm:$0xff] %vm422_vm0, %v7626_v11 }
 0x78c   : > { %7657 = vst.msk [vmem:[#allocation3 + $0x40] sm:$0xff] %vm422_vm0, %v7625_v57 }
 0x78e   : > { %v10539_v42 = vpop.f32.mrb[42].mxu0 }
 0x78f   : > { %v7596_v4 = vadd.f32 %v10539_v42, %v14809_v40  ;;  %v7437_v21 = vpop.f32.mrb[43].mxu0 }
 0x790   : > { %v7595_v31 = vadd.f32 %v14809_v40, %v7437_v21 }
 0x791   : > { %v7628_v19 = vmax.f32 %v7596_v4, 0.0 }
 0x792   : > { %v7627_v51 = vmax.f32 %v7595_v31, 0.0 }
 0x793   : > { %7660 = vst.msk [vmem:[#allocation3 + $0x58] sm:$0xff] %vm422_vm0, %v7628_v19 }
 0x794   : > { %7659 = vst.msk [vmem:[#allocation3 + $0x50] sm:$0xff] %vm422_vm0, %v7627_v51 }
 0x796   : > { %v10542_v23 = vpop.f32.mrb[44].mxu0 }
 0x797   : > { %v7598_v43 = vadd.f32 %v10542_v23, %v14809_v40  ;;  %v7447_v17 = vpop.f32.mrb[45].mxu0 }
 0x798   : > { %v7597_v1 = vadd.f32 %v14809_v40, %v7447_v17 }
 0x799   : > { %v7630_v20 = vmax.f32 %v7598_v43, 0.0 }
 0x79a   : > { %v7629_v56 = vmax.f32 %v7597_v1, 0.0 }
 0x79b   : > { %7662 = vst.msk [vmem:[#allocation3 + $0x68] sm:$0xff] %vm422_vm0, %v7630_v20 }
 0x79c   : > { %7661 = vst.msk [vmem:[#allocation3 + $0x60] sm:$0xff] %vm422_vm0, %v7629_v56 }
 0x79e   : > { %v10545_v62 = vpop.f32.mrb[46].mxu0 }
 0x79f   : > { %v7600_v41 = vadd.f32 %v10545_v62, %v14809_v40  ;;  %v7457_v58 = vpop.f32.mrb[47].mxu0 }
 0x7a0   : > { %v7599_v3 = vadd.f32 %v14809_v40, %v7457_v58 }
 0x7a1   : > { %v7632_v52 = vmax.f32 %v7600_v41, 0.0 }
 0x7a2   : > { %v7631_v34 = vmax.f32 %v7599_v3, 0.0 }
 0x7a3   : > { %7664 = vst.msk [vmem:[#allocation3 + $0x78] sm:$0xff] %vm422_vm0, %v7632_v52 }
 0x7a4   : > { %7663 = vst.msk [vmem:[#allocation3 + $0x70] sm:$0xff] %vm422_vm0, %v7631_v34 }
 0x7a6   : > { %v10548_v18 = vpop.f32.mrb[48].mxu0 }
 0x7a7   : > { %v7602_v13 = vadd.f32 %v10548_v18, %v14809_v40  ;;  %v7467_v15 = vpop.f32.mrb[49].mxu0 }
 0x7a8   : > { %v7601_v27 = vadd.f32 %v14809_v40, %v7467_v15 }
 0x7a9   : > { %v7634_v39 = vmax.f32 %v7602_v13, 0.0 }
 0x7aa   : > { %v7633_v35 = vmax.f32 %v7601_v27, 0.0 }
 0x7ab   : > { %7666 = vst.msk [vmem:[#allocation3 + $0x88] sm:$0xff] %vm422_vm0, %v7634_v39 }
 0x7ac   : > { %7665 = vst.msk [vmem:[#allocation3 + $0x80] sm:$0xff] %vm422_vm0, %v7633_v35 }
 0x7ae   : > { %v10551_v12 = vpop.f32.mrb[50].mxu0 }
 0x7af   : > { %v7604_v30 = vadd.f32 %v10551_v12, %v14809_v40  ;;  %v7477_v47 = vpop.f32.mrb[51].mxu0 }
 0x7b0   : > { %v7603_v29 = vadd.f32 %v14809_v40, %v7477_v47 }
 0x7b1   : > { %v7636_v16 = vmax.f32 %v7604_v30, 0.0 }
 0x7b2   : > { %v7635_v55 = vmax.f32 %v7603_v29, 0.0 }
 0x7b3   : > { %7668 = vst.msk [vmem:[#allocation3 + $0x98] sm:$0xff] %vm422_vm0, %v7636_v16 }
 0x7b4   : > { %7667 = vst.msk [vmem:[#allocation3 + $0x90] sm:$0xff] %vm422_vm0, %v7635_v55 }
 0x7b6   : > { %v10554_v45 = vpop.f32.mrb[52].mxu0 }
 0x7b7   : > { %v7606_v22 = vadd.f32 %v10554_v45, %v14809_v40  ;;  %v7487_v2 = vpop.f32.mrb[53].mxu0 }
 0x7b8   : > { %v7605_v53 = vadd.f32 %v14809_v40, %v7487_v2 }
 0x7b9   : > { %v7638_v48 = vmax.f32 %v7606_v22, 0.0 }
 0x7ba   : > { %v7637_v28 = vmax.f32 %v7605_v53, 0.0 }
 0x7bb   : > { %7670 = vst.msk [vmem:[#allocation3 + $0xa8] sm:$0xff] %vm422_vm0, %v7638_v48 }
 0x7bc   : > { %7669 = vst.msk [vmem:[#allocation3 + $0xa0] sm:$0xff] %vm422_vm0, %v7637_v28 }
 0x7be   : > { %v10557_v63 = vpop.f32.mrb[54].mxu0 }
 0x7bf   : > { %v7608_v24 = vadd.f32 %v10557_v63, %v14809_v40  ;;  %v7497_v36 = vpop.f32.mrb[55].mxu0 }
 0x7c0   : > { %v7607_v10 = vadd.f32 %v14809_v40, %v7497_v36 }
 0x7c1   : > { %v7640_v61 = vmax.f32 %v7608_v24, 0.0 }
 0x7c2   : > { %v7639_v59 = vmax.f32 %v7607_v10, 0.0 }
 0x7c3   : > { %7672 = vst.msk [vmem:[#allocation3 + $0xb8] sm:$0xff] %vm422_vm0, %v7640_v61 }
 0x7c4   : > { %7671 = vst.msk [vmem:[#allocation3 + $0xb0] sm:$0xff] %vm422_vm0, %v7639_v59 }
 0x7c6   : > { %v10560_v46 = vpop.f32.mrb[56].mxu0 }
 0x7c7   : > { %v7610_v14 = vadd.f32 %v10560_v46, %v14809_v40  ;;  %v7507_v32 = vpop.f32.mrb[57].mxu0 }
 0x7c8   : > { %v7609_v5 = vadd.f32 %v14809_v40, %v7507_v32 }
 0x7c9   : > { %v7642_v26 = vmax.f32 %v7610_v14, 0.0 }
 0x7ca   : > { %v7641_v37 = vmax.f32 %v7609_v5, 0.0 }
 0x7cb   : > { %7674 = vst.msk [vmem:[#allocation3 + $0xc8] sm:$0xff] %vm422_vm0, %v7642_v26 }
 0x7cc   : > { %7673 = vst.msk [vmem:[#allocation3 + $0xc0] sm:$0xff] %vm422_vm0, %v7641_v37 }
 0x7ce   : > { %v10563_v49 = vpop.f32.mrb[58].mxu0 }
 0x7cf   : > { %v7612_v8 = vadd.f32 %v10563_v49, %v14809_v40  ;;  %v7517_v33 = vpop.f32.mrb[59].mxu0 }
 0x7d0   : > { %v7611_v7 = vadd.f32 %v14809_v40, %v7517_v33 }
 0x7d1   : > { %v7644_v54 = vmax.f32 %v7612_v8, 0.0 }
 0x7d2   : > { %v7643_v6 = vmax.f32 %v7611_v7, 0.0 }
 0x7d3   : > { %7676 = vst.msk [vmem:[#allocation3 + $0xd8] sm:$0xff] %vm422_vm0, %v7644_v54 }
 0x7d4   : > { %7675 = vst.msk [vmem:[#allocation3 + $0xd0] sm:$0xff] %vm422_vm0, %v7643_v6 }
 0x7d6   : > { %v10566_v44 = vpop.f32.mrb[60].mxu0 }
 0x7d7   : > { %v7614_v9 = vadd.f32 %v10566_v44, %v14809_v40  ;;  %v7527_v60 = vpop.f32.mrb[61].mxu0 }
 0x7d8   : > { %v7613_v38 = vadd.f32 %v14809_v40, %v7527_v60 }
 0x7d9   : > { %v7646_v25 = vmax.f32 %v7614_v9, 0.0 }
 0x7da   : > { %v7645_v0 = vmax.f32 %v7613_v38, 0.0 }
 0x7db   : > { %7678 = vst.msk [vmem:[#allocation3 + $0xe8] sm:$0xff] %vm422_vm0, %v7646_v25 }
 0x7dc   : > { %7677 = vst.msk [vmem:[#allocation3 + $0xe0] sm:$0xff] %vm422_vm0, %v7645_v0 }
 0x7de   : > { %v10569_v50 = vpop.f32.mrb[62].mxu0 }
 0x7df   : > { %v7616_v11 = vadd.f32 %v10569_v50, %v14809_v40  ;;  %v7537_v57 = vpop.f32.mrb[63].mxu0 }
 0x7e0   : > { %v7615_v42 = vadd.f32 %v14809_v40, %v7537_v57 }
 0x7e1   : > { %v7648_v4 = vmax.f32 %v7616_v11, 0.0 }
 0x7e2   : > { %v7647_v21 = vmax.f32 %v7615_v42, 0.0 }
 0x7e3   : > { %7680 = vst.msk [vmem:[#allocation3 + $0xf8] sm:$0xff] %vm422_vm0, %v7648_v4 }
 0x7e4   : > { %7679 = vst.msk [vmem:[#allocation3 + $0xf0] sm:$0xff] %vm422_vm0, %v7647_v21 }
 0x7e5 LB: >> { %v7698_v31 = vld [vmem:[#allocation6 + $0x8] sm:$0xff]  ;;  %v7700_v51 = vld [vmem:[#allocation6 + $0x18] sm:$0xff]  ;;  %v7697_v40 = vld [vmem:[#allocation6] sm:$0xff]  ;;  %v11331_v1 = vmov 0.0   ;;  %s9264_s23 = sshll.u32 %s11320_s22, 6  ;;  %s15739_s17 = sld [smem:[#allocation35_spill]]  ;;  %s11320_s22 = sphi %s14875_s22, %s7686_s22  }
 0x7e6   : >> { %v7706_v19 = vld [vmem:[#allocation6 + $0x48] sm:$0xff]  ;;  %v7708_v43 = vld [vmem:[#allocation6 + $0x58] sm:$0xff]  ;;  %v7705_v17 = vld [vmem:[#allocation6 + $0x40] sm:$0xff]  ;;  %7859 = vmatprep.mubr.f32.mxu0 %v11331_v1  ;;  %7972 = vmatprep.mubr.f32.mxu1 %v11331_v1  ;;  %s14885_s28 = scalar_lea.vmem [#allocation3], %s9264_s23  ;;  %s15740_s29 = sld [smem:[#allocation36_spill]] }
 0x7e7   : >> { %v10786_v23 = vpack.c.bf16 %v7706_v19, %v7698_v31  ;;  %v10794_v20 = vpack.c.bf16 %v7708_v43, %v7700_v51  ;;  %v10788_v56 = vpack.c.bf16 %v7705_v17, %v7697_v40  ;;  %v7699_v62 = vld [vmem:[#allocation6 + $0x10] sm:$0xff]  ;;  %v7714_v58 = vld [vmem:[#allocation6 + $0x88] sm:$0xff]  ;;  %v7716_v34 = vld [vmem:[#allocation6 + $0x98] sm:$0xff]  ;;  %s15582_s10 = scalar_lea.vmem %s11567_s26, %s9264_s23  ;;  %s7686_s22 = sadd.s32 1, %s11320_s22  }
 0x7e8   : >> { %v7707_v41 = vld [vmem:[#allocation6 + $0x50] sm:$0xff]  ;;  %v7722_v52 = vld [vmem:[#allocation6 + $0xc8] sm:$0xff]  ;;  %v7724_v18 = vld [vmem:[#allocation6 + $0xd8] sm:$0xff]  ;;  %p7683_p8 = scmp.ge.s32.totalorder %s7686_s22, 4  }
 0x7e9   : >> { %10787 = vmatprep.subr.bf16.mxu0 %v10786_v23  ;;  %v10796_v3 = vpack.c.bf16 %v7707_v41, %v7699_v62  ;;  %10795 = vmatprep.subr.bf16.mxu1 %v10794_v20  ;;  %v10790_v13 = vpack.c.bf16 %v7722_v52, %v7714_v58  ;;  %v10798_v15 = vpack.c.bf16 %v7724_v18, %v7716_v34  ;;  %v7713_v27 = vld [vmem:[#allocation6 + $0x80] sm:$0xff]  ;;  %v7715_v35 = vld [vmem:[#allocation6 + $0x90] sm:$0xff]  ;;  %v7702_v47 = vld [vmem:[#allocation6 + $0x28] sm:$0xff] }
 0x7ea   : >> { %10789 = vmatpush1.bf16.msra.mxu0 %v10788_v56  ;;  %v7721_v39 = vld [vmem:[#allocation6 + $0xc0] sm:$0xff]  ;;  %v7723_v30 = vld [vmem:[#allocation6 + $0xd0] sm:$0xff]  ;;  %v7710_v16 = vld [vmem:[#allocation6 + $0x68] sm:$0xff] }
 0x7eb   : >> { %10797 = vmatpush1.bf16.msra.mxu1 %v10796_v3  ;;  %v10792_v12 = vpack.c.bf16 %v7721_v39, %v7713_v27  ;;  %10791 = vmatprep.subr.bf16.mxu0 %v10790_v13  ;;  %v10800_v29 = vpack.c.bf16 %v7723_v30, %v7715_v35  ;;  %v7701_v55 = vld [vmem:[#allocation6 + $0x20] sm:$0xff]  ;;  %v10802_v22 = vpack.c.bf16 %v7710_v16, %v7702_v47  ;;  %v7704_v2 = vld [vmem:[#allocation6 + $0x38] sm:$0xff]  ;;  %v7703_v48 = vld [vmem:[#allocation6 + $0x30] sm:$0xff] }
 0x7ec   : >> { %10799 = vmatprep.subr.bf16.mxu1 %v10798_v15  ;;  %v7709_v45 = vld [vmem:[#allocation6 + $0x60] sm:$0xff]  ;;  %v7712_v53 = vld [vmem:[#allocation6 + $0x78] sm:$0xff]  ;;  %v14888_v28 = vld [vmem:[%s14885_s28] sm:$0xff] }
 0x7ed   : >> { %v10804_v63 = vpack.c.bf16 %v7709_v45, %v7701_v55  ;;  %v10810_v24 = vpack.c.bf16 %v7712_v53, %v7704_v2  ;;  %v7711_v36 = vld [vmem:[#allocation6 + $0x70] sm:$0xff]  ;;  %v7718_v10 = vld [vmem:[#allocation6 + $0xa8] sm:$0xff]  ;;  %v7717_v46 = vld [vmem:[#allocation6 + $0xa0] sm:$0xff] }
 0x7ee   : >> { %10793 = vmatpush1.bf16.msra.mxu0 %v10792_v12  ;;  %v10812_v61 = vpack.c.bf16 %v7711_v36, %v7703_v48  ;;  %v7726_v59 = vld [vmem:[#allocation6 + $0xe8] sm:$0xff]  ;;  %v7725_v14 = vld [vmem:[#allocation6 + $0xe0] sm:$0xff]  ;;  %v7720_v5 = vld [vmem:[#allocation6 + $0xb8] sm:$0xff] }
 0x7ef   : >> { %10801 = vmatpush1.bf16.msra.mxu1 %v10800_v29  ;;  %10803 = vmatprep.subr.bf16.mxu0 %v10802_v22  ;;  %v10806_v32 = vpack.c.bf16 %v7726_v59, %v7718_v10  ;;  %v7728_v26 = vld [vmem:[#allocation6 + $0xf8] sm:$0xff]  ;;  %v7719_v37 = vld [vmem:[#allocation6 + $0xb0] sm:$0xff]  ;;  %v10808_v7 = vpack.c.bf16 %v7725_v14, %v7717_v46  ;;  %v14917_v0 = vld [vmem:[%s14885_s28 + $0x10] sm:$0xff] }
 0x7f0   : >> { %10811 = vmatprep.subr.bf16.mxu1 %v10810_v24  ;;  %v14895_v49 = vld [vmem:[%s14885_s28 + $0x8] sm:$0xff]  ;;  %v10814_v8 = vpack.c.bf16 %v7728_v26, %v7720_v5  ;;  %v7727_v33 = vld [vmem:[#allocation6 + $0xf0] sm:$0xff]  ;;  %v14926_v50 = vld [vmem:[%s14885_s28 + $0x18] sm:$0xff] }
 0x7f1   : >> { %9265 = vmatmul.mubr.msk.f32.vlgmr.msra.gmra.mrb[0].mxu0 %vm422_vm0, %v14888_v28  ;;  %v8327_v54 = vld [vmem:[%s15623_s9 + $0x80] sm:$0xff]  ;;  %v8328_v6 = vld [vmem:[%s15623_s9 + $0x88] sm:$0xff]  ;;  %v10816_v44 = vpack.c.bf16 %v7727_v33, %v7719_v37  ;;  %v14953_v42 = vld [vmem:[%s14885_s28 + $0x30] sm:$0xff] }
 0x7f2   : >> { %9273 = vmatmul.mubr.msk.f32.vlgmr.msra.gmra.mrb[0].mxu1 %vm422_vm0, %v14888_v28  ;;  %10805 = vmatpush1.bf16.msra.mxu0 %v10804_v63  ;;  %v10818_v9 = vpack.c.bf16 %v8328_v6, %v8327_v54  ;;  %v8359_v60 = vld [vmem:[%s15623_s9 + $0x180] sm:$0xff]  ;;  %v8360_v38 = vld [vmem:[%s15623_s9 + $0x188] sm:$0xff]  ;;  %v14962_v4 = vld [vmem:[%s14885_s28 + $0x38] sm:$0xff] }
 0x7f3   : >> { %7865 = vmatprep.mubr.f32.mxu0 %v11331_v1  ;;  %7978 = vmatprep.mubr.f32.mxu1 %v11331_v1  ;;  %v10850_v25 = vpack.c.bf16 %v8360_v38, %v8359_v60  ;;  %v14935_v11 = vld [vmem:[%s14885_s28 + $0x20] sm:$0xff]  ;;  %v14944_v57 = vld [vmem:[%s14885_s28 + $0x28] sm:$0xff]  ;;  %v8329_v23 = vld [vmem:[%s15623_s9 + $0x90] sm:$0xff] }
 0x7f4   : >> { %10813 = vmatpush1.bf16.msra.mxu1 %v10812_v61  ;;  %10807 = vmatprep.subr.bf16.mxu0 %v10806_v32  ;;  %v8311_v21 = vld [vmem:[%s15623_s9] sm:$0xff]  ;;  %v8312_v31 = vld [vmem:[%s15623_s9 + $0x8] sm:$0xff]  ;;  %v8330_v43 = vld [vmem:[%s15623_s9 + $0x98] sm:$0xff] }
 0x7f5   : >> { %9266 = vmatmul.mubr.msk.f32.gmra.mrb[2].mxu0 %vm422_vm0, %v14895_v49  ;;  %10815 = vmatprep.subr.bf16.mxu1 %v10814_v8  ;;  %v8343_v19 = vld [vmem:[%s15623_s9 + $0x100] sm:$0xff]  ;;  %v8344_v51 = vld [vmem:[%s15623_s9 + $0x108] sm:$0xff]  ;;  %v8361_v40 = vld [vmem:[%s15623_s9 + $0x190] sm:$0xff]  ;;  %v10820_v20 = vpack.c.bf16 %v8312_v31, %v8311_v21  ;;  %v10822_v62 = vpack.c.bf16 %v8330_v43, %v8329_v23 }
 0x7f6   : >> { %9274 = vmatmul.mubr.msk.f32.gmra.mrb[2].mxu1 %vm422_vm0, %v14895_v49  ;;  %7871 = vmatprep.mubr.f32.mxu0 %v11331_v1  ;;  %v8362_v17 = vld [vmem:[%s15623_s9 + $0x198] sm:$0xff]  ;;  %v10852_v56 = vpack.c.bf16 %v8344_v51, %v8343_v19  ;;  %v8313_v41 = vld [vmem:[%s15623_s9 + $0x10] sm:$0xff]  ;;  %v8331_v18 = vld [vmem:[%s15623_s9 + $0xa0] sm:$0xff] }
 0x7f7   : >> { %7984 = vmatprep.mubr.f32.mxu1 %v11331_v1  ;;  %10809 = vmatpush1.bf16.msra.mxu0 %v10808_v7  ;;  %v8314_v58 = vld [vmem:[%s15623_s9 + $0x18] sm:$0xff]  ;;  %v8345_v3 = vld [vmem:[%s15623_s9 + $0x110] sm:$0xff]  ;;  %v10854_v52 = vpack.c.bf16 %v8362_v17, %v8361_v40  ;;  %v8332_v13 = vld [vmem:[%s15623_s9 + $0xa8] sm:$0xff] }
 0x7f8   : >> { %10817 = vmatpush1.bf16.msra.mxu1 %v10816_v44  ;;  %10819 = vmatprep.subr.bf16.mxu0 %v10818_v9  ;;  %v8346_v34 = vld [vmem:[%s15623_s9 + $0x118] sm:$0xff]  ;;  %v8363_v15 = vld [vmem:[%s15623_s9 + $0x1a0] sm:$0xff]  ;;  %v8364_v27 = vld [vmem:[%s15623_s9 + $0x1a8] sm:$0xff]  ;;  %v10824_v39 = vpack.c.bf16 %v8314_v58, %v8313_v41  ;;  %v10826_v12 = vpack.c.bf16 %v8332_v13, %v8331_v18 }
 0x7f9   : >> { %9267 = vmatmul.mubr.msk.f32.gmra.mrb[4].mxu0 %vm422_vm0, %v14917_v0  ;;  %10851 = vmatprep.subr.bf16.mxu1 %v10850_v25  ;;  %v10856_v35 = vpack.c.bf16 %v8346_v34, %v8345_v3  ;;  %v8315_v30 = vld [vmem:[%s15623_s9 + $0x20] sm:$0xff]  ;;  %v8316_v47 = vld [vmem:[%s15623_s9 + $0x28] sm:$0xff]  ;;  %v10858_v16 = vpack.c.bf16 %v8364_v27, %v8363_v15  ;;  %v8333_v45 = vld [vmem:[%s15623_s9 + $0xb0] sm:$0xff] }
 0x7fa   : >> { %9275 = vmatmul.mubr.msk.f32.gmra.mrb[4].mxu1 %vm422_vm0, %v14917_v0  ;;  %7877 = vmatprep.mubr.f32.mxu0 %v11331_v1  ;;  %v8347_v29 = vld [vmem:[%s15623_s9 + $0x120] sm:$0xff]  ;;  %v8348_v55 = vld [vmem:[%s15623_s9 + $0x128] sm:$0xff]  ;;  %v8334_v22 = vld [vmem:[%s15623_s9 + $0xb8] sm:$0xff]  ;;  %v10828_v48 = vpack.c.bf16 %v8316_v47, %v8315_v30 }
 0x7fb   : >> { %7990 = vmatprep.mubr.f32.mxu1 %v11331_v1  ;;  %v8365_v2 = vld [vmem:[%s15623_s9 + $0x1b0] sm:$0xff]  ;;  %v8366_v53 = vld [vmem:[%s15623_s9 + $0x1b8] sm:$0xff]  ;;  %v10830_v63 = vpack.c.bf16 %v8334_v22, %v8333_v45  ;;  %v8335_v46 = vld [vmem:[%s15623_s9 + $0xc0] sm:$0xff] }
 0x7fc   : >> { %v8317_v24 = vld [vmem:[%s15623_s9 + $0x30] sm:$0xff]  ;;  %v8318_v36 = vld [vmem:[%s15623_s9 + $0x38] sm:$0xff]  ;;  %v10862_v61 = vpack.c.bf16 %v8366_v53, %v8365_v2  ;;  %v8336_v14 = vld [vmem:[%s15623_s9 + $0xc8] sm:$0xff] }
 0x7fd   : >> { %9268 = vmatmul.mubr.msk.f32.gmra.mrb[6].mxu0 %vm422_vm0, %v14926_v50  ;;  %v8349_v10 = vld [vmem:[%s15623_s9 + $0x130] sm:$0xff]  ;;  %v8350_v59 = vld [vmem:[%s15623_s9 + $0x138] sm:$0xff]  ;;  %v8367_v32 = vld [vmem:[%s15623_s9 + $0x1c0] sm:$0xff]  ;;  %v10832_v26 = vpack.c.bf16 %v8318_v36, %v8317_v24 }
 0x7fe   : >> { %9276 = vmatmul.mubr.msk.f32.gmra.mrb[6].mxu1 %vm422_vm0, %v14926_v50  ;;  %7883 = vmatprep.mubr.f32.mxu0 %v11331_v1  ;;  %v8368_v5 = vld [vmem:[%s15623_s9 + $0x1c8] sm:$0xff]  ;;  %v10864_v37 = vpack.c.bf16 %v8350_v59, %v8349_v10  ;;  %v8319_v8 = vld [vmem:[%s15623_s9 + $0x40] sm:$0xff]  ;;  %v8337_v44 = vld [vmem:[%s15623_s9 + $0xd0] sm:$0xff] }
 0x7ff   : >> { %7996 = vmatprep.mubr.f32.mxu1 %v11331_v1  ;;  %v8320_v33 = vld [vmem:[%s15623_s9 + $0x48] sm:$0xff]  ;;  %v8351_v7 = vld [vmem:[%s15623_s9 + $0x140] sm:$0xff]  ;;  %v10866_v54 = vpack.c.bf16 %v8368_v5, %v8367_v32  ;;  %v8338_v9 = vld [vmem:[%s15623_s9 + $0xd8] sm:$0xff] }
 0x800   : >> { %v8352_v6 = vld [vmem:[%s15623_s9 + $0x148] sm:$0xff]  ;;  %v8369_v60 = vld [vmem:[%s15623_s9 + $0x1d0] sm:$0xff]  ;;  %v8370_v38 = vld [vmem:[%s15623_s9 + $0x1d8] sm:$0xff]  ;;  %v10836_v25 = vpack.c.bf16 %v8320_v33, %v8319_v8  ;;  %v10838_v21 = vpack.c.bf16 %v8338_v9, %v8337_v44 }
 0x801   : >> { %9269 = vmatmul.mubr.msk.f32.gmra.mrb[8].mxu0 %vm422_vm0, %v14935_v11  ;;  %v8322_v31 = vld [vmem:[%s15623_s9 + $0x58] sm:$0xff]  ;;  %v8353_v19 = vld [vmem:[%s15623_s9 + $0x150] sm:$0xff]  ;;  %v10870_v51 = vpack.c.bf16 %v8370_v38, %v8369_v60  ;;  %v8339_v43 = vld [vmem:[%s15623_s9 + $0xe0] sm:$0xff] }
 0x802   : >> { %9277 = vmatmul.mubr.msk.f32.gmra.mrb[8].mxu1 %vm422_vm0, %v14935_v11  ;;  %7889 = vmatprep.mubr.f32.mxu0 %v11331_v1  ;;  %v8354_v23 = vld [vmem:[%s15623_s9 + $0x158] sm:$0xff]  ;;  %v8340_v40 = vld [vmem:[%s15623_s9 + $0xe8] sm:$0xff]  ;;  %v8371_v17 = vld [vmem:[%s15623_s9 + $0x1e0] sm:$0xff] }
 0x803   : >> { %8002 = vmatprep.mubr.f32.mxu1 %v11331_v1  ;;  %v10842_v41 = vpack.c.bf16 %v8340_v40, %v8339_v43  ;;  %v8324_v58 = vld [vmem:[%s15623_s9 + $0x68] sm:$0xff]  ;;  %v8342_v34 = vld [vmem:[%s15623_s9 + $0xf8] sm:$0xff]  ;;  %v8373_v18 = vld [vmem:[%s15623_s9 + $0x1f0] sm:$0xff] }
 0x804   : >> { %v8374_v15 = vld [vmem:[%s15623_s9 + $0x1f8] sm:$0xff]  ;;  %v8325_v27 = vld [vmem:[%s15623_s9 + $0x70] sm:$0xff]  ;;  %v8423_v45 = vld [vmem:[%s15623_s9 + $0x380] sm:$0xff] }
 0x805   : >> { %9270 = vmatmul.mubr.msk.f32.gmra.mrb[10].mxu0 %vm422_vm0, %v14944_v57  ;;  %v8357_v30 = vld [vmem:[%s15623_s9 + $0x170] sm:$0xff]  ;;  %v8358_v47 = vld [vmem:[%s15623_s9 + $0x178] sm:$0xff]  ;;  %v8424_v2 = vld [vmem:[%s15623_s9 + $0x388] sm:$0xff] }
 0x806   : >> { %9278 = vmatmul.mubr.msk.f32.gmra.mrb[10].mxu1 %vm422_vm0, %v14944_v57  ;;  %7895 = vmatprep.mubr.f32.mxu0 %v11331_v1  ;;  %v10914_v53 = vpack.c.bf16 %v8424_v2, %v8423_v45  ;;  %v15215_v24 = vld [vmem:[%s15739_s17] sm:$0xff]  ;;  %v8376_v33 = vld [vmem:[%s15623_s9 + $0x208] sm:$0xff]  ;;  %v8393_v60 = vld [vmem:[%s15623_s9 + $0x290] sm:$0xff] }
 0x807   : >> { %8008 = vmatprep.mubr.f32.mxu1 %v11331_v1  ;;  %v8394_v38 = vld [vmem:[%s15623_s9 + $0x298] sm:$0xff]  ;;  %v8377_v43 = vld [vmem:[%s15623_s9 + $0x210] sm:$0xff] }
 0x808   : >> { %v8378_v40 = vld [vmem:[%s15623_s9 + $0x218] sm:$0xff] }
 0x809   : >> { %9271 = vmatmul.mubr.msk.f32.gmra.mrb[12].mxu0 %vm422_vm0, %v14953_v42 }
 0x80a   : >> { %9279 = vmatmul.mubr.msk.f32.gmra.mrb[12].mxu1 %vm422_vm0, %v14953_v42  ;;  %7901 = vmatprep.mubr.f32.mxu0 %v11331_v1 }
 0x80b   : >> { %8014 = vmatprep.mubr.f32.mxu1 %v11331_v1 }
 0x80d   : >> { %9272 = vmatmul.mubr.msk.f32.gmra.mrb[14].mxu0 %vm422_vm0, %v14962_v4 }
 0x80e   : >> { %9280 = vmatmul.mubr.msk.f32.gmra.mrb[14].mxu1 %vm422_vm0, %v14962_v4  ;;  %8085 = vmatprep.mubr.f32.mxu0 %v11331_v1 }
 0x80f   : >> { %8198 = vmatprep.mubr.f32.mxu1 %v11331_v1 }
 0x811   : >> { %9281 = vmatmul.mubr.msk.f32.vlgmr.msra.gmra.mrb[16].mxu0 %vm422_vm0, %v14888_v28 }
 0x812   : >> { %9289 = vmatmul.mubr.msk.f32.vlgmr.msra.gmra.mrb[16].mxu1 %vm422_vm0, %v14888_v28  ;;  %8091 = vmatprep.mubr.f32.mxu0 %v11331_v1  ;;  %v10860_v28 = vpack.c.bf16 %v8348_v55, %v8347_v29  ;;  %v10880_v29 = vpack.c.bf16 %v8358_v47, %v8357_v30  ;;  %v8392_v55 = vld [vmem:[%s15623_s9 + $0x288] sm:$0xff]  ;;  %v8379_v47 = vld [vmem:[%s15623_s9 + $0x220] sm:$0xff] }
 0x813   : >> { %8204 = vmatprep.mubr.f32.mxu1 %v11331_v1  ;;  %10821 = vmatpush3.bf16.msra.mxu0 %v10820_v20  ;;  %v8372_v20 = vld [vmem:[%s15623_s9 + $0x1e8] sm:$0xff] }
 0x814   : >> { %10853 = vmatpush3.bf16.msra.mxu1 %v10852_v56  ;;  %10823 = vmatprep.subr.bf16.mxu0 %v10822_v62  ;;  %v10872_v62 = vpack.c.bf16 %v8354_v23, %v8353_v19 }
 0x815   : >> { %9282 = vmatmul.mubr.msk.f32.gmra.mrb[18].mxu0 %vm422_vm0, %v14895_v49  ;;  %10855 = vmatprep.subr.bf16.mxu1 %v10854_v52 }
 0x816   : >> { %9290 = vmatmul.mubr.msk.f32.gmra.mrb[18].mxu1 %vm422_vm0, %v14895_v49  ;;  %8097 = vmatprep.mubr.f32.mxu0 %v11331_v1  ;;  %v10834_v49 = vpack.c.bf16 %v8336_v14, %v8335_v46 }
 0x817   : >> { %8210 = vmatprep.mubr.f32.mxu1 %v11331_v1  ;;  %10825 = vmatpush3.bf16.msra.mxu0 %v10824_v39  ;;  %v8326_v39 = vld [vmem:[%s15623_s9 + $0x78] sm:$0xff] }
 0x818   : >> { %10857 = vmatpush3.bf16.msra.mxu1 %v10856_v35  ;;  %10827 = vmatprep.subr.bf16.mxu0 %v10826_v12  ;;  %v10878_v35 = vpack.c.bf16 %v8374_v15, %v8373_v18  ;;  %v10848_v12 = vpack.c.bf16 %v8326_v39, %v8325_v27  ;;  %v8428_v15 = vld [vmem:[%s15623_s9 + $0x3a8] sm:$0xff] }
 0x819   : >> { %9283 = vmatmul.mubr.msk.f32.gmra.mrb[20].mxu0 %vm422_vm0, %v14917_v0  ;;  %10859 = vmatprep.subr.bf16.mxu1 %v10858_v16  ;;  %v8391_v16 = vld [vmem:[%s15623_s9 + $0x280] sm:$0xff] }
 0x81a   : >> { %9291 = vmatmul.mubr.msk.f32.gmra.mrb[20].mxu1 %vm422_vm0, %v14917_v0  ;;  %8103 = vmatprep.mubr.f32.mxu0 %v11331_v1  ;;  %v10868_v0 = vpack.c.bf16 %v8352_v6, %v8351_v7  ;;  %v10882_v22 = vpack.c.bf16 %v8392_v55, %v8391_v16  ;;  %v8407_v7 = vld [vmem:[%s15623_s9 + $0x300] sm:$0xff] }
 0x81b   : >> { %8216 = vmatprep.mubr.f32.mxu1 %v11331_v1  ;;  %10829 = vmatpush3.bf16.msra.mxu0 %v10828_v48  ;;  %v7731_v48 = vlaneseq }
 0x81c   : >> { %10861 = vmatpush3.bf16.msra.mxu1 %v10860_v28  ;;  %10831 = vmatprep.subr.bf16.mxu0 %v10830_v63 }
 0x81d   : >> { %9284 = vmatmul.mubr.msk.f32.gmra.mrb[22].mxu0 %vm422_vm0, %v14926_v50  ;;  %10863 = vmatprep.subr.bf16.mxu1 %v10862_v61  ;;  %v15209_v28 = vshrl.u32 %v7731_v48, 7  ;;  %v8411_v48 = vld [vmem:[%s15623_s9 + $0x320] sm:$0xff] }
 0x81e   : >> { %9292 = vmatmul.mubr.msk.f32.gmra.mrb[22].mxu1 %vm422_vm0, %v14926_v50  ;;  %8109 = vmatprep.mubr.f32.mxu0 %v11331_v1  ;;  %v8321_v50 = vld [vmem:[%s15623_s9 + $0x50] sm:$0xff] }
 0x81f   : >> { %8222 = vmatprep.mubr.f32.mxu1 %v11331_v1  ;;  %10833 = vmatpush3.bf16.msra.mxu0 %v10832_v26  ;;  %v10840_v56 = vpack.c.bf16 %v8322_v31, %v8321_v50  ;;  %v7733_v63 = vsub.s32 0, %v15209_v28  ;;  %v7741_v36 = vsub.s32 2, %v15209_v28  ;;  %v7737_v10 = vsub.s32 1, %v15209_v28  ;;  %v8375_v26 = vld [vmem:[%s15623_s9 + $0x200] sm:$0xff] }
 0x820   : >> { %10865 = vmatpush3.bf16.msra.mxu1 %v10864_v37  ;;  %10835 = vmatprep.subr.bf16.mxu0 %v10834_v49  ;;  %v7745_v61 = vsub.s32 3, %v15209_v28 }
 0x821   : >> { %9285 = vmatmul.mubr.msk.f32.gmra.mrb[24].mxu0 %vm422_vm0, %v14935_v11  ;;  %10867 = vmatprep.subr.bf16.mxu1 %v10866_v54  ;;  %v15221_v59 = vrot.slane %v15215_v24, %v7733_v63  ;;  %v15224_v46 = vrot.slane %v15215_v24, %v7741_v36  ;;  %v15227_v14 = vrot.slane %v15215_v24, %v7737_v10  ;;  %v8408_v54 = vld [vmem:[%s15623_s9 + $0x308] sm:$0xff] }
 0x822   : >> { %9293 = vmatmul.mubr.msk.f32.gmra.mrb[24].mxu1 %vm422_vm0, %v14935_v11  ;;  %8115 = vmatprep.mubr.f32.mxu0 %v11331_v1  ;;  %v10874_v11 = vpack.c.bf16 %v8372_v20, %v8371_v17  ;;  %v15230_v32 = vrot.slane %v15215_v24, %v7745_v61  ;;  %v10916_v23 = vpack.c.bf16 %v8408_v54, %v8407_v7  ;;  %v8412_v63 = vld [vmem:[%s15623_s9 + $0x328] sm:$0xff] }
 0x823   : >> { %8228 = vmatprep.mubr.f32.mxu1 %v11331_v1  ;;  %10837 = vmatpush3.bf16.msra.mxu0 %v10836_v25 }
 0x824   : >> { %10869 = vmatpush3.bf16.msra.mxu1 %v10868_v0  ;;  %10839 = vmatprep.subr.bf16.mxu0 %v10838_v21  ;;  %v8425_v0 = vld [vmem:[%s15623_s9 + $0x390] sm:$0xff]  ;;  %v8426_v21 = vld [vmem:[%s15623_s9 + $0x398] sm:$0xff] }
 0x825   : >> { %9286 = vmatmul.mubr.msk.f32.gmra.mrb[26].mxu0 %vm422_vm0, %v14944_v57  ;;  %10871 = vmatprep.subr.bf16.mxu1 %v10870_v51  ;;  %v10884_v51 = vpack.c.bf16 %v8376_v33, %v8375_v26  ;;  %v8397_v26 = vld [vmem:[%s15623_s9 + $0x2b0] sm:$0xff]  ;;  %v8430_v33 = vld [vmem:[%s15623_s9 + $0x3b8] sm:$0xff] }
 0x826   : >> { %9294 = vmatmul.mubr.msk.f32.gmra.mrb[26].mxu1 %vm422_vm0, %v14944_v57  ;;  %8121 = vmatprep.mubr.f32.mxu0 %v11331_v1  ;;  %v8323_v57 = vld [vmem:[%s15623_s9 + $0x60] sm:$0xff] }
 0x827   : >> { %8234 = vmatprep.mubr.f32.mxu1 %v11331_v1  ;;  %10841 = vmatpush3.bf16.msra.mxu0 %v10840_v56  ;;  %v10844_v3 = vpack.c.bf16 %v8324_v58, %v8323_v57  ;;  %v8409_v57 = vld [vmem:[%s15623_s9 + $0x310] sm:$0xff]  ;;  %v8410_v58 = vld [vmem:[%s15623_s9 + $0x318] sm:$0xff] }
 0x828   : >> { %10873 = vmatpush3.bf16.msra.mxu1 %v10872_v62  ;;  %10843 = vmatprep.subr.bf16.mxu0 %v10842_v41  ;;  %v10920_v30 = vpack.c.bf16 %v8410_v58, %v8409_v57  ;;  %v8432_v57 = vld [vmem:[%s15623_s9 + $0x3c8] sm:$0xff]  ;;  %v15355_v58 = vld [vmem:[%s15623_s9 + $0x240] sm:$0xff] }
 0x829   : >> { %9287 = vmatmul.mubr.msk.f32.gmra.mrb[28].mxu0 %vm422_vm0, %v14953_v42  ;;  %10875 = vmatprep.subr.bf16.mxu1 %v10874_v11  ;;  %v10886_v11 = vpack.c.bf16 %v8394_v38, %v8393_v60  ;;  %v15319_v60 = vld [vmem:[%s15623_s9 + $0x230] sm:$0xff]  ;;  %v15324_v38 = vld [vmem:[%s15623_s9 + $0x238] sm:$0xff] }
 0x82a   : >> { %9295 = vmatmul.mubr.msk.f32.gmra.mrb[28].mxu1 %vm422_vm0, %v14953_v42  ;;  %8127 = vmatprep.mubr.f32.mxu0 %v11331_v1  ;;  %v8355_v42 = vld [vmem:[%s15623_s9 + $0x160] sm:$0xff] }
 0x82b   : >> { %8240 = vmatprep.mubr.f32.mxu1 %v11331_v1  ;;  %v8356_v1 = vld [vmem:[%s15623_s9 + $0x168] sm:$0xff]  ;;  %10845 = vmatpush3.bf16.msra.mxu0 %v10844_v3 }
 0x82c   : >> { %v10876_v52 = vpack.c.bf16 %v8356_v1, %v8355_v42 }
 0x82d   : >> { %9288 = vmatmul.mubr.msk.f32.gmra.mrb[30].mxu0 %vm422_vm0, %v14962_v4 }
 0x82e   : >> { %9296 = vmatmul.mubr.msk.f32.gmra.mrb[30].mxu1 %vm422_vm0, %v14962_v4  ;;  %v8341_v4 = vld [vmem:[%s15623_s9 + $0xf0] sm:$0xff] }
 0x82f   : >> { %10877 = vmatpush3.bf16.msra.mxu1 %v10876_v52  ;;  %v10846_v13 = vpack.c.bf16 %v8342_v34, %v8341_v4  ;;  %v10918_v52 = vpack.c.bf16 %v8426_v21, %v8425_v0  ;;  %v8395_v4 = vld [vmem:[%s15623_s9 + $0x2a0] sm:$0xff]  ;;  %v8396_v34 = vld [vmem:[%s15623_s9 + $0x2a8] sm:$0xff] }
 0x830   : >> { %10879 = vmatprep.subr.bf16.mxu1 %v10878_v35 }
 0x831   : >> { %10847 = vmatprep.subr.bf16.mxu0 %v10846_v13  ;;  %v8427_v13 = vld [vmem:[%s15623_s9 + $0x3a0] sm:$0xff] }
 0x832   : >> { %10849 = vmatpush3.bf16.msra.mxu0 %v10848_v12  ;;  %v10888_v12 = vpack.c.bf16 %v8378_v40, %v8377_v43 }
 0x833   : >> { %10881 = vmatpush3.bf16.msra.mxu1 %v10880_v29  ;;  %10883 = vmatprep.subr.bf16.mxu0 %v10882_v22  ;;  %v8380_v29 = vld [vmem:[%s15623_s9 + $0x228] sm:$0xff] }
 0x834   : >> { %10915 = vmatprep.subr.bf16.mxu1 %v10914_v53  ;;  %v10890_v53 = vpack.c.bf16 %v8396_v34, %v8395_v4  ;;  %v15364_v34 = vld [vmem:[%s15623_s9 + $0x248] sm:$0xff] }
 0x8c4   : >> { %v7861_v5 = vpop.f32.mrb[0].mxu0 }
 0x8c5   : >> { %v7862_v37 = vadd.f32 %v7861_v5, %v15221_v59  ;;  %v7974_v49 = vpop.f32.mrb[0].mxu1  ;;  %v7863_v8 = vpop.f32.mrb[1].mxu0  ;;  %v10922_v5 = vpack.c.bf16 %v8428_v15, %v8427_v13  ;;  %v15374_v13 = vld [vmem:[%s15623_s9 + $0x348] sm:$0xff] }
 0x8c6   : >> { %v7975_v6 = vadd.f32 %v7974_v49, %v15224_v46  ;;  %v7864_v44 = vadd.f32 %v7863_v8, %v15227_v14  ;;  %v7976_v9 = vpop.f32.mrb[1].mxu1  ;;  %v8429_v8 = vld [vmem:[%s15623_s9 + $0x3b0] sm:$0xff] }
 0x8c7   : >> { %v7977_v25 = vadd.f32 %v7976_v9, %v15230_v32  ;;  %v8247_v17 = vmax.f32 %v7862_v37, 0.0  ;;  %v8398_v37 = vld [vmem:[%s15623_s9 + $0x2b8] sm:$0xff]  ;;  %v10924_v9 = vpack.c.bf16 %v8412_v63, %v8411_v48  ;;  %v10900_v63 = vpack.c.bf16 %v15364_v34, %v15355_v58 }
 0x8c8   : >> { %v8249_v50 = vmax.f32 %v7975_v6, 0.0  ;;  %v8248_v31 = vmax.f32 %v7864_v44, 0.0  ;;  %v7867_v19 = vpop.f32.mrb[2].mxu0  ;;  %v10892_v44 = vpack.c.bf16 %v8380_v29, %v8379_v47  ;;  %v15380_v47 = vld [vmem:[%s15623_s9 + $0x2d0] sm:$0xff]  ;;  %v15385_v29 = vld [vmem:[%s15623_s9 + $0x2d8] sm:$0xff]  ;;  %v7757_v58 = vsub.s32 6, %v15209_v28 }
 0x8c9   : >> { %v8250_v20 = vmax.f32 %v7977_v25, 0.0  ;;  %v7868_v56 = vadd.f32 %v7867_v19, %v15221_v59  ;;  %v7980_v62 = vpop.f32.mrb[2].mxu1  ;;  %v7869_v41 = vpop.f32.mrb[3].mxu0  ;;  %v10894_v19 = vpack.c.bf16 %v8398_v37, %v8397_v26 }
 0x8ca   : >> { %v7981_v42 = vadd.f32 %v7980_v62, %v15224_v46  ;;  %v7870_v3 = vadd.f32 %v7869_v41, %v15227_v14  ;;  %v7982_v1 = vpop.f32.mrb[3].mxu1  ;;  %8510 = vmatprep.mubr.f32.mxu0 %v8248_v31  ;;  %v8400_v62 = vld [vmem:[%s15623_s9 + $0x2c8] sm:$0xff] }
 0x8cb   : >> { %v7983_v18 = vadd.f32 %v7982_v1, %v15230_v32  ;;  %8615 = vmatprep.mubr.f32.mxu1 %v8250_v20  ;;  %8511 = vmatmul.mubr.f32.vlgmr.msra.gmra.mrb[32].mxu0 %v8247_v17  ;;  %v8255_v16 = vmax.f32 %v7868_v56, 0.0  ;;  %v10926_v20 = vpack.c.bf16 %v8430_v33, %v8429_v8  ;;  %v8399_v56 = vld [vmem:[%s15623_s9 + $0x2c0] sm:$0xff]  ;;  %v10902_v8 = vpack.c.bf16 %v15385_v29, %v15380_v47  ;;  %v15424_v33 = vld [vmem:[%s15623_s9 + $0x358] sm:$0xff] }
 0x8cc   : >> { %v8257_v27 = vmax.f32 %v7981_v42, 0.0  ;;  %v8256_v39 = vmax.f32 %v7870_v3, 0.0  ;;  %8616 = vmatmul.mubr.f32.vlgmr.msra.gmra.mrb[32].mxu1 %v8249_v50  ;;  %v7873_v35 = vpop.f32.mrb[4].mxu0  ;;  %10885 = vmatpush3.bf16.msra.mxu0 %v10884_v51  ;;  %v15330_v51 = vld [vmem:[%s15623_s9 + $0x330] sm:$0xff] }
 0x8cd   : >> { %v8258_v55 = vmax.f32 %v7983_v18, 0.0  ;;  %v7874_v45 = vadd.f32 %v7873_v35, %v15221_v59  ;;  %v7986_v22 = vpop.f32.mrb[4].mxu1  ;;  %10917 = vmatpush3.bf16.msra.mxu1 %v10916_v23  ;;  %v7875_v2 = vpop.f32.mrb[5].mxu0  ;;  %10887 = vmatprep.subr.bf16.mxu0 %v10886_v11  ;;  %v15335_v23 = vld [vmem:[%s15623_s9 + $0x338] sm:$0xff]  ;;  %v8431_v11 = vld [vmem:[%s15623_s9 + $0x3c0] sm:$0xff] }
 0x8ce   : >> { %v7987_v36 = vadd.f32 %v7986_v22, %v15224_v46  ;;  %v7876_v10 = vadd.f32 %v7875_v2, %v15227_v14  ;;  %v7988_v61 = vpop.f32.mrb[5].mxu1  ;;  %8515 = vmatprep.mubr.f32.mxu0 %v8256_v39  ;;  %10919 = vmatprep.subr.bf16.mxu1 %v10918_v52  ;;  %v10896_v52 = vpack.c.bf16 %v15324_v38, %v15319_v60  ;;  %v15369_v18 = vld [vmem:[%s15623_s9 + $0x340] sm:$0xff]  ;;  %v15392_v2 = vld [vmem:[%s15623_s9 + $0x3d0] sm:$0xff] }
 0x8cf   : >> { %v7989_v49 = vadd.f32 %v7988_v61, %v15230_v32  ;;  %8620 = vmatprep.mubr.f32.mxu1 %v8258_v55  ;;  %8516 = vmatmul.mubr.f32.gmra.mrb[34].mxu0 %v8255_v16  ;;  %v8263_v25 = vmax.f32 %v7874_v45, 0.0  ;;  %v10928_v4 = vpack.c.bf16 %v15335_v23, %v15330_v51  ;;  %v10930_v22 = vpack.c.bf16 %v8432_v57, %v8431_v11  ;;  %v15415_v61 = vld [vmem:[%s15623_s9 + $0x350] sm:$0xff]  ;;  %v15451_v51 = vld [vmem:[%s15623_s9 + $0x3e8] sm:$0xff] }
 0x8d0   : >> { %v8265_v7 = vmax.f32 %v7987_v36, 0.0  ;;  %v8264_v54 = vmax.f32 %v7876_v10, 0.0  ;;  %8621 = vmatmul.mubr.f32.gmra.mrb[34].mxu1 %v8257_v27  ;;  %v7879_v6 = vpop.f32.mrb[6].mxu0  ;;  %10889 = vmatpush3.bf16.msra.mxu0 %v10888_v12  ;;  %v15405_v36 = vld [vmem:[%s15623_s9 + $0x250] sm:$0xff]  ;;  %v15410_v10 = vld [vmem:[%s15623_s9 + $0x258] sm:$0xff] }
 0x8d1   : >> { %v8266_v0 = vmax.f32 %v7989_v49, 0.0  ;;  %v7880_v21 = vadd.f32 %v7879_v6, %v15221_v59  ;;  %v7992_v50 = vpop.f32.mrb[6].mxu1  ;;  %10921 = vmatpush3.bf16.msra.mxu1 %v10920_v30  ;;  %v7881_v31 = vpop.f32.mrb[7].mxu0  ;;  %10891 = vmatprep.subr.bf16.mxu0 %v10890_v53  ;;  %v10898_v30 = vpack.c.bf16 %v8400_v62, %v8399_v56  ;;  %v15397_v53 = vld [vmem:[%s15623_s9 + $0x3d8] sm:$0xff]  ;;  %v10932_v49 = vpack.c.bf16 %v15374_v13, %v15369_v18  ;;  %v15467_v56 = vld [vmem:[%s15623_s9 + $0x268] sm:$0xff]  ;;  %v15472_v62 = vld [vmem:[%s15623_s9 + $0x360] sm:$0xff] }
 0x8d2   : >> { %v7993_v43 = vadd.f32 %v7992_v50, %v15224_v46  ;;  %v7882_v40 = vadd.f32 %v7881_v31, %v15227_v14  ;;  %v7994_v17 = vpop.f32.mrb[7].mxu1  ;;  %8520 = vmatprep.mubr.f32.mxu0 %v8264_v54  ;;  %10923 = vmatprep.subr.bf16.mxu1 %v10922_v5  ;;  %v15434_v54 = vld [vmem:[%s15623_s9 + $0x2e8] sm:$0xff]  ;;  %v10904_v31 = vpack.c.bf16 %v15410_v10, %v15405_v36 }
 0x8d3   : >> { %v7995_v41 = vadd.f32 %v7994_v17, %v15230_v32  ;;  %8625 = vmatprep.mubr.f32.mxu1 %v8266_v0  ;;  %8521 = vmatmul.mubr.f32.gmra.mrb[36].mxu0 %v8263_v25  ;;  %v8271_v15 = vmax.f32 %v7880_v21, 0.0  ;;  %v10934_v25 = vpack.c.bf16 %v15397_v53, %v15392_v2  ;;  %v7749_v17 = vsub.s32 4, %v15209_v28 }
 0x8d4   : >> { %v8273_v42 = vmax.f32 %v7993_v43, 0.0  ;;  %v8272_v3 = vmax.f32 %v7882_v40, 0.0  ;;  %8626 = vmatmul.mubr.f32.gmra.mrb[36].mxu1 %v8265_v7  ;;  %v7885_v1 = vpop.f32.mrb[8].mxu0  ;;  %10893 = vmatpush3.bf16.msra.mxu0 %v10892_v44  ;;  %v15429_v7 = vld [vmem:[%s15623_s9 + $0x2e0] sm:$0xff]  ;;  %v10936_v43 = vpack.c.bf16 %v15424_v33, %v15415_v61 }
 0x8d5   : >> { %v8274_v27 = vmax.f32 %v7995_v41, 0.0  ;;  %v7886_v39 = vadd.f32 %v7885_v1, %v15221_v59  ;;  %v7998_v35 = vpop.f32.mrb[8].mxu1  ;;  %10925 = vmatpush3.bf16.msra.mxu1 %v10924_v9  ;;  %v7887_v12 = vpop.f32.mrb[9].mxu0  ;;  %10895 = vmatprep.subr.bf16.mxu0 %v10894_v19  ;;  %v15446_v19 = vld [vmem:[%s15623_s9 + $0x3e0] sm:$0xff]  ;;  %v10906_v40 = vpack.c.bf16 %v15434_v54, %v15429_v7  ;;  %v15496_v29 = vrot.slane %v15215_v24, %v7749_v17 }
 0x8d6   : >> { %v7999_v16 = vadd.f32 %v7998_v35, %v15224_v46  ;;  %v7888_v55 = vadd.f32 %v7887_v12, %v15227_v14  ;;  %v8000_v45 = vpop.f32.mrb[9].mxu1  ;;  %8525 = vmatprep.mubr.f32.mxu0 %v8272_v3  ;;  %10927 = vmatprep.subr.bf16.mxu1 %v10926_v20  ;;  %v15462_v20 = vld [vmem:[%s15623_s9 + $0x260] sm:$0xff]  ;;  %v7753_v3 = vsub.s32 5, %v15209_v28  ;;  %v10938_v13 = vpack.c.bf16 %v15451_v51, %v15446_v19  ;;  %v8405_v12 = vld [vmem:[%s15623_s9 + $0x2f0] sm:$0xff] }
 0x8d7   : >> { %v8001_v48 = vadd.f32 %v8000_v45, %v15230_v32  ;;  %8630 = vmatprep.mubr.f32.mxu1 %v8274_v27  ;;  %8526 = vmatmul.mubr.f32.gmra.mrb[38].mxu0 %v8271_v15  ;;  %v8279_v6 = vmax.f32 %v7886_v39, 0.0  ;;  %v10908_v35 = vpack.c.bf16 %v15467_v56, %v15462_v20  ;;  %v8437_v45 = vld [vmem:[%s15623_s9 + $0x3f0] sm:$0xff] }
 0x8d8   : >> { %v8281_v5 = vmax.f32 %v7999_v16, 0.0  ;;  %v8280_v26 = vmax.f32 %v7888_v55, 0.0  ;;  %8631 = vmatmul.mubr.f32.gmra.mrb[38].mxu1 %v8273_v42  ;;  %v7891_v37 = vpop.f32.mrb[10].mxu0  ;;  %10897 = vmatpush3.bf16.msra.mxu0 %v10896_v52  ;;  %v15478_v42 = vld [vmem:[%s15623_s9 + $0x368] sm:$0xff]  ;;  %v7761_v55 = vsub.s32 7, %v15209_v28  ;;  %v15511_v36 = vrot.slane %v15215_v24, %v7753_v3 }
 0x8d9   : >> { %v8282_v44 = vmax.f32 %v8001_v48, 0.0  ;;  %v7892_v9 = vadd.f32 %v7891_v37, %v15221_v59  ;;  %v8004_v60 = vpop.f32.mrb[10].mxu1  ;;  %10929 = vmatpush3.bf16.msra.mxu1 %v10928_v4  ;;  %v7893_v38 = vpop.f32.mrb[11].mxu0  ;;  %10899 = vmatprep.subr.bf16.mxu0 %v10898_v30  ;;  %v8406_v30 = vld [vmem:[%s15623_s9 + $0x2f8] sm:$0xff]  ;;  %v10940_v16 = vpack.c.bf16 %v15478_v42, %v15472_v62 }
 0x8da   : >> { %v8005_v0 = vadd.f32 %v8004_v60, %v15224_v46  ;;  %v7894_v21 = vadd.f32 %v7893_v38, %v15227_v14  ;;  %v8006_v50 = vpop.f32.mrb[11].mxu1  ;;  %8530 = vmatprep.mubr.f32.mxu0 %v8280_v26  ;;  %10931 = vmatprep.subr.bf16.mxu1 %v10930_v22  ;;  %v8438_v22 = vld [vmem:[%s15623_s9 + $0x3f8] sm:$0xff]  ;;  %v10910_v37 = vpack.c.bf16 %v8406_v30, %v8405_v12 }
 0x8db   : >> { %v8007_v23 = vadd.f32 %v8006_v50, %v15230_v32  ;;  %8635 = vmatprep.mubr.f32.mxu1 %v8282_v44  ;;  %8531 = vmatmul.mubr.f32.gmra.mrb[40].mxu0 %v8279_v6  ;;  %v8287_v1 = vmax.f32 %v7892_v9, 0.0  ;;  %v8421_v6 = vld [vmem:[%s15623_s9 + $0x370] sm:$0xff]  ;;  %v8422_v44 = vld [vmem:[%s15623_s9 + $0x378] sm:$0xff] }
 0x8dc   : >> { %v8289_v41 = vmax.f32 %v8005_v0, 0.0  ;;  %v8288_v11 = vmax.f32 %v7894_v21, 0.0  ;;  %8636 = vmatmul.mubr.f32.gmra.mrb[40].mxu1 %v8281_v5  ;;  %v7897_v57 = vpop.f32.mrb[12].mxu0  ;;  %10901 = vmatpush3.bf16.msra.mxu0 %v10900_v63  ;;  %v15508_v63 = vrot.slane %v15215_v24, %v7757_v58 }
 0x8dd   : >> { %v8290_v52 = vmax.f32 %v8007_v23, 0.0  ;;  %v7898_v4 = vadd.f32 %v7897_v57, %v15221_v59  ;;  %v8010_v34 = vpop.f32.mrb[12].mxu1  ;;  %10933 = vmatpush3.bf16.msra.mxu1 %v10932_v49  ;;  %v7899_v18 = vpop.f32.mrb[13].mxu0  ;;  %10903 = vmatprep.subr.bf16.mxu0 %v10902_v8  ;;  %v8389_v49 = vld [vmem:[%s15623_s9 + $0x270] sm:$0xff]  ;;  %v8390_v8 = vld [vmem:[%s15623_s9 + $0x278] sm:$0xff] }
 0x8de   : >> { %v8011_v15 = vadd.f32 %v8010_v34, %v15224_v46  ;;  %v7900_v27 = vadd.f32 %v7899_v18, %v15227_v14  ;;  %v8012_v39 = vpop.f32.mrb[13].mxu1  ;;  %8535 = vmatprep.mubr.f32.mxu0 %v8288_v11  ;;  %10935 = vmatprep.subr.bf16.mxu1 %v10934_v25  ;;  %v10912_v25 = vpack.c.bf16 %v8390_v8, %v8389_v49 }
 0x8df   : >> { %v8013_v47 = vadd.f32 %v8012_v39, %v15230_v32  ;;  %8640 = vmatprep.mubr.f32.mxu1 %v8290_v52  ;;  %8536 = vmatmul.mubr.f32.gmra.mrb[42].mxu0 %v8287_v1  ;;  %v8295_v28 = vmax.f32 %v7898_v4, 0.0 }
 0x8e0   : >> { %v8297_v2 = vmax.f32 %v8011_v15, 0.0  ;;  %v8296_v53 = vmax.f32 %v7900_v27, 0.0  ;;  %8641 = vmatmul.mubr.f32.gmra.mrb[42].mxu1 %v8289_v41  ;;  %v7903_v48 = vpop.f32.mrb[14].mxu0  ;;  %10905 = vmatpush3.bf16.msra.mxu0 %v10904_v31 }
 0x8e1   : >> { %v8298_v10 = vmax.f32 %v8013_v47, 0.0  ;;  %v7904_v61 = vadd.f32 %v7903_v48, %v15221_v59  ;;  %v8016_v5 = vpop.f32.mrb[14].mxu1  ;;  %10937 = vmatpush3.bf16.msra.mxu1 %v10936_v43  ;;  %v7905_v26 = vpop.f32.mrb[15].mxu0  ;;  %10907 = vmatprep.subr.bf16.mxu0 %v10906_v40  ;;  %v10942_v59 = vpack.c.bf16 %v8438_v22, %v8437_v45 }
 0x8e2   : >> { %v8017_v33 = vadd.f32 %v8016_v5, %v15224_v46  ;;  %v7906_v7 = vadd.f32 %v7905_v26, %v15227_v14  ;;  %v8018_v54 = vpop.f32.mrb[15].mxu1  ;;  %8540 = vmatprep.mubr.f32.mxu0 %v8296_v53  ;;  %10939 = vmatprep.subr.bf16.mxu1 %v10938_v13  ;;  %v15530_v46 = vrot.slane %v15215_v24, %v7761_v55 }
 0x8e3   : >> { %v8019_v9 = vadd.f32 %v8018_v54, %v15230_v32  ;;  %8645 = vmatprep.mubr.f32.mxu1 %v8298_v10  ;;  %8541 = vmatmul.mubr.f32.gmra.mrb[44].mxu0 %v8295_v28  ;;  %v8303_v0 = vmax.f32 %v7904_v61, 0.0  ;;  %v10944_v32 = vpack.c.bf16 %v8422_v44, %v8421_v6 }
 0x8e4   : >> { %v8305_v14 = vmax.f32 %v8017_v33, 0.0  ;;  %v8304_v60 = vmax.f32 %v7906_v7, 0.0  ;;  %8646 = vmatmul.mubr.f32.gmra.mrb[44].mxu1 %v8297_v2  ;;  %v8087_v38 = vpop.f32.mrb[16].mxu0  ;;  %10909 = vmatpush3.bf16.msra.mxu0 %v10908_v35 }
 0x8e5   : >> { %v8306_v21 = vmax.f32 %v8019_v9, 0.0  ;;  %v8088_v50 = vadd.f32 %v8087_v38, %v15496_v29  ;;  %v8200_v31 = vpop.f32.mrb[16].mxu1  ;;  %10941 = vmatpush3.bf16.msra.mxu1 %v10940_v16  ;;  %v8089_v19 = vpop.f32.mrb[17].mxu0  ;;  %10911 = vmatprep.subr.bf16.mxu0 %v10910_v37 }
 0x8e6   : >> { %v8201_v51 = vadd.f32 %v8200_v31, %v15508_v63  ;;  %v8090_v24 = vadd.f32 %v8089_v19, %v15511_v36  ;;  %v8202_v23 = vpop.f32.mrb[17].mxu1  ;;  %8545 = vmatprep.mubr.f32.mxu0 %v8304_v60  ;;  %10943 = vmatprep.subr.bf16.mxu1 %v10942_v59 }
 0x8e7   : >> { %v8203_v43 = vadd.f32 %v8202_v23, %v15530_v46  ;;  %8650 = vmatprep.mubr.f32.mxu1 %v8306_v21  ;;  %8546 = vmatmul.mubr.f32.gmra.mrb[46].mxu0 %v8303_v0  ;;  %v8251_v56 = vmax.f32 %v8088_v50, 0.0 }
 0x8e8   : >> { %v8253_v40 = vmax.f32 %v8201_v51, 0.0  ;;  %v8252_v17 = vmax.f32 %v8090_v24, 0.0  ;;  %8651 = vmatmul.mubr.f32.gmra.mrb[46].mxu1 %v8305_v14  ;;  %v8093_v20 = vpop.f32.mrb[18].mxu0  ;;  %10913 = vmatpush3.bf16.msra.mxu0 %v10912_v25 }
 0x8e9   : >> { %v8254_v62 = vmax.f32 %v8203_v43, 0.0  ;;  %v8094_v41 = vadd.f32 %v8093_v20, %v15496_v29  ;;  %v8206_v11 = vpop.f32.mrb[18].mxu1  ;;  %10945 = vmatpush3.bf16.msra.mxu1 %v10944_v32  ;;  %v8095_v57 = vpop.f32.mrb[19].mxu0 }
 0x8ea   : >> { %v8207_v58 = vadd.f32 %v8206_v11, %v15508_v63  ;;  %v8096_v42 = vadd.f32 %v8095_v57, %v15511_v36  ;;  %v8208_v3 = vpop.f32.mrb[19].mxu1  ;;  %8720 = vmatprep.mubr.f32.mxu0 %v8252_v17 }
 0x8eb   : >> { %v8209_v1 = vadd.f32 %v8208_v3, %v15530_v46  ;;  %8825 = vmatprep.mubr.f32.mxu1 %v8254_v62  ;;  %8721 = vmatmul.mubr.f32.vlgmr.msra.gmra.mrb[48].mxu0 %v8251_v56  ;;  %v8259_v18 = vmax.f32 %v8094_v41, 0.0 }
 0x8ec   : >> { %v8261_v52 = vmax.f32 %v8207_v58, 0.0  ;;  %v8260_v4 = vmax.f32 %v8096_v42, 0.0  ;;  %8826 = vmatmul.mubr.f32.vlgmr.msra.gmra.mrb[48].mxu1 %v8253_v40  ;;  %v8099_v34 = vpop.f32.mrb[20].mxu0 }
 0x8ed   : >> { %v8262_v13 = vmax.f32 %v8209_v1, 0.0  ;;  %v8100_v15 = vadd.f32 %v8099_v34, %v15496_v29  ;;  %v8212_v27 = vpop.f32.mrb[20].mxu1  ;;  %v8101_v39 = vpop.f32.mrb[21].mxu0 }
 0x8ee   : >> { %v8213_v35 = vadd.f32 %v8212_v27, %v15508_v63  ;;  %v8102_v12 = vadd.f32 %v8101_v39, %v15511_v36  ;;  %v8214_v30 = vpop.f32.mrb[21].mxu1  ;;  %8725 = vmatprep.mubr.f32.mxu0 %v8260_v4 }
 0x8ef   : >> { %v8215_v47 = vadd.f32 %v8214_v30, %v15530_v46  ;;  %8830 = vmatprep.mubr.f32.mxu1 %v8262_v13  ;;  %8726 = vmatmul.mubr.f32.gmra.mrb[50].mxu0 %v8259_v18  ;;  %v8267_v22 = vmax.f32 %v8100_v15, 0.0 }
 0x8f0   : >> { %v8269_v16 = vmax.f32 %v8213_v35, 0.0  ;;  %v8268_v55 = vmax.f32 %v8102_v12, 0.0  ;;  %8831 = vmatmul.mubr.f32.gmra.mrb[50].mxu1 %v8261_v52  ;;  %v8105_v45 = vpop.f32.mrb[22].mxu0 }
 0x8f1   : >> { %v8270_v2 = vmax.f32 %v8215_v47, 0.0  ;;  %v8106_v53 = vadd.f32 %v8105_v45, %v15496_v29  ;;  %v8218_v48 = vpop.f32.mrb[22].mxu1  ;;  %v8107_v28 = vpop.f32.mrb[23].mxu0 }
 0x8f2   : >> { %v8219_v10 = vadd.f32 %v8218_v48, %v15508_v63  ;;  %v8108_v61 = vadd.f32 %v8107_v28, %v15511_v36  ;;  %v8220_v5 = vpop.f32.mrb[23].mxu1  ;;  %8730 = vmatprep.mubr.f32.mxu0 %v8268_v55 }
 0x8f3   : >> { %v8221_v26 = vadd.f32 %v8220_v5, %v15530_v46  ;;  %8835 = vmatprep.mubr.f32.mxu1 %v8270_v2  ;;  %8731 = vmatmul.mubr.f32.gmra.mrb[52].mxu0 %v8267_v22  ;;  %v8275_v33 = vmax.f32 %v8106_v53, 0.0 }
 0x8f4   : >> { %v8277_v37 = vmax.f32 %v8219_v10, 0.0  ;;  %v8276_v49 = vmax.f32 %v8108_v61, 0.0  ;;  %8836 = vmatmul.mubr.f32.gmra.mrb[52].mxu1 %v8269_v16  ;;  %v8111_v8 = vpop.f32.mrb[24].mxu0 }
 0x8f5   : >> { %v8278_v7 = vmax.f32 %v8221_v26, 0.0  ;;  %v8112_v54 = vadd.f32 %v8111_v8, %v15496_v29  ;;  %v8224_v59 = vpop.f32.mrb[24].mxu1  ;;  %v8113_v6 = vpop.f32.mrb[25].mxu0 }
 0x8f6   : >> { %v8225_v44 = vadd.f32 %v8224_v59, %v15508_v63  ;;  %v8114_v9 = vadd.f32 %v8113_v6, %v15511_v36  ;;  %v8226_v14 = vpop.f32.mrb[25].mxu1  ;;  %8735 = vmatprep.mubr.f32.mxu0 %v8276_v49 }
 0x8f7   : >> { %v8227_v60 = vadd.f32 %v8226_v14, %v15530_v46  ;;  %8840 = vmatprep.mubr.f32.mxu1 %v8278_v7  ;;  %8736 = vmatmul.mubr.f32.gmra.mrb[54].mxu0 %v8275_v33  ;;  %v8283_v21 = vmax.f32 %v8112_v54, 0.0 }
 0x8f8   : >> { %v8285_v38 = vmax.f32 %v8225_v44, 0.0  ;;  %v8284_v25 = vmax.f32 %v8114_v9, 0.0  ;;  %8841 = vmatmul.mubr.f32.gmra.mrb[54].mxu1 %v8277_v37  ;;  %v8117_v0 = vpop.f32.mrb[26].mxu0 }
 0x8f9   : >> { %v8286_v50 = vmax.f32 %v8227_v60, 0.0  ;;  %v8118_v31 = vadd.f32 %v8117_v0, %v15496_v29  ;;  %v8230_v19 = vpop.f32.mrb[26].mxu1  ;;  %v8119_v32 = vpop.f32.mrb[27].mxu0 }
 0x8fa   : >> { %v8231_v51 = vadd.f32 %v8230_v19, %v15508_v63  ;;  %v8120_v24 = vadd.f32 %v8119_v32, %v15511_v36  ;;  %v8232_v23 = vpop.f32.mrb[27].mxu1  ;;  %8740 = vmatprep.mubr.f32.mxu0 %v8284_v25 }
 0x8fb   : >> { %v8233_v43 = vadd.f32 %v8232_v23, %v15530_v46  ;;  %8845 = vmatprep.mubr.f32.mxu1 %v8286_v50  ;;  %8741 = vmatmul.mubr.f32.gmra.mrb[56].mxu0 %v8283_v21  ;;  %v8291_v56 = vmax.f32 %v8118_v31, 0.0 }
 0x8fc   : >> { %v8293_v40 = vmax.f32 %v8231_v51, 0.0  ;;  %v8292_v17 = vmax.f32 %v8120_v24, 0.0  ;;  %8846 = vmatmul.mubr.f32.gmra.mrb[56].mxu1 %v8285_v38  ;;  %v8123_v20 = vpop.f32.mrb[28].mxu0 }
 0x8fd   : >> { %v8294_v62 = vmax.f32 %v8233_v43, 0.0  ;;  %v8124_v41 = vadd.f32 %v8123_v20, %v15496_v29  ;;  %v8236_v11 = vpop.f32.mrb[28].mxu1  ;;  %v8125_v57 = vpop.f32.mrb[29].mxu0 }
 0x8fe   : >> { %v8237_v58 = vadd.f32 %v8236_v11, %v15508_v63  ;;  %v8126_v42 = vadd.f32 %v8125_v57, %v15511_v36  ;;  %v8238_v3 = vpop.f32.mrb[29].mxu1  ;;  %8745 = vmatprep.mubr.f32.mxu0 %v8292_v17 }
 0x8ff   : >> { %v8239_v1 = vadd.f32 %v8238_v3, %v15530_v46  ;;  %8850 = vmatprep.mubr.f32.mxu1 %v8294_v62  ;;  %8746 = vmatmul.mubr.f32.gmra.mrb[58].mxu0 %v8291_v56  ;;  %v8299_v18 = vmax.f32 %v8124_v41, 0.0 }
 0x900   : >> { %v8301_v52 = vmax.f32 %v8237_v58, 0.0  ;;  %v8300_v4 = vmax.f32 %v8126_v42, 0.0  ;;  %8851 = vmatmul.mubr.f32.gmra.mrb[58].mxu1 %v8293_v40  ;;  %v8129_v34 = vpop.f32.mrb[30].mxu0 }
 0x901   : >> { %v8302_v13 = vmax.f32 %v8239_v1, 0.0  ;;  %v8130_v15 = vadd.f32 %v8129_v34, %v15496_v29  ;;  %v8242_v27 = vpop.f32.mrb[30].mxu1  ;;  %v8131_v39 = vpop.f32.mrb[31].mxu0 }
 0x902   : >> { %v8243_v35 = vadd.f32 %v8242_v27, %v15508_v63  ;;  %v8132_v12 = vadd.f32 %v8131_v39, %v15511_v36  ;;  %v8244_v30 = vpop.f32.mrb[31].mxu1  ;;  %8750 = vmatprep.mubr.f32.mxu0 %v8300_v4  ;;  %v9297_v63 = vld [vmem:[%s15740_s29] ss:$0 sm:$0xff] }
 0x903   : >> { %v8245_v47 = vadd.f32 %v8244_v30, %v15530_v46  ;;  %8855 = vmatprep.mubr.f32.mxu1 %v8302_v13  ;;  %8751 = vmatmul.mubr.f32.gmra.mrb[60].mxu0 %v8299_v18  ;;  %v8307_v45 = vmax.f32 %v8130_v15, 0.0 }
 0x904   : >> { %v8309_v16 = vmax.f32 %v8243_v35, 0.0  ;;  %v8308_v55 = vmax.f32 %v8132_v12, 0.0  ;;  %8856 = vmatmul.mubr.f32.gmra.mrb[60].mxu1 %v8301_v52 }
 0x905   : >> { %v8310_v22 = vmax.f32 %v8245_v47, 0.0 }
 0x906   : >> { %8755 = vmatprep.mubr.f32.mxu0 %v8308_v55 }
 0x907   : >> { %8860 = vmatprep.mubr.f32.mxu1 %v8310_v22  ;;  %8756 = vmatmul.mubr.f32.gmra.mrb[62].mxu0 %v8307_v45 }
 0x908   : >> { %8861 = vmatmul.mubr.f32.gmra.mrb[62].mxu1 %v8309_v16 }
 0x99e   : >> { %v9730_v29 = vpop.f32.mrb[32].mxu0 }
 0x99f   : >> { %v9786_v2 = vpop.f32.mrb[32].mxu1  ;;  %v9731_v36 = vpop.f32.mrb[33].mxu0 }
 0x9a0   : >> { %v9732_v53 = vadd.f32 %v9731_v36, %v9730_v29  ;;  %v9787_v46 = vpop.f32.mrb[33].mxu1 }
 0x9a1   : >> { %v9788_v48 = vadd.f32 %v9787_v46, %v9786_v2 }
 0x9a2   : >> { %v8513_v28 = vadd.f32 %v9732_v53, %v9297_v63  ;;  %v9733_v10 = vpop.f32.mrb[34].mxu0 }
 0x9a3   : >> { %v9789_v61 = vpop.f32.mrb[34].mxu1  ;;  %v9734_v5 = vpop.f32.mrb[35].mxu0 }
 0x9a4   : >> { %v8618_v26 = vadd.f32 %v9788_v48, %v8513_v28  ;;  %v9735_v37 = vadd.f32 %v9734_v5, %v9733_v10  ;;  %v9790_v49 = vpop.f32.mrb[35].mxu1 }
 0x9a5   : >> { %v9791_v8 = vadd.f32 %v9790_v49, %v9789_v61 }
 0x9a6   : >> { %v8518_v33 = vadd.f32 %v9735_v37, %v9297_v63  ;;  %v9736_v7 = vpop.f32.mrb[36].mxu0 }
 0x9a7   : >> { %v9792_v54 = vpop.f32.mrb[36].mxu1  ;;  %v9737_v59 = vpop.f32.mrb[37].mxu0 }
 0x9a8   : >> { %v8623_v6 = vadd.f32 %v9791_v8, %v8518_v33  ;;  %v9738_v44 = vadd.f32 %v9737_v59, %v9736_v7  ;;  %v9793_v9 = vpop.f32.mrb[37].mxu1 }
 0x9a9   : >> { %v9794_v14 = vadd.f32 %v9793_v9, %v9792_v54 }
 0x9aa   : >> { %v8523_v60 = vadd.f32 %v9738_v44, %v9297_v63  ;;  %v9739_v38 = vpop.f32.mrb[38].mxu0 }
 0x9ab   : >> { %v9795_v25 = vpop.f32.mrb[38].mxu1  ;;  %v9740_v0 = vpop.f32.mrb[39].mxu0 }
 0x9ac   : >> { %v15567_v21 = vadd.f32 %v9794_v14, %v8523_v60  ;;  %v9741_v50 = vadd.f32 %v9740_v0, %v9739_v38  ;;  %v9796_v31 = vpop.f32.mrb[39].mxu1 }
 0x9ad   : >> { %v9797_v19 = vadd.f32 %v9796_v31, %v9795_v25 }
 0x9ae   : >> { %v8528_v32 = vadd.f32 %v9741_v50, %v9297_v63  ;;  %v9742_v51 = vpop.f32.mrb[40].mxu0 }
 0x9af   : >> { %v9798_v24 = vpop.f32.mrb[40].mxu1  ;;  %v9743_v23 = vpop.f32.mrb[41].mxu0 }
 0x9b0   : >> { %v15569_v43 = vadd.f32 %v9797_v19, %v8528_v32  ;;  %v9744_v40 = vadd.f32 %v9743_v23, %v9742_v51  ;;  %v9799_v17 = vpop.f32.mrb[41].mxu1 }
 0x9b1   : >> { %v9800_v20 = vadd.f32 %v9799_v17, %v9798_v24 }
 0x9b2   : >> { %v8533_v56 = vadd.f32 %v9744_v40, %v9297_v63  ;;  %v9745_v62 = vpop.f32.mrb[42].mxu0 }
 0x9b3   : >> { %v9801_v41 = vpop.f32.mrb[42].mxu1  ;;  %v9746_v11 = vpop.f32.mrb[43].mxu0 }
 0x9b4   : >> { %v15571_v57 = vadd.f32 %v9800_v20, %v8533_v56  ;;  %v9747_v58 = vadd.f32 %v9746_v11, %v9745_v62  ;;  %v9802_v42 = vpop.f32.mrb[43].mxu1 }
 0x9b5   : >> { %v9803_v3 = vadd.f32 %v9802_v42, %v9801_v41 }
 0x9b6   : >> { %v8538_v1 = vadd.f32 %v9747_v58, %v9297_v63  ;;  %v9748_v52 = vpop.f32.mrb[44].mxu0 }
 0x9b7   : >> { %v9804_v4 = vpop.f32.mrb[44].mxu1  ;;  %v9749_v34 = vpop.f32.mrb[45].mxu0 }
 0x9b8   : >> { %v15573_v18 = vadd.f32 %v9803_v3, %v8538_v1  ;;  %v9750_v13 = vadd.f32 %v9749_v34, %v9748_v52  ;;  %v9805_v15 = vpop.f32.mrb[45].mxu1 }
 0x9b9   : >> { %v9806_v27 = vadd.f32 %v9805_v15, %v9804_v4 }
 0x9ba   : >> { %v8543_v39 = vadd.f32 %v9750_v13, %v9297_v63  ;;  %v9751_v35 = vpop.f32.mrb[46].mxu0 }
 0x9bb   : >> { %v9807_v12 = vpop.f32.mrb[46].mxu1  ;;  %v9752_v30 = vpop.f32.mrb[47].mxu0 }
 0x9bc   : >> { %v15575_v47 = vadd.f32 %v9806_v27, %v8543_v39  ;;  %v9753_v16 = vadd.f32 %v9752_v30, %v9751_v35  ;;  %v9808_v55 = vpop.f32.mrb[47].mxu1 }
 0x9bd   : >> { %v9809_v45 = vadd.f32 %v9808_v55, %v9807_v12 }
 0x9be   : >> { %v8548_v22 = vadd.f32 %v9753_v16, %v9297_v63  ;;  %v9842_v29 = vpop.f32.mrb[48].mxu0 }
 0x9bf   : >> { %v9898_v2 = vpop.f32.mrb[48].mxu1  ;;  %v9843_v36 = vpop.f32.mrb[49].mxu0 }
 0x9c0   : >> { %v15577_v53 = vadd.f32 %v9809_v45, %v8548_v22  ;;  %v9844_v46 = vadd.f32 %v9843_v36, %v9842_v29  ;;  %v9899_v48 = vpop.f32.mrb[49].mxu1 }
 0x9c1   : >> { %v9900_v28 = vadd.f32 %v9899_v48, %v9898_v2 }
 0x9c2   : >> { %v8723_v10 = vadd.f32 %v9844_v46, %v8618_v26  ;;  %v9845_v61 = vpop.f32.mrb[50].mxu0 }
 0x9c3   : >> { %v9901_v5 = vpop.f32.mrb[50].mxu1  ;;  %v9846_v37 = vpop.f32.mrb[51].mxu0 }
 0x9c4   : >> { %v8828_v49 = vadd.f32 %v9900_v28, %v8723_v10  ;;  %v9847_v8 = vadd.f32 %v9846_v37, %v9845_v61  ;;  %v9902_v63 = vpop.f32.mrb[51].mxu1 }
 0x9c5   : >> { %v9903_v33 = vadd.f32 %v9902_v63, %v9901_v5 }
 0x9c6   : >> { %8867 = vst [vmem:[%s15582_s10] sm:$0xff] %v8828_v49  ;;  %v8728_v7 = vadd.f32 %v9847_v8, %v8623_v6  ;;  %v9848_v54 = vpop.f32.mrb[52].mxu0 }
 0x9c7   : >> { %v9904_v59 = vpop.f32.mrb[52].mxu1  ;;  %v9849_v44 = vpop.f32.mrb[53].mxu0 }
 0x9c8   : >> { %v8833_v9 = vadd.f32 %v9903_v33, %v8728_v7  ;;  %v9850_v26 = vadd.f32 %v9849_v44, %v9848_v54  ;;  %v9905_v14 = vpop.f32.mrb[53].mxu1 }
 0x9c9   : >> { %v9906_v60 = vadd.f32 %v9905_v14, %v9904_v59 }
 0x9ca   : >> { %8868 = vst [vmem:[%s15582_s10 + $0x8] sm:$0xff] %v8833_v9  ;;  %v8733_v38 = vadd.f32 %v9850_v26, %v15567_v21  ;;  %v9851_v25 = vpop.f32.mrb[54].mxu0 }
 0x9cb   : >> { %v9907_v0 = vpop.f32.mrb[54].mxu1  ;;  %v9852_v50 = vpop.f32.mrb[55].mxu0 }
 0x9cc   : >> { %v8838_v31 = vadd.f32 %v9906_v60, %v8733_v38  ;;  %v9853_v19 = vadd.f32 %v9852_v50, %v9851_v25  ;;  %v9908_v32 = vpop.f32.mrb[55].mxu1 }
 0x9cd   : >> { %v9909_v51 = vadd.f32 %v9908_v32, %v9907_v0 }
 0x9ce   : >> { %8869 = vst [vmem:[%s15582_s10 + $0x10] sm:$0xff] %v8838_v31  ;;  %v8738_v6 = vadd.f32 %v9853_v19, %v15569_v43  ;;  %v9854_v24 = vpop.f32.mrb[56].mxu0 }
 0x9cf   : >> { %v9910_v23 = vpop.f32.mrb[56].mxu1  ;;  %v9855_v40 = vpop.f32.mrb[57].mxu0 }
 0x9d0   : >> { %v8843_v17 = vadd.f32 %v9909_v51, %v8738_v6  ;;  %v9856_v20 = vadd.f32 %v9855_v40, %v9854_v24  ;;  %v9911_v56 = vpop.f32.mrb[57].mxu1 }
 0x9d1   : >> { %v9912_v62 = vadd.f32 %v9911_v56, %v9910_v23 }
 0x9d2   : >> { %8870 = vst [vmem:[%s15582_s10 + $0x18] sm:$0xff] %v8843_v17  ;;  %v8743_v21 = vadd.f32 %v9856_v20, %v15571_v57  ;;  %v9857_v41 = vpop.f32.mrb[58].mxu0 }
 0x9d3   : >> { %v9913_v11 = vpop.f32.mrb[58].mxu1  ;;  %v9858_v58 = vpop.f32.mrb[59].mxu0 }
 0x9d4   : >> { %v8848_v42 = vadd.f32 %v9912_v62, %v8743_v21  ;;  %v9859_v3 = vadd.f32 %v9858_v58, %v9857_v41  ;;  %v9914_v1 = vpop.f32.mrb[59].mxu1 }
 0x9d5   : >> { %v9915_v52 = vadd.f32 %v9914_v1, %v9913_v11 }
 0x9d6   : >> { %8871 = vst [vmem:[%s15582_s10 + $0x20] sm:$0xff] %v8848_v42  ;;  %v8748_v43 = vadd.f32 %v9859_v3, %v15573_v18  ;;  %v9860_v4 = vpop.f32.mrb[60].mxu0 }
 0x9d7   : >> { %v9916_v34 = vpop.f32.mrb[60].mxu1  ;;  %v9861_v13 = vpop.f32.mrb[61].mxu0 }
 0x9d8   : >> { %v8853_v15 = vadd.f32 %v9915_v52, %v8748_v43  ;;  %v9862_v27 = vadd.f32 %v9861_v13, %v9860_v4  ;;  %v9917_v39 = vpop.f32.mrb[61].mxu1 }
 0x9d9   : >> { %v9918_v57 = vadd.f32 %v9917_v39, %v9916_v34 }
 0x9da   : >> { %8872 = vst [vmem:[%s15582_s10 + $0x28] sm:$0xff] %v8853_v15  ;;  %v8753_v35 = vadd.f32 %v9862_v27, %v15575_v47  ;;  %v9863_v12 = vpop.f32.mrb[62].mxu0 }
 0x9db   : >> { %v9919_v30 = vpop.f32.mrb[62].mxu1  ;;  %v9864_v16 = vpop.f32.mrb[63].mxu0 }
 0x9dc   : >> { %v8858_v55 = vadd.f32 %v9918_v57, %v8753_v35  ;;  %v9865_v45 = vadd.f32 %v9864_v16, %v9863_v12  ;;  %v9920_v22 = vpop.f32.mrb[63].mxu1  ;;  %7685 = sbr.rel (!%p7683_p8) target bundleno = 2021 (0x7e5), region = 120 }
 0x9dd   : >> { %v9921_v29 = vadd.f32 %v9920_v22, %v9919_v30 }
 0x9de   : >> { %8873 = vst [vmem:[%s15582_s10 + $0x30] sm:$0xff] %v8858_v55  ;;  %v8758_v18 = vadd.f32 %v9865_v45, %v15577_v53 }
 0x9e0   : >> { %v8863_v2 = vadd.f32 %v9921_v29, %v8758_v18 }
 0x9e2   : >> { %8874 = vst [vmem:[%s15582_s10 + $0x38] sm:$0xff] %v8863_v2 }
 0x9e3 PF: > { %s15741_s20 = sld [smem:[#allocation10_spill]]  ;;  %s15742_s17 = smov %s11308_s18 }
 0x9e4   : > { %s15743_s18 = smov %s11312_s19  ;;  %s15744_s19 = smov %s11462_s15 }
 0x9e9   : > { %p22_p9 = scmp.ge.s32.totalorder %s15741_s20, 4  }
 0x9eb   :  { %24 = sbr.rel (!%p22_p9) target bundleno = 7 (0x7), region = 131 }
 0x9f2   :  { %8896 = vsyncpa [#allocation5], 1 }
 0x9f3   :  { %8898 = vsyncpa [#allocation5 + $0x1], 1 }
 0x9f4   :  { %8899 = vsyncpa [#allocation7], 1 }

</bundles_post_ra>
